<compile_context>
chip_gen: v6e
topology: v6e:2x2x1
jax: 0.10.0
libtpu: 0.0.40
codegen_flags: <defaults>
</compile_context>

<pallas_src>
import functools

import jax
import jax.numpy as jnp
from jax import lax
from jax.experimental import pallas as pl
from jax.experimental.pallas import tpu as pltpu

_BN_EPS = 1e-5
_TM_MAX = 512  # fixed row-tile cap for the decoder matmuls (~85% HBM roofline)


# ---------------------------------------------------------------------------
# Pallas kernels
# ---------------------------------------------------------------------------

def _conv3x3_bn_relu_pool_kernel(x_ref, w_ref, b_ref, o_ref, *, H, W, Cin, Cout):
    """3x3 conv (pad=1, BN folded) + ReLU + fused 2x2/2 max-pool, one image.

    x_ref: (1, H+2, W+2, Cin)  zero-padded activation (bf16)
    w_ref: (3, 3, Cin, Cout)   BN-folded weights (bf16)
    b_ref: (1, Cout)           BN-folded bias (f32)
    o_ref: (1, H//2, W//2, Cout)
    """
    acc = jnp.zeros((H * W, Cout), jnp.float32)
    # in-kernel im2col: 9 shifted windows, each a (H*W, Cin) x (Cin, Cout) dot
    for kh in range(3):
        for kw in range(3):
            patch = x_ref[0, kh:kh + H, kw:kw + W, :].reshape(H * W, Cin)
            acc = acc + jnp.dot(patch, w_ref[kh, kw],
                                preferred_element_type=jnp.float32)
    acc = jnp.maximum(acc + b_ref[...], 0.0)

    # fused 2x2 stride-2 max pool (rows of acc are (h, w) row-major)
    y = acc.reshape(H * W // 2, 2, Cout)
    y = jnp.maximum(y[:, 0, :], y[:, 1, :])          # pool along W
    y = y.reshape(H // 2, 2, W // 2, Cout)
    y = jnp.maximum(y[:, 0, :, :], y[:, 1, :, :])    # pool along H
    o_ref[0] = y.astype(o_ref.dtype)


def _matmul_bias_act_kernel(x_ref, w_ref, b_ref, o_ref, *, act):
    acc = jnp.dot(x_ref[...], w_ref[...], preferred_element_type=jnp.float32)
    acc = acc + b_ref[...]
    if act == "relu":
        acc = jnp.maximum(acc, 0.0)
    elif act == "tanh":
        acc = jnp.tanh(acc)
    o_ref[...] = acc.astype(o_ref.dtype)


def _embed_cluster_kernel(v_ref, w1_ref, b1_ref, w2_ref, b2_ref,
                          wc_ref, bc_ref, it_ref, emb_ref, prob_ref):
    """fc1 + ReLU -> (BN-folded) fc2 -> L2-normalize -> cluster linear -> softmax."""
    h1 = jnp.dot(v_ref[...], w1_ref[...], preferred_element_type=jnp.float32)
    h1 = jnp.maximum(h1 + b1_ref[...], 0.0)
    h2 = jnp.dot(h1, w2_ref[...], preferred_element_type=jnp.float32) + b2_ref[...]

    # F.normalize(p=2, dim=1): x / max(||x||, 1e-12) == x * rsqrt(max(sumsq, 1e-24))
    ss = jnp.sum(h2 * h2, axis=1, keepdims=True)
    e_n = h2 * lax.rsqrt(jnp.maximum(ss, 1e-24))
    emb_ref[...] = e_n

    logits = jnp.dot(e_n, wc_ref[...], preferred_element_type=jnp.float32)
    scaled = (logits + bc_ref[...]) * it_ref[...]    # * 1/(temperature*0.1)
    m = jnp.max(scaled, axis=1, keepdims=True)
    ex = jnp.exp(scaled - m)
    denom = jnp.sum(ex, axis=1, keepdims=True)
    prob_ref[...] = ex * pl.reciprocal(denom, approx=True)


# ---------------------------------------------------------------------------
# Layer wrappers
# ---------------------------------------------------------------------------

def conv3x3_bn_relu_pool(x_nhwc, w, b, bn):
    """Conv2d(3x3, pad=1) + eval-mode BN (folded) + ReLU + MaxPool2d(2) fused."""
    gamma, beta, mean, var = bn
    scale = gamma / jnp.sqrt(var + _BN_EPS)
    w_f = w * scale[:, None, None, None]              # (Cout, Cin, 3, 3)
    b_f = (b - mean) * scale + beta

    N, H, W, Cin = x_nhwc.shape
    Cout = w.shape[0]
    Hp, Wp = H // 2, W // 2
    xp = jnp.pad(x_nhwc, ((0, 0), (1, 1), (1, 1), (0, 0))).astype(jnp.bfloat16)
    w_k = jnp.transpose(w_f, (2, 3, 1, 0)).astype(jnp.bfloat16)   # (3,3,Cin,Cout)
    b_k = b_f.reshape(1, Cout).astype(jnp.float32)

    return pl.pallas_call(
        functools.partial(_conv3x3_bn_relu_pool_kernel,
                          H=H, W=W, Cin=Cin, Cout=Cout),
        out_shape=jax.ShapeDtypeStruct((N, Hp, Wp, Cout), jnp.bfloat16),
        grid=(N,),
        in_specs=[
            pl.BlockSpec((1, H + 2, W + 2, Cin), lambda n: (n, 0, 0, 0)),
            pl.BlockSpec((3, 3, Cin, Cout), lambda n: (0, 0, 0, 0)),
            pl.BlockSpec((1, Cout), lambda n: (0, 0)),
        ],
        out_specs=pl.BlockSpec((1, Hp, Wp, Cout), lambda n: (n, 0, 0, 0)),
        compiler_params=pltpu.CompilerParams(
            dimension_semantics=("parallel",)),
    )(xp, w_k, b_k)


def matmul_bias_act(x, w, b, act="none", out_dtype=jnp.float32):
    """out = act(x @ w + b); x:(M,K), w:(K,N), b:(N,). Fixed-TM row tiling."""
    M, K = x.shape
    K2, N = w.shape
    assert K == K2
    Mpad = -(-M // 8) * 8
    if Mpad > _TM_MAX:
        TM = _TM_MAX
        Mpad = -(-M // TM) * TM
    else:
        TM = Mpad
    x_in = x if Mpad == M else jnp.pad(x, ((0, Mpad - M), (0, 0)))
    b2 = b.reshape(1, N).astype(jnp.float32)

    out = pl.pallas_call(
        functools.partial(_matmul_bias_act_kernel, act=act),
        out_shape=jax.ShapeDtypeStruct((Mpad, N), out_dtype),
        grid=(Mpad // TM,),
        in_specs=[
            pl.BlockSpec((TM, K), lambda i: (i, 0)),
            pl.BlockSpec((K, N), lambda i: (0, 0)),
            pl.BlockSpec((1, N), lambda i: (0, 0)),
        ],
        out_specs=pl.BlockSpec((TM, N), lambda i: (i, 0)),
        compiler_params=pltpu.CompilerParams(
            dimension_semantics=("parallel",)),
    )(x_in, w, b2)
    return out if Mpad == M else out[:M]


def conv_transpose2x2(x_nhwc, w, b, bn, act, out_dtype):
    """ConvTranspose2d(kernel=2, stride=2) + optional folded BN + activation.

    w: (Cin, Cout, 2, 2). Columns laid out (kh, kw, cout) so Cout stays the
    trailing (lane) dim and the matmul output is 4*Cout lanes wide.
    """
    N, H, W, Cin = x_nhwc.shape
    Cout = w.shape[1]
    if bn is not None:
        gamma, beta, mean, var = bn
        scale = gamma / jnp.sqrt(var + _BN_EPS)
        w_f = w * scale[None, :, None, None]
        b_f = (b - mean) * scale + beta
    else:
        w_f, b_f = w, b
    w_mat = jnp.transpose(w_f, (0, 2, 3, 1)).reshape(Cin, 4 * Cout).astype(jnp.bfloat16)
    b_mat = jnp.tile(b_f, 4).astype(jnp.float32)
    y = matmul_bias_act(x_nhwc.reshape(N * H * W, Cin), w_mat, b_mat,
                        act=act, out_dtype=out_dtype)
    y = y.reshape(N, H, W, 2, 2, Cout)
    y = jnp.transpose(y, (0, 1, 3, 2, 4, 5)).reshape(N, 2 * H, 2 * W, Cout)
    return y


def embed_cluster_head(v, p):
    """Fused embedding MLP (BN folded into fc2) + L2 normalize + clustering softmax."""
    B = v.shape[0]
    E = p["fc2_w"].shape[0]
    K = p["clu_w"].shape[0]

    g1, be1, m1, v1 = p["ebn1"]
    s1 = g1 / jnp.sqrt(v1 + _BN_EPS)
    g2, be2, m2, v2 = p["ebn2"]
    s2 = g2 / jnp.sqrt(v2 + _BN_EPS)

    w1 = p["fc1_w"].T.astype(jnp.float32)                       # (128, 64)
    b1 = p["fc1_b"].reshape(1, -1).astype(jnp.float32)
    # fold ebn1 (input side) and ebn2 (output side) into fc2
    w2f = (p["fc2_w"] * s1[None, :]) * s2[:, None]              # (E, 64)
    b2f = (p["fc2_w"] @ (be1 - m1 * s1) + p["fc2_b"] - m2) * s2 + be2
    w2 = w2f.T.astype(jnp.float32)                              # (64, E)
    b2 = b2f.reshape(1, -1).astype(jnp.float32)
    wc = p["clu_w"].T.astype(jnp.float32)                       # (E, K)
    bc = p["clu_b"].reshape(1, -1).astype(jnp.float32)
    inv_t = (1.0 / (p["temperature"] * 0.1)).reshape(1, 1).astype(jnp.float32)

    vmem = pl.BlockSpec(memory_space=pltpu.MemorySpace.VMEM)
    emb, probs = pl.pallas_call(
        _embed_cluster_kernel,
        out_shape=(jax.ShapeDtypeStruct((B, E), jnp.float32),
                   jax.ShapeDtypeStruct((B, K), jnp.float32)),
        in_specs=[vmem] * 8,
        out_specs=(vmem, vmem),
    )(v.astype(jnp.float32), w1, b1, w2, b2, wc, bc, inv_t)
    return emb, probs


# ---------------------------------------------------------------------------
# Parameters
# ---------------------------------------------------------------------------

def init_params(key, input_channels=3, n_clusters=10, embedding_dim=32):
    def bn_params(c):
        return (jnp.ones((c,), jnp.float32), jnp.zeros((c,), jnp.float32),
                jnp.zeros((c,), jnp.float32), jnp.ones((c,), jnp.float32))

    ks = jax.random.split(key, 16)
    p = {}
    # encoder convs (Cout, Cin, 3, 3)
    p["conv1_w"] = 0.1 * jax.random.normal(ks[0], (32, input_channels, 3, 3), jnp.float32)
    p["conv1_b"] = 0.01 * jax.random.normal(ks[1], (32,), jnp.float32)
    p["bn1"] = bn_params(32)
    p["conv2_w"] = 0.05 * jax.random.normal(ks[2], (64, 32, 3, 3), jnp.float32)
    p["conv2_b"] = 0.01 * jax.random.normal(ks[3], (64,), jnp.float32)
    p["bn2"] = bn_params(64)
    p["conv3_w"] = 0.05 * jax.random.normal(ks[4], (128, 64, 3, 3), jnp.float32)
    p["conv3_b"] = 0.01 * jax.random.normal(ks[5], (128,), jnp.float32)
    p["bn3"] = bn_params(128)
    # decoder transposed convs (Cin, Cout, 2, 2)
    p["dec1_w"] = 0.05 * jax.random.normal(ks[6], (128, 64, 2, 2), jnp.float32)
    p["dec1_b"] = 0.01 * jax.random.normal(ks[7], (64,), jnp.float32)
    p["dbn1"] = bn_params(64)
    p["dec2_w"] = 0.05 * jax.random.normal(ks[8], (64, 32, 2, 2), jnp.float32)
    p["dec2_b"] = 0.01 * jax.random.normal(ks[9], (32,), jnp.float32)
    p["dbn2"] = bn_params(32)
    p["dec3_w"] = 0.05 * jax.random.normal(ks[10], (32, input_channels, 2, 2), jnp.float32)
    p["dec3_b"] = 0.01 * jax.random.normal(ks[11], (input_channels,), jnp.float32)
    # embedding MLP (PyTorch Linear: weight (out, in))
    p["fc1_w"] = 0.05 * jax.random.normal(ks[12], (64, 128), jnp.float32)
    p["fc1_b"] = jnp.zeros((64,), jnp.float32)
    p["ebn1"] = bn_params(64)
    p["fc2_w"] = 0.05 * jax.random.normal(ks[13], (embedding_dim, 64), jnp.float32)
    p["fc2_b"] = jnp.zeros((embedding_dim,), jnp.float32)
    p["ebn2"] = bn_params(embedding_dim)
    # clustering head
    p["clu_w"] = 0.1 * jax.random.normal(ks[14], (n_clusters, embedding_dim), jnp.float32)
    p["clu_b"] = jnp.zeros((n_clusters,), jnp.float32)
    p["temperature"] = jnp.ones((1,), jnp.float32)
    return p


# ---------------------------------------------------------------------------
# Forward pass
# ---------------------------------------------------------------------------

def forward(x_nchw, p):
    x = jnp.transpose(x_nchw, (0, 2, 3, 1))          # NCHW -> NHWC

    # encoder: each stage = one fused conv + BN + ReLU + maxpool Pallas kernel
    h = conv3x3_bn_relu_pool(x, p["conv1_w"], p["conv1_b"], p["bn1"])
    h = conv3x3_bn_relu_pool(h, p["conv2_w"], p["conv2_b"], p["bn2"])
    features = conv3x3_bn_relu_pool(h, p["conv3_w"], p["conv3_b"], p["bn3"])  # (N,H/8,W/8,128)

    # decoder
    d = conv_transpose2x2(features, p["dec1_w"], p["dec1_b"], p["dbn1"],
                          act="relu", out_dtype=jnp.bfloat16)
    d = conv_transpose2x2(d, p["dec2_w"], p["dec2_b"], p["dbn2"],
                          act="relu", out_dtype=jnp.bfloat16)
    recon = conv_transpose2x2(d, p["dec3_w"], p["dec3_b"], None,
                              act="tanh", out_dtype=jnp.float32)
    recon = jnp.transpose(recon, (0, 3, 1, 2))       # back to NCHW

    # embedding + clustering head (AdaptiveAvgPool2d(1) + Flatten in plain XLA)
    v = jnp.mean(features.astype(jnp.float32), axis=(1, 2))      # (N, 128)
    embedding, cluster_probs = embed_cluster_head(v, p)
    return recon, embedding, cluster_probs


# ---------------------------------------------------------------------------
# Main
# ---------------------------------------------------------------------------

if __name__ == "__main__":
    key = jax.random.PRNGKey(0)
    pkey, xkey = jax.random.split(key)
    params = init_params(pkey, input_channels=3, n_clusters=10, embedding_dim=32)

    x = jax.random.normal(xkey, (2, 3, 16, 16), jnp.float32)  # small NCHW input

    recon, embedding, cluster_probs = jax.jit(forward)(x, params)
    jax.block_until_ready((recon, embedding, cluster_probs))

    assert recon.shape == (2, 3, 16, 16)
    assert embedding.shape == (2, 32)
    assert cluster_probs.shape == (2, 10)
    print("KERNEL_OK")
</pallas_src>

<mosaic_0001>
module attributes {stable_mosaic.version = 11 : i64} {
  func.func @_conv3x3_bn_relu_pool_kernel(%arg0: i32, %arg1: memref<1x18x18x3xbf16, #tpu.memory_space<vmem>>, %arg2: memref<3x3x3x32xbf16, #tpu.memory_space<vmem>>, %arg3: memref<1x32xf32, #tpu.memory_space<vmem>>, %arg4: memref<1x8x8x32xbf16, #tpu.memory_space<vmem>>) attributes {dimension_semantics = [#tpu.dimension_semantics<parallel>], iteration_bounds = array<i64: 2>, scalar_prefetch = 0 : i64, scratch_operands = 0 : i64, tpu.core_type = #tpu.core_type<tc>, window_params = [{transform_indices = @transform_0, window_bounds = array<i64: 1, 18, 18, 3>}, {pipeline_mode = #tpu.pipeline_mode<synchronous>, transform_indices = @transform_1, window_bounds = array<i64: 3, 3, 3, 32>}, {pipeline_mode = #tpu.pipeline_mode<synchronous>, transform_indices = @transform_2, window_bounds = array<i64: 1, 32>}, {transform_indices = @transform_3, window_bounds = array<i64: 1, 8, 8, 32>}]} {
    %cst = arith.constant 0.000000e+00 : f32
    %0 = vector.broadcast %cst : f32 to vector<256x32xf32>
    %c0 = arith.constant 0 : index
    %c0_0 = arith.constant 0 : index
    %c0_1 = arith.constant 0 : index
    %c0_2 = arith.constant 0 : index
    %1 = vector.load %arg1[%c0, %c0_0, %c0_1, %c0_2] : memref<1x18x18x3xbf16, #tpu.memory_space<vmem>>, vector<1x16x16x3xbf16>
    %2 = vector.shape_cast %1 : vector<1x16x16x3xbf16> to vector<16x16x3xbf16>
    %3 = vector.shape_cast %2 : vector<16x16x3xbf16> to vector<256x3xbf16>
    %c0_3 = arith.constant 0 : index
    %c0_4 = arith.constant 0 : index
    %c0_5 = arith.constant 0 : index
    %c0_6 = arith.constant 0 : index
    %4 = vector.load %arg2[%c0_3, %c0_4, %c0_5, %c0_6] : memref<3x3x3x32xbf16, #tpu.memory_space<vmem>>, vector<1x1x3x32xbf16>
    %5 = vector.shape_cast %4 : vector<1x1x3x32xbf16> to vector<3x32xbf16>
    %cst_7 = arith.constant dense<0.000000e+00> : vector<256x32xf32>
    %6 = tpu.matmul %3, %5, %cst_7 {dimension_numbers = #tpu.dot_dimension_numbers<[1], [0], [0], [1], [0, 0, 1, 1], [], []>} : vector<256x3xbf16>, vector<3x32xbf16>, vector<256x32xf32> -> vector<256x32xf32>
    %7 = arith.addf %0, %6 : vector<256x32xf32>
    %c0_8 = arith.constant 0 : index
    %c0_9 = arith.constant 0 : index
    %c1 = arith.constant 1 : index
    %c0_10 = arith.constant 0 : index
    %8 = vector.load %arg1[%c0_8, %c0_9, %c1, %c0_10] : memref<1x18x18x3xbf16, #tpu.memory_space<vmem>>, vector<1x16x16x3xbf16>
    %9 = vector.shape_cast %8 : vector<1x16x16x3xbf16> to vector<16x16x3xbf16>
    %10 = vector.shape_cast %9 : vector<16x16x3xbf16> to vector<256x3xbf16>
    %c0_11 = arith.constant 0 : index
    %c1_12 = arith.constant 1 : index
    %c0_13 = arith.constant 0 : index
    %c0_14 = arith.constant 0 : index
    %11 = vector.load %arg2[%c0_11, %c1_12, %c0_13, %c0_14] : memref<3x3x3x32xbf16, #tpu.memory_space<vmem>>, vector<1x1x3x32xbf16>
    %12 = vector.shape_cast %11 : vector<1x1x3x32xbf16> to vector<3x32xbf16>
    %cst_15 = arith.constant dense<0.000000e+00> : vector<256x32xf32>
    %13 = tpu.matmul %10, %12, %cst_15 {dimension_numbers = #tpu.dot_dimension_numbers<[1], [0], [0], [1], [0, 0, 1, 1], [], []>} : vector<256x3xbf16>, vector<3x32xbf16>, vector<256x32xf32> -> vector<256x32xf32>
    %14 = arith.addf %7, %13 : vector<256x32xf32>
    %c0_16 = arith.constant 0 : index
    %c0_17 = arith.constant 0 : index
    %c2 = arith.constant 2 : index
    %c0_18 = arith.constant 0 : index
    %15 = vector.load %arg1[%c0_16, %c0_17, %c2, %c0_18] : memref<1x18x18x3xbf16, #tpu.memory_space<vmem>>, vector<1x16x16x3xbf16>
    %16 = vector.shape_cast %15 : vector<1x16x16x3xbf16> to vector<16x16x3xbf16>
    %17 = vector.shape_cast %16 : vector<16x16x3xbf16> to vector<256x3xbf16>
    %c0_19 = arith.constant 0 : index
    %c2_20 = arith.constant 2 : index
    %c0_21 = arith.constant 0 : index
    %c0_22 = arith.constant 0 : index
    %18 = vector.load %arg2[%c0_19, %c2_20, %c0_21, %c0_22] : memref<3x3x3x32xbf16, #tpu.memory_space<vmem>>, vector<1x1x3x32xbf16>
    %19 = vector.shape_cast %18 : vector<1x1x3x32xbf16> to vector<3x32xbf16>
    %cst_23 = arith.constant dense<0.000000e+00> : vector<256x32xf32>
    %20 = tpu.matmul %17, %19, %cst_23 {dimension_numbers = #tpu.dot_dimension_numbers<[1], [0], [0], [1], [0, 0, 1, 1], [], []>} : vector<256x3xbf16>, vector<3x32xbf16>, vector<256x32xf32> -> vector<256x32xf32>
    %21 = arith.addf %14, %20 : vector<256x32xf32>
    %c0_24 = arith.constant 0 : index
    %c1_25 = arith.constant 1 : index
    %c0_26 = arith.constant 0 : index
    %c0_27 = arith.constant 0 : index
    %22 = vector.load %arg1[%c0_24, %c1_25, %c0_26, %c0_27] : memref<1x18x18x3xbf16, #tpu.memory_space<vmem>>, vector<1x16x16x3xbf16>
    %23 = vector.shape_cast %22 : vector<1x16x16x3xbf16> to vector<16x16x3xbf16>
    %24 = vector.shape_cast %23 : vector<16x16x3xbf16> to vector<256x3xbf16>
    %c1_28 = arith.constant 1 : index
    %c0_29 = arith.constant 0 : index
    %c0_30 = arith.constant 0 : index
    %c0_31 = arith.constant 0 : index
    %25 = vector.load %arg2[%c1_28, %c0_29, %c0_30, %c0_31] : memref<3x3x3x32xbf16, #tpu.memory_space<vmem>>, vector<1x1x3x32xbf16>
    %26 = vector.shape_cast %25 : vector<1x1x3x32xbf16> to vector<3x32xbf16>
    %cst_32 = arith.constant dense<0.000000e+00> : vector<256x32xf32>
    %27 = tpu.matmul %24, %26, %cst_32 {dimension_numbers = #tpu.dot_dimension_numbers<[1], [0], [0], [1], [0, 0, 1, 1], [], []>} : vector<256x3xbf16>, vector<3x32xbf16>, vector<256x32xf32> -> vector<256x32xf32>
    %28 = arith.addf %21, %27 : vector<256x32xf32>
    %c0_33 = arith.constant 0 : index
    %c1_34 = arith.constant 1 : index
    %c1_35 = arith.constant 1 : index
    %c0_36 = arith.constant 0 : index
    %29 = vector.load %arg1[%c0_33, %c1_34, %c1_35, %c0_36] : memref<1x18x18x3xbf16, #tpu.memory_space<vmem>>, vector<1x16x16x3xbf16>
    %30 = vector.shape_cast %29 : vector<1x16x16x3xbf16> to vector<16x16x3xbf16>
    %31 = vector.shape_cast %30 : vector<16x16x3xbf16> to vector<256x3xbf16>
    %c1_37 = arith.constant 1 : index
    %c1_38 = arith.constant 1 : index
    %c0_39 = arith.constant 0 : index
    %c0_40 = arith.constant 0 : index
    %32 = vector.load %arg2[%c1_37, %c1_38, %c0_39, %c0_40] : memref<3x3x3x32xbf16, #tpu.memory_space<vmem>>, vector<1x1x3x32xbf16>
    %33 = vector.shape_cast %32 : vector<1x1x3x32xbf16> to vector<3x32xbf16>
    %cst_41 = arith.constant dense<0.000000e+00> : vector<256x32xf32>
    %34 = tpu.matmul %31, %33, %cst_41 {dimension_numbers = #tpu.dot_dimension_numbers<[1], [0], [0], [1], [0, 0, 1, 1], [], []>} : vector<256x3xbf16>, vector<3x32xbf16>, vector<256x32xf32> -> vector<256x32xf32>
    %35 = arith.addf %28, %34 : vector<256x32xf32>
    %c0_42 = arith.constant 0 : index
    %c1_43 = arith.constant 1 : index
    %c2_44 = arith.constant 2 : index
    %c0_45 = arith.constant 0 : index
    %36 = vector.load %arg1[%c0_42, %c1_43, %c2_44, %c0_45] : memref<1x18x18x3xbf16, #tpu.memory_space<vmem>>, vector<1x16x16x3xbf16>
    %37 = vector.shape_cast %36 : vector<1x16x16x3xbf16> to vector<16x16x3xbf16>
    %38 = vector.shape_cast %37 : vector<16x16x3xbf16> to vector<256x3xbf16>
    %c1_46 = arith.constant 1 : index
    %c2_47 = arith.constant 2 : index
    %c0_48 = arith.constant 0 : index
    %c0_49 = arith.constant 0 : index
    %39 = vector.load %arg2[%c1_46, %c2_47, %c0_48, %c0_49] : memref<3x3x3x32xbf16, #tpu.memory_space<vmem>>, vector<1x1x3x32xbf16>
    %40 = vector.shape_cast %39 : vector<1x1x3x32xbf16> to vector<3x32xbf16>
    %cst_50 = arith.constant dense<0.000000e+00> : vector<256x32xf32>
    %41 = tpu.matmul %38, %40, %cst_50 {dimension_numbers = #tpu.dot_dimension_numbers<[1], [0], [0], [1], [0, 0, 1, 1], [], []>} : vector<256x3xbf16>, vector<3x32xbf16>, vector<256x32xf32> -> vector<256x32xf32>
    %42 = arith.addf %35, %41 : vector<256x32xf32>
    %c0_51 = arith.constant 0 : index
    %c2_52 = arith.constant 2 : index
    %c0_53 = arith.constant 0 : index
    %c0_54 = arith.constant 0 : index
    %43 = vector.load %arg1[%c0_51, %c2_52, %c0_53, %c0_54] : memref<1x18x18x3xbf16, #tpu.memory_space<vmem>>, vector<1x16x16x3xbf16>
    %44 = vector.shape_cast %43 : vector<1x16x16x3xbf16> to vector<16x16x3xbf16>
    %45 = vector.shape_cast %44 : vector<16x16x3xbf16> to vector<256x3xbf16>
    %c2_55 = arith.constant 2 : index
    %c0_56 = arith.constant 0 : index
    %c0_57 = arith.constant 0 : index
    %c0_58 = arith.constant 0 : index
    %46 = vector.load %arg2[%c2_55, %c0_56, %c0_57, %c0_58] : memref<3x3x3x32xbf16, #tpu.memory_space<vmem>>, vector<1x1x3x32xbf16>
    %47 = vector.shape_cast %46 : vector<1x1x3x32xbf16> to vector<3x32xbf16>
    %cst_59 = arith.constant dense<0.000000e+00> : vector<256x32xf32>
    %48 = tpu.matmul %45, %47, %cst_59 {dimension_numbers = #tpu.dot_dimension_numbers<[1], [0], [0], [1], [0, 0, 1, 1], [], []>} : vector<256x3xbf16>, vector<3x32xbf16>, vector<256x32xf32> -> vector<256x32xf32>
    %49 = arith.addf %42, %48 : vector<256x32xf32>
    %c0_60 = arith.constant 0 : index
    %c2_61 = arith.constant 2 : index
    %c1_62 = arith.constant 1 : index
    %c0_63 = arith.constant 0 : index
    %50 = vector.load %arg1[%c0_60, %c2_61, %c1_62, %c0_63] : memref<1x18x18x3xbf16, #tpu.memory_space<vmem>>, vector<1x16x16x3xbf16>
    %51 = vector.shape_cast %50 : vector<1x16x16x3xbf16> to vector<16x16x3xbf16>
    %52 = vector.shape_cast %51 : vector<16x16x3xbf16> to vector<256x3xbf16>
    %c2_64 = arith.constant 2 : index
    %c1_65 = arith.constant 1 : index
    %c0_66 = arith.constant 0 : index
    %c0_67 = arith.constant 0 : index
    %53 = vector.load %arg2[%c2_64, %c1_65, %c0_66, %c0_67] : memref<3x3x3x32xbf16, #tpu.memory_space<vmem>>, vector<1x1x3x32xbf16>
    %54 = vector.shape_cast %53 : vector<1x1x3x32xbf16> to vector<3x32xbf16>
    %cst_68 = arith.constant dense<0.000000e+00> : vector<256x32xf32>
    %55 = tpu.matmul %52, %54, %cst_68 {dimension_numbers = #tpu.dot_dimension_numbers<[1], [0], [0], [1], [0, 0, 1, 1], [], []>} : vector<256x3xbf16>, vector<3x32xbf16>, vector<256x32xf32> -> vector<256x32xf32>
    %56 = arith.addf %49, %55 : vector<256x32xf32>
    %c0_69 = arith.constant 0 : index
    %c2_70 = arith.constant 2 : index
    %c2_71 = arith.constant 2 : index
    %c0_72 = arith.constant 0 : index
    %57 = vector.load %arg1[%c0_69, %c2_70, %c2_71, %c0_72] : memref<1x18x18x3xbf16, #tpu.memory_space<vmem>>, vector<1x16x16x3xbf16>
    %58 = vector.shape_cast %57 : vector<1x16x16x3xbf16> to vector<16x16x3xbf16>
    %59 = vector.shape_cast %58 : vector<16x16x3xbf16> to vector<256x3xbf16>
    %c2_73 = arith.constant 2 : index
    %c2_74 = arith.constant 2 : index
    %c0_75 = arith.constant 0 : index
    %c0_76 = arith.constant 0 : index
    %60 = vector.load %arg2[%c2_73, %c2_74, %c0_75, %c0_76] : memref<3x3x3x32xbf16, #tpu.memory_space<vmem>>, vector<1x1x3x32xbf16>
    %61 = vector.shape_cast %60 : vector<1x1x3x32xbf16> to vector<3x32xbf16>
    %cst_77 = arith.constant dense<0.000000e+00> : vector<256x32xf32>
    %62 = tpu.matmul %59, %61, %cst_77 {dimension_numbers = #tpu.dot_dimension_numbers<[1], [0], [0], [1], [0, 0, 1, 1], [], []>} : vector<256x3xbf16>, vector<3x32xbf16>, vector<256x32xf32> -> vector<256x32xf32>
    %63 = arith.addf %56, %62 : vector<256x32xf32>
    %c0_78 = arith.constant 0 : index
    %c0_79 = arith.constant 0 : index
    %64 = vector.load %arg3[%c0_78, %c0_79] : memref<1x32xf32, #tpu.memory_space<vmem>>, vector<1x32xf32>
    %65 = vector.broadcast %64 : vector<1x32xf32> to vector<256x32xf32>
    %66 = arith.addf %63, %65 : vector<256x32xf32>
    %cst_80 = arith.constant 0.000000e+00 : f32
    %67 = vector.broadcast %cst_80 : f32 to vector<256x32xf32>
    %68 = arith.maximumf %66, %67 : vector<256x32xf32>
    %69 = vector.shape_cast %68 : vector<256x32xf32> to vector<128x2x32xf32>
    %70 = vector.extract_strided_slice %69 {offsets = [0, 0, 0], sizes = [128, 1, 32], strides = [1, 1, 1]} : vector<128x2x32xf32> to vector<128x1x32xf32>
    %71 = vector.shape_cast %70 : vector<128x1x32xf32> to vector<128x32xf32>
    %72 = vector.extract_strided_slice %69 {offsets = [0, 1, 0], sizes = [128, 1, 32], strides = [1, 1, 1]} : vector<128x2x32xf32> to vector<128x1x32xf32>
    %73 = vector.shape_cast %72 : vector<128x1x32xf32> to vector<128x32xf32>
    %74 = arith.maximumf %71, %73 : vector<128x32xf32>
    %75 = vector.shape_cast %74 : vector<128x32xf32> to vector<8x2x8x32xf32>
    %76 = vector.extract_strided_slice %75 {offsets = [0, 0, 0, 0], sizes = [8, 1, 8, 32], strides = [1, 1, 1, 1]} : vector<8x2x8x32xf32> to vector<8x1x8x32xf32>
    %77 = vector.shape_cast %76 : vector<8x1x8x32xf32> to vector<8x8x32xf32>
    %78 = vector.extract_strided_slice %75 {offsets = [0, 1, 0, 0], sizes = [8, 1, 8, 32], strides = [1, 1, 1, 1]} : vector<8x2x8x32xf32> to vector<8x1x8x32xf32>
    %79 = vector.shape_cast %78 : vector<8x1x8x32xf32> to vector<8x8x32xf32>
    %80 = arith.maximumf %77, %79 : vector<8x8x32xf32>
    %81 = arith.truncf %80 : vector<8x8x32xf32> to vector<8x8x32xbf16>
    %c0_81 = arith.constant 0 : index
    %c0_82 = arith.constant 0 : index
    %c0_83 = arith.constant 0 : index
    %c0_84 = arith.constant 0 : index
    %82 = vector.load %arg4[%c0_81, %c0_82, %c0_83, %c0_84] : memref<1x8x8x32xbf16, #tpu.memory_space<vmem>>, vector<1x8x8x32xbf16>
    %83 = vector.shape_cast %82 : vector<1x8x8x32xbf16> to vector<8x8x32xbf16>
    %84 = vector.shape_cast %81 : vector<8x8x32xbf16> to vector<1x8x8x32xbf16>
    tpu.vector_store %arg4[%c0_81, %c0_82, %c0_83, %c0_84], %84 {strides = array<i32>} : memref<1x8x8x32xbf16, #tpu.memory_space<vmem>>, vector<1x8x8x32xbf16>,
    return
  }
  func.func @transform_0(%arg0: i32) -> (i32, i32, i32, i32) {
    %c0_i32 = arith.constant 0 : i32
    %c0_i32_0 = arith.constant 0 : i32
    %c0_i32_1 = arith.constant 0 : i32
    %c0_i32_2 = arith.constant 0 : i32
    return %arg0, %c0_i32, %c0_i32_0, %c0_i32_1 : i32, i32, i32, i32
  }
  func.func @transform_1(%arg0: i32) -> (i32, i32, i32, i32) {
    %c0_i32 = arith.constant 0 : i32
    %c0_i32_0 = arith.constant 0 : i32
    %c0_i32_1 = arith.constant 0 : i32
    %c0_i32_2 = arith.constant 0 : i32
    %c0_i32_3 = arith.constant 0 : i32
    return %c0_i32, %c0_i32_0, %c0_i32_1, %c0_i32_2 : i32, i32, i32, i32
  }
  func.func @transform_2(%arg0: i32) -> (i32, i32) {
    %c0_i32 = arith.constant 0 : i32
    %c0_i32_0 = arith.constant 0 : i32
    %c0_i32_1 = arith.constant 0 : i32
    return %c0_i32, %c0_i32_0 : i32, i32
  }
  func.func @transform_3(%arg0: i32) -> (i32, i32, i32, i32) {
    %c0_i32 = arith.constant 0 : i32
    %c0_i32_0 = arith.constant 0 : i32
    %c0_i32_1 = arith.constant 0 : i32
    %c0_i32_2 = arith.constant 0 : i32
    return %arg0, %c0_i32, %c0_i32_0, %c0_i32_1 : i32, i32, i32, i32
  }
}

module attributes {stable_mosaic.version = 11 : i64} {
  func.func @_conv3x3_bn_relu_pool_kernel(%arg0: i32, %arg1: memref<1x10x10x32xbf16, #tpu.memory_space<vmem>>, %arg2: memref<3x3x32x64xbf16, #tpu.memory_space<vmem>>, %arg3: memref<1x64xf32, #tpu.memory_space<vmem>>, %arg4: memref<1x4x4x64xbf16, #tpu.memory_space<vmem>>) attributes {dimension_semantics = [#tpu.dimension_semantics<parallel>], iteration_bounds = array<i64: 2>, scalar_prefetch = 0 : i64, scratch_operands = 0 : i64, tpu.core_type = #tpu.core_type<tc>, window_params = [{transform_indices = @transform_0, window_bounds = array<i64: 1, 10, 10, 32>}, {pipeline_mode = #tpu.pipeline_mode<synchronous>, transform_indices = @transform_1, window_bounds = array<i64: 3, 3, 32, 64>}, {pipeline_mode = #tpu.pipeline_mode<synchronous>, transform_indices = @transform_2, window_bounds = array<i64: 1, 64>}, {transform_indices = @transform_3, window_bounds = array<i64: 1, 4, 4, 64>}]} {
    %cst = arith.constant 0.000000e+00 : f32
    %0 = vector.broadcast %cst : f32 to vector<64x64xf32>
    %c0 = arith.constant 0 : index
    %c0_0 = arith.constant 0 : index
    %c0_1 = arith.constant 0 : index
    %c0_2 = arith.constant 0 : index
    %1 = vector.load %arg1[%c0, %c0_0, %c0_1, %c0_2] : memref<1x10x10x32xbf16, #tpu.memory_space<vmem>>, vector<1x8x8x32xbf16>
    %2 = vector.shape_cast %1 : vector<1x8x8x32xbf16> to vector<8x8x32xbf16>
    %3 = vector.shape_cast %2 : vector<8x8x32xbf16> to vector<64x32xbf16>
    %c0_3 = arith.constant 0 : index
    %c0_4 = arith.constant 0 : index
    %c0_5 = arith.constant 0 : index
    %c0_6 = arith.constant 0 : index
    %4 = vector.load %arg2[%c0_3, %c0_4, %c0_5, %c0_6] : memref<3x3x32x64xbf16, #tpu.memory_space<vmem>>, vector<1x1x32x64xbf16>
    %5 = vector.shape_cast %4 : vector<1x1x32x64xbf16> to vector<32x64xbf16>
    %cst_7 = arith.constant dense<0.000000e+00> : vector<64x64xf32>
    %6 = tpu.matmul %3, %5, %cst_7 {dimension_numbers = #tpu.dot_dimension_numbers<[1], [0], [0], [1], [0, 0, 1, 1], [], []>} : vector<64x32xbf16>, vector<32x64xbf16>, vector<64x64xf32> -> vector<64x64xf32>
    %7 = arith.addf %0, %6 : vector<64x64xf32>
    %c0_8 = arith.constant 0 : index
    %c0_9 = arith.constant 0 : index
    %c1 = arith.constant 1 : index
    %c0_10 = arith.constant 0 : index
    %8 = vector.load %arg1[%c0_8, %c0_9, %c1, %c0_10] : memref<1x10x10x32xbf16, #tpu.memory_space<vmem>>, vector<1x8x8x32xbf16>
    %9 = vector.shape_cast %8 : vector<1x8x8x32xbf16> to vector<8x8x32xbf16>
    %10 = vector.shape_cast %9 : vector<8x8x32xbf16> to vector<64x32xbf16>
    %c0_11 = arith.constant 0 : index
    %c1_12 = arith.constant 1 : index
    %c0_13 = arith.constant 0 : index
    %c0_14 = arith.constant 0 : index
    %11 = vector.load %arg2[%c0_11, %c1_12, %c0_13, %c0_14] : memref<3x3x32x64xbf16, #tpu.memory_space<vmem>>, vector<1x1x32x64xbf16>
    %12 = vector.shape_cast %11 : vector<1x1x32x64xbf16> to vector<32x64xbf16>
    %cst_15 = arith.constant dense<0.000000e+00> : vector<64x64xf32>
    %13 = tpu.matmul %10, %12, %cst_15 {dimension_numbers = #tpu.dot_dimension_numbers<[1], [0], [0], [1], [0, 0, 1, 1], [], []>} : vector<64x32xbf16>, vector<32x64xbf16>, vector<64x64xf32> -> vector<64x64xf32>
    %14 = arith.addf %7, %13 : vector<64x64xf32>
    %c0_16 = arith.constant 0 : index
    %c0_17 = arith.constant 0 : index
    %c2 = arith.constant 2 : index
    %c0_18 = arith.constant 0 : index
    %15 = vector.load %arg1[%c0_16, %c0_17, %c2, %c0_18] : memref<1x10x10x32xbf16, #tpu.memory_space<vmem>>, vector<1x8x8x32xbf16>
    %16 = vector.shape_cast %15 : vector<1x8x8x32xbf16> to vector<8x8x32xbf16>
    %17 = vector.shape_cast %16 : vector<8x8x32xbf16> to vector<64x32xbf16>
    %c0_19 = arith.constant 0 : index
    %c2_20 = arith.constant 2 : index
    %c0_21 = arith.constant 0 : index
    %c0_22 = arith.constant 0 : index
    %18 = vector.load %arg2[%c0_19, %c2_20, %c0_21, %c0_22] : memref<3x3x32x64xbf16, #tpu.memory_space<vmem>>, vector<1x1x32x64xbf16>
    %19 = vector.shape_cast %18 : vector<1x1x32x64xbf16> to vector<32x64xbf16>
    %cst_23 = arith.constant dense<0.000000e+00> : vector<64x64xf32>
    %20 = tpu.matmul %17, %19, %cst_23 {dimension_numbers = #tpu.dot_dimension_numbers<[1], [0], [0], [1], [0, 0, 1, 1], [], []>} : vector<64x32xbf16>, vector<32x64xbf16>, vector<64x64xf32> -> vector<64x64xf32>
    %21 = arith.addf %14, %20 : vector<64x64xf32>
    %c0_24 = arith.constant 0 : index
    %c1_25 = arith.constant 1 : index
    %c0_26 = arith.constant 0 : index
    %c0_27 = arith.constant 0 : index
    %22 = vector.load %arg1[%c0_24, %c1_25, %c0_26, %c0_27] : memref<1x10x10x32xbf16, #tpu.memory_space<vmem>>, vector<1x8x8x32xbf16>
    %23 = vector.shape_cast %22 : vector<1x8x8x32xbf16> to vector<8x8x32xbf16>
    %24 = vector.shape_cast %23 : vector<8x8x32xbf16> to vector<64x32xbf16>
    %c1_28 = arith.constant 1 : index
    %c0_29 = arith.constant 0 : index
    %c0_30 = arith.constant 0 : index
    %c0_31 = arith.constant 0 : index
    %25 = vector.load %arg2[%c1_28, %c0_29, %c0_30, %c0_31] : memref<3x3x32x64xbf16, #tpu.memory_space<vmem>>, vector<1x1x32x64xbf16>
    %26 = vector.shape_cast %25 : vector<1x1x32x64xbf16> to vector<32x64xbf16>
    %cst_32 = arith.constant dense<0.000000e+00> : vector<64x64xf32>
    %27 = tpu.matmul %24, %26, %cst_32 {dimension_numbers = #tpu.dot_dimension_numbers<[1], [0], [0], [1], [0, 0, 1, 1], [], []>} : vector<64x32xbf16>, vector<32x64xbf16>, vector<64x64xf32> -> vector<64x64xf32>
    %28 = arith.addf %21, %27 : vector<64x64xf32>
    %c0_33 = arith.constant 0 : index
    %c1_34 = arith.constant 1 : index
    %c1_35 = arith.constant 1 : index
    %c0_36 = arith.constant 0 : index
    %29 = vector.load %arg1[%c0_33, %c1_34, %c1_35, %c0_36] : memref<1x10x10x32xbf16, #tpu.memory_space<vmem>>, vector<1x8x8x32xbf16>
    %30 = vector.shape_cast %29 : vector<1x8x8x32xbf16> to vector<8x8x32xbf16>
    %31 = vector.shape_cast %30 : vector<8x8x32xbf16> to vector<64x32xbf16>
    %c1_37 = arith.constant 1 : index
    %c1_38 = arith.constant 1 : index
    %c0_39 = arith.constant 0 : index
    %c0_40 = arith.constant 0 : index
    %32 = vector.load %arg2[%c1_37, %c1_38, %c0_39, %c0_40] : memref<3x3x32x64xbf16, #tpu.memory_space<vmem>>, vector<1x1x32x64xbf16>
    %33 = vector.shape_cast %32 : vector<1x1x32x64xbf16> to vector<32x64xbf16>
    %cst_41 = arith.constant dense<0.000000e+00> : vector<64x64xf32>
    %34 = tpu.matmul %31, %33, %cst_41 {dimension_numbers = #tpu.dot_dimension_numbers<[1], [0], [0], [1], [0, 0, 1, 1], [], []>} : vector<64x32xbf16>, vector<32x64xbf16>, vector<64x64xf32> -> vector<64x64xf32>
    %35 = arith.addf %28, %34 : vector<64x64xf32>
    %c0_42 = arith.constant 0 : index
    %c1_43 = arith.constant 1 : index
    %c2_44 = arith.constant 2 : index
    %c0_45 = arith.constant 0 : index
    %36 = vector.load %arg1[%c0_42, %c1_43, %c2_44, %c0_45] : memref<1x10x10x32xbf16, #tpu.memory_space<vmem>>, vector<1x8x8x32xbf16>
    %37 = vector.shape_cast %36 : vector<1x8x8x32xbf16> to vector<8x8x32xbf16>
    %38 = vector.shape_cast %37 : vector<8x8x32xbf16> to vector<64x32xbf16>
    %c1_46 = arith.constant 1 : index
    %c2_47 = arith.constant 2 : index
    %c0_48 = arith.constant 0 : index
    %c0_49 = arith.constant 0 : index
    %39 = vector.load %arg2[%c1_46, %c2_47, %c0_48, %c0_49] : memref<3x3x32x64xbf16, #tpu.memory_space<vmem>>, vector<1x1x32x64xbf16>
    %40 = vector.shape_cast %39 : vector<1x1x32x64xbf16> to vector<32x64xbf16>
    %cst_50 = arith.constant dense<0.000000e+00> : vector<64x64xf32>
    %41 = tpu.matmul %38, %40, %cst_50 {dimension_numbers = #tpu.dot_dimension_numbers<[1], [0], [0], [1], [0, 0, 1, 1], [], []>} : vector<64x32xbf16>, vector<32x64xbf16>, vector<64x64xf32> -> vector<64x64xf32>
    %42 = arith.addf %35, %41 : vector<64x64xf32>
    %c0_51 = arith.constant 0 : index
    %c2_52 = arith.constant 2 : index
    %c0_53 = arith.constant 0 : index
    %c0_54 = arith.constant 0 : index
    %43 = vector.load %arg1[%c0_51, %c2_52, %c0_53, %c0_54] : memref<1x10x10x32xbf16, #tpu.memory_space<vmem>>, vector<1x8x8x32xbf16>
    %44 = vector.shape_cast %43 : vector<1x8x8x32xbf16> to vector<8x8x32xbf16>
    %45 = vector.shape_cast %44 : vector<8x8x32xbf16> to vector<64x32xbf16>
    %c2_55 = arith.constant 2 : index
    %c0_56 = arith.constant 0 : index
    %c0_57 = arith.constant 0 : index
    %c0_58 = arith.constant 0 : index
    %46 = vector.load %arg2[%c2_55, %c0_56, %c0_57, %c0_58] : memref<3x3x32x64xbf16, #tpu.memory_space<vmem>>, vector<1x1x32x64xbf16>
    %47 = vector.shape_cast %46 : vector<1x1x32x64xbf16> to vector<32x64xbf16>
    %cst_59 = arith.constant dense<0.000000e+00> : vector<64x64xf32>
    %48 = tpu.matmul %45, %47, %cst_59 {dimension_numbers = #tpu.dot_dimension_numbers<[1], [0], [0], [1], [0, 0, 1, 1], [], []>} : vector<64x32xbf16>, vector<32x64xbf16>, vector<64x64xf32> -> vector<64x64xf32>
    %49 = arith.addf %42, %48 : vector<64x64xf32>
    %c0_60 = arith.constant 0 : index
    %c2_61 = arith.constant 2 : index
    %c1_62 = arith.constant 1 : index
    %c0_63 = arith.constant 0 : index
    %50 = vector.load %arg1[%c0_60, %c2_61, %c1_62, %c0_63] : memref<1x10x10x32xbf16, #tpu.memory_space<vmem>>, vector<1x8x8x32xbf16>
    %51 = vector.shape_cast %50 : vector<1x8x8x32xbf16> to vector<8x8x32xbf16>
    %52 = vector.shape_cast %51 : vector<8x8x32xbf16> to vector<64x32xbf16>
    %c2_64 = arith.constant 2 : index
    %c1_65 = arith.constant 1 : index
    %c0_66 = arith.constant 0 : index
    %c0_67 = arith.constant 0 : index
    %53 = vector.load %arg2[%c2_64, %c1_65, %c0_66, %c0_67] : memref<3x3x32x64xbf16, #tpu.memory_space<vmem>>, vector<1x1x32x64xbf16>
    %54 = vector.shape_cast %53 : vector<1x1x32x64xbf16> to vector<32x64xbf16>
    %cst_68 = arith.constant dense<0.000000e+00> : vector<64x64xf32>
    %55 = tpu.matmul %52, %54, %cst_68 {dimension_numbers = #tpu.dot_dimension_numbers<[1], [0], [0], [1], [0, 0, 1, 1], [], []>} : vector<64x32xbf16>, vector<32x64xbf16>, vector<64x64xf32> -> vector<64x64xf32>
    %56 = arith.addf %49, %55 : vector<64x64xf32>
    %c0_69 = arith.constant 0 : index
    %c2_70 = arith.constant 2 : index
    %c2_71 = arith.constant 2 : index
    %c0_72 = arith.constant 0 : index
    %57 = vector.load %arg1[%c0_69, %c2_70, %c2_71, %c0_72] : memref<1x10x10x32xbf16, #tpu.memory_space<vmem>>, vector<1x8x8x32xbf16>
    %58 = vector.shape_cast %57 : vector<1x8x8x32xbf16> to vector<8x8x32xbf16>
    %59 = vector.shape_cast %58 : vector<8x8x32xbf16> to vector<64x32xbf16>
    %c2_73 = arith.constant 2 : index
    %c2_74 = arith.constant 2 : index
    %c0_75 = arith.constant 0 : index
    %c0_76 = arith.constant 0 : index
    %60 = vector.load %arg2[%c2_73, %c2_74, %c0_75, %c0_76] : memref<3x3x32x64xbf16, #tpu.memory_space<vmem>>, vector<1x1x32x64xbf16>
    %61 = vector.shape_cast %60 : vector<1x1x32x64xbf16> to vector<32x64xbf16>
    %cst_77 = arith.constant dense<0.000000e+00> : vector<64x64xf32>
    %62 = tpu.matmul %59, %61, %cst_77 {dimension_numbers = #tpu.dot_dimension_numbers<[1], [0], [0], [1], [0, 0, 1, 1], [], []>} : vector<64x32xbf16>, vector<32x64xbf16>, vector<64x64xf32> -> vector<64x64xf32>
    %63 = arith.addf %56, %62 : vector<64x64xf32>
    %c0_78 = arith.constant 0 : index
    %c0_79 = arith.constant 0 : index
    %64 = vector.load %arg3[%c0_78, %c0_79] : memref<1x64xf32, #tpu.memory_space<vmem>>, vector<1x64xf32>
    %65 = vector.broadcast %64 : vector<1x64xf32> to vector<64x64xf32>
    %66 = arith.addf %63, %65 : vector<64x64xf32>
    %cst_80 = arith.constant 0.000000e+00 : f32
    %67 = vector.broadcast %cst_80 : f32 to vector<64x64xf32>
    %68 = arith.maximumf %66, %67 : vector<64x64xf32>
    %69 = vector.shape_cast %68 : vector<64x64xf32> to vector<32x2x64xf32>
    %70 = vector.extract_strided_slice %69 {offsets = [0, 0, 0], sizes = [32, 1, 64], strides = [1, 1, 1]} : vector<32x2x64xf32> to vector<32x1x64xf32>
    %71 = vector.shape_cast %70 : vector<32x1x64xf32> to vector<32x64xf32>
    %72 = vector.extract_strided_slice %69 {offsets = [0, 1, 0], sizes = [32, 1, 64], strides = [1, 1, 1]} : vector<32x2x64xf32> to vector<32x1x64xf32>
    %73 = vector.shape_cast %72 : vector<32x1x64xf32> to vector<32x64xf32>
    %74 = arith.maximumf %71, %73 : vector<32x64xf32>
    %75 = vector.shape_cast %74 : vector<32x64xf32> to vector<4x2x4x64xf32>
    %76 = vector.extract_strided_slice %75 {offsets = [0, 0, 0, 0], sizes = [4, 1, 4, 64], strides = [1, 1, 1, 1]} : vector<4x2x4x64xf32> to vector<4x1x4x64xf32>
    %77 = vector.shape_cast %76 : vector<4x1x4x64xf32> to vector<4x4x64xf32>
    %78 = vector.extract_strided_slice %75 {offsets = [0, 1, 0, 0], sizes = [4, 1, 4, 64], strides = [1, 1, 1, 1]} : vector<4x2x4x64xf32> to vector<4x1x4x64xf32>
    %79 = vector.shape_cast %78 : vector<4x1x4x64xf32> to vector<4x4x64xf32>
    %80 = arith.maximumf %77, %79 : vector<4x4x64xf32>
    %81 = arith.truncf %80 : vector<4x4x64xf32> to vector<4x4x64xbf16>
    %c0_81 = arith.constant 0 : index
    %c0_82 = arith.constant 0 : index
    %c0_83 = arith.constant 0 : index
    %c0_84 = arith.constant 0 : index
    %82 = vector.load %arg4[%c0_81, %c0_82, %c0_83, %c0_84] : memref<1x4x4x64xbf16, #tpu.memory_space<vmem>>, vector<1x4x4x64xbf16>
    %83 = vector.shape_cast %82 : vector<1x4x4x64xbf16> to vector<4x4x64xbf16>
    %84 = vector.shape_cast %81 : vector<4x4x64xbf16> to vector<1x4x4x64xbf16>
    tpu.vector_store %arg4[%c0_81, %c0_82, %c0_83, %c0_84], %84 {strides = array<i32>} : memref<1x4x4x64xbf16, #tpu.memory_space<vmem>>, vector<1x4x4x64xbf16>,
    return
  }
  func.func @transform_0(%arg0: i32) -> (i32, i32, i32, i32) {
    %c0_i32 = arith.constant 0 : i32
    %c0_i32_0 = arith.constant 0 : i32
    %c0_i32_1 = arith.constant 0 : i32
    %c0_i32_2 = arith.constant 0 : i32
    return %arg0, %c0_i32, %c0_i32_0, %c0_i32_1 : i32, i32, i32, i32
  }
  func.func @transform_1(%arg0: i32) -> (i32, i32, i32, i32) {
    %c0_i32 = arith.constant 0 : i32
    %c0_i32_0 = arith.constant 0 : i32
    %c0_i32_1 = arith.constant 0 : i32
    %c0_i32_2 = arith.constant 0 : i32
    %c0_i32_3 = arith.constant 0 : i32
    return %c0_i32, %c0_i32_0, %c0_i32_1, %c0_i32_2 : i32, i32, i32, i32
  }
  func.func @transform_2(%arg0: i32) -> (i32, i32) {
    %c0_i32 = arith.constant 0 : i32
    %c0_i32_0 = arith.constant 0 : i32
    %c0_i32_1 = arith.constant 0 : i32
    return %c0_i32, %c0_i32_0 : i32, i32
  }
  func.func @transform_3(%arg0: i32) -> (i32, i32, i32, i32) {
    %c0_i32 = arith.constant 0 : i32
    %c0_i32_0 = arith.constant 0 : i32
    %c0_i32_1 = arith.constant 0 : i32
    %c0_i32_2 = arith.constant 0 : i32
    return %arg0, %c0_i32, %c0_i32_0, %c0_i32_1 : i32, i32, i32, i32
  }
}

module attributes {stable_mosaic.version = 11 : i64} {
  func.func @_conv3x3_bn_relu_pool_kernel(%arg0: i32, %arg1: memref<1x6x6x64xbf16, #tpu.memory_space<vmem>>, %arg2: memref<3x3x64x128xbf16, #tpu.memory_space<vmem>>, %arg3: memref<1x128xf32, #tpu.memory_space<vmem>>, %arg4: memref<1x2x2x128xbf16, #tpu.memory_space<vmem>>) attributes {dimension_semantics = [#tpu.dimension_semantics<parallel>], iteration_bounds = array<i64: 2>, scalar_prefetch = 0 : i64, scratch_operands = 0 : i64, tpu.core_type = #tpu.core_type<tc>, window_params = [{transform_indices = @transform_0, window_bounds = array<i64: 1, 6, 6, 64>}, {pipeline_mode = #tpu.pipeline_mode<synchronous>, transform_indices = @transform_1, window_bounds = array<i64: 3, 3, 64, 128>}, {pipeline_mode = #tpu.pipeline_mode<synchronous>, transform_indices = @transform_2, window_bounds = array<i64: 1, 128>}, {transform_indices = @transform_3, window_bounds = array<i64: 1, 2, 2, 128>}]} {
    %cst = arith.constant 0.000000e+00 : f32
    %0 = vector.broadcast %cst : f32 to vector<16x128xf32>
    %c0 = arith.constant 0 : index
    %c0_0 = arith.constant 0 : index
    %c0_1 = arith.constant 0 : index
    %c0_2 = arith.constant 0 : index
    %1 = vector.load %arg1[%c0, %c0_0, %c0_1, %c0_2] : memref<1x6x6x64xbf16, #tpu.memory_space<vmem>>, vector<1x4x4x64xbf16>
    %2 = vector.shape_cast %1 : vector<1x4x4x64xbf16> to vector<4x4x64xbf16>
    %3 = vector.shape_cast %2 : vector<4x4x64xbf16> to vector<16x64xbf16>
    %c0_3 = arith.constant 0 : index
    %c0_4 = arith.constant 0 : index
    %c0_5 = arith.constant 0 : index
    %c0_6 = arith.constant 0 : index
    %4 = vector.load %arg2[%c0_3, %c0_4, %c0_5, %c0_6] : memref<3x3x64x128xbf16, #tpu.memory_space<vmem>>, vector<1x1x64x128xbf16>
    %5 = vector.shape_cast %4 : vector<1x1x64x128xbf16> to vector<64x128xbf16>
    %cst_7 = arith.constant dense<0.000000e+00> : vector<16x128xf32>
    %6 = tpu.matmul %3, %5, %cst_7 {dimension_numbers = #tpu.dot_dimension_numbers<[1], [0], [0], [1], [0, 0, 1, 1], [], []>} : vector<16x64xbf16>, vector<64x128xbf16>, vector<16x128xf32> -> vector<16x128xf32>
    %7 = arith.addf %0, %6 : vector<16x128xf32>
    %c0_8 = arith.constant 0 : index
    %c0_9 = arith.constant 0 : index
    %c1 = arith.constant 1 : index
    %c0_10 = arith.constant 0 : index
    %8 = vector.load %arg1[%c0_8, %c0_9, %c1, %c0_10] : memref<1x6x6x64xbf16, #tpu.memory_space<vmem>>, vector<1x4x4x64xbf16>
    %9 = vector.shape_cast %8 : vector<1x4x4x64xbf16> to vector<4x4x64xbf16>
    %10 = vector.shape_cast %9 : vector<4x4x64xbf16> to vector<16x64xbf16>
    %c0_11 = arith.constant 0 : index
    %c1_12 = arith.constant 1 : index
    %c0_13 = arith.constant 0 : index
    %c0_14 = arith.constant 0 : index
    %11 = vector.load %arg2[%c0_11, %c1_12, %c0_13, %c0_14] : memref<3x3x64x128xbf16, #tpu.memory_space<vmem>>, vector<1x1x64x128xbf16>
    %12 = vector.shape_cast %11 : vector<1x1x64x128xbf16> to vector<64x128xbf16>
    %cst_15 = arith.constant dense<0.000000e+00> : vector<16x128xf32>
    %13 = tpu.matmul %10, %12, %cst_15 {dimension_numbers = #tpu.dot_dimension_numbers<[1], [0], [0], [1], [0, 0, 1, 1], [], []>} : vector<16x64xbf16>, vector<64x128xbf16>, vector<16x128xf32> -> vector<16x128xf32>
    %14 = arith.addf %7, %13 : vector<16x128xf32>
    %c0_16 = arith.constant 0 : index
    %c0_17 = arith.constant 0 : index
    %c2 = arith.constant 2 : index
    %c0_18 = arith.constant 0 : index
    %15 = vector.load %arg1[%c0_16, %c0_17, %c2, %c0_18] : memref<1x6x6x64xbf16, #tpu.memory_space<vmem>>, vector<1x4x4x64xbf16>
    %16 = vector.shape_cast %15 : vector<1x4x4x64xbf16> to vector<4x4x64xbf16>
    %17 = vector.shape_cast %16 : vector<4x4x64xbf16> to vector<16x64xbf16>
    %c0_19 = arith.constant 0 : index
    %c2_20 = arith.constant 2 : index
    %c0_21 = arith.constant 0 : index
    %c0_22 = arith.constant 0 : index
    %18 = vector.load %arg2[%c0_19, %c2_20, %c0_21, %c0_22] : memref<3x3x64x128xbf16, #tpu.memory_space<vmem>>, vector<1x1x64x128xbf16>
    %19 = vector.shape_cast %18 : vector<1x1x64x128xbf16> to vector<64x128xbf16>
    %cst_23 = arith.constant dense<0.000000e+00> : vector<16x128xf32>
    %20 = tpu.matmul %17, %19, %cst_23 {dimension_numbers = #tpu.dot_dimension_numbers<[1], [0], [0], [1], [0, 0, 1, 1], [], []>} : vector<16x64xbf16>, vector<64x128xbf16>, vector<16x128xf32> -> vector<16x128xf32>
    %21 = arith.addf %14, %20 : vector<16x128xf32>
    %c0_24 = arith.constant 0 : index
    %c1_25 = arith.constant 1 : index
    %c0_26 = arith.constant 0 : index
    %c0_27 = arith.constant 0 : index
    %22 = vector.load %arg1[%c0_24, %c1_25, %c0_26, %c0_27] : memref<1x6x6x64xbf16, #tpu.memory_space<vmem>>, vector<1x4x4x64xbf16>
    %23 = vector.shape_cast %22 : vector<1x4x4x64xbf16> to vector<4x4x64xbf16>
    %24 = vector.shape_cast %23 : vector<4x4x64xbf16> to vector<16x64xbf16>
    %c1_28 = arith.constant 1 : index
    %c0_29 = arith.constant 0 : index
    %c0_30 = arith.constant 0 : index
    %c0_31 = arith.constant 0 : index
    %25 = vector.load %arg2[%c1_28, %c0_29, %c0_30, %c0_31] : memref<3x3x64x128xbf16, #tpu.memory_space<vmem>>, vector<1x1x64x128xbf16>
    %26 = vector.shape_cast %25 : vector<1x1x64x128xbf16> to vector<64x128xbf16>
    %cst_32 = arith.constant dense<0.000000e+00> : vector<16x128xf32>
    %27 = tpu.matmul %24, %26, %cst_32 {dimension_numbers = #tpu.dot_dimension_numbers<[1], [0], [0], [1], [0, 0, 1, 1], [], []>} : vector<16x64xbf16>, vector<64x128xbf16>, vector<16x128xf32> -> vector<16x128xf32>
    %28 = arith.addf %21, %27 : vector<16x128xf32>
    %c0_33 = arith.constant 0 : index
    %c1_34 = arith.constant 1 : index
    %c1_35 = arith.constant 1 : index
    %c0_36 = arith.constant 0 : index
    %29 = vector.load %arg1[%c0_33, %c1_34, %c1_35, %c0_36] : memref<1x6x6x64xbf16, #tpu.memory_space<vmem>>, vector<1x4x4x64xbf16>
    %30 = vector.shape_cast %29 : vector<1x4x4x64xbf16> to vector<4x4x64xbf16>
    %31 = vector.shape_cast %30 : vector<4x4x64xbf16> to vector<16x64xbf16>
    %c1_37 = arith.constant 1 : index
    %c1_38 = arith.constant 1 : index
    %c0_39 = arith.constant 0 : index
    %c0_40 = arith.constant 0 : index
    %32 = vector.load %arg2[%c1_37, %c1_38, %c0_39, %c0_40] : memref<3x3x64x128xbf16, #tpu.memory_space<vmem>>, vector<1x1x64x128xbf16>
    %33 = vector.shape_cast %32 : vector<1x1x64x128xbf16> to vector<64x128xbf16>
    %cst_41 = arith.constant dense<0.000000e+00> : vector<16x128xf32>
    %34 = tpu.matmul %31, %33, %cst_41 {dimension_numbers = #tpu.dot_dimension_numbers<[1], [0], [0], [1], [0, 0, 1, 1], [], []>} : vector<16x64xbf16>, vector<64x128xbf16>, vector<16x128xf32> -> vector<16x128xf32>
    %35 = arith.addf %28, %34 : vector<16x128xf32>
    %c0_42 = arith.constant 0 : index
    %c1_43 = arith.constant 1 : index
    %c2_44 = arith.constant 2 : index
    %c0_45 = arith.constant 0 : index
    %36 = vector.load %arg1[%c0_42, %c1_43, %c2_44, %c0_45] : memref<1x6x6x64xbf16, #tpu.memory_space<vmem>>, vector<1x4x4x64xbf16>
    %37 = vector.shape_cast %36 : vector<1x4x4x64xbf16> to vector<4x4x64xbf16>
    %38 = vector.shape_cast %37 : vector<4x4x64xbf16> to vector<16x64xbf16>
    %c1_46 = arith.constant 1 : index
    %c2_47 = arith.constant 2 : index
    %c0_48 = arith.constant 0 : index
    %c0_49 = arith.constant 0 : index
    %39 = vector.load %arg2[%c1_46, %c2_47, %c0_48, %c0_49] : memref<3x3x64x128xbf16, #tpu.memory_space<vmem>>, vector<1x1x64x128xbf16>
    %40 = vector.shape_cast %39 : vector<1x1x64x128xbf16> to vector<64x128xbf16>
    %cst_50 = arith.constant dense<0.000000e+00> : vector<16x128xf32>
    %41 = tpu.matmul %38, %40, %cst_50 {dimension_numbers = #tpu.dot_dimension_numbers<[1], [0], [0], [1], [0, 0, 1, 1], [], []>} : vector<16x64xbf16>, vector<64x128xbf16>, vector<16x128xf32> -> vector<16x128xf32>
    %42 = arith.addf %35, %41 : vector<16x128xf32>
    %c0_51 = arith.constant 0 : index
    %c2_52 = arith.constant 2 : index
    %c0_53 = arith.constant 0 : index
    %c0_54 = arith.constant 0 : index
    %43 = vector.load %arg1[%c0_51, %c2_52, %c0_53, %c0_54] : memref<1x6x6x64xbf16, #tpu.memory_space<vmem>>, vector<1x4x4x64xbf16>
    %44 = vector.shape_cast %43 : vector<1x4x4x64xbf16> to vector<4x4x64xbf16>
    %45 = vector.shape_cast %44 : vector<4x4x64xbf16> to vector<16x64xbf16>
    %c2_55 = arith.constant 2 : index
    %c0_56 = arith.constant 0 : index
    %c0_57 = arith.constant 0 : index
    %c0_58 = arith.constant 0 : index
    %46 = vector.load %arg2[%c2_55, %c0_56, %c0_57, %c0_58] : memref<3x3x64x128xbf16, #tpu.memory_space<vmem>>, vector<1x1x64x128xbf16>
    %47 = vector.shape_cast %46 : vector<1x1x64x128xbf16> to vector<64x128xbf16>
    %cst_59 = arith.constant dense<0.000000e+00> : vector<16x128xf32>
    %48 = tpu.matmul %45, %47, %cst_59 {dimension_numbers = #tpu.dot_dimension_numbers<[1], [0], [0], [1], [0, 0, 1, 1], [], []>} : vector<16x64xbf16>, vector<64x128xbf16>, vector<16x128xf32> -> vector<16x128xf32>
    %49 = arith.addf %42, %48 : vector<16x128xf32>
    %c0_60 = arith.constant 0 : index
    %c2_61 = arith.constant 2 : index
    %c1_62 = arith.constant 1 : index
    %c0_63 = arith.constant 0 : index
    %50 = vector.load %arg1[%c0_60, %c2_61, %c1_62, %c0_63] : memref<1x6x6x64xbf16, #tpu.memory_space<vmem>>, vector<1x4x4x64xbf16>
    %51 = vector.shape_cast %50 : vector<1x4x4x64xbf16> to vector<4x4x64xbf16>
    %52 = vector.shape_cast %51 : vector<4x4x64xbf16> to vector<16x64xbf16>
    %c2_64 = arith.constant 2 : index
    %c1_65 = arith.constant 1 : index
    %c0_66 = arith.constant 0 : index
    %c0_67 = arith.constant 0 : index
    %53 = vector.load %arg2[%c2_64, %c1_65, %c0_66, %c0_67] : memref<3x3x64x128xbf16, #tpu.memory_space<vmem>>, vector<1x1x64x128xbf16>
    %54 = vector.shape_cast %53 : vector<1x1x64x128xbf16> to vector<64x128xbf16>
    %cst_68 = arith.constant dense<0.000000e+00> : vector<16x128xf32>
    %55 = tpu.matmul %52, %54, %cst_68 {dimension_numbers = #tpu.dot_dimension_numbers<[1], [0], [0], [1], [0, 0, 1, 1], [], []>} : vector<16x64xbf16>, vector<64x128xbf16>, vector<16x128xf32> -> vector<16x128xf32>
    %56 = arith.addf %49, %55 : vector<16x128xf32>
    %c0_69 = arith.constant 0 : index
    %c2_70 = arith.constant 2 : index
    %c2_71 = arith.constant 2 : index
    %c0_72 = arith.constant 0 : index
    %57 = vector.load %arg1[%c0_69, %c2_70, %c2_71, %c0_72] : memref<1x6x6x64xbf16, #tpu.memory_space<vmem>>, vector<1x4x4x64xbf16>
    %58 = vector.shape_cast %57 : vector<1x4x4x64xbf16> to vector<4x4x64xbf16>
    %59 = vector.shape_cast %58 : vector<4x4x64xbf16> to vector<16x64xbf16>
    %c2_73 = arith.constant 2 : index
    %c2_74 = arith.constant 2 : index
    %c0_75 = arith.constant 0 : index
    %c0_76 = arith.constant 0 : index
    %60 = vector.load %arg2[%c2_73, %c2_74, %c0_75, %c0_76] : memref<3x3x64x128xbf16, #tpu.memory_space<vmem>>, vector<1x1x64x128xbf16>
    %61 = vector.shape_cast %60 : vector<1x1x64x128xbf16> to vector<64x128xbf16>
    %cst_77 = arith.constant dense<0.000000e+00> : vector<16x128xf32>
    %62 = tpu.matmul %59, %61, %cst_77 {dimension_numbers = #tpu.dot_dimension_numbers<[1], [0], [0], [1], [0, 0, 1, 1], [], []>} : vector<16x64xbf16>, vector<64x128xbf16>, vector<16x128xf32> -> vector<16x128xf32>
    %63 = arith.addf %56, %62 : vector<16x128xf32>
    %c0_78 = arith.constant 0 : index
    %c0_79 = arith.constant 0 : index
    %64 = vector.load %arg3[%c0_78, %c0_79] : memref<1x128xf32, #tpu.memory_space<vmem>>, vector<1x128xf32>
    %65 = vector.broadcast %64 : vector<1x128xf32> to vector<16x128xf32>
    %66 = arith.addf %63, %65 : vector<16x128xf32>
    %cst_80 = arith.constant 0.000000e+00 : f32
    %67 = vector.broadcast %cst_80 : f32 to vector<16x128xf32>
    %68 = arith.maximumf %66, %67 : vector<16x128xf32>
    %69 = vector.shape_cast %68 : vector<16x128xf32> to vector<8x2x128xf32>
    %70 = vector.extract_strided_slice %69 {offsets = [0, 0, 0], sizes = [8, 1, 128], strides = [1, 1, 1]} : vector<8x2x128xf32> to vector<8x1x128xf32>
    %71 = vector.shape_cast %70 : vector<8x1x128xf32> to vector<8x128xf32>
    %72 = vector.extract_strided_slice %69 {offsets = [0, 1, 0], sizes = [8, 1, 128], strides = [1, 1, 1]} : vector<8x2x128xf32> to vector<8x1x128xf32>
    %73 = vector.shape_cast %72 : vector<8x1x128xf32> to vector<8x128xf32>
    %74 = arith.maximumf %71, %73 : vector<8x128xf32>
    %75 = vector.shape_cast %74 : vector<8x128xf32> to vector<2x2x2x128xf32>
    %76 = vector.extract_strided_slice %75 {offsets = [0, 0, 0, 0], sizes = [2, 1, 2, 128], strides = [1, 1, 1, 1]} : vector<2x2x2x128xf32> to vector<2x1x2x128xf32>
    %77 = vector.shape_cast %76 : vector<2x1x2x128xf32> to vector<2x2x128xf32>
    %78 = vector.extract_strided_slice %75 {offsets = [0, 1, 0, 0], sizes = [2, 1, 2, 128], strides = [1, 1, 1, 1]} : vector<2x2x2x128xf32> to vector<2x1x2x128xf32>
    %79 = vector.shape_cast %78 : vector<2x1x2x128xf32> to vector<2x2x128xf32>
    %80 = arith.maximumf %77, %79 : vector<2x2x128xf32>
    %81 = arith.truncf %80 : vector<2x2x128xf32> to vector<2x2x128xbf16>
    %c0_81 = arith.constant 0 : index
    %c0_82 = arith.constant 0 : index
    %c0_83 = arith.constant 0 : index
    %c0_84 = arith.constant 0 : index
    %82 = vector.load %arg4[%c0_81, %c0_82, %c0_83, %c0_84] : memref<1x2x2x128xbf16, #tpu.memory_space<vmem>>, vector<1x2x2x128xbf16>
    %83 = vector.shape_cast %82 : vector<1x2x2x128xbf16> to vector<2x2x128xbf16>
    %84 = vector.shape_cast %81 : vector<2x2x128xbf16> to vector<1x2x2x128xbf16>
    tpu.vector_store %arg4[%c0_81, %c0_82, %c0_83, %c0_84], %84 {strides = array<i32>} : memref<1x2x2x128xbf16, #tpu.memory_space<vmem>>, vector<1x2x2x128xbf16>,
    return
  }
  func.func @transform_0(%arg0: i32) -> (i32, i32, i32, i32) {
    %c0_i32 = arith.constant 0 : i32
    %c0_i32_0 = arith.constant 0 : i32
    %c0_i32_1 = arith.constant 0 : i32
    %c0_i32_2 = arith.constant 0 : i32
    return %arg0, %c0_i32, %c0_i32_0, %c0_i32_1 : i32, i32, i32, i32
  }
  func.func @transform_1(%arg0: i32) -> (i32, i32, i32, i32) {
    %c0_i32 = arith.constant 0 : i32
    %c0_i32_0 = arith.constant 0 : i32
    %c0_i32_1 = arith.constant 0 : i32
    %c0_i32_2 = arith.constant 0 : i32
    %c0_i32_3 = arith.constant 0 : i32
    return %c0_i32, %c0_i32_0, %c0_i32_1, %c0_i32_2 : i32, i32, i32, i32
  }
  func.func @transform_2(%arg0: i32) -> (i32, i32) {
    %c0_i32 = arith.constant 0 : i32
    %c0_i32_0 = arith.constant 0 : i32
    %c0_i32_1 = arith.constant 0 : i32
    return %c0_i32, %c0_i32_0 : i32, i32
  }
  func.func @transform_3(%arg0: i32) -> (i32, i32, i32, i32) {
    %c0_i32 = arith.constant 0 : i32
    %c0_i32_0 = arith.constant 0 : i32
    %c0_i32_1 = arith.constant 0 : i32
    %c0_i32_2 = arith.constant 0 : i32
    return %arg0, %c0_i32, %c0_i32_0, %c0_i32_1 : i32, i32, i32, i32
  }
}

module attributes {stable_mosaic.version = 11 : i64} {
  func.func @_embed_cluster_kernel(%arg0: memref<2x128xf32, #tpu.memory_space<vmem>>, %arg1: memref<128x64xf32, #tpu.memory_space<vmem>>, %arg2: memref<1x64xf32, #tpu.memory_space<vmem>>, %arg3: memref<64x32xf32, #tpu.memory_space<vmem>>, %arg4: memref<1x32xf32, #tpu.memory_space<vmem>>, %arg5: memref<32x10xf32, #tpu.memory_space<vmem>>, %arg6: memref<1x10xf32, #tpu.memory_space<vmem>>, %arg7: memref<1x1xf32, #tpu.memory_space<vmem>>, %arg8: memref<2x32xf32, #tpu.memory_space<vmem>>, %arg9: memref<2x10xf32, #tpu.memory_space<vmem>>) attributes {dimension_semantics = [], scalar_prefetch = 0 : i64, scratch_operands = 0 : i64, tpu.core_type = #tpu.core_type<tc>} {
    %c0 = arith.constant 0 : index
    %c0_0 = arith.constant 0 : index
    %0 = vector.load %arg0[%c0, %c0_0] : memref<2x128xf32, #tpu.memory_space<vmem>>, vector<2x128xf32>
    %c0_1 = arith.constant 0 : index
    %c0_2 = arith.constant 0 : index
    %1 = vector.load %arg1[%c0_1, %c0_2] : memref<128x64xf32, #tpu.memory_space<vmem>>, vector<128x64xf32>
    %cst = arith.constant dense<0.000000e+00> : vector<2x64xf32>
    %2 = tpu.matmul %0, %1, %cst {dimension_numbers = #tpu.dot_dimension_numbers<[1], [0], [0], [1], [0, 0, 1, 1], [], []>} : vector<2x128xf32>, vector<128x64xf32>, vector<2x64xf32> -> vector<2x64xf32>
    %c0_3 = arith.constant 0 : index
    %c0_4 = arith.constant 0 : index
    %3 = vector.load %arg2[%c0_3, %c0_4] : memref<1x64xf32, #tpu.memory_space<vmem>>, vector<1x64xf32>
    %4 = vector.broadcast %3 : vector<1x64xf32> to vector<2x64xf32>
    %5 = arith.addf %2, %4 : vector<2x64xf32>
    %cst_5 = arith.constant 0.000000e+00 : f32
    %6 = vector.broadcast %cst_5 : f32 to vector<2x64xf32>
    %7 = arith.maximumf %5, %6 : vector<2x64xf32>
    %c0_6 = arith.constant 0 : index
    %c0_7 = arith.constant 0 : index
    %8 = vector.load %arg3[%c0_6, %c0_7] : memref<64x32xf32, #tpu.memory_space<vmem>>, vector<64x32xf32>
    %cst_8 = arith.constant dense<0.000000e+00> : vector<2x32xf32>
    %9 = tpu.matmul %7, %8, %cst_8 {dimension_numbers = #tpu.dot_dimension_numbers<[1], [0], [0], [1], [0, 0, 1, 1], [], []>} : vector<2x64xf32>, vector<64x32xf32>, vector<2x32xf32> -> vector<2x32xf32>
    %c0_9 = arith.constant 0 : index
    %c0_10 = arith.constant 0 : index
    %10 = vector.load %arg4[%c0_9, %c0_10] : memref<1x32xf32, #tpu.memory_space<vmem>>, vector<1x32xf32>
    %11 = vector.broadcast %10 : vector<1x32xf32> to vector<2x32xf32>
    %12 = arith.addf %9, %11 : vector<2x32xf32>
    %13 = arith.mulf %12, %12 : vector<2x32xf32>
    %cst_11 = arith.constant dense<0.000000e+00> : vector<2xf32>
    %14 = vector.multi_reduction <add>, %13, %cst_11 [1] : vector<2x32xf32> to vector<2xf32>
    %15 = vector.shape_cast %14 : vector<2xf32> to vector<2x1xf32>
    %cst_12 = arith.constant 1.000000e-24 : f32
    %16 = vector.broadcast %cst_12 : f32 to vector<2x1xf32>
    %17 = arith.maximumf %15, %16 : vector<2x1xf32>
    %18 = math.rsqrt %17 : vector<2x1xf32>
    %19 = vector.broadcast %18 : vector<2x1xf32> to vector<2x32xf32>
    %20 = arith.mulf %12, %19 : vector<2x32xf32>
    %c0_13 = arith.constant 0 : index
    %c0_14 = arith.constant 0 : index
    %21 = vector.load %arg8[%c0_13, %c0_14] : memref<2x32xf32, #tpu.memory_space<vmem>>, vector<2x32xf32>
    tpu.vector_store %arg8[%c0_13, %c0_14], %20 {strides = array<i32>} : memref<2x32xf32, #tpu.memory_space<vmem>>, vector<2x32xf32>,
    %c0_15 = arith.constant 0 : index
    %c0_16 = arith.constant 0 : index
    %22 = vector.load %arg5[%c0_15, %c0_16] : memref<32x10xf32, #tpu.memory_space<vmem>>, vector<32x10xf32>
    %cst_17 = arith.constant dense<0.000000e+00> : vector<2x10xf32>
    %23 = tpu.matmul %20, %22, %cst_17 {dimension_numbers = #tpu.dot_dimension_numbers<[1], [0], [0], [1], [0, 0, 1, 1], [], []>} : vector<2x32xf32>, vector<32x10xf32>, vector<2x10xf32> -> vector<2x10xf32>
    %c0_18 = arith.constant 0 : index
    %c0_19 = arith.constant 0 : index
    %24 = vector.load %arg6[%c0_18, %c0_19] : memref<1x10xf32, #tpu.memory_space<vmem>>, vector<1x10xf32>
    %25 = vector.broadcast %24 : vector<1x10xf32> to vector<2x10xf32>
    %26 = arith.addf %23, %25 : vector<2x10xf32>
    %c0_20 = arith.constant 0 : index
    %c0_21 = arith.constant 0 : index
    %27 = vector.load %arg7[%c0_20, %c0_21] : memref<1x1xf32, #tpu.memory_space<vmem>>, vector<1x1xf32>
    %28 = vector.broadcast %27 : vector<1x1xf32> to vector<2x10xf32>
    %29 = arith.mulf %26, %28 : vector<2x10xf32>
    %cst_22 = arith.constant dense<0xFF800000> : vector<2xf32>
    %30 = vector.multi_reduction <maximumf>, %29, %cst_22 [1] : vector<2x10xf32> to vector<2xf32>
    %31 = vector.shape_cast %30 : vector<2xf32> to vector<2x1xf32>
    %32 = vector.broadcast %31 : vector<2x1xf32> to vector<2x10xf32>
    %33 = arith.subf %29, %32 : vector<2x10xf32>
    %34 = math.exp %33 : vector<2x10xf32>
    %cst_23 = arith.constant dense<0.000000e+00> : vector<2xf32>
    %35 = vector.multi_reduction <add>, %34, %cst_23 [1] : vector<2x10xf32> to vector<2xf32>
    %36 = vector.shape_cast %35 : vector<2xf32> to vector<2x1xf32>
    %37 = tpu.reciprocal %36 {approx = true} : vector<2x1xf32> -> vector<2x1xf32>
    %38 = vector.broadcast %37 : vector<2x1xf32> to vector<2x10xf32>
    %39 = arith.mulf %34, %38 : vector<2x10xf32>
    %c0_24 = arith.constant 0 : index
    %c0_25 = arith.constant 0 : index
    %40 = vector.load %arg9[%c0_24, %c0_25] : memref<2x10xf32, #tpu.memory_space<vmem>>, vector<2x10xf32>
    tpu.vector_store %arg9[%c0_24, %c0_25], %39 {strides = array<i32>} : memref<2x10xf32, #tpu.memory_space<vmem>>, vector<2x10xf32>,
    return
  }
}

module attributes {stable_mosaic.version = 11 : i64} {
  func.func @_matmul_bias_act_kernel(%arg0: i32, %arg1: memref<8x128xbf16, #tpu.memory_space<vmem>>, %arg2: memref<128x256xbf16, #tpu.memory_space<vmem>>, %arg3: memref<1x256xf32, #tpu.memory_space<vmem>>, %arg4: memref<8x256xbf16, #tpu.memory_space<vmem>>) attributes {dimension_semantics = [#tpu.dimension_semantics<parallel>], iteration_bounds = array<i64: 1>, scalar_prefetch = 0 : i64, scratch_operands = 0 : i64, tpu.core_type = #tpu.core_type<tc>, window_params = [{transform_indices = @transform_0, window_bounds = array<i64: 8, 128>}, {pipeline_mode = #tpu.pipeline_mode<synchronous>, transform_indices = @transform_1, window_bounds = array<i64: 128, 256>}, {pipeline_mode = #tpu.pipeline_mode<synchronous>, transform_indices = @transform_2, window_bounds = array<i64: 1, 256>}, {transform_indices = @transform_3, window_bounds = array<i64: 8, 256>}]} {
    %c0 = arith.constant 0 : index
    %c0_0 = arith.constant 0 : index
    %0 = vector.load %arg1[%c0, %c0_0] : memref<8x128xbf16, #tpu.memory_space<vmem>>, vector<8x128xbf16>
    %c0_1 = arith.constant 0 : index
    %c0_2 = arith.constant 0 : index
    %1 = vector.load %arg2[%c0_1, %c0_2] : memref<128x256xbf16, #tpu.memory_space<vmem>>, vector<128x256xbf16>
    %cst = arith.constant dense<0.000000e+00> : vector<8x256xf32>
    %2 = tpu.matmul %0, %1, %cst {dimension_numbers = #tpu.dot_dimension_numbers<[1], [0], [0], [1], [0, 0, 1, 1], [], []>} : vector<8x128xbf16>, vector<128x256xbf16>, vector<8x256xf32> -> vector<8x256xf32>
    %c0_3 = arith.constant 0 : index
    %c0_4 = arith.constant 0 : index
    %3 = vector.load %arg3[%c0_3, %c0_4] : memref<1x256xf32, #tpu.memory_space<vmem>>, vector<1x256xf32>
    %4 = vector.broadcast %3 : vector<1x256xf32> to vector<8x256xf32>
    %5 = arith.addf %2, %4 : vector<8x256xf32>
    %cst_5 = arith.constant 0.000000e+00 : f32
    %6 = vector.broadcast %cst_5 : f32 to vector<8x256xf32>
    %7 = arith.maximumf %5, %6 : vector<8x256xf32>
    %8 = arith.truncf %7 : vector<8x256xf32> to vector<8x256xbf16>
    %c0_6 = arith.constant 0 : index
    %c0_7 = arith.constant 0 : index
    %9 = vector.load %arg4[%c0_6, %c0_7] : memref<8x256xbf16, #tpu.memory_space<vmem>>, vector<8x256xbf16>
    tpu.vector_store %arg4[%c0_6, %c0_7], %8 {strides = array<i32>} : memref<8x256xbf16, #tpu.memory_space<vmem>>, vector<8x256xbf16>,
    return
  }
  func.func @transform_0(%arg0: i32) -> (i32, i32) {
    %c0_i32 = arith.constant 0 : i32
    %c0_i32_0 = arith.constant 0 : i32
    return %arg0, %c0_i32 : i32, i32
  }
  func.func @transform_1(%arg0: i32) -> (i32, i32) {
    %c0_i32 = arith.constant 0 : i32
    %c0_i32_0 = arith.constant 0 : i32
    %c0_i32_1 = arith.constant 0 : i32
    return %c0_i32, %c0_i32_0 : i32, i32
  }
  func.func @transform_2(%arg0: i32) -> (i32, i32) {
    %c0_i32 = arith.constant 0 : i32
    %c0_i32_0 = arith.constant 0 : i32
    %c0_i32_1 = arith.constant 0 : i32
    return %c0_i32, %c0_i32_0 : i32, i32
  }
  func.func @transform_3(%arg0: i32) -> (i32, i32) {
    %c0_i32 = arith.constant 0 : i32
    %c0_i32_0 = arith.constant 0 : i32
    return %arg0, %c0_i32 : i32, i32
  }
}

module attributes {stable_mosaic.version = 11 : i64} {
  func.func @_matmul_bias_act_kernel(%arg0: i32, %arg1: memref<32x64xbf16, #tpu.memory_space<vmem>>, %arg2: memref<64x128xbf16, #tpu.memory_space<vmem>>, %arg3: memref<1x128xf32, #tpu.memory_space<vmem>>, %arg4: memref<32x128xbf16, #tpu.memory_space<vmem>>) attributes {dimension_semantics = [#tpu.dimension_semantics<parallel>], iteration_bounds = array<i64: 1>, scalar_prefetch = 0 : i64, scratch_operands = 0 : i64, tpu.core_type = #tpu.core_type<tc>, window_params = [{transform_indices = @transform_0, window_bounds = array<i64: 32, 64>}, {pipeline_mode = #tpu.pipeline_mode<synchronous>, transform_indices = @transform_1, window_bounds = array<i64: 64, 128>}, {pipeline_mode = #tpu.pipeline_mode<synchronous>, transform_indices = @transform_2, window_bounds = array<i64: 1, 128>}, {transform_indices = @transform_3, window_bounds = array<i64: 32, 128>}]} {
    %c0 = arith.constant 0 : index
    %c0_0 = arith.constant 0 : index
    %0 = vector.load %arg1[%c0, %c0_0] : memref<32x64xbf16, #tpu.memory_space<vmem>>, vector<32x64xbf16>
    %c0_1 = arith.constant 0 : index
    %c0_2 = arith.constant 0 : index
    %1 = vector.load %arg2[%c0_1, %c0_2] : memref<64x128xbf16, #tpu.memory_space<vmem>>, vector<64x128xbf16>
    %cst = arith.constant dense<0.000000e+00> : vector<32x128xf32>
    %2 = tpu.matmul %0, %1, %cst {dimension_numbers = #tpu.dot_dimension_numbers<[1], [0], [0], [1], [0, 0, 1, 1], [], []>} : vector<32x64xbf16>, vector<64x128xbf16>, vector<32x128xf32> -> vector<32x128xf32>
    %c0_3 = arith.constant 0 : index
    %c0_4 = arith.constant 0 : index
    %3 = vector.load %arg3[%c0_3, %c0_4] : memref<1x128xf32, #tpu.memory_space<vmem>>, vector<1x128xf32>
    %4 = vector.broadcast %3 : vector<1x128xf32> to vector<32x128xf32>
    %5 = arith.addf %2, %4 : vector<32x128xf32>
    %cst_5 = arith.constant 0.000000e+00 : f32
    %6 = vector.broadcast %cst_5 : f32 to vector<32x128xf32>
    %7 = arith.maximumf %5, %6 : vector<32x128xf32>
    %8 = arith.truncf %7 : vector<32x128xf32> to vector<32x128xbf16>
    %c0_6 = arith.constant 0 : index
    %c0_7 = arith.constant 0 : index
    %9 = vector.load %arg4[%c0_6, %c0_7] : memref<32x128xbf16, #tpu.memory_space<vmem>>, vector<32x128xbf16>
    tpu.vector_store %arg4[%c0_6, %c0_7], %8 {strides = array<i32>} : memref<32x128xbf16, #tpu.memory_space<vmem>>, vector<32x128xbf16>,
    return
  }
  func.func @transform_0(%arg0: i32) -> (i32, i32) {
    %c0_i32 = arith.constant 0 : i32
    %c0_i32_0 = arith.constant 0 : i32
    return %arg0, %c0_i32 : i32, i32
  }
  func.func @transform_1(%arg0: i32) -> (i32, i32) {
    %c0_i32 = arith.constant 0 : i32
    %c0_i32_0 = arith.constant 0 : i32
    %c0_i32_1 = arith.constant 0 : i32
    return %c0_i32, %c0_i32_0 : i32, i32
  }
  func.func @transform_2(%arg0: i32) -> (i32, i32) {
    %c0_i32 = arith.constant 0 : i32
    %c0_i32_0 = arith.constant 0 : i32
    %c0_i32_1 = arith.constant 0 : i32
    return %c0_i32, %c0_i32_0 : i32, i32
  }
  func.func @transform_3(%arg0: i32) -> (i32, i32) {
    %c0_i32 = arith.constant 0 : i32
    %c0_i32_0 = arith.constant 0 : i32
    return %arg0, %c0_i32 : i32, i32
  }
}

module attributes {stable_mosaic.version = 11 : i64} {
  func.func @_matmul_bias_act_kernel(%arg0: i32, %arg1: memref<128x32xbf16, #tpu.memory_space<vmem>>, %arg2: memref<32x12xbf16, #tpu.memory_space<vmem>>, %arg3: memref<1x12xf32, #tpu.memory_space<vmem>>, %arg4: memref<128x12xf32, #tpu.memory_space<vmem>>) attributes {dimension_semantics = [#tpu.dimension_semantics<parallel>], iteration_bounds = array<i64: 1>, scalar_prefetch = 0 : i64, scratch_operands = 0 : i64, tpu.core_type = #tpu.core_type<tc>, window_params = [{transform_indices = @transform_0, window_bounds = array<i64: 128, 32>}, {pipeline_mode = #tpu.pipeline_mode<synchronous>, transform_indices = @transform_1, window_bounds = array<i64: 32, 12>}, {pipeline_mode = #tpu.pipeline_mode<synchronous>, transform_indices = @transform_2, window_bounds = array<i64: 1, 12>}, {transform_indices = @transform_3, window_bounds = array<i64: 128, 12>}]} {
    %c0 = arith.constant 0 : index
    %c0_0 = arith.constant 0 : index
    %0 = vector.load %arg1[%c0, %c0_0] : memref<128x32xbf16, #tpu.memory_space<vmem>>, vector<128x32xbf16>
    %c0_1 = arith.constant 0 : index
    %c0_2 = arith.constant 0 : index
    %1 = vector.load %arg2[%c0_1, %c0_2] : memref<32x12xbf16, #tpu.memory_space<vmem>>, vector<32x12xbf16>
    %cst = arith.constant dense<0.000000e+00> : vector<128x12xf32>
    %2 = tpu.matmul %0, %1, %cst {dimension_numbers = #tpu.dot_dimension_numbers<[1], [0], [0], [1], [0, 0, 1, 1], [], []>} : vector<128x32xbf16>, vector<32x12xbf16>, vector<128x12xf32> -> vector<128x12xf32>
    %c0_3 = arith.constant 0 : index
    %c0_4 = arith.constant 0 : index
    %3 = vector.load %arg3[%c0_3, %c0_4] : memref<1x12xf32, #tpu.memory_space<vmem>>, vector<1x12xf32>
    %4 = vector.broadcast %3 : vector<1x12xf32> to vector<128x12xf32>
    %5 = arith.addf %2, %4 : vector<128x12xf32>
    %6 = math.tanh %5 : vector<128x12xf32>
    %c0_5 = arith.constant 0 : index
    %c0_6 = arith.constant 0 : index
    %7 = vector.load %arg4[%c0_5, %c0_6] : memref<128x12xf32, #tpu.memory_space<vmem>>, vector<128x12xf32>
    tpu.vector_store %arg4[%c0_5, %c0_6], %6 {strides = array<i32>} : memref<128x12xf32, #tpu.memory_space<vmem>>, vector<128x12xf32>,
    return
  }
  func.func @transform_0(%arg0: i32) -> (i32, i32) {
    %c0_i32 = arith.constant 0 : i32
    %c0_i32_0 = arith.constant 0 : i32
    return %arg0, %c0_i32 : i32, i32
  }
  func.func @transform_1(%arg0: i32) -> (i32, i32) {
    %c0_i32 = arith.constant 0 : i32
    %c0_i32_0 = arith.constant 0 : i32
    %c0_i32_1 = arith.constant 0 : i32
    return %c0_i32, %c0_i32_0 : i32, i32
  }
  func.func @transform_2(%arg0: i32) -> (i32, i32) {
    %c0_i32 = arith.constant 0 : i32
    %c0_i32_0 = arith.constant 0 : i32
    %c0_i32_1 = arith.constant 0 : i32
    return %c0_i32, %c0_i32_0 : i32, i32
  }
  func.func @transform_3(%arg0: i32) -> (i32, i32) {
    %c0_i32 = arith.constant 0 : i32
    %c0_i32_0 = arith.constant 0 : i32
    return %arg0, %c0_i32 : i32, i32
  }
}

</mosaic_0001>

<bundles_post_ra>
// kernel: forward.9
= control target key start
LH: loop header
LB: loop body
LE: loop exit
PB: predicated region body
PF: predicated region fallthrough
CT: control target
= control target key end

     0   :  { %s2270_s12 = smov 0   ;;  %s2591_s0 = inlined_call_operand.vmem [shape: bf16[2,6,6,64], index: 0, kind: input, shape index: {}]   ;;  %s2592_s1 = inlined_call_operand.vmem [shape: bf16[3,3,64,128], index: 1, kind: input, shape index: {}]   ;;  %s2593_s2 = inlined_call_operand.vmem [shape: f32[1,128], index: 2, kind: input, shape index: {}]   ;;  %s2594_s3 = inlined_call_operand.vmem [shape: bf16[2,2,2,128], index: 3, kind: output, shape index: {}]  }
   0x1 LB: > { %s1833_s13 = sadd.s32 4294967295, %s2243_s12   ;;  %p1837_p0 = scmp.ge.s32.totalorder %s2243_s12, 1  ;;  %s2243_s12 = sphi %s2270_s12, %s13_s12  }
   0x2   : > { %p137_p1 = scmp.lt.s32.totalorder %s2243_s12, 3 }
   0x4   : > { %p138_p2 = pnand %p1837_p0, %p137_p1 }
   0x5   : > { %p160_p3 = scmp.lt.s32.totalorder (!%p138_p2), %s1833_s13, 1 }
   0x6   : > { %141 = sbr.rel (%p138_p2) target bundleno = 337 (0x151), region = 32 }
   0xb   : > { %v2189_v0 = vld [vmem:[%s2592_s1 + $0x38] sm:$0xff]   ;;  %v2245_v1 = vmov 0.0   ;;  %v2191_v3 = vld [vmem:[%s2592_s1 + $0x30] sm:$0xff]   ;;  %vm2246_vm0 = vmmov 0   ;;  %s2606_s13 = smov (!%p160_p3, %s1833_s13), 1  ;;  %v2193_v5 = vld [vmem:[%s2592_s1 + $0x28] sm:$0xff]   ;;  %v299_v23 = vlaneseq }
   0xc   : > { %2067 = vmatprep.subr.bf16.mxu0 %v2245_v1  ;;  %2079 = vmatprep.subr.bf16.mxu1 %v2245_v1  ;;  %v2190_v2 = vld [vmem:[%s2592_s1 + $0x18] sm:$0xff]   ;;  %v2192_v4 = vld [vmem:[%s2592_s1 + $0x10] sm:$0xff]   ;;  %s2175_s24 = smul.u32 24, %s2606_s13  ;;  %v2194_v6 = vld [vmem:[%s2592_s1 + $0x8] sm:$0xff]   ;;  %vm222_vm1 = vsmask.f32 1280 }
   0xd   : > { %2068 = vmatpush3.bf16.msra.mxu0 %v2189_v0  ;;  %2075 = vmatprep.mubr.msk.bf16.mxu0 %vm2246_vm0, %v2245_v1  ;;  %v2195_v7 = vld [vmem:[%s2592_s1 + $0x20] sm:$0xff]   ;;  %vm223_vm2 = vsmask.f32 3336  ;;  %vm225_vm3 = vsmask.f32 5392  ;;  %v2346_v45 = vshrl.u32 %v299_v23, 7 }
   0xe   : > { %2080 = vmatpush3.bf16.msra.mxu1 %v2190_v2  ;;  %2069 = vmatprep.subr.bf16.mxu0 %v2245_v1  ;;  %s2315_s4 = scalar_lea.vmem %s2591_s0, %s2175_s24  ;;  %v2196_v8 = vld [vmem:[%s2592_s1] sm:$0xff]   ;;  %vm227_vm4 = vsmask.f32 7448  ;;  %vm2322_vm5 = vmor %vm222_vm1, %vm223_vm2  ;;  %v2247_v52 = vmov 1983009808   ;;  %vm509_vm8 = vcmask 1040384  }
   0xf   : > { %2081 = vmatprep.subr.bf16.mxu1 %v2245_v1  ;;  %2087 = vmatprep.mubr.msk.bf16.mxu1 %vm2246_vm0, %v2245_v1  ;;  %v1840_v9 = vld.sshfl [vmem:[%s2315_s4] sm:$0x13 pattern:$0x76325410]  ;;  %vm2333_vm6 = vmor %vm2322_vm5, %vm225_vm3  ;;  %v297_v53 = vunpack.c.l.s4 %v2247_v52  ;;  %vm510_vm9 = vcmask 1042434   ;;  %vm335_vm10 = vcmask 523264  }
  0x10   : > { %v1841_v10 = vld.sshfl [vmem:[%s2315_s4 + $0x4] sm:$0x13 pattern:$0x76325410]  ;;  %v197_v11 = vcombine.high %v1840_v9, %v1840_v9  ;;  %v230_v13 = vshrl.u32 %v1840_v9, 16  ;;  %v233_v14 = vshll.u32 %v1840_v9, 16  ;;  %vm2341_vm7 = vmor %vm2333_vm6, %vm227_vm4 }
  0x11   : > { %2070 = vmatpush3.bf16.msra.mxu0 %v2191_v3  ;;  %v1842_v15 = vld.sshfl [vmem:[%s2315_s4 + $0x8] sm:$0x13 pattern:$0x76325410]  ;;  %v205_v16 = vcombine.high %v1841_v10, %v1841_v10  ;;  %v244_v17 = vshrl.u32 %v1841_v10, 16  ;;  %v247_v18 = vshll.u32 %v1841_v10, 16  ;;  %v298_v59 = vunpack.c.0.s8 %v297_v53  ;;  %vm511_vm11 = vmor %vm509_vm8, %vm510_vm9 }
  0x12   : > { %2082 = vmatpush3.bf16.msra.mxu1 %v2192_v4  ;;  %2071 = vmatprep.subr.bf16.mxu0 %v2245_v1  ;;  %v1843_v19 = vld.sshfl [vmem:[%s2315_s4 + $0xc] sm:$0x13 pattern:$0x76325410]  ;;  %v213_v20 = vcombine.high %v1842_v15, %v1842_v15  ;;  %v232_v21 = vrot.slane %v230_v13, 6  ;;  %v235_v22 = vrot.slane %v233_v14, 7 }
  0x13   : > { %2083 = vmatprep.subr.bf16.mxu1 %v2245_v1  ;;  %v221_v24 = vcombine.high %v1843_v19, %v1843_v19  ;;  %v239_v26 = vshll.u32 %v197_v11, 16  ;;  %v246_v27 = vrot.slane %v244_v17, 6  ;;  %v249_v28 = vrot.slane %v247_v18, 7  ;;  %v2200_v4 = vld [vmem:[%s2592_s1 + $0x78] sm:$0xff]   ;;  %v2202_v12 = vld [vmem:[%s2592_s1 + $0x70] sm:$0xff]   ;;  %v2222_v37 = vld [vmem:[%s2592_s1 + $0xe8] sm:$0xff]  }
  0x14   : > { %v236_v29 = vor.u32 %v235_v22, %v232_v21  ;;  %v253_v30 = vshll.u32 %v205_v16, 16  ;;  %v258_v31 = vshrl.u32 %v1842_v15, 16  ;;  %v261_v32 = vshll.u32 %v1842_v15, 16  ;;  %s1839_s18 = sshll.u32 %s2606_s13, 1 }
  0x15   : > { %2072 = vmatpush3.bf16.msra.mxu0 %v2193_v5  ;;  %v241_v33 = vrot.slane %v239_v26, 7  ;;  %v250_v34 = vor.u32 %v249_v28, %v246_v27  ;;  %v267_v35 = vshll.u32 %v213_v20, 16  ;;  %v272_v36 = vshrl.u32 %v1843_v19, 16  ;;  %v2201_v26 = vld [vmem:[%s2592_s1 + $0x50] sm:$0xff]   ;;  %v2204_v28 = vld [vmem:[%s2592_s1 + $0x68] sm:$0xff]   ;;  %s168_s21 = scalar_lea.vmem %s2594_s3, %s1839_s18 }
  0x16   : > { %2084 = vmatpush3.bf16.msra.mxu1 %v2194_v6  ;;  %2073 = vmatprep.subr.bf16.mxu0 %v2245_v1  ;;  %v237_v38 = vrot.slane %v236_v29, 2  ;;  %v255_v39 = vrot.slane %v253_v30, 7  ;;  %v260_v40 = vrot.slane %v258_v31, 6  ;;  %v263_v41 = vrot.slane %v261_v32, 7 }
  0x17   : > { %2085 = vmatprep.subr.bf16.mxu1 %v2245_v1  ;;  %v251_v42 = vrot.slane %v250_v34, 2  ;;  %v274_v43 = vrot.slane %v272_v36, 6  ;;  %v275_v44 = vshll.u32 %v1843_v19, 16  ;;  %v269_v47 = vrot.slane %v267_v35, 7 }
  0x18   : > { %v264_v46 = vor.u32 %v263_v41, %v260_v40  ;;  %v281_v48 = vshll.u32 %v221_v24, 16  ;;  %v242_v49 = vsel %vm2341_vm7, %v237_v38, %v241_v33  ;;  %v2231_v54 = vld.sshfl [vmem:[%s2315_s4] sm:$0xf pattern:$0x76325410]  ;;  %v2362_v63 = vsub.s32 %v298_v59, %v2346_v45 }
  0x19   : > { %2074 = vmatpush3.bf16.msra.mxu0 %v2195_v7  ;;  %v2352_v50 = vsel %vm2341_vm7, %v251_v42, %v255_v39  ;;  %v277_v51 = vrot.slane %v275_v44, 7  ;;  %v2232_v55 = vld.sshfl [vmem:[%s2315_s4 + $0x8] sm:$0xf pattern:$0x76325410]  ;;  %vm512_vm12 = vcmask 1044484  }
  0x1a   : > { %2086 = vmatpush3.bf16.msra.mxu1 %v2196_v8  ;;  %2091 = vmatprep.subr.bf16.mxu0 %v2245_v1  ;;  %v265_v56 = vrot.slane %v264_v46, 2  ;;  %v283_v57 = vrot.slane %v281_v48, 7  ;;  %v294_v60 = vcombine.low %v242_v49, %v2352_v50  ;;  %v1862_v5 = vld.sshfl [vmem:[%s2315_s4] sm:$0x12 pattern:$0x76325410]  ;;  %v400_v6 = vcombine.low %v2231_v54, %v2232_v55  ;;  %vm2379_vm13 = vmor %vm511_vm11, %vm512_vm12 }
  0x1b   : > { %2103 = vmatprep.subr.bf16.mxu1 %v2245_v1  ;;  %v278_v58 = vor.u32 %v277_v51, %v274_v43  ;;  %v2199_v7 = vld [vmem:[%s2592_s1 + $0x58] sm:$0xff]   ;;  %v1863_v8 = vld.sshfl [vmem:[%s2315_s4 + $0x4] sm:$0x12 pattern:$0x76325410]  ;;  %v484_v9 = vcombine.high %v1862_v5, %v1862_v5  ;;  %vm514_vm14 = vcmask 1046534  }
  0x1c   : > { %v2359_v61 = vsel %vm2341_vm7, %v265_v56, %v269_v47  ;;  %v302_v3 = vrot.slane %v294_v60, %v2362_v63  ;;  %v1864_v13 = vld.sshfl [vmem:[%s2315_s4 + $0x8] sm:$0x12 pattern:$0x76325410]  ;;  %v492_v14 = vcombine.high %v1863_v8, %v1863_v8  ;;  %v1866_v15 = vrot.slane %v1862_v5, 9  ;;  %vm2396_vm15 = vmor %vm2379_vm13, %vm514_vm14  ;;  %v2206_v40 = vld [vmem:[%s2592_s1 + $0x60] sm:$0xff]  }
  0x1d   : > { %v279_v62 = vrot.slane %v278_v58, 2  ;;  %v1867_v16 = vrot.slane %v1863_v8, 9  ;;  %2088 = vmatmul.mubr.msk.bf16.vlgmr.msra.gmra.mxu1 %vm335_vm10, %v400_v6  ;;  %v1865_v17 = vld.sshfl [vmem:[%s2315_s4 + $0xc] sm:$0x12 pattern:$0x76325410]  ;;  %v500_v18 = vcombine.high %v1864_v13, %v1864_v13 }
  0x1e   : > { %v518_v19 = vrot.slane %v484_v9, 7  ;;  %v1868_v20 = vrot.slane %v1864_v13, 9  ;;  %2104 = vmatpush3.bf16.msra.mxu1 %v2200_v4  ;;  %v508_v22 = vcombine.high %v1865_v17, %v1865_v17  ;;  %v522_v24 = vrot.slane %v492_v14, 7  ;;  %2111 = vmatprep.mubr.msk.bf16.mxu1 %vm2246_vm0, %v2245_v1  ;;  %v2203_v39 = vld [vmem:[%s2592_s1 + $0x48] sm:$0xff]   ;;  %v2205_v44 = vld [vmem:[%s2592_s1 + $0x40] sm:$0xff]   ;;  %v2210_v47 = vld [vmem:[%s2592_s1 + $0xb8] sm:$0xff]  }
  0x1f   : > { %v2366_v0 = vsel %vm2341_vm7, %v279_v62, %v283_v57  ;;  %v1869_v25 = vrot.slane %v1865_v17, 9  ;;  %2105 = vmatprep.subr.bf16.mxu1 %v2245_v1  ;;  %v526_v27 = vrot.slane %v500_v18, 7  ;;  %v2233_v33 = vld.sshfl [vmem:[%s2315_s4 + $0x4] sm:$0xf pattern:$0x76325410] }
  0x20   : > { %v295_v2 = vcombine.low %v2359_v61, %v2366_v0  ;;  %v530_v29 = vrot.slane %v508_v22, 7  ;;  %v519_v30 = vsel %vm2396_vm15, %v1866_v15, %v518_v19  ;;  %v2416_v31 = vsel %vm2396_vm15, %v1867_v16, %v522_v24  ;;  %v2234_v34 = vld.sshfl [vmem:[%s2315_s4 + $0xc] sm:$0xf pattern:$0x76325410]  ;;  %v2207_v58 = vld [vmem:[%s2592_s1 + $0x98] sm:$0xff]  }
  0x21   : > { %v2420_v32 = vsel %vm2396_vm15, %v1868_v20, %v526_v27  ;;  %v541_v36 = vcombine.low %v519_v30, %v2416_v31  ;;  %v1907_v43 = vld.sshfl [vmem:[%s2315_s4 + $0x10] sm:$0x13 pattern:$0x76325410]  ;;  %v662_v46 = vcombine.low %v2233_v33, %v2234_v34  ;;  %v2213_v13 = vld [vmem:[%s2592_s1 + $0x88] sm:$0xff]   ;;  %v2216_v18 = vld [vmem:[%s2592_s1 + $0xa0] sm:$0xff]  }
  0x22   : > { %v2384_v11 = vrot.slane %v295_v2, %v2362_v63  ;;  %2106 = vmatpush3.bf16.msra.mxu1 %v2202_v12  ;;  %v531_v35 = vsel %vm2396_vm15, %v1869_v25, %v530_v29  ;;  %v772_v48 = vcombine.high %v1907_v43, %v1907_v43  ;;  %v816_v49 = vshrl.u32 %v1907_v43, 16  ;;  %v1928_v52 = vld.sshfl [vmem:[%s2315_s4 + $0x10] sm:$0x12 pattern:$0x76325410]  ;;  %v2215_v25 = vld [vmem:[%s2592_s1 + $0x80] sm:$0xff]  }
  0x23   : > { %2107 = vmatprep.subr.bf16.mxu1 %v2245_v1  ;;  %v542_v38 = vcombine.low %v2420_v32, %v531_v35  ;;  %v549_v41 = vrot.slane %v541_v36, %v2362_v63  ;;  %v819_v51 = vshll.u32 %v1907_v43, 16  ;;  %v964_v56 = vcombine.high %v1928_v52, %v1928_v52  ;;  %v2211_v6 = vld [vmem:[%s2592_s1 + $0x90] sm:$0xff]   ;;  %v2218_v27 = vld [vmem:[%s2592_s1 + $0xf8] sm:$0xff]   ;;  %v2224_v43 = vld [vmem:[%s2592_s1 + $0xe0] sm:$0xff]  }
  0x24   : > { %v310_v21 = vcombine.low %v302_v3, %v2384_v11  ;;  %v818_v53 = vrot.slane %v816_v49, 6  ;;  %v825_v55 = vshll.u32 %v772_v48, 16  ;;  %v1932_v59 = vrot.slane %v1928_v52, 9  ;;  %v2212_v3 = vld [vmem:[%s2592_s1 + $0xb0] sm:$0xff]  }
  0x25   : > { %v2440_v42 = vrot.slane %v542_v38, %v2362_v63  ;;  %v821_v54 = vrot.slane %v819_v51, 7  ;;  %v979_v2 = vrot.slane %v964_v56, 7  ;;  %v990_v9 = vcombine.low %v2416_v31, %v2420_v32  ;;  %v1970_v17 = vld.sshfl [vmem:[%s2315_s4 + $0x14] sm:$0x13 pattern:$0x76325410] }
  0x26   : > { %2076 = vmatmul.mubr.msk.bf16.vlgmr.msra.gmra.mxu0 %vm335_vm10, %v310_v21  ;;  %2108 = vmatpush3.bf16.msra.mxu1 %v2204_v28  ;;  %v827_v62 = vrot.slane %v825_v55, 7  ;;  %v838_v12 = vcombine.low %v2352_v50, %v2359_v61  ;;  %v1221_v50 = vcombine.high %v1970_v17, %v1970_v17  ;;  %v1265_v61 = vshrl.u32 %v1970_v17, 16  ;;  %v2217_v32 = vld [vmem:[%s2592_s1 + $0xd8] sm:$0xff]   ;;  %v2220_v33 = vld [vmem:[%s2592_s1 + $0xf0] sm:$0xff]   ;;  %v2229_v56 = vld [vmem:[%s2592_s1 + $0x108] sm:$0xff]  }
  0x27   : > { %2092 = vmatpush3.bf16.msra.mxu0 %v2199_v7  ;;  %2099 = vmatprep.mubr.msk.bf16.mxu0 %vm2246_vm0, %v2245_v1  ;;  %v557_v57 = vcombine.low %v549_v41, %v2440_v42  ;;  %v822_v60 = vor.u32 %v821_v54, %v818_v53  ;;  %v2466_v5 = vsel %vm2396_vm15, %v1932_v59, %v979_v2  ;;  %v2214_v7 = vld [vmem:[%s2592_s1 + $0xa8] sm:$0xff]   ;;  %v1268_v19 = vshll.u32 %v1970_v17, 16  ;;  %v2227_v51 = vld [vmem:[%s2592_s1 + $0x118] sm:$0xff]  }
  0x28   : > { %2093 = vmatprep.subr.bf16.mxu0 %v2245_v1  ;;  %2109 = vmatprep.subr.bf16.mxu1 %v2245_v1  ;;  %v991_v10 = vcombine.low %v531_v35, %v2466_v5  ;;  %v998_v15 = vrot.slane %v990_v9, %v2362_v63  ;;  %v1267_v21 = vrot.slane %v1265_v61, 6  ;;  %v1274_v24 = vshll.u32 %v1221_v50, 16  ;;  %v2219_v35 = vld [vmem:[%s2592_s1 + $0xd0] sm:$0xff]  }
  0x29   : > { %v823_v4 = vrot.slane %v822_v60, 2  ;;  %v1270_v22 = vrot.slane %v1268_v19, 7  ;;  %v2235_v38 = vld.sshfl [vmem:[%s2315_s4 + $0x8] sm:$0xf pattern:$0x76325410] }
  0x2a   : > { %2110 = vmatpush3.bf16.msra.mxu1 %v2206_v40  ;;  %v1005_v16 = vrot.slane %v991_v10, %v2362_v63  ;;  %v1276_v29 = vrot.slane %v1274_v24, 7  ;;  %v2221_v40 = vld [vmem:[%s2592_s1 + $0xc8] sm:$0xff]  }
  0x2b   : > { %2094 = vmatpush3.bf16.msra.mxu0 %v2201_v26  ;;  %2127 = vmatprep.subr.bf16.mxu1 %v2245_v1  ;;  %v828_v8 = vsel %vm2341_vm7, %v823_v4, %v827_v62  ;;  %v1271_v28 = vor.u32 %v1270_v22, %v1267_v21 }
  0x2c   : > { %2095 = vmatprep.subr.bf16.mxu0 %v2245_v1  ;;  %v839_v14 = vcombine.low %v2366_v0, %v828_v8  ;;  %v846_v0 = vrot.slane %v838_v12, %v2362_v63  ;;  %v1006_v26 = vcombine.low %v998_v15, %v1005_v16 }
  0x2d   : > { %2112 = vmatmul.mubr.msk.bf16.vlgmr.msra.gmra.mxu1 %vm335_vm10, %v662_v46  ;;  %v1272_v31 = vrot.slane %v1271_v28, 2  ;;  %v2223_v46 = vld [vmem:[%s2592_s1 + $0xc0] sm:$0xff]  }
  0x2e   : > { %2128 = vmatpush3.bf16.msra.mxu1 %v2210_v47  ;;  %2135 = vmatprep.mubr.msk.bf16.mxu1 %vm2246_vm0, %v2245_v1  ;;  %v853_v20 = vrot.slane %v839_v14, %v2362_v63 }
  0x2f   : > { %2096 = vmatpush3.bf16.msra.mxu0 %v2203_v39  ;;  %2129 = vmatprep.subr.bf16.mxu1 %v2245_v1  ;;  %v1277_v34 = vsel %vm2341_vm7, %v1272_v31, %v1276_v29  ;;  %v2236_v39 = vld.sshfl [vmem:[%s2315_s4 + $0x10] sm:$0xf pattern:$0x76325410] }
  0x30   : > { %2097 = vmatprep.subr.bf16.mxu0 %v2245_v1  ;;  %v854_v30 = vcombine.low %v846_v0, %v853_v20  ;;  %v1288_v36 = vcombine.low %v828_v8, %v1277_v34  ;;  %v1111_v49 = vcombine.low %v2235_v38, %v2236_v39 }
  0x32   : > { %2130 = vmatpush3.bf16.msra.mxu1 %v2212_v3  ;;  %v1302_v41 = vrot.slane %v1288_v36, %v2362_v63 }
  0x33   : > { %2098 = vmatpush3.bf16.msra.mxu0 %v2205_v44  ;;  %2131 = vmatprep.subr.bf16.mxu1 %v2245_v1  ;;  %v1991_v44 = vld.sshfl [vmem:[%s2315_s4 + $0x14] sm:$0x12 pattern:$0x76325410] }
  0x34   : > { %2115 = vmatprep.subr.bf16.mxu0 %v2245_v1  ;;  %v1303_v47 = vcombine.low %v2384_v11, %v1302_v41  ;;  %v1413_v48 = vcombine.high %v1991_v44, %v1991_v44  ;;  %v1995_v52 = vrot.slane %v1991_v44, 9  ;;  %v2228_v11 = vld [vmem:[%s2592_s1 + $0x110] sm:$0xff]  }
  0x36   : > { %2100 = vmatmul.mubr.msk.bf16.vlgmr.msra.gmra.mxu0 %vm335_vm10, %v557_v57  ;;  %2132 = vmatpush3.bf16.msra.mxu1 %v2214_v7  ;;  %v1428_v53 = vrot.slane %v1413_v48, 7 }
  0x37   : > { %2116 = vmatpush3.bf16.msra.mxu0 %v2207_v58  ;;  %2123 = vmatprep.mubr.msk.bf16.mxu0 %vm2246_vm0, %v2245_v1  ;;  %v2230_v58 = vld [vmem:[%s2592_s1 + $0x100] sm:$0xff]  }
  0x38   : > { %2117 = vmatprep.subr.bf16.mxu0 %v2245_v1  ;;  %2133 = vmatprep.subr.bf16.mxu1 %v2245_v1  ;;  %v1429_v54 = vsel %vm2396_vm15, %v1995_v52, %v1428_v53  ;;  %v2248_v53 = vmov 1966171168  }
  0x39   : > { %v1440_v55 = vcombine.low %v2466_v5, %v1429_v54 }
  0x3a   : > { %2134 = vmatpush3.bf16.msra.mxu1 %v2216_v18 }
  0x3b   : > { %2118 = vmatpush3.bf16.msra.mxu0 %v2211_v6  ;;  %2151 = vmatprep.subr.bf16.mxu1 %v2245_v1  ;;  %v1454_v57 = vrot.slane %v1440_v55, %v2362_v63 }
  0x3c   : > { %2119 = vmatprep.subr.bf16.mxu0 %v2245_v1 }
  0x3d   : > { %2136 = vmatmul.mubr.msk.bf16.vlgmr.msra.gmra.mxu1 %vm335_vm10, %v1006_v26  ;;  %v1455_v23 = vcombine.low %v2440_v42, %v1454_v57 }
  0x3e   : > { %2152 = vmatpush3.bf16.msra.mxu1 %v2218_v27  ;;  %2159 = vmatprep.mubr.msk.bf16.mxu1 %vm2246_vm0, %v2245_v1 }
  0x3f   : > { %2120 = vmatpush3.bf16.msra.mxu0 %v2213_v13  ;;  %2153 = vmatprep.subr.bf16.mxu1 %v2245_v1 }
  0x40   : > { %2121 = vmatprep.subr.bf16.mxu0 %v2245_v1 }
  0x42   : > { %2154 = vmatpush3.bf16.msra.mxu1 %v2220_v33 }
  0x43   : > { %2122 = vmatpush3.bf16.msra.mxu0 %v2215_v25  ;;  %2155 = vmatprep.subr.bf16.mxu1 %v2245_v1 }
  0x44   : > { %2139 = vmatprep.subr.bf16.mxu0 %v2245_v1 }
  0x46   : > { %2124 = vmatmul.mubr.msk.bf16.vlgmr.msra.gmra.mxu0 %vm335_vm10, %v854_v30  ;;  %2156 = vmatpush3.bf16.msra.mxu1 %v2222_v37 }
  0x47   : > { %2140 = vmatpush3.bf16.msra.mxu0 %v2217_v32  ;;  %2147 = vmatprep.mubr.msk.bf16.mxu0 %vm2246_vm0, %v2245_v1 }
  0x48   : > { %2141 = vmatprep.subr.bf16.mxu0 %v2245_v1  ;;  %2157 = vmatprep.subr.bf16.mxu1 %v2245_v1 }
  0x4a   : > { %2158 = vmatpush3.bf16.msra.mxu1 %v2224_v43  ;;  %v2009_v43 = vld [vmem:[%s2593_s2] ss:$0 sm:$0xff] }
  0x4b   : > { %2142 = vmatpush3.bf16.msra.mxu0 %v2219_v35 }
  0x4c   : > { %2143 = vmatprep.subr.bf16.mxu0 %v2245_v1 }
  0x4d   : > { %2160 = vmatmul.mubr.msk.bf16.vlgmr.msra.gmra.mxu1 %vm335_vm10, %v1303_v47 }
  0x4f   : > { %2144 = vmatpush3.bf16.msra.mxu0 %v2221_v40 }
  0x50   : > { %2145 = vmatprep.subr.bf16.mxu0 %v2245_v1 }
  0x53   : > { %2146 = vmatpush3.bf16.msra.mxu0 %v2223_v46 }
  0x54   : > { %2163 = vmatprep.subr.bf16.mxu0 %v2245_v1 }
  0x56   : > { %2148 = vmatmul.mubr.msk.bf16.vlgmr.msra.gmra.mxu0 %vm335_vm10, %v1111_v49 }
  0x57   : > { %2164 = vmatpush3.bf16.msra.mxu0 %v2227_v51  ;;  %2171 = vmatprep.mubr.msk.bf16.mxu0 %vm2246_vm0, %v2245_v1  ;;  %vm1742_vm0 = vcmask 1041409  }
  0x58   : > { %2165 = vmatprep.subr.bf16.mxu0 %v2245_v1 }
  0x5b   : > { %2166 = vmatpush3.bf16.msra.mxu0 %v2228_v11  ;;  %v1626_v11 = vunpack.c.l.s4 %v2248_v53 }
  0x5c   : > { %2167 = vmatprep.subr.bf16.mxu0 %v2245_v1 }
  0x5f   : > { %2168 = vmatpush3.bf16.msra.mxu0 %v2229_v56 }
  0x60   : > { %2169 = vmatprep.subr.bf16.mxu0 %v2245_v1 }
  0x63   : > { %2170 = vmatpush3.bf16.msra.mxu0 %v2230_v58 }
  0x66   : > { %2172 = vmatmul.mubr.msk.bf16.vlgmr.msra.gmra.mxu0 %vm335_vm10, %v1455_v23 }
  0xdd   : > { %v462_v59 = vpop.f32.mrf.mxu1 }
  0xdf   : > { %v2089_v60 = vpop.f32.mrf.mxu1 }
  0xe1   : > { %v465_v2 = vpop.f32.mrf.mxu1 }
  0xe3   : > { %v2090_v4 = vpop.f32.mrf.mxu1 }
  0xe6   : > { %v373_v62 = vpop.f32.mrf.mxu0 }
  0xe7   : > { %v463_v0 = vadd.f32 %v462_v59, %v373_v62  ;;  %v1627_v62 = vunpack.c.0.s8 %v1626_v11 }
  0xe8   : > { %v2077_v3 = vpop.f32.mrf.mxu0 }
  0xea   : > { %v376_v5 = vpop.f32.mrf.mxu0 }
  0xeb   : > { %v466_v25 = vadd.f32 %v465_v2, %v376_v5  ;;  %v2249_v5 = vmov 1935823168  }
  0xec   : > { %v2078_v6 = vpop.f32.mrf.mxu0 }
  0xed   : > { %v724_v7 = vpop.f32.mrf.mxu1  ;;  %v1682_v6 = vunpack.c.l.s4 %v2249_v5 }
  0xef   : > { %v2113_v8 = vpop.f32.mrf.mxu1 }
  0xf1   : > { %v727_v10 = vpop.f32.mrf.mxu1 }
  0xf3   : > { %v2114_v13 = vpop.f32.mrf.mxu1 }
  0xf4   : > { %v1630_v13 = vsub.s32 %v1627_v62, %v2346_v45 }
  0xf6   : > { %v619_v9 = vpop.f32.mrf.mxu0 }
  0xf7   : > { %v626_v21 = vadd.f32 %v619_v9, %v463_v0 }
  0xf8   : > { %v2101_v12 = vpop.f32.mrf.mxu0 }
  0xf9   : > { %v731_v28 = vadd.f32 %v724_v7, %v626_v21 }
  0xfa   : > { %v622_v1 = vpop.f32.mrf.mxu0 }
  0xfb   : > { %v627_v29 = vadd.f32 %v622_v1, %v466_v25 }
  0xfc   : > { %v2102_v14 = vpop.f32.mrf.mxu0 }
  0xfd   : > { %v1068_v42 = vpop.f32.mrf.mxu1  ;;  %v732_v34 = vadd.f32 %v727_v10, %v627_v29 }
  0xff   : > { %v2137_v15 = vpop.f32.mrf.mxu1 }
 0x101   : > { %v1071_v17 = vpop.f32.mrf.mxu1 }
 0x103   : > { %v2138_v50 = vpop.f32.mrf.mxu1 }
 0x106   : > { %v916_v16 = vpop.f32.mrf.mxu0 }
 0x107   : > { %v923_v32 = vadd.f32 %v916_v16, %v731_v28 }
 0x108   : > { %v2125_v18 = vpop.f32.mrf.mxu0 }
 0x109   : > { %v1075_v35 = vadd.f32 %v1068_v42, %v923_v32  ;;  %v1683_v18 = vunpack.c.0.s8 %v1682_v6 }
 0x10a   : > { %v919_v61 = vpop.f32.mrf.mxu0 }
 0x10b   : > { %v924_v36 = vadd.f32 %v919_v61, %v732_v34 }
 0x10c   : > { %v2126_v19 = vpop.f32.mrf.mxu0 }
 0x10d   : > { %v1365_v20 = vpop.f32.mrf.mxu1  ;;  %v1076_v38 = vadd.f32 %v1071_v17, %v924_v36 }
 0x10f   : > { %v2161_v22 = vpop.f32.mrf.mxu1 }
 0x111   : > { %v1368_v26 = vpop.f32.mrf.mxu1 }
 0x113   : > { %v2162_v30 = vpop.f32.mrf.mxu1 }
 0x116   : > { %v1173_v24 = vpop.f32.mrf.mxu0 }
 0x117   : > { %v1180_v37 = vadd.f32 %v1173_v24, %v1075_v35 }
 0x118   : > { %v2149_v27 = vpop.f32.mrf.mxu0 }
 0x119   : > { %v1372_v39 = vadd.f32 %v1365_v20, %v1180_v37  ;;  %v1686_v27 = vsub.s32 %v1683_v18, %v2346_v45 }
 0x11a   : > { %v1176_v31 = vpop.f32.mrf.mxu0 }
 0x11b   : > { %v1181_v40 = vadd.f32 %v1176_v31, %v1076_v38 }
 0x11c   : > { %v2150_v33 = vpop.f32.mrf.mxu0 }
 0x11d   : > { %v1373_v47 = vadd.f32 %v1368_v26, %v1181_v40 }
 0x126   : > { %v1517_v41 = vpop.f32.mrf.mxu0 }
 0x127   : > { %v1524_v44 = vadd.f32 %v1517_v41, %v1372_v39 }
 0x128   : > { %v2173_v46 = vpop.f32.mrf.mxu0 }
 0x129   : > { %v1533_v48 = vadd.f32 %v2009_v43, %v1524_v44 }
 0x12a   : > { %v1520_v49 = vpop.f32.mrf.mxu0 }
 0x12b   : > { %v1535_v51 = vmax.f32 %v1533_v48, 0.0  ;;  %v1525_v52 = vadd.f32 %v1520_v49, %v1373_v47 }
 0x12c   : > { %v2174_v54 = vpop.f32.mrf.mxu0 }
 0x12d   : > { %v1539_v55 = vcombine.high %v1535_v51, %v1535_v51  ;;  %v1546_v56 = vrot.slane %v1535_v51, %v2362_v63  ;;  %v1534_v57 = vadd.f32 %v2009_v43, %v1525_v52 }
 0x12f   : > { %v1553_v58 = vrot.slane %v1539_v55, %v2362_v63  ;;  %v1554_v23 = vcombine.high %v1546_v56, %v1546_v56  ;;  %v2010_v59 = vrot.slane %v1546_v56, 9  ;;  %v1536_v60 = vmax.f32 %v1534_v57, 0.0 }
 0x131   : > { %v1555_v2 = vcombine.high %v1553_v58, %v1553_v58  ;;  %v2011_v3 = vrot.slane %v1554_v23, 9  ;;  %v2012_v4 = vrot.slane %v1553_v58, 9  ;;  %v1556_v7 = vcombine.high %v1536_v60, %v1536_v60 }
 0x132   : > { %v1563_v8 = vrot.slane %v1536_v60, %v2362_v63  ;;  %v1605_v10 = vmax.f32 %v1546_v56, %v2010_v59 }
 0x133   : > { %v2013_v9 = vrot.slane %v1555_v2, 9  ;;  %v1607_v12 = vmax.f32 %v1553_v58, %v2012_v4  ;;  %v1570_v1 = vrot.slane %v1556_v7, %v2362_v63  ;;  %v1606_v15 = vmax.f32 %v1554_v23, %v2011_v3 }
 0x134   : > { %v1571_v14 = vcombine.high %v1563_v8, %v1563_v8  ;;  %v2014_v42 = vrot.slane %v1563_v8, 9 }
 0x135   : > { %v1608_v16 = vmax.f32 %v1555_v2, %v2013_v9  ;;  %v1613_v17 = vmax.f32 %v1605_v10, %v1607_v12  ;;  %v1572_v50 = vcombine.high %v1570_v1, %v1570_v1  ;;  %v2016_v19 = vrot.slane %v1570_v1, 9 }
 0x136   : > { %v2015_v61 = vrot.slane %v1571_v14, 9  ;;  %v1609_v22 = vmax.f32 %v1563_v8, %v2014_v42 }
 0x137   : > { %v1614_v0 = vmax.f32 %v1606_v15, %v1608_v16  ;;  %v1617_v20 = vpack.c.bf16 %v1613_v17, %v1613_v17  ;;  %v2017_v21 = vrot.slane %v1572_v50, 9  ;;  %v1611_v24 = vmax.f32 %v1570_v1, %v2016_v19 }
 0x138   : > { %v1610_v28 = vmax.f32 %v1571_v14, %v2015_v61 }
 0x139   : > { %v1618_v25 = vpack.c.bf16 %v1614_v0, %v1614_v0  ;;  %v1631_v26 = vrot.slane %v1617_v20, %v1630_v13  ;;  %v1612_v63 = vmax.f32 %v1572_v50, %v2017_v21  ;;  %v1615_v29 = vmax.f32 %v1609_v22, %v1611_v24 }
 0x13b   : > { %v1638_v30 = vrot.slane %v1631_v26, %v1630_v13  ;;  %v1645_v31 = vrot.slane %v1618_v25, %v1630_v13  ;;  %v1616_v32 = vmax.f32 %v1610_v28, %v1612_v63  ;;  %v1619_v33 = vpack.c.bf16 %v1615_v29, %v1615_v29 }
 0x13d   : > { %v1652_v34 = vrot.slane %v1645_v31, %v1630_v13  ;;  %v1687_v35 = vrot.slane %v1638_v30, %v1686_v27  ;;  %v1620_v36 = vpack.c.bf16 %v1616_v32, %v1616_v32  ;;  %v1659_v37 = vrot.slane %v1619_v33, %v1630_v13 }
 0x13f   : > { %v1701_v38 = vrot.slane %v1652_v34, %v1686_v27  ;;  %v1666_v39 = vrot.slane %v1659_v37, %v1630_v13  ;;  %v1673_v40 = vrot.slane %v1620_v36, %v1630_v13  ;;  %v1694_v41 = vrot.slane %v1687_v35, %v1686_v27 }
 0x141   : > { %v1708_v43 = vrot.slane %v1701_v38, %v1686_v27  ;;  %v1680_v44 = vrot.slane %v1673_v40, %v1630_v13  ;;  %v1715_v46 = vrot.slane %v1666_v39, %v1686_v27  ;;  %v1737_v48 = vunpack.c.l.b16 %v1694_v41 }
 0x143   : > { %v1738_v45 = vunpack.c.l.b16 %v1708_v43  ;;  %v1729_v47 = vrot.slane %v1680_v44, %v1686_v27  ;;  %v1722_v51 = vrot.slane %v1715_v46, %v1686_v27 }
 0x145   : > { %v1741_v49 = vrot.slane %v1738_v45, 7  ;;  %v1736_v52 = vrot.slane %v1729_v47, %v1686_v27  ;;  %v1739_v56 = vunpack.c.l.b16 %v1722_v51 }
 0x147   : > { %v1743_v53 = vsel %vm1742_vm0, %v1741_v49, %v1737_v48  ;;  %v1740_v54 = vunpack.c.l.b16 %v1736_v52 }
 0x148   : > { %v1746_v11 = vpack.c.b16 %v1743_v53, %v1743_v53 }
 0x149   : > { %v1744_v57 = vrot.slane %v1740_v54, 7 }
 0x14a   : > { %v1754_v55 = vrot.slane %v1746_v11, %v1630_v13 }
 0x14b   : > { %v1745_v58 = vsel %vm1742_vm0, %v1744_v57, %v1739_v56 }
 0x14c   : > { %2018 = vst.sshfl [vmem:[%s168_s21] sm:$0x1 pattern:$0x73625140] %v1754_v55  ;;  %v1747_v23 = vpack.c.b16 %v1745_v58, %v1745_v58 }
 0x14e   : > { %v1768_v59 = vrot.slane %v1747_v23, %v1630_v13 }
 0x150   : > { %2019 = vst.sshfl [vmem:[%s168_s21 + $0x1] sm:$0x1 pattern:$0x73625140] %v1768_v59 }
 0x151 PF: > { %s13_s12 = sadd.s32 1, %s2243_s12  }
 0x152   : > { %p10_p4 = scmp.ge.s32.totalorder %s13_s12, 4  }
 0x154   :  { %12 = sbr.rel (!%p10_p4) target bundleno = 1 (0x1), region = 72 }

// kernel: forward.13
= control target key start
LH: loop header
LB: loop body
LE: loop exit
PB: predicated region body
PF: predicated region fallthrough
CT: control target
= control target key end

     0   :  { %s722_s0 = inlined_call_operand.vmem [shape: f32[2,128], index: 0, kind: input, shape index: {}]   ;;  %s723_s1 = inlined_call_operand.vmem [shape: f32[128,64], index: 1, kind: input, shape index: {}]   ;;  %s724_s2 = inlined_call_operand.vmem [shape: f32[1,64], index: 2, kind: input, shape index: {}]   ;;  %s725_s3 = inlined_call_operand.vmem [shape: f32[64,32], index: 3, kind: input, shape index: {}]   ;;  %s726_s4 = inlined_call_operand.vmem [shape: f32[1,32], index: 4, kind: input, shape index: {}]   ;;  %s727_s5 = inlined_call_operand.vmem [shape: f32[32,10], index: 5, kind: input, shape index: {}]   ;;  %s728_s6 = inlined_call_operand.vmem [shape: f32[1,10], index: 6, kind: input, shape index: {}]   ;;  %s729_s7 = inlined_call_operand.<no memory space> [shape: f32[1,1], index: 7, kind: input, shape index: {}]   ;;  %s730_s8 = inlined_call_operand.hbm [shape: f32[2,32], index: 8, kind: output, shape index: {0}]   ;;  %s731_s9 = inlined_call_operand.hbm [shape: f32[2,10], index: 9, kind: output, shape index: {1}]  }
   0x1   :  { %v15_v0 = vstv %s729_s7 }
   0x2   :  { %16 = vst [vmem:[#allocation2] sm:$0x1] %v15_v0 }
   0x3   :  { %17 = vsyncpa [#allocation4], 0  ;;  %v51_v1 = vld [vmem:[%s723_s1 + $0x78] sm:$0xff]  ;;  %v523_v2 = vmov 0.0   ;;  %v50_v3 = vld [vmem:[%s723_s1 + $0x70] sm:$0xff]  ;;  %vm524_vm0 = vmmov 0  }
   0x4   :  { %402 = vmatprep.subr.mxu0 %v523_v2  ;;  %434 = vmatprep.mubr.msk.f32.mxu0 %vm524_vm0, %v523_v2  ;;  %v49_v4 = vld [vmem:[%s723_s1 + $0x68] sm:$0xff]  ;;  %v48_v5 = vld [vmem:[%s723_s1 + $0x60] sm:$0xff]  ;;  %v137_v6 = vld [vmem:[%s725_s3 + $0x38] sm:$0xff] }
   0x5   :  { %403 = vmatpush3.msra.mxu0 %v51_v1  ;;  %437 = vmatprep.subr.mxu1 %v523_v2  ;;  %v136_v7 = vld [vmem:[%s725_s3 + $0x30] sm:$0xff]  ;;  %v47_v8 = vld [vmem:[%s723_s1 + $0x58] sm:$0xff]  ;;  %v135_v9 = vld [vmem:[%s725_s3 + $0x28] sm:$0xff] }
   0x6   :  { %404 = vmatprep.subr.mxu0 %v523_v2  ;;  %453 = vmatprep.mubr.msk.f32.mxu1 %vm524_vm0, %v523_v2 }
   0x7   :  { %405 = vmatpush3.msra.mxu0 %v50_v3  ;;  %438 = vmatpush3.msra.mxu1 %v137_v6 }
   0x8   :  { %406 = vmatprep.subr.mxu0 %v523_v2  ;;  %439 = vmatprep.subr.mxu1 %v523_v2 }
   0x9   :  { %407 = vmatpush3.msra.mxu0 %v49_v4 }
   0xa   :  { %408 = vmatprep.subr.mxu0 %v523_v2 }
   0xb   :  { %18 = vsyncpa [#allocation6], 0  ;;  %409 = vmatpush3.msra.mxu0 %v48_v5  ;;  %440 = vmatpush3.msra.mxu1 %v136_v7  ;;  %v46_v10 = vld [vmem:[%s723_s1 + $0x50] sm:$0xff]  ;;  %v134_v11 = vld [vmem:[%s725_s3 + $0x20] sm:$0xff]  ;;  %vm145_vm1 = vcmask 523264   ;;  %vm220_vm2 = vcmask 254976  }
   0xc   :  { %410 = vmatprep.subr.mxu0 %v523_v2  ;;  %441 = vmatprep.subr.mxu1 %v523_v2  ;;  %v45_v12 = vld [vmem:[%s723_s1 + $0x48] sm:$0xff]  ;;  %v133_v13 = vld [vmem:[%s725_s3 + $0x18] sm:$0xff]  ;;  %v44_v14 = vld [vmem:[%s723_s1 + $0x40] sm:$0xff]  ;;  %v525_v43 = vmov 0   ;;  %vm239_vm3 = vcmask 261120   ;;  %vm324_vm4 = vcmask 74752  }
   0xd   :  { %411 = vmatpush3.msra.mxu0 %v47_v8  ;;  %442 = vmatpush3.msra.mxu1 %v135_v9  ;;  %v43_v15 = vld [vmem:[%s723_s1 + $0x38] sm:$0xff]  ;;  %v42_v16 = vld [vmem:[%s723_s1 + $0x30] sm:$0xff]  ;;  %v41_v17 = vld [vmem:[%s723_s1 + $0x28] sm:$0xff] }
   0xe   :  { %412 = vmatprep.subr.mxu0 %v523_v2  ;;  %443 = vmatprep.subr.mxu1 %v523_v2  ;;  %v40_v18 = vld [vmem:[%s723_s1 + $0x20] sm:$0xff]  ;;  %v39_v19 = vld [vmem:[%s723_s1 + $0x18] sm:$0xff]  ;;  %v38_v20 = vld [vmem:[%s723_s1 + $0x10] sm:$0xff] }
   0xf   :  { %413 = vmatpush3.msra.mxu0 %v46_v10  ;;  %444 = vmatpush3.msra.mxu1 %v134_v11  ;;  %v37_v21 = vld [vmem:[%s723_s1 + $0x8] sm:$0xff]  ;;  %v36_v22 = vld [vmem:[%s723_s1] sm:$0xff]  ;;  %v132_v24 = vld [vmem:[%s725_s3 + $0x10] sm:$0xff] }
  0x10   :  { %414 = vmatprep.subr.mxu0 %v523_v2  ;;  %445 = vmatprep.subr.mxu1 %v523_v2  ;;  %v35_v23 = vld [vmem:[%s722_s0] sm:$0x3]  ;;  %v131_v25 = vld [vmem:[%s725_s3 + $0x8] sm:$0xff]  ;;  %v231_v38 = vld [vmem:[%s727_s5 + $0x18] sm:$0xff] }
  0x11   :  { %415 = vmatpush3.msra.mxu0 %v45_v12  ;;  %446 = vmatpush3.msra.mxu1 %v133_v13  ;;  %v130_v26 = vld [vmem:[%s725_s3] sm:$0xff]  ;;  %v230_v39 = vld [vmem:[%s727_s5 + $0x10] sm:$0xff]  ;;  %v229_v40 = vld [vmem:[%s727_s5 + $0x8] sm:$0xff] }
  0x12   :  { %416 = vmatprep.subr.mxu0 %v523_v2  ;;  %447 = vmatprep.subr.mxu1 %v523_v2  ;;  %v365_v27 = vld [vmem:[%s724_s2] ss:$0 sm:$0xff] }
  0x13   :  { %417 = vmatpush3.msra.mxu0 %v44_v14  ;;  %448 = vmatpush3.msra.mxu1 %v132_v24  ;;  %v366_v32 = vld [vmem:[%s726_s4] ss:$0 sm:$0xff] }
  0x14   :  { %418 = vmatprep.subr.mxu0 %v523_v2  ;;  %449 = vmatprep.subr.mxu1 %v523_v2  ;;  %v228_v41 = vld [vmem:[%s727_s5] sm:$0xff]  ;;  %s526_s5 = smov [#allocation3]  }
  0x15   :  { %419 = vmatpush3.msra.mxu0 %v43_v15  ;;  %450 = vmatpush3.msra.mxu1 %v131_v25  ;;  %v370_v42 = vld [vmem:[#allocation2] ss:$0 sm:$0xff]  ;;  %s343_s25 = sshll.u32 %s526_s5, 4  ;;  %s344_s25 = int_to_ptr.vmem [resolvable:$true] %s343_s25 }
  0x16   :  { %420 = vmatprep.subr.mxu0 %v523_v2  ;;  %451 = vmatprep.subr.mxu1 %v523_v2  ;;  %v368_v48 = vld [vmem:[%s728_s6] ss:$0 sm:$0xff]  ;;  %s479_s6 = scalar_lea.vmem %s344_s25, 32  ;;  %p484_p1 = scmp.lt.s32.totalorder %s344_s25, %s344_s25 }
  0x17   :  { %421 = vmatpush3.msra.mxu0 %v42_v16  ;;  %452 = vmatpush3.msra.mxu1 %v130_v26  ;;  %p480_p0 = scmp.ne.s32.totalorder %s344_s25, %s479_s6  ;;  %p485_p2 = scmp.lt.s32.totalorder %s479_s6, %s479_s6 }
  0x18   :  { %422 = vmatprep.subr.mxu0 %v523_v2  ;;  %456 = vmatprep.subr.mxu1 %v523_v2 }
  0x19   :  { %423 = vmatpush3.msra.mxu0 %v41_v17  ;;  %472 = vset.pattern.permute.xlu0 %v525_v43  ;;  %p486_p3 = por %p485_p2, %p484_p1 }
  0x1a   :  { %424 = vmatprep.subr.mxu0 %v523_v2 }
  0x1b   :  { %425 = vmatpush3.msra.mxu0 %v40_v18  ;;  %p487_p4 = pnand %p486_p3, %p480_p0 }
  0x1c   :  { %426 = vmatprep.subr.mxu0 %v523_v2 }
  0x1d   :  { %427 = vmatpush3.msra.mxu0 %v39_v19 }
  0x1e   :  { %428 = vmatprep.subr.mxu0 %v523_v2 }
  0x1f   :  { %429 = vmatpush3.msra.mxu0 %v38_v20 }
  0x20   :  { %430 = vmatprep.subr.mxu0 %v523_v2 }
  0x21   :  { %431 = vmatpush3.msra.mxu0 %v37_v21 }
  0x22   :  { %432 = vmatprep.subr.mxu0 %v523_v2 }
  0x23   :  { %433 = vmatpush3.msra.mxu0 %v36_v22 }
  0x24   :  { %435 = vmatmul.mubr.f32.vlgmr.msra.gmra.mxu0 %v35_v23 }
  0xe4   :  { %v125_v28 = vpop.f32.mrf.mxu0 }
  0xe5   :  { %v126_v29 = vadd.f32 %v365_v27, %v125_v28 }
  0xe6   :  { %v436_v30 = vpop.f32.mrf.mxu0 }
  0xe7   :  { %v129_v31 = vmax.f32 %v126_v29, 0.0 }
  0xe9   :  { %454 = vmatmul.mubr.msk.f32.vlgmr.msra.gmra.mxu1 %vm145_vm1, %v129_v31 }
  0xea   :  { %464 = vmatprep.mubr.msk.f32.mxu1 %vm524_vm0, %v523_v2  ;;  %457 = vmatpush3.msra.mxu1 %v231_v38 }
  0xeb   :  { %458 = vmatprep.subr.mxu1 %v523_v2 }
  0xec   :  { %459 = vmatpush3.msra.mxu1 %v230_v39 }
  0xed   :  { %460 = vmatprep.subr.mxu1 %v523_v2 }
  0xee   :  { %461 = vmatpush3.msra.mxu1 %v229_v40 }
  0xef   :  { %462 = vmatprep.subr.mxu1 %v523_v2 }
  0xf0   :  { %463 = vmatpush3.msra.mxu1 %v228_v41 }
 0x1a9   :  { %v215_v33 = vpop.f32.mrf.mxu1 }
 0x1aa   :  { %v216_v34 = vadd.f32 %v366_v32, %v215_v33 }
 0x1ab   :  { %v455_v35 = vpop.f32.mrf.mxu1 }
 0x1ac   :  { %v219_v36 = vmul.f32 %v216_v34, %v216_v34 }
 0x1ae   :  { %v221_v37 = vsel %vm220_vm2, %v219_v36, 0.0 }
 0x1af   :  { %222 = vadd.xlane.f32.xlu0 %v221_v37 }
 0x1c5   :  { %320 = vperm.xlu0 %472, %v370_v42  }
 0x238   :  { %v223_v44 = vpop.xlane.xlu0 %222 }
 0x239   :  { %v224_v45 = vmax.f32 %v223_v44, 1e-24 }
 0x23b   :  { %473 = vrsqrt.f32 %v224_v45 }
 0x240   :  { %v321_v50 = vpop.permute.xlu0 %320 }
 0x248   :  { %v474_v46 = vpop.eup %473 }
 0x249   :  { %v226_v47 = vmul.f32 %v474_v46, %v216_v34 }
 0x24b   :  { %465 = vmatmul.mubr.msk.f32.vlgmr.msra.gmra.mxu1 %vm239_vm3, %v226_v47  ;;  %227 = vst.msk [vmem:[#allocation3] sm:$0x3] %vm220_vm2, %v226_v47 }
 0x30b   :  { %v309_v49 = vpop.f32.mrf.mxu1 }
 0x30c   :  { %v310_v51 = vadd.f32 %v368_v48, %v309_v49 }
 0x30d   :  { %v466_v52 = vpop.f32.mrf.mxu1 }
 0x30e   :  { %v323_v53 = vmul.f32 %v321_v50, %v310_v51 }
 0x310   :  { %v325_v54 = vsel %vm324_vm4, %v323_v53, -inf }
 0x311   :  { %326 = vmax.xlane.f32.xlu1 %v325_v54 }
 0x39a   :  { %v327_v55 = vpop.xlane.xlu1 %326 }
 0x39b   :  { %v328_v56 = vsub.f32 %v323_v53, %v327_v55 }
 0x39d   :  { %v329_v57 = vmul.f32 1.442695, %v328_v56 }
 0x39f   :  { %475 = vpow2.f32 %v329_v57 }
 0x3ac   :  { %v476_v58 = vpop.eup %475 }
 0x3ad   :  { %v331_v59 = vsel %vm324_vm4, %v476_v58, 0.0 }
 0x3ae   :  { %332 = vadd.xlane.f32.xlu1 %v331_v59 }
 0x3af   :  { %490 = shalt.err (!%p487_p4)
}
 0x3b0   :  { %346 = dma.vmem_to_hbm [thread:$0]  %s344_s25, 32, %s730_s8, [#allocation4]  }
 0x3b1   :  { %s527_s28 = smov [#allocation5]  }
 0x3b2   :  { %s353_s29 = sshll.u32 %s527_s28, 4  ;;  %s354_s29 = int_to_ptr.vmem [resolvable:$true] %s353_s29 }
 0x3b3   :  { %s499_s30 = scalar_lea.vmem %s354_s29, 32  ;;  %p504_p6 = scmp.lt.s32.totalorder %s354_s29, %s354_s29 }
 0x3b4   :  { %p500_p5 = scmp.ne.s32.totalorder %s354_s29, %s499_s30  ;;  %p505_p7 = scmp.lt.s32.totalorder %s499_s30, %s499_s30 }
 0x3b6   :  { %p506_p8 = por %p505_p7, %p504_p6 }
 0x3b8   :  { %p507_p9 = pnand %p506_p8, %p500_p5 }
 0x437   :  { %v333_v60 = vpop.xlane.xlu1 %332 }
 0x438   :  { %477 = vrcp.f32 %v333_v60 }
 0x445   :  { %v478_v61 = vpop.eup %477 }
 0x446   :  { %v335_v62 = vmul.f32 %v478_v61, %v476_v58 }
 0x448   :  { %336 = vst.msk [vmem:[#allocation5] sm:$0x3] %vm324_vm4, %v335_v62 }
 0x449   :  { %510 = shalt.err (!%p507_p9)
}
 0x44a   :  { %356 = dma.vmem_to_hbm [thread:$0]  %s354_s29, 32, %s731_s9, [#allocation6]  }
 0x44b   :  { %519 = dma.done.wait [#allocation4], 32  }
 0x44c   :  { %520 = vsyncadd [#allocation4], 4294967264 }
 0x44d   :  { %521 = dma.done.wait [#allocation6], 32  }
 0x44e   :  { %522 = vsyncadd [#allocation6], 4294967264 }
 0x44f   :  { %363 = vsyncpa [#allocation4], 1 }
 0x450   :  { %364 = vsyncpa [#allocation6], 1 }

// kernel: forward.8
= control target key start
LH: loop header
LB: loop body
LE: loop exit
PB: predicated region body
PF: predicated region fallthrough
CT: control target
= control target key end

     0   :  { %s3009_s12 = smov 0   ;;  %s3618_s0 = inlined_call_operand.vmem [shape: bf16[2,10,10,32], index: 0, kind: input, shape index: {}]   ;;  %s3619_s1 = inlined_call_operand.vmem [shape: bf16[3,3,32,64], index: 1, kind: input, shape index: {}]   ;;  %s3620_s2 = inlined_call_operand.vmem [shape: f32[1,64], index: 2, kind: input, shape index: {}]   ;;  %s3621_s3 = inlined_call_operand.vmem [shape: bf16[2,4,4,64], index: 3, kind: output, shape index: {}]  }
   0x1 LB: > { %s2520_s13 = sadd.s32 4294967295, %s2986_s12   ;;  %p2524_p0 = scmp.ge.s32.totalorder %s2986_s12, 1  ;;  %s2986_s12 = sphi %s3009_s12, %s13_s12  }
   0x2   : > { %p137_p1 = scmp.lt.s32.totalorder %s2986_s12, 3 }
   0x4   : > { %p138_p2 = pnand %p2524_p0, %p137_p1 }
   0x5   : > { %p161_p3 = scmp.lt.s32.totalorder (!%p138_p2), %s2520_s13, 1 }
   0x6   : > { %141 = sbr.rel (%p138_p2) target bundleno = 372 (0x174), region = 32 }
   0xb   : > { %v2950_v0 = vld [vmem:[%s3619_s1 + $0x18] sm:$0xff]   ;;  %v2951_v1 = vld [vmem:[%s3619_s1 + $0x10] sm:$0xff]   ;;  %s3627_s13 = smov (!%p161_p3, %s2520_s13), 1  ;;  %v3028_v2 = vld [vmem:[%s3619_s1 + $0x8] sm:$0xff]   ;;  %vm192_vm0 = vsmask.f32 3328 }
   0xc   : > { %2936 = vmatprep.subr.bf16.mxu1 %v2950_v0  ;;  %2828 = vmatprep.subr.bf16.mxu0 %v2950_v0  ;;  %s2940_s20 = smul.u32 80, %s3627_s13  ;;  %v3034_v3 = vld [vmem:[%s3619_s1 + $0x28] sm:$0xff]   ;;  %vm193_vm1 = vsmask.f32 7440  ;;  %vm336_vm2 = vcmask 261120   ;;  %vm547_vm4 = vcmask 1042432  }
   0xd   : > { %2938 = vmatpush3.bf16.msra.mxu1 %v2950_v0  ;;  %2829 = vmatpush3.bf16.msra.mxu0 %v2950_v0  ;;  %vm3080_vm3 = vmor %vm192_vm0, %vm193_vm1  ;;  %vm548_vm5 = vcmask 1046532   ;;  %vm2398_vm7 = vcmask 1041409   ;;  %vm2401_vm8 = vcmask 1042434   ;;  %vm2404_vm9 = vcmask 1043459   ;;  %s2773_s4 = sshll.u32 %s3627_s13, 3 }
   0xe   : > { %2937 = vmatprep.subr.bf16.mxu1 %v2951_v1  ;;  %2830 = vmatprep.subr.bf16.mxu0 %v2951_v1  ;;  %s3039_s25 = scalar_lea.vmem %s3618_s0, %s2940_s20  ;;  %vm3144_vm6 = vmor %vm547_vm4, %vm548_vm5  ;;  %s3567_s6 = scalar_lea.vmem %s3621_s3, %s2773_s4  ;;  %vm2460_vm10 = vcmask 517120  }
   0xf   : > { %v3042_v4 = vld [vmem:[%s3039_s25] sm:$0xf]  ;;  %v3045_v5 = vld [vmem:[%s3039_s25 + $0x8] sm:$0xf]  ;;  %v3048_v6 = vld [vmem:[%s3039_s25 + $0x4] sm:$0x1] }
  0x10   : > { %v3051_v7 = vld [vmem:[%s3039_s25 + $0xc] sm:$0x1]  ;;  %v196_v8 = vshrl.u32 %v3042_v4, 16  ;;  %v199_v9 = vshll.u32 %v3042_v4, 16  ;;  %v205_v10 = vshll.u32 %v3048_v6, 16  ;;  %v210_v11 = vshrl.u32 %v3045_v5, 16 }
  0x11   : > { %2939 = vmatpush3.bf16.msra.mxu1 %v2951_v1  ;;  %2831 = vmatpush3.bf16.msra.mxu0 %v2951_v1  ;;  %v213_v12 = vshll.u32 %v3045_v5, 16  ;;  %v219_v13 = vshll.u32 %v3051_v7, 16  ;;  %v552_v14 = vrot.slane %v3048_v6, 5  ;;  %v556_v15 = vrot.slane %v3051_v7, 5  ;;  %v3064_v16 = vld [vmem:[%s3039_s25 + $0x20] sm:$0xf] }
  0x12   : > { %2840 = vmatprep.subr.bf16.mxu1 %v3028_v2  ;;  %2852 = vmatprep.subr.bf16.mxu0 %v3034_v3  ;;  %v198_v17 = vrot.slane %v196_v8, 4  ;;  %v201_v18 = vrot.slane %v199_v9, 5  ;;  %v207_v19 = vrot.slane %v205_v10, 5  ;;  %v212_v20 = vrot.slane %v210_v11, 4  ;;  %v3067_v21 = vld [vmem:[%s3039_s25 + $0x28] sm:$0xf] }
  0x13   : > { %v215_v22 = vrot.slane %v213_v12, 5  ;;  %v221_v23 = vrot.slane %v219_v13, 5  ;;  %v3070_v24 = vld [vmem:[%s3039_s25 + $0x24] sm:$0x1]  ;;  %v3073_v25 = vld [vmem:[%s3039_s25 + $0x2c] sm:$0x1] }
  0x14   : > { %v202_v26 = vor.u32 %v201_v18, %v198_v17  ;;  %v252_v27 = vshrl.u32 %v3064_v16, 16  ;;  %v255_v28 = vshll.u32 %v3064_v16, 16  ;;  %v261_v29 = vshll.u32 %v3070_v24, 16  ;;  %v3088_v35 = vld [vmem:[%s3039_s25 + $0x10] sm:$0xf]  ;;  %v2954_v7 = vld [vmem:[%s3619_s1] sm:$0xff]  }
  0x15   : > { %v216_v31 = vor.u32 %v215_v22, %v212_v20  ;;  %v266_v32 = vshrl.u32 %v3067_v21, 16  ;;  %v269_v33 = vshll.u32 %v3067_v21, 16  ;;  %v275_v34 = vshll.u32 %v3073_v25, 16  ;;  %v3091_v40 = vld [vmem:[%s3039_s25 + $0x18] sm:$0xf] }
  0x16   : > { %v203_v36 = vrot.slane %v202_v26, 4  ;;  %v254_v37 = vrot.slane %v252_v27, 4  ;;  %v257_v38 = vrot.slane %v255_v28, 5  ;;  %v263_v39 = vrot.slane %v261_v29, 5  ;;  %v3094_v45 = vld [vmem:[%s3039_s25 + $0x14] sm:$0x1] }
  0x17   : > { %v217_v41 = vrot.slane %v216_v31, 4  ;;  %v268_v42 = vrot.slane %v266_v32, 4  ;;  %v271_v43 = vrot.slane %v269_v33, 5  ;;  %v277_v44 = vrot.slane %v275_v34, 5  ;;  %v3103_v52 = vld [vmem:[%s3039_s25 + $0x1c] sm:$0x1] }
  0x18   : > { %v208_v46 = vsel %vm3080_vm3, %v203_v36, %v207_v19  ;;  %v258_v47 = vor.u32 %v257_v38, %v254_v37  ;;  %v568_v48 = vrot.slane %v3070_v24, 5  ;;  %v572_v49 = vrot.slane %v3073_v25, 5  ;;  %v3108_v55 = vld [vmem:[%s3039_s25 + $0x30] sm:$0xf]  ;;  %v3113_v60 = vld [vmem:[%s3039_s25 + $0x34] sm:$0x1] }
  0x19   : > { %v222_v50 = vsel %vm3080_vm3, %v217_v41, %v221_v23  ;;  %v272_v51 = vor.u32 %v271_v43, %v268_v42  ;;  %v224_v53 = vshrl.u32 %v3088_v35, 16  ;;  %v227_v54 = vshll.u32 %v3088_v35, 16  ;;  %v3117_v1 = vld [vmem:[%s3039_s25 + $0x38] sm:$0xf]  ;;  %v3120_v8 = vld [vmem:[%s3039_s25 + $0x3c] sm:$0x1] }
  0x1a   : > { %v2532_v56 = vcombine.low %v208_v46, %v222_v50  ;;  %v259_v57 = vrot.slane %v258_v47, 4  ;;  %v233_v58 = vshll.u32 %v3094_v45, 16  ;;  %v238_v59 = vshrl.u32 %v3091_v40, 16  ;;  %v523_v20 = vld [vmem:[%s3039_s25] sm:$0xe] }
  0x1b   : > { %v273_v61 = vrot.slane %v272_v51, 4  ;;  %v226_v62 = vrot.slane %v224_v53, 4  ;;  %v229_v63 = vrot.slane %v227_v54, 5  ;;  %v241_v0 = vshll.u32 %v3091_v40, 16  ;;  %v524_v28 = vld [vmem:[%s3039_s25 + $0x8] sm:$0xe] }
  0x1c   : > { %2832 = vmatprep.mubr.msk.bf16.mxu0 %vm336_vm2, %v2532_v56  ;;  %v264_v9 = vsel %vm3080_vm3, %v259_v57, %v263_v39  ;;  %v235_v10 = vrot.slane %v233_v58, 5  ;;  %v240_v11 = vrot.slane %v238_v59, 4  ;;  %v247_v12 = vshll.u32 %v3103_v52, 16  ;;  %v525_v34 = vld [vmem:[%s3039_s25 + $0x10] sm:$0xe] }
  0x1d   : > { %v278_v13 = vsel %vm3080_vm3, %v273_v61, %v277_v44  ;;  %v230_v17 = vor.u32 %v229_v63, %v226_v62  ;;  %v243_v18 = vrot.slane %v241_v0, 5  ;;  %v560_v19 = vrot.slane %v3094_v45, 5  ;;  %v526_v45 = vld [vmem:[%s3039_s25 + $0x18] sm:$0xe]  ;;  %v527_v46 = vld [vmem:[%s3039_s25 + $0x20] sm:$0xe] }
  0x1e   : > { %v2534_v22 = vcombine.low %v264_v9, %v278_v13  ;;  %v249_v23 = vrot.slane %v247_v12, 5  ;;  %v564_v26 = vrot.slane %v3103_v52, 5  ;;  %v280_v27 = vshrl.u32 %v3108_v55, 16  ;;  %v528_v53 = vld [vmem:[%s3039_s25 + $0x28] sm:$0xe]  ;;  %v2955_v62 = vld [vmem:[%s3619_s1 + $0x20] sm:$0xff]  }
  0x1f   : > { %v231_v29 = vrot.slane %v230_v17, 4  ;;  %v244_v31 = vor.u32 %v243_v18, %v240_v11  ;;  %v283_v32 = vshll.u32 %v3108_v55, 16  ;;  %v289_v33 = vshll.u32 %v3113_v60, 16  ;;  %v529_v9 = vld [vmem:[%s3039_s25 + $0x30] sm:$0xe] }
  0x20   : > { %2836 = vmatprep.mubr.msk.bf16.mxu1 %vm336_vm2, %v2534_v22  ;;  %v282_v36 = vrot.slane %v280_v27, 4  ;;  %v294_v37 = vshrl.u32 %v3117_v1, 16  ;;  %v297_v38 = vshll.u32 %v3117_v1, 16  ;;  %v303_v39 = vshll.u32 %v3120_v8, 16  ;;  %v2596_v27 = vld [vmem:[%s3039_s25 + $0x8] sm:$0xf] }
  0x21   : > { %v236_v41 = vsel %vm3080_vm3, %v231_v29, %v235_v10  ;;  %v245_v42 = vrot.slane %v244_v31, 4  ;;  %v285_v43 = vrot.slane %v283_v32, 5  ;;  %v291_v47 = vrot.slane %v289_v33, 5  ;;  %v530_v10 = vld [vmem:[%s3039_s25 + $0x38] sm:$0xe] }
  0x22   : > { %v296_v50 = vrot.slane %v294_v37, 4  ;;  %v299_v51 = vrot.slane %v297_v38, 5  ;;  %v2552_v52 = vrot.slane %v523_v20, 9  ;;  %v305_v57 = vrot.slane %v303_v39, 5  ;;  %v2598_v29 = vld [vmem:[%s3039_s25 + $0x10] sm:$0xf] }
  0x23   : > { %v250_v54 = vsel %vm3080_vm3, %v245_v42, %v249_v23  ;;  %v286_v56 = vor.u32 %v285_v43, %v282_v36  ;;  %v2553_v58 = vrot.slane %v524_v28, 9  ;;  %v2554_v0 = vrot.slane %v525_v34, 9  ;;  %v3195_v28 = vld [vmem:[%s3039_s25 + $0xc] sm:$0x1]  ;;  %v3200_v36 = vld [vmem:[%s3039_s25 + $0x14] sm:$0x1] }
  0x24   : > { %v2533_v59 = vcombine.low %v236_v41, %v250_v54  ;;  %v300_v61 = vor.u32 %v299_v51, %v296_v50  ;;  %v553_v63 = vsel %vm3144_vm6, %v2552_v52, %v552_v14  ;;  %v2555_v13 = vrot.slane %v526_v45, 9  ;;  %v2957_v45 = vld [vmem:[%s3619_s1 + $0x38] sm:$0xff]  }
  0x25   : > { %v287_v11 = vrot.slane %v286_v56, 4  ;;  %v557_v12 = vsel %vm3144_vm6, %v2553_v58, %v556_v15  ;;  %v2556_v17 = vrot.slane %v527_v46, 9  ;;  %v561_v6 = vsel %vm3144_vm6, %v2554_v0, %v560_v19  ;;  %v3225_v54 = vld [vmem:[%s3039_s25 + $0x1c] sm:$0x1]  ;;  %v2602_v56 = vld [vmem:[%s3039_s25 + $0x20] sm:$0xf] }
  0x26   : > { %2833 = vmatmul.mubr.msk.bf16.vlgmr.msra.gmra.mxu0 %vm336_vm2, %v2533_v59  ;;  %v301_v18 = vrot.slane %v300_v61, 4  ;;  %v2564_v20 = vcombine.low %v553_v63, %v557_v12  ;;  %v2557_v14 = vrot.slane %v528_v53, 9  ;;  %v2542_v15 = vcombine.low %v3042_v4, %v3045_v5  ;;  %v2600_v53 = vld [vmem:[%s3039_s25 + $0x18] sm:$0xf] }
  0x27   : > { %v292_v22 = vsel %vm3080_vm3, %v287_v11, %v291_v47  ;;  %2853 = vmatpush3.bf16.msra.mxu0 %v3034_v3  ;;  %v565_v23 = vsel %vm3144_vm6, %v2555_v13, %v564_v26  ;;  %v2959_v3 = vld [vmem:[%s3619_s1 + $0x48] sm:$0xff]   ;;  %v569_v4 = vsel %vm3144_vm6, %v2556_v17, %v568_v48  ;;  %v2558_v26 = vrot.slane %v529_v9, 9 }
  0x28   : > { %v306_v19 = vsel %vm3080_vm3, %v301_v18, %v305_v57  ;;  %2854 = vmatprep.subr.bf16.mxu0 %v2955_v62  ;;  %2856 = vmatprep.mubr.msk.bf16.mxu0 %vm336_vm2, %v2564_v20  ;;  %v573_v5 = vsel %vm3144_vm6, %v2557_v14, %v572_v49  ;;  %v2565_v32 = vcombine.low %v561_v6, %v565_v23  ;;  %v576_v33 = vrot.slane %v3113_v60, 5  ;;  %v3233_v57 = vld [vmem:[%s3039_s25 + $0x24] sm:$0x1]  ;;  %v3240_v13 = vld [vmem:[%s3619_s1 + $0x68] sm:$0xff]  }
  0x29   : > { %v2535_v31 = vcombine.low %v292_v22, %v306_v19  ;;  %v2559_v34 = vrot.slane %v530_v10, 9  ;;  %v580_v24 = vrot.slane %v3120_v8, 5  ;;  %v844_v37 = vshrl.u32 %v2596_v27, 16  ;;  %v2963_v8 = vld [vmem:[%s3619_s1 + $0x40] sm:$0xff]   ;;  %v3250_v22 = vld [vmem:[%s3619_s1 + $0x58] sm:$0xff]  }
  0x2a   : > { %v847_v48 = vshll.u32 %v2596_v27, 16  ;;  %v853_v25 = vshll.u32 %v3195_v28, 16  ;;  %v2566_v49 = vcombine.low %v569_v4, %v573_v5  ;;  %v858_v38 = vshrl.u32 %v2598_v29, 16  ;;  %v2604_v27 = vld [vmem:[%s3039_s25 + $0x28] sm:$0xf] }
  0x2b   : > { %2837 = vmatmul.mubr.msk.bf16.vlgmr.msra.gmra.mxu1 %vm336_vm2, %v2535_v31  ;;  %2855 = vmatpush3.bf16.msra.mxu0 %v2955_v62  ;;  %v861_v39 = vshll.u32 %v2598_v29, 16  ;;  %v867_v41 = vshll.u32 %v3200_v36, 16  ;;  %v2544_v60 = vcombine.low %v3064_v16, %v3067_v21  ;;  %v846_v42 = vrot.slane %v844_v37, 4  ;;  %v3255_v4 = vld [vmem:[%s3039_s25 + $0x2c] sm:$0x1] }
  0x2c   : > { %2841 = vmatpush3.bf16.msra.mxu1 %v3028_v2  ;;  %2844 = vmatprep.mubr.msk.bf16.mxu1 %vm336_vm2, %v2542_v15  ;;  %v849_v43 = vrot.slane %v847_v48, 5  ;;  %v855_v2 = vrot.slane %v853_v25, 5  ;;  %v860_v46 = vrot.slane %v858_v38, 4  ;;  %v2543_v21 = vcombine.low %v3088_v35, %v3091_v40  ;;  %v2961_v35 = vld [vmem:[%s3619_s1 + $0x30] sm:$0xff]  }
  0x2d   : > { %2842 = vmatprep.subr.bf16.mxu1 %v2954_v7  ;;  %2876 = vmatprep.subr.bf16.mxu0 %v2959_v3  ;;  %v863_v47 = vrot.slane %v861_v39, 5  ;;  %v869_v16 = vrot.slane %v867_v41, 5  ;;  %v577_v50 = vsel %vm3144_vm6, %v2558_v26, %v576_v33  ;;  %v581_v51 = vsel %vm3144_vm6, %v2559_v34, %v580_v24  ;;  %v2606_v5 = vld [vmem:[%s3039_s25 + $0x30] sm:$0xf]  ;;  %v3259_v26 = vld [vmem:[%s3039_s25 + $0x34] sm:$0x1] }
  0x2e   : > { %2857 = vmatmul.mubr.msk.bf16.vlgmr.msra.gmra.mxu0 %vm336_vm2, %v2565_v32  ;;  %v850_v52 = vor.u32 %v849_v43, %v846_v42  ;;  %v872_v58 = vshrl.u32 %v2600_v53, 16  ;;  %v875_v59 = vshll.u32 %v2600_v53, 16  ;;  %v881_v61 = vshll.u32 %v3225_v54, 16  ;;  %v2964_v41 = vld [vmem:[%s3039_s25 + $0x8] ss:$8 sps:$4 sm:$0xff]  }
  0x2f   : > { %2877 = vmatpush3.bf16.msra.mxu0 %v2959_v3  ;;  %2860 = vmatprep.mubr.msk.bf16.mxu0 %vm336_vm2, %v2566_v49  ;;  %v864_v40 = vor.u32 %v863_v47, %v860_v46  ;;  %v886_v63 = vshrl.u32 %v2602_v56, 16  ;;  %v889_v0 = vshll.u32 %v2602_v56, 16  ;;  %v895_v9 = vshll.u32 %v3233_v57, 16 }
  0x30   : > { %2843 = vmatpush3.bf16.msra.mxu1 %v2954_v7  ;;  %2878 = vmatprep.subr.bf16.mxu0 %v2963_v8  ;;  %v851_v62 = vrot.slane %v850_v52, 4  ;;  %v874_v11 = vrot.slane %v872_v58, 4  ;;  %v877_v12 = vrot.slane %v875_v59, 5  ;;  %v2567_v17 = vcombine.low %v577_v50, %v581_v51  ;;  %v2971_v52 = vld [vmem:[%s3619_s1 + $0x60] sm:$0xff]  }
  0x31   : > { %2864 = vmatprep.subr.bf16.mxu1 %v2957_v45  ;;  %v865_v10 = vrot.slane %v864_v40, 4  ;;  %v888_v20 = vrot.slane %v886_v63, 4  ;;  %v891_v6 = vrot.slane %v889_v0, 5  ;;  %v883_v15 = vrot.slane %v881_v61, 5  ;;  %v2966_v63 = vld [vmem:[%s3039_s25 + $0x18] ss:$8 sps:$4 sm:$0xff]  }
  0x32   : > { %v856_v18 = vsel %vm3080_vm3, %v851_v62, %v855_v2  ;;  %v878_v7 = vor.u32 %v877_v12, %v874_v11  ;;  %v897_v23 = vrot.slane %v895_v9, 5  ;;  %v900_v31 = vshrl.u32 %v2604_v27, 16  ;;  %v3276_v2 = vld [vmem:[%s3039_s25 + $0x3c] sm:$0x1]  ;;  %v2626_v12 = vld [vmem:[%s3039_s25 + $0x8] sm:$0xe] }
  0x33   : > { %2845 = vmatmul.mubr.msk.bf16.vlgmr.msra.gmra.mxu1 %vm336_vm2, %v2543_v21  ;;  %2879 = vmatpush3.bf16.msra.mxu0 %v2963_v8  ;;  %v870_v14 = vsel %vm3080_vm3, %v865_v10, %v869_v16  ;;  %v892_v3 = vor.u32 %v891_v6, %v888_v20  ;;  %v903_v32 = vshll.u32 %v2604_v27, 16  ;;  %v909_v33 = vshll.u32 %v3255_v4, 16  ;;  %v2610_v16 = vld [vmem:[%s3039_s25 + $0x40] sm:$0xf]  ;;  %v3280_v21 = vld [vmem:[%s3039_s25 + $0x44] sm:$0x1] }
  0x34   : > { %2865 = vmatpush3.bf16.msra.mxu1 %v2957_v45  ;;  %2848 = vmatprep.mubr.msk.bf16.mxu1 %vm336_vm2, %v2544_v60  ;;  %v2616_v19 = vcombine.low %v856_v18, %v870_v14  ;;  %v879_v29 = vrot.slane %v878_v7, 4  ;;  %v914_v24 = vshrl.u32 %v2606_v5, 16  ;;  %v917_v37 = vshll.u32 %v2606_v5, 16  ;;  %v2608_v45 = vld [vmem:[%s3039_s25 + $0x38] sm:$0xf] }
  0x35   : > { %2866 = vmatprep.subr.bf16.mxu1 %v2961_v35  ;;  %2900 = vmatprep.subr.bf16.mxu0 %v3240_v13  ;;  %v893_v34 = vrot.slane %v892_v3, 4  ;;  %v923_v48 = vshll.u32 %v3259_v26, 16  ;;  %v2545_v25 = vcombine.low %v3108_v55, %v3117_v1  ;;  %v902_v38 = vrot.slane %v900_v31, 4  ;;  %v2627_v6 = vld [vmem:[%s3039_s25 + $0x10] sm:$0xe] }
  0x36   : > { %2861 = vmatmul.mubr.msk.bf16.gmra.mxu0 %vm336_vm2, %v2567_v17  ;;  %v884_v49 = vsel %vm3080_vm3, %v879_v29, %v883_v15  ;;  %v905_v39 = vrot.slane %v903_v32, 5  ;;  %v916_v8 = vrot.slane %v914_v24, 4  ;;  %v919_v42 = vrot.slane %v917_v37, 5  ;;  %v2968_v7 = vld [vmem:[%s3039_s25 + $0x28] ss:$8 sps:$4 sm:$0xff]  }
  0x37   : > { %2880 = vmatprep.mubr.msk.bf16.mxu0 %vm336_vm2, %v2616_v19  ;;  %v898_v60 = vsel %vm3080_vm3, %v893_v34, %v897_v23  ;;  %v911_v55 = vrot.slane %v909_v33, 5  ;;  %v925_v1 = vrot.slane %v923_v48, 5  ;;  %v928_v50 = vshrl.u32 %v2608_v45, 16  ;;  %v2969_v23 = vld [vmem:[%s3619_s1 + $0x50] sm:$0xff]   ;;  %v2628_v33 = vld [vmem:[%s3039_s25 + $0x18] sm:$0xe] }
  0x38   : > { %2867 = vmatpush3.bf16.msra.mxu1 %v2961_v35  ;;  %v906_v43 = vor.u32 %v905_v39, %v902_v38  ;;  %v2617_v46 = vcombine.low %v884_v49, %v898_v60  ;;  %v920_v47 = vor.u32 %v919_v42, %v916_v8  ;;  %v931_v51 = vshll.u32 %v2608_v45, 16  ;;  %v2972_v32 = vld [vmem:[%s3039_s25 + $0x10] ss:$8 sps:$4 sm:$0xff]   ;;  %v3311_v34 = vld [vmem:[%s3619_s1 + $0x88] sm:$0xff]  }
  0x39   : > { %2888 = vmatprep.subr.bf16.mxu1 %v3250_v22  ;;  %v937_v56 = vshll.u32 %v3276_v2, 16  ;;  %v942_v35 = vshrl.u32 %v2610_v16, 16  ;;  %v945_v40 = vshll.u32 %v2610_v16, 16  ;;  %v930_v59 = vrot.slane %v928_v50, 4  ;;  %v2631_v60 = vld [vmem:[%s3039_s25 + $0x30] sm:$0xe] }
  0x3a   : > { %v907_v53 = vrot.slane %v906_v43, 4  ;;  %v921_v58 = vrot.slane %v920_v47, 4  ;;  %v933_v61 = vrot.slane %v931_v51, 5  ;;  %v951_v62 = vshll.u32 %v3280_v21, 16  ;;  %v2970_v42 = vld [vmem:[%s3039_s25 + $0x38] ss:$8 sps:$4 sm:$0xff]  }
  0x3b   : > { %2849 = vmatmul.mubr.msk.bf16.gmra.mxu1 %vm336_vm2, %v2545_v25  ;;  %v939_v9 = vrot.slane %v937_v56, 5  ;;  %v944_v10 = vrot.slane %v942_v35, 4  ;;  %v947_v11 = vrot.slane %v945_v40, 5  ;;  %v2634_v14 = vrot.slane %v2626_v12, 9  ;;  %v2974_v47 = vld [vmem:[%s3039_s25 + $0x20] ss:$8 sps:$4 sm:$0xff]  }
  0x3c   : > { %2868 = vmatprep.mubr.msk.bf16.mxu1 %vm336_vm2, %v2964_v41  ;;  %v912_v0 = vsel %vm3080_vm3, %v907_v53, %v911_v55  ;;  %v926_v17 = vsel %vm3080_vm3, %v921_v58, %v925_v1  ;;  %v934_v18 = vor.u32 %v933_v61, %v930_v59  ;;  %v953_v20 = vrot.slane %v951_v62, 5  ;;  %v2630_v41 = vld [vmem:[%s3039_s25 + $0x28] sm:$0xe]  ;;  %v2976_v53 = vld [vmem:[%s3039_s25 + $0x30] ss:$8 sps:$4 sm:$0xff]  }
  0x3d   : > { %v2618_v15 = vcombine.low %v912_v0, %v926_v17  ;;  %v948_v27 = vor.u32 %v947_v11, %v944_v10  ;;  %v1095_v19 = vrot.slane %v3195_v28, 5  ;;  %v2635_v3 = vrot.slane %v2627_v6, 9  ;;  %v2678_v40 = vld [vmem:[%s3039_s25 + $0x10] sm:$0xf]  ;;  %v2680_v61 = vld [vmem:[%s3039_s25 + $0x18] sm:$0xf] }
  0x3e   : > { %2881 = vmatmul.mubr.msk.bf16.vlgmr.msra.gmra.mxu0 %vm336_vm2, %v2617_v46  ;;  %v935_v5 = vrot.slane %v934_v18, 4  ;;  %v1099_v29 = vrot.slane %v3200_v36, 5  ;;  %v2636_v24 = vrot.slane %v2628_v33, 9  ;;  %v1103_v37 = vrot.slane %v3225_v54, 5  ;;  %v2633_v46 = vld [vmem:[%s3039_s25 + $0x40] sm:$0xe] }
  0x3f   : > { %2901 = vmatpush3.bf16.msra.mxu0 %v3240_v13  ;;  %2884 = vmatprep.mubr.msk.bf16.mxu0 %vm336_vm2, %v2618_v15  ;;  %v949_v31 = vrot.slane %v948_v27, 4  ;;  %v2629_v13 = vld [vmem:[%s3039_s25 + $0x20] sm:$0xe]  ;;  %v1107_v25 = vrot.slane %v3233_v57, 5  ;;  %v1111_v49 = vrot.slane %v3255_v4, 5  ;;  %v1096_v54 = vsel %vm3144_vm6, %v2634_v14, %v1095_v19  ;;  %v3332_v57 = vld [vmem:[%s3619_s1 + $0x78] sm:$0xff]  }
  0x40   : > { %2902 = vmatprep.subr.bf16.mxu0 %v2971_v52  ;;  %v940_v28 = vsel %vm3080_vm3, %v935_v5, %v939_v9  ;;  %v2637_v48 = vrot.slane %v2629_v13, 9  ;;  %v1100_v39 = vsel %vm3144_vm6, %v2635_v3, %v1099_v29  ;;  %v2639_v4 = vrot.slane %v2631_v60, 9  ;;  %v2681_v62 = vld [vmem:[%s3039_s25 + $0x1c] sm:$0x1]  ;;  %v2979_v0 = vld [vmem:[%s3619_s1 + $0x80] sm:$0xff]  }
  0x41   : > { %v954_v36 = vsel %vm3080_vm3, %v949_v31, %v953_v20  ;;  %v1115_v8 = vrot.slane %v3259_v26, 5  ;;  %v2646_v43 = vcombine.low %v1096_v54, %v1100_v39  ;;  %v3341_v55 = vsel %vm3144_vm6, %v2636_v24, %v1103_v37  ;;  %v2632_v26 = vld [vmem:[%s3039_s25 + $0x38] sm:$0xe]  ;;  %v2708_v12 = vld [vmem:[%s3039_s25 + $0x10] sm:$0xe] }
  0x42   : > { %v2619_v38 = vcombine.low %v940_v28, %v954_v36  ;;  %v3345_v1 = vsel %vm3144_vm6, %v2637_v48, %v1107_v25  ;;  %v2640_v50 = vrot.slane %v2632_v26, 9  ;;  %v1119_v51 = vrot.slane %v3276_v2, 5  ;;  %v2709_v6 = vld [vmem:[%s3039_s25 + $0x18] sm:$0xe]  ;;  %v2682_v19 = vld [vmem:[%s3039_s25 + $0x20] sm:$0xf] }
  0x43   : > { %2869 = vmatmul.mubr.msk.bf16.vlgmr.msra.gmra.mxu1 %vm336_vm2, %v2966_v63  ;;  %2903 = vmatpush3.bf16.msra.mxu0 %v2971_v52  ;;  %v3356_v16 = vsel %vm3144_vm6, %v2639_v4, %v1115_v8  ;;  %v2641_v52 = vrot.slane %v2633_v46, 9  ;;  %v1123_v56 = vrot.slane %v3280_v21, 5  ;;  %v2647_v58 = vcombine.low %v3341_v55, %v3345_v1  ;;  %v2679_v21 = vld [vmem:[%s3039_s25 + $0x14] sm:$0x1]  ;;  %v2978_v33 = vld [vmem:[%s3039_s25 + $0x40] ss:$8 sps:$4 sm:$0xff]  }
  0x44   : > { %2889 = vmatpush3.bf16.msra.mxu1 %v3250_v22  ;;  %2872 = vmatprep.mubr.msk.bf16.mxu1 %vm336_vm2, %v2968_v7  ;;  %v2638_v22 = vrot.slane %v2630_v41, 9  ;;  %v3364_v35 = vsel %vm3144_vm6, %v2640_v50, %v1119_v51  ;;  %v1387_v9 = vshrl.u32 %v2678_v40, 16  ;;  %v1390_v10 = vshll.u32 %v2678_v40, 16  ;;  %v2684_v37 = vld [vmem:[%s3039_s25 + $0x28] sm:$0xf] }
  0x45   : > { %2890 = vmatprep.subr.bf16.mxu1 %v2969_v23  ;;  %2924 = vmatprep.subr.bf16.mxu0 %v3311_v34  ;;  %v3374_v59 = vsel %vm3144_vm6, %v2641_v52, %v1123_v56  ;;  %v1396_v11 = vshll.u32 %v2679_v21, 16  ;;  %v1401_v17 = vshrl.u32 %v2680_v61, 16  ;;  %v1404_v18 = vshll.u32 %v2680_v61, 16  ;;  %v2685_v25 = vld [vmem:[%s3039_s25 + $0x2c] sm:$0x1] }
  0x46   : > { %2885 = vmatmul.mubr.msk.bf16.gmra.mxu0 %vm336_vm2, %v2619_v38  ;;  %v3349_v45 = vsel %vm3144_vm6, %v2638_v22, %v1111_v49  ;;  %v2649_v63 = vcombine.low %v3364_v35, %v3374_v59  ;;  %v1410_v20 = vshll.u32 %v2681_v62, 16  ;;  %v2716_v14 = vrot.slane %v2708_v12, 9  ;;  %v2710_v4 = vld [vmem:[%s3039_s25 + $0x20] sm:$0xe]  ;;  %v2711_v1 = vld [vmem:[%s3039_s25 + $0x28] sm:$0xe] }
  0x47   : > { %2904 = vmatprep.mubr.msk.bf16.mxu0 %vm336_vm2, %v2972_v32  ;;  %v2648_v2 = vcombine.low %v3349_v45, %v3356_v16  ;;  %v1389_v7 = vrot.slane %v1387_v9, 4  ;;  %v1392_v15 = vrot.slane %v1390_v10, 5  ;;  %v1638_v27 = vrot.slane %v2679_v21, 5  ;;  %v2683_v32 = vld [vmem:[%s3039_s25 + $0x24] sm:$0x1] }
  0x48   : > { %2891 = vmatpush3.bf16.msra.mxu1 %v2969_v23  ;;  %v1398_v23 = vrot.slane %v1396_v11, 5  ;;  %v1403_v3 = vrot.slane %v1401_v17, 4  ;;  %v1406_v5 = vrot.slane %v1404_v18, 5  ;;  %v1412_v29 = vrot.slane %v1410_v20, 5  ;;  %v2686_v16 = vld [vmem:[%s3039_s25 + $0x30] sm:$0xf] }
  0x49   : > { %2912 = vmatprep.subr.bf16.mxu1 %v3332_v57  ;;  %v2717_v31 = vrot.slane %v2709_v6, 9  ;;  %v1393_v13 = vor.u32 %v1392_v15, %v1389_v7  ;;  %v1639_v28 = vsel %vm3144_vm6, %v2716_v14, %v1638_v27  ;;  %v1642_v24 = vrot.slane %v2681_v62, 5  ;;  %v2687_v56 = vld [vmem:[%s3039_s25 + $0x34] sm:$0x1]  ;;  %v2688_v40 = vld [vmem:[%s3039_s25 + $0x38] sm:$0xf] }
  0x4a   : > { %v1415_v36 = vshrl.u32 %v2682_v19, 16  ;;  %v1407_v48 = vor.u32 %v1406_v5, %v1403_v3  ;;  %v1418_v49 = vshll.u32 %v2682_v19, 16  ;;  %v1424_v38 = vshll.u32 %v2683_v32, 16  ;;  %v2689_v11 = vld [vmem:[%s3039_s25 + $0x3c] sm:$0x1] }
  0x4b   : > { %2873 = vmatmul.mubr.msk.bf16.gmra.mxu1 %vm336_vm2, %v2970_v42  ;;  %v1429_v54 = vshrl.u32 %v2684_v37, 16  ;;  %v1394_v39 = vrot.slane %v1393_v13, 4  ;;  %v1643_v41 = vsel %vm3144_vm6, %v2717_v31, %v1642_v24  ;;  %v1432_v22 = vshll.u32 %v2684_v37, 16  ;;  %v2712_v15 = vld [vmem:[%s3039_s25 + $0x30] sm:$0xe] }
  0x4c   : > { %2892 = vmatprep.mubr.msk.bf16.mxu1 %vm336_vm2, %v2646_v43  ;;  %v1417_v60 = vrot.slane %v1415_v36, 4  ;;  %v1408_v8 = vrot.slane %v1407_v48, 4  ;;  %v2728_v42 = vcombine.low %v1639_v28, %v1643_v41  ;;  %v1420_v43 = vrot.slane %v1418_v49, 5  ;;  %v2691_v28 = vld [vmem:[%s3039_s25 + $0x44] sm:$0x1] }
  0x4d   : > { %v1426_v55 = vrot.slane %v1424_v38, 5  ;;  %v1399_v45 = vsel %vm3080_vm3, %v1394_v39, %v1398_v23  ;;  %v1431_v26 = vrot.slane %v1429_v54, 4  ;;  %v1434_v46 = vrot.slane %v1432_v22, 5  ;;  %v2713_v23 = vld [vmem:[%s3039_s25 + $0x38] sm:$0xe] }
  0x4e   : > { %2905 = vmatmul.mubr.msk.bf16.vlgmr.msra.gmra.mxu0 %vm336_vm2, %v2974_v47  ;;  %v1438_v47 = vshll.u32 %v2685_v25, 16  ;;  %v1413_v50 = vsel %vm3080_vm3, %v1408_v8, %v1412_v29  ;;  %v1421_v51 = vor.u32 %v1420_v43, %v1417_v60  ;;  %v2718_v52 = vrot.slane %v2710_v4, 9  ;;  %v2690_v29 = vld [vmem:[%s3039_s25 + $0x40] sm:$0xf]  ;;  %v2692_v48 = vld [vmem:[%s3039_s25 + $0x48] sm:$0xf] }
  0x4f   : > { %2925 = vmatpush3.bf16.msra.mxu0 %v3311_v34  ;;  %2908 = vmatprep.mubr.msk.bf16.mxu0 %vm336_vm2, %v2976_v53  ;;  %v2977_v34 = vld [vmem:[%s3619_s1 + $0x70] sm:$0xff]   ;;  %v1646_v53 = vrot.slane %v2683_v32, 5  ;;  %v2719_v21 = vrot.slane %v2711_v1, 9  ;;  %v1443_v9 = vshrl.u32 %v2686_v16, 16  ;;  %v1446_v12 = vshll.u32 %v2686_v16, 16 }
  0x50   : > { %2926 = vmatprep.subr.bf16.mxu0 %v2979_v0  ;;  %v1422_v61 = vrot.slane %v1421_v51, 4  ;;  %v1452_v17 = vshll.u32 %v2687_v56, 16  ;;  %v1457_v18 = vshrl.u32 %v2688_v40, 16  ;;  %v1460_v7 = vshll.u32 %v2688_v40, 16  ;;  %v2693_v54 = vld [vmem:[%s3039_s25 + $0x4c] sm:$0x1] }
  0x51   : > { %v1647_v62 = vsel %vm3144_vm6, %v2718_v52, %v1646_v53  ;;  %v1445_v14 = vrot.slane %v1443_v9, 4  ;;  %v1448_v3 = vrot.slane %v1446_v12, 5  ;;  %v1466_v13 = vshll.u32 %v2689_v11, 16 }
  0x52   : > { %v1427_v20 = vsel %vm3080_vm3, %v1422_v61, %v1426_v55  ;;  %v1454_v5 = vrot.slane %v1452_v17, 5  ;;  %v1459_v32 = vrot.slane %v1457_v18, 4  ;;  %v2720_v37 = vrot.slane %v2712_v15, 9 }
  0x53   : > { %2893 = vmatmul.mubr.msk.bf16.vlgmr.msra.gmra.mxu1 %vm336_vm2, %v2647_v58  ;;  %2927 = vmatpush3.bf16.msra.mxu0 %v2979_v0  ;;  %v1435_v58 = vor.u32 %v1434_v46, %v1431_v26  ;;  %v1650_v0 = vrot.slane %v2685_v25, 5  ;;  %v1449_v24 = vor.u32 %v1448_v3, %v1445_v14  ;;  %v1654_v36 = vrot.slane %v2687_v56, 5 }
  0x54   : > { %2913 = vmatpush3.bf16.msra.mxu1 %v3332_v57  ;;  %2896 = vmatprep.mubr.msk.bf16.mxu1 %vm336_vm2, %v2648_v2  ;;  %v2698_v57 = vcombine.low %v1399_v45, %v1413_v50  ;;  %v1440_v2 = vrot.slane %v1438_v47, 5  ;;  %v1468_v49 = vrot.slane %v1466_v13, 5  ;;  %v1658_v38 = vrot.slane %v2689_v11, 5  ;;  %v2715_v45 = vld [vmem:[%s3039_s25 + $0x48] sm:$0xe] }
  0x55   : > { %2914 = vmatprep.subr.bf16.mxu1 %v2977_v34  ;;  %v1436_v10 = vrot.slane %v1435_v58, 4  ;;  %v1651_v6 = vsel %vm3144_vm6, %v2719_v21, %v1650_v0  ;;  %v1471_v35 = vshrl.u32 %v2690_v29, 16  ;;  %v1450_v59 = vrot.slane %v1449_v24, 4 }
  0x56   : > { %2909 = vmatmul.mubr.msk.bf16.gmra.mxu0 %vm336_vm2, %v2978_v33  ;;  %v2729_v19 = vcombine.low %v1647_v62, %v1651_v6  ;;  %v1462_v33 = vrot.slane %v1460_v7, 5  ;;  %v1474_v39 = vshll.u32 %v2690_v29, 16  ;;  %v1480_v41 = vshll.u32 %v2691_v28, 16 }
  0x57   : > { %2928 = vmatprep.mubr.msk.bf16.mxu0 %vm336_vm2, %v2728_v42  ;;  %v1441_v27 = vsel %vm3080_vm3, %v1436_v10, %v1440_v2  ;;  %v1473_v4 = vrot.slane %v1471_v35, 4  ;;  %v1485_v8 = vshrl.u32 %v2692_v48, 16  ;;  %v2714_v42 = vld [vmem:[%s3039_s25 + $0x40] sm:$0xe]  ;;  %v1455_v43 = vsel %vm3080_vm3, %v1450_v59, %v1454_v5 }
  0x58   : > { %2915 = vmatpush3.bf16.msra.mxu1 %v2977_v34  ;;  %v2699_v31 = vcombine.low %v1427_v20, %v1441_v27  ;;  %v2721_v34 = vrot.slane %v2713_v23, 9  ;;  %v1463_v25 = vor.u32 %v1462_v33, %v1459_v32  ;;  %v1476_v1 = vrot.slane %v1474_v39, 5 }
  0x59   : > { %v1487_v46 = vrot.slane %v1485_v8, 4  ;;  %v1488_v47 = vshll.u32 %v2692_v48, 16  ;;  %v1494_v16 = vshll.u32 %v2693_v54, 16  ;;  %v2722_v52 = vrot.slane %v2714_v42, 9 }
  0x5a   : > { %v1464_v60 = vrot.slane %v1463_v25, 4  ;;  %v1659_v22 = vsel %vm3144_vm6, %v2721_v34, %v1658_v38  ;;  %v1477_v51 = vor.u32 %v1476_v1, %v1473_v4  ;;  %v1662_v53 = vrot.slane %v2691_v28, 5 }
  0x5b   : > { %2897 = vmatmul.mubr.msk.bf16.gmra.mxu1 %vm336_vm2, %v2649_v63  ;;  %v1655_v63 = vsel %vm3144_vm6, %v2720_v37, %v1654_v36  ;;  %v1482_v56 = vrot.slane %v1480_v41, 5  ;;  %v1490_v40 = vrot.slane %v1488_v47, 5  ;;  %v1666_v58 = vrot.slane %v2693_v54, 5 }
  0x5c   : > { %2916 = vmatprep.mubr.msk.bf16.mxu1 %vm336_vm2, %v2698_v57  ;;  %v2730_v55 = vcombine.low %v1655_v63, %v1659_v22  ;;  %v1469_v26 = vsel %vm3080_vm3, %v1464_v60, %v1468_v49  ;;  %v2723_v57 = vrot.slane %v2715_v45, 9  ;;  %v1478_v2 = vrot.slane %v1477_v51, 4 }
  0x5d   : > { %v2700_v50 = vcombine.low %v1455_v43, %v1469_v26  ;;  %v1663_v21 = vsel %vm3144_vm6, %v2722_v52, %v1662_v53  ;;  %v1491_v61 = vor.u32 %v1490_v40, %v1487_v46  ;;  %v1496_v62 = vrot.slane %v1494_v16, 5 }
  0x5e   : > { %2929 = vmatmul.mubr.msk.bf16.vlgmr.msra.gmra.mxu0 %vm336_vm2, %v2729_v19  ;;  %v1667_v0 = vsel %vm3144_vm6, %v2723_v57, %v1666_v58  ;;  %v1483_v10 = vsel %vm3080_vm3, %v1478_v2, %v1482_v56 }
  0x5f   : > { %2932 = vmatprep.mubr.msk.bf16.mxu0 %vm336_vm2, %v2730_v55  ;;  %v2731_v9 = vcombine.low %v1663_v21, %v1667_v0  ;;  %v1492_v11 = vrot.slane %v1491_v61, 4 }
  0x61   : > { %v1497_v12 = vsel %vm3080_vm3, %v1492_v11, %v1496_v62 }
  0x62   : > { %v2701_v17 = vcombine.low %v1483_v10, %v1497_v12 }
  0x63   : > { %2917 = vmatmul.mubr.msk.bf16.vlgmr.msra.gmra.mxu1 %vm336_vm2, %v2699_v31 }
  0x64   : > { %2920 = vmatprep.mubr.msk.bf16.mxu1 %vm336_vm2, %v2700_v50 }
  0x66   : > { %2933 = vmatmul.mubr.msk.bf16.gmra.mxu0 %vm336_vm2, %v2731_v9 }
  0x6b   : > { %2921 = vmatmul.mubr.msk.bf16.gmra.mxu1 %vm336_vm2, %v2701_v17 }
  0xe6   : > { %v2834_v18 = vpop.f32.mrf.mxu0 }
  0xe8   : > { %v383_v20 = vpop.f32.mrf.mxu0 }
  0xea   : > { %v2835_v6 = vpop.f32.mrf.mxu0 }
  0xeb   : > { %v2838_v14 = vpop.f32.mrf.mxu1 }
  0xec   : > { %v386_v7 = vpop.f32.mrf.mxu0 }
  0xed   : > { %v399_v44 = vpop.f32.mrf.mxu1 }
  0xee   : > { %v2858_v15 = vpop.f32.mrf.mxu0 }
  0xef   : > { %v3460_v23 = vpop.f32.mrf.mxu1 }
  0xf0   : > { %v657_v27 = vpop.f32.mrf.mxu0 }
  0xf1   : > { %v402_v19 = vpop.f32.mrf.mxu1 }
  0xf2   : > { %v2859_v3 = vpop.f32.mrf.mxu0 }
  0xf3   : > { %v2846_v5 = vpop.f32.mrf.mxu1 }
  0xf4   : > { %v660_v29 = vpop.f32.mrf.mxu0  ;;  %v501_v52 = vadd.f32 %v2846_v5, %v2834_v18 }
  0xf5   : > { %v492_v31 = vpop.f32.mrf.mxu1 }
  0xf6   : > { %v2862_v30 = vpop.f32.mrf.mxu0  ;;  %v493_v40 = vadd.f32 %v492_v31, %v383_v20  ;;  %v690_v2 = vadd.f32 %v2858_v15, %v501_v52 }
  0xf7   : > { %v2847_v32 = vpop.f32.mrf.mxu1 }
  0xf8   : > { %v673_v33 = vpop.f32.mrf.mxu0  ;;  %v504_v21 = vadd.f32 %v2847_v32, %v2835_v6  ;;  %v688_v0 = vadd.f32 %v657_v27, %v493_v40 }
  0xf9   : > { %v495_v13 = vpop.f32.mrf.mxu1 }
  0xfa   : > { %v3462_v28 = vpop.f32.mrf.mxu0  ;;  %v496_v9 = vadd.f32 %v495_v13, %v386_v7  ;;  %v691_v17 = vadd.f32 %v2859_v3, %v504_v21  ;;  %v1817_v3 = vlaneseq }
  0xfb   : > { %v2850_v24 = vpop.f32.mrf.mxu1 }
  0xfc   : > { %v517_v37 = vadd.f32 %v2850_v24, %v2838_v14  ;;  %v676_v36 = vpop.f32.mrf.mxu0 }
  0xfd   : > { %v508_v34 = vpop.f32.mrf.mxu1 }
  0xfe   : > { %v694_v48 = vadd.f32 %v2862_v30, %v517_v37  ;;  %v509_v25 = vadd.f32 %v508_v34, %v399_v44  ;;  %v2882_v49 = vpop.f32.mrf.mxu0 }
  0xff   : > { %v2851_v38 = vpop.f32.mrf.mxu1 }
 0x100   : > { %v3464_v35 = vadd.f32 %v673_v33, %v509_v25  ;;  %v1030_v59 = vpop.f32.mrf.mxu0  ;;  %v2988_v33 = vmov 1983009808  }
 0x101   : > { %v511_v63 = vpop.f32.mrf.mxu1  ;;  %v1815_v13 = vunpack.c.l.s4 %v2988_v33 }
 0x102   : > { %v512_v54 = vadd.f32 %v511_v63, %v402_v19  ;;  %v2883_v39 = vpop.f32.mrf.mxu0  ;;  %v689_v19 = vadd.f32 %v660_v29, %v496_v9 }
 0x103   : > { %v2870_v41 = vpop.f32.mrf.mxu1 }
 0x104   : > { %v3466_v60 = vadd.f32 %v676_v36, %v512_v54  ;;  %v1033_v22 = vpop.f32.mrf.mxu0  ;;  %v821_v10 = vadd.f32 %v2870_v41, %v690_v2  ;;  %v520_v54 = vadd.f32 %v2851_v38, %v3460_v23  ;;  %v1816_v41 = vunpack.c.0.s8 %v1815_v13 }
 0x105   : > { %v788_v4 = vpop.f32.mrf.mxu1 }
 0x106   : > { %v2886_v8 = vpop.f32.mrf.mxu0  ;;  %v819_v14 = vadd.f32 %v788_v4, %v688_v0  ;;  %v1063_v20 = vadd.f32 %v2882_v49, %v821_v10  ;;  %v1818_v4 = vshrl.u32 %v1817_v3, 7 }
 0x107   : > { %v2871_v42 = vpop.f32.mrf.mxu1 }
 0x108   : > { %v3468_v43 = vpop.f32.mrf.mxu0  ;;  %v822_v5 = vadd.f32 %v2871_v42, %v691_v17  ;;  %v1061_v15 = vadd.f32 %v1030_v59, %v819_v14  ;;  %v3500_v2 = vsub.s32 %v1816_v41, %v1818_v4 }
 0x109   : > { %v791_v55 = vpop.f32.mrf.mxu1 }
 0x10a   : > { %v3470_v1 = vpop.f32.mrf.mxu0  ;;  %v820_v30 = vadd.f32 %v791_v55, %v689_v19  ;;  %v1064_v24 = vadd.f32 %v2883_v39, %v822_v5  ;;  %v3496_v39 = vld [vmem:[%s3620_s2] ss:$0 sm:$0xff] }
 0x10b   : > { %v2874_v45 = vpop.f32.mrf.mxu1 }
 0x10c   : > { %v3472_v26 = vpop.f32.mrf.mxu0  ;;  %v825_v36 = vadd.f32 %v2874_v45, %v694_v48  ;;  %v1062_v29 = vadd.f32 %v1033_v22, %v820_v30 }
 0x10d   : > { %v804_v46 = vpop.f32.mrf.mxu1 }
 0x10e   : > { %v2906_v47 = vpop.f32.mrf.mxu0  ;;  %v823_v23 = vadd.f32 %v804_v46, %v3464_v35 }
 0x10f   : > { %v3474_v16 = vpop.f32.mrf.mxu1 }
 0x110   : > { %v1331_v50 = vpop.f32.mrf.mxu0  ;;  %v3508_v14 = vadd.f32 %v3468_v43, %v823_v23 }
 0x111   : > { %v3476_v51 = vpop.f32.mrf.mxu1 }
 0x112   : > { %v2907_v53 = vpop.f32.mrf.mxu0 }
 0x113   : > { %v2894_v56 = vpop.f32.mrf.mxu1 }
 0x114   : > { %v1334_v57 = vpop.f32.mrf.mxu0  ;;  %v1233_v27 = vadd.f32 %v2894_v56, %v1063_v20  ;;  %v1067_v56 = vadd.f32 %v2886_v8, %v825_v36 }
 0x115   : > { %v1200_v58 = vpop.f32.mrf.mxu1 }
 0x116   : > { %v3478_v61 = vpop.f32.mrf.mxu0  ;;  %v1231_v37 = vadd.f32 %v1200_v58, %v1061_v15  ;;  %v1364_v25 = vadd.f32 %v2906_v47, %v1233_v27  ;;  %v695_v58 = vadd.f32 %v3462_v28, %v520_v54 }
 0x117   : > { %v2895_v62 = vpop.f32.mrf.mxu1 }
 0x118   : > { %v3480_v11 = vpop.f32.mrf.mxu0  ;;  %v1234_v49 = vadd.f32 %v2895_v62, %v1064_v24  ;;  %v1362_v42 = vadd.f32 %v1331_v50, %v1231_v37  ;;  %v826_v9 = vadd.f32 %v3474_v16, %v695_v58 }
 0x119   : > { %v1203_v12 = vpop.f32.mrf.mxu1 }
 0x11a   : > { %v3482_v44 = vpop.f32.mrf.mxu0  ;;  %v1232_v55 = vadd.f32 %v1203_v12, %v1062_v29  ;;  %v1365_v45 = vadd.f32 %v2907_v53, %v1234_v49  ;;  %v824_v53 = vadd.f32 %v3476_v51, %v3466_v60  ;;  %v3514_v60 = vadd.f32 %v3470_v1, %v826_v9 }
 0x11b   : > { %v2898_v18 = vpop.f32.mrf.mxu1 }
 0x11c   : > { %v3484_v31 = vpop.f32.mrf.mxu0  ;;  %v1237_v38 = vadd.f32 %v2898_v18, %v1067_v56  ;;  %v1363_v21 = vadd.f32 %v1334_v57, %v1232_v55  ;;  %v3517_v51 = vadd.f32 %v3472_v26, %v824_v53 }
 0x11d   : > { %v3486_v6 = vpop.f32.mrf.mxu1 }
 0x11e   : > { %v2930_v7 = vpop.f32.mrf.mxu0  ;;  %v1368_v57 = vadd.f32 %v3478_v61, %v1237_v38 }
 0x11f   : > { %v3488_v32 = vpop.f32.mrf.mxu1 }
 0x120   : > { %v1743_v63 = vpop.f32.mrf.mxu0 }
 0x121   : > { %v3490_v34 = vpop.f32.mrf.mxu1 }
 0x122   : > { %v2931_v40 = vpop.f32.mrf.mxu0 }
 0x123   : > { %v2918_v59 = vpop.f32.mrf.mxu1 }
 0x124   : > { %v1606_v52 = vadd.f32 %v2918_v59, %v1364_v25  ;;  %v1746_v46 = vpop.f32.mrf.mxu0 }
 0x125   : > { %v1573_v48 = vpop.f32.mrf.mxu1 }
 0x126   : > { %v1776_v22 = vadd.f32 %v2930_v7, %v1606_v52  ;;  %v1604_v47 = vadd.f32 %v1573_v48, %v1362_v42  ;;  %v2934_v33 = vpop.f32.mrf.mxu0 }
 0x127   : > { %v2919_v50 = vpop.f32.mrf.mxu1 }
 0x128   : > { %v1791_v8 = vadd.f32 %v3496_v39, %v1776_v22  ;;  %v1774_v62 = vadd.f32 %v1743_v63, %v1604_v47  ;;  %v1607_v0 = vadd.f32 %v2919_v50, %v1365_v45 }
 0x129   : > { %v1576_v10 = vpop.f32.mrf.mxu1 }
 0x12a   : > { %v1799_v12 = vmax.f32 %v1791_v8, 0.0  ;;  %v1789_v28 = vadd.f32 %v3496_v39, %v1774_v62  ;;  %v1777_v17 = vadd.f32 %v2931_v40, %v1607_v0  ;;  %v1605_v35 = vadd.f32 %v1576_v10, %v1363_v21 }
 0x12b   : > { %v2922_v5 = vpop.f32.mrf.mxu1 }
 0x12c   : > { %v1847_v18 = vcombine.high %v1799_v12, %v1799_v12  ;;  %v1854_v19 = vrot.slane %v1799_v12, %v3500_v2  ;;  %v1797_v20 = vmax.f32 %v1789_v28, 0.0  ;;  %v1792_v16 = vadd.f32 %v3496_v39, %v1777_v17 }
 0x12d   : > { %v1775_v15 = vadd.f32 %v1746_v46, %v1605_v35  ;;  %v1610_v30 = vadd.f32 %v2922_v5, %v1368_v57 }
 0x12e   : > { %v1861_v43 = vrot.slane %v1847_v18, %v3500_v2  ;;  %v1862_v27 = vcombine.high %v1854_v19, %v1854_v19  ;;  %v2747_v7 = vrot.slane %v1854_v19, 9  ;;  %v1813_v61 = vcombine.high %v1797_v20, %v1797_v20 }
 0x12f   : > { %v1820_v13 = vrot.slane %v1797_v20, %v3500_v2  ;;  %v1800_v3 = vmax.f32 %v1792_v16, 0.0  ;;  %v1790_v24 = vadd.f32 %v3496_v39, %v1775_v15  ;;  %v1780_v37 = vadd.f32 %v2934_v33, %v1610_v30 }
 0x130   : > { %v1863_v36 = vcombine.high %v1861_v43, %v1861_v43  ;;  %v2748_v1 = vrot.slane %v1862_v27, 9  ;;  %v2749_v29 = vrot.slane %v1861_v43, 9  ;;  %v2085_v25 = vmax.f32 %v1854_v19, %v2747_v7 }
 0x131   : > { %v1827_v26 = vrot.slane %v1813_v61, %v3500_v2  ;;  %v1828_v49 = vcombine.high %v1820_v13, %v1820_v13  ;;  %v2739_v63 = vrot.slane %v1820_v13, 9  ;;  %v1864_v54 = vcombine.high %v1800_v3, %v1800_v3 }
 0x132   : > { %v2750_v59 = vrot.slane %v1863_v36, 9  ;;  %v2086_v41 = vmax.f32 %v1862_v27, %v2748_v1  ;;  %v2087_v4 = vmax.f32 %v1861_v43, %v2749_v29  ;;  %v1871_v42 = vrot.slane %v1800_v3, %v3500_v2 }
 0x133   : > { %v1829_v55 = vcombine.high %v1827_v26, %v1827_v26  ;;  %v2740_v52 = vrot.slane %v1828_v49, 9  ;;  %v2741_v56 = vrot.slane %v1827_v26, 9  ;;  %v2077_v48 = vmax.f32 %v1820_v13, %v2739_v63 }
 0x134   : > { %v2088_v45 = vmax.f32 %v1863_v36, %v2750_v59  ;;  %v1878_v22 = vrot.slane %v1864_v54, %v3500_v2  ;;  %v1879_v47 = vcombine.high %v1871_v42, %v1871_v42  ;;  %v2751_v40 = vrot.slane %v1871_v42, 9 }
 0x135   : > { %v2742_v58 = vrot.slane %v1829_v55, 9  ;;  %v2078_v23 = vmax.f32 %v1828_v49, %v2740_v52  ;;  %v2079_v38 = vmax.f32 %v1827_v26, %v2741_v56  ;;  %v1798_v50 = vmax.f32 %v1790_v24, 0.0 }
 0x136   : > { %v1880_v21 = vcombine.high %v1878_v22, %v1878_v22  ;;  %v2752_v8 = vrot.slane %v1879_v47, 9  ;;  %v2753_v62 = vrot.slane %v1878_v22, 9  ;;  %v2089_v0 = vmax.f32 %v1871_v42, %v2751_v40 }
 0x137   : > { %v2080_v9 = vmax.f32 %v1829_v55, %v2742_v58  ;;  %v1830_v53 = vcombine.high %v1798_v50, %v1798_v50  ;;  %v1837_v10 = vrot.slane %v1798_v50, %v3500_v2  ;;  %v1795_v12 = vadd.f32 %v3496_v39, %v1780_v37  ;;  %v1589_v50 = vpop.f32.mrf.mxu1 }
 0x138   : > { %v2754_v28 = vrot.slane %v1880_v21, 9  ;;  %v2090_v17 = vmax.f32 %v1879_v47, %v2752_v8  ;;  %v2091_v35 = vmax.f32 %v1878_v22, %v2753_v62  ;;  %v2113_v46 = vmax.f32 %v2085_v25, %v2089_v0 }
 0x139   : > { %v1844_v57 = vrot.slane %v1830_v53, %v3500_v2  ;;  %v1845_v18 = vcombine.high %v1837_v10, %v1837_v10  ;;  %v2743_v19 = vrot.slane %v1837_v10, 9  ;;  %v3528_v20 = vmax.f32 %v1795_v12, 0.0 }
 0x13a   : > { %v2092_v16 = vmax.f32 %v1880_v21, %v2754_v28  ;;  %v2114_v5 = vmax.f32 %v2086_v41, %v2090_v17  ;;  %v2115_v15 = vmax.f32 %v2087_v4, %v2091_v35  ;;  %v2129_v30 = vpack.c.bf16 %v2113_v46, %v2113_v46 }
 0x13b   : > { %v1846_v43 = vcombine.high %v1844_v57, %v1844_v57  ;;  %v2744_v27 = vrot.slane %v1845_v18, 9  ;;  %v2745_v7 = vrot.slane %v1844_v57, 9  ;;  %v2081_v61 = vmax.f32 %v1837_v10, %v2743_v19  ;;  %v1759_v19 = vpop.f32.mrf.mxu0 }
 0x13c   : > { %v2116_v33 = vmax.f32 %v2088_v45, %v2092_v16  ;;  %v2130_v13 = vpack.c.bf16 %v2114_v5, %v2114_v5  ;;  %v2131_v3 = vpack.c.bf16 %v2115_v15, %v2115_v15  ;;  %v2191_v24 = vrot.slane %v2129_v30, %v3500_v2  ;;  %v2923_v16 = vpop.f32.mrf.mxu1 }
 0x13d   : > { %v2746_v37 = vrot.slane %v1846_v43, 9  ;;  %v2082_v36 = vmax.f32 %v1845_v18, %v2744_v27  ;;  %v2083_v1 = vmax.f32 %v1844_v57, %v2745_v7  ;;  %v2109_v29 = vmax.f32 %v2077_v48, %v2081_v61 }
 0x13e   : > { %v2132_v25 = vpack.c.bf16 %v2116_v33, %v2116_v33  ;;  %v2198_v26 = vrot.slane %v2130_v13, %v3500_v2  ;;  %v2205_v49 = vrot.slane %v2131_v3, %v3500_v2  ;;  %v2303_v63 = vrot.slane %v2191_v24, %v3500_v2  ;;  %v2935_v3 = vpop.f32.mrf.mxu0  ;;  %v1592_v24 = vpop.f32.mrf.mxu1 }
 0x13f   : > { %v2084_v54 = vmax.f32 %v1846_v43, %v2746_v37  ;;  %v2110_v59 = vmax.f32 %v2078_v23, %v2082_v36  ;;  %v2111_v41 = vmax.f32 %v2079_v38, %v2083_v1  ;;  %v2125_v4 = vpack.c.bf16 %v2109_v29, %v2109_v29 }
 0x140   : > { %v1235_v42 = vadd.f32 %v3486_v6, %v3508_v14  ;;  %v2212_v55 = vrot.slane %v2132_v25, %v3500_v2  ;;  %v2310_v52 = vrot.slane %v2198_v26, %v3500_v2  ;;  %v2317_v56 = vrot.slane %v2205_v49, %v3500_v2 }
 0x141   : > { %v2112_v48 = vmax.f32 %v2080_v9, %v2084_v54  ;;  %v2126_v45 = vpack.c.bf16 %v2110_v59, %v2110_v59  ;;  %v2127_v22 = vpack.c.bf16 %v2111_v41, %v2111_v41  ;;  %v2163_v47 = vrot.slane %v2125_v4, %v3500_v2  ;;  %v1762_v4 = vpop.f32.mrf.mxu0 }
 0x142   : > { %v2324_v40 = vrot.slane %v2212_v55, %v3500_v2  ;;  %v2385_v58 = vunpack.c.l.b16 %v2303_v63  ;;  %v2386_v23 = vunpack.c.l.b16 %v2310_v52  ;;  %v2387_v38 = vunpack.c.l.b16 %v2317_v56 }
 0x143   : > { %v2128_v21 = vpack.c.bf16 %v2112_v48, %v2112_v48  ;;  %v2170_v6 = vrot.slane %v2126_v45, %v3500_v2  ;;  %v2177_v14 = vrot.slane %v2127_v22, %v3500_v2  ;;  %v1915_v8 = vcombine.high %v3528_v20, %v3528_v20 }
 0x144   : > { %v2388_v62 = vunpack.c.l.b16 %v2324_v40  ;;  %v2406_v0 = vrot.slane %v2386_v23, 7  ;;  %v2408_v9 = vrot.slane %v2387_v38, 6  ;;  %v2275_v53 = vrot.slane %v2163_v47, %v3500_v2 }
 0x145   : > { %v1238_v10 = vadd.f32 %v3488_v32, %v3514_v60  ;;  %v2184_v12 = vrot.slane %v2128_v21, %v3500_v2  ;;  %v2282_v28 = vrot.slane %v2170_v6, %v3500_v2  ;;  %v2289_v17 = vrot.slane %v2177_v14, %v3500_v2 }
 0x146   : > { %v1236_v35 = vadd.f32 %v3490_v34, %v3517_v51  ;;  %v2407_v46 = vsel %vm2398_vm7, %v2406_v0, %v2385_v58  ;;  %v2410_v57 = vrot.slane %v2388_v62, 5  ;;  %v1922_v18 = vrot.slane %v3528_v20, %v3500_v2 }
 0x147   : > { %v2409_v32 = vsel %vm2401_vm8, %v2408_v9, %v2407_v46  ;;  %v2296_v60 = vrot.slane %v2184_v12, %v3500_v2  ;;  %v2382_v5 = vunpack.c.l.b16 %v2282_v28  ;;  %v2383_v15 = vunpack.c.l.b16 %v2289_v17 }
 0x148   : > { %v1366_v30 = vadd.f32 %v3480_v11, %v1235_v42  ;;  %v2411_v43 = vsel %vm2404_vm9, %v2410_v57, %v2409_v32  ;;  %v2381_v34 = vunpack.c.l.b16 %v2275_v53  ;;  %v1929_v51 = vrot.slane %v1915_v8, %v3500_v2 }
 0x149   : > { %v2425_v27 = vpack.c.b16 %v2411_v43, %v2411_v43  ;;  %v2384_v7 = vunpack.c.l.b16 %v2296_v60  ;;  %v2397_v61 = vrot.slane %v2382_v5, 7  ;;  %v2400_v20 = vrot.slane %v2383_v15, 6 }
 0x14a   : > { %v1369_v33 = vadd.f32 %v3482_v44, %v1238_v10  ;;  %v1367_v13 = vadd.f32 %v3484_v31, %v1236_v35  ;;  %v1930_v11 = vcombine.high %v1922_v18, %v1922_v18  ;;  %v1608_v29 = vadd.f32 %v1589_v50, %v1366_v30 }
 0x14b   : > { %v2441_v37 = vrot.slane %v2425_v27, %v3500_v2  ;;  %v2399_v36 = vsel %vm2398_vm7, %v2397_v61, %v2381_v34  ;;  %v2403_v1 = vrot.slane %v2384_v7, 5  ;;  %v1931_v25 = vcombine.high %v1929_v51, %v1929_v51 }
 0x14c   : > { %v2402_v44 = vsel %vm2401_vm8, %v2400_v20, %v2399_v36  ;;  %v1611_v31 = vadd.f32 %v2923_v16, %v1369_v33  ;;  %v1778_v49 = vadd.f32 %v1759_v19, %v1608_v29  ;;  %v1609_v63 = vadd.f32 %v1592_v24, %v1367_v13 }
 0x14d   : > { %2462 = vst.msk [vmem:[%s3567_s6 + $0x2] sm:$0x3] %vm2460_vm10, %v2441_v37  ;;  %v2405_v26 = vsel %vm2404_vm9, %v2403_v1, %v2402_v44  ;;  %v2763_v59 = vrot.slane %v1922_v18, 9  ;;  %v2764_v42 = vrot.slane %v1930_v11, 9  ;;  %v2765_v48 = vrot.slane %v1929_v51, 9 }
 0x14e   : > { %v2424_v54 = vpack.c.b16 %v2405_v26, %v2405_v26  ;;  %v1781_v41 = vadd.f32 %v2935_v3, %v1611_v31  ;;  %v1793_v55 = vadd.f32 %v3496_v39, %v1778_v49  ;;  %v1779_v52 = vadd.f32 %v1762_v4, %v1609_v63 }
 0x14f   : > { %v2766_v45 = vrot.slane %v1931_v25, 9  ;;  %v2101_v58 = vmax.f32 %v1922_v18, %v2763_v59  ;;  %v2102_v38 = vmax.f32 %v1930_v11, %v2764_v42  ;;  %v2103_v14 = vmax.f32 %v1929_v51, %v2765_v48 }
 0x150   : > { %v2434_v56 = vrot.slane %v2424_v54, %v3500_v2  ;;  %v1796_v22 = vadd.f32 %v3496_v39, %v1781_v41  ;;  %v1801_v47 = vmax.f32 %v1793_v55, 0.0  ;;  %v1794_v40 = vadd.f32 %v3496_v39, %v1779_v52 }
 0x151   : > { %v2104_v8 = vmax.f32 %v1931_v25, %v2766_v45 }
 0x152   : > { %2461 = vst.msk [vmem:[%s3567_s6] sm:$0x3] %vm2460_vm10, %v2434_v56  ;;  %v1804_v23 = vmax.f32 %v1796_v22, 0.0  ;;  %v1881_v50 = vcombine.high %v1801_v47, %v1801_v47  ;;  %v1888_v21 = vrot.slane %v1801_v47, %v3500_v2  ;;  %v1802_v6 = vmax.f32 %v1794_v40, 0.0 }
 0x154   : > { %v1932_v62 = vcombine.high %v1804_v23, %v1804_v23  ;;  %v1939_v0 = vrot.slane %v1804_v23, %v3500_v2  ;;  %v1895_v9 = vrot.slane %v1881_v50, %v3500_v2  ;;  %v1896_v53 = vcombine.high %v1888_v21, %v1888_v21 }
 0x155   : > { %v2755_v10 = vrot.slane %v1888_v21, 9  ;;  %v1898_v12 = vcombine.high %v1802_v6, %v1802_v6  ;;  %v1905_v35 = vrot.slane %v1802_v6, %v3500_v2 }
 0x156   : > { %v1946_v39 = vrot.slane %v1932_v62, %v3500_v2  ;;  %v1947_v28 = vcombine.high %v1939_v0, %v1939_v0  ;;  %v2767_v17 = vrot.slane %v1939_v0, 9  ;;  %v1897_v46 = vcombine.high %v1895_v9, %v1895_v9 }
 0x157   : > { %v2756_v57 = vrot.slane %v1896_v53, 9  ;;  %v2757_v18 = vrot.slane %v1895_v9, 9  ;;  %v2093_v19 = vmax.f32 %v1888_v21, %v2755_v10  ;;  %v1912_v34 = vrot.slane %v1898_v12, %v3500_v2 }
 0x158   : > { %v1948_v16 = vcombine.high %v1946_v39, %v1946_v39  ;;  %v2768_v32 = vrot.slane %v1947_v28, 9  ;;  %v2769_v60 = vrot.slane %v1946_v39, 9  ;;  %v2105_v5 = vmax.f32 %v1939_v0, %v2767_v17 }
 0x159   : > { %v2758_v15 = vrot.slane %v1897_v46, 9  ;;  %v2094_v30 = vmax.f32 %v1896_v53, %v2756_v57  ;;  %v2095_v43 = vmax.f32 %v1895_v9, %v2757_v18  ;;  %v1913_v33 = vcombine.high %v1905_v35, %v1905_v35 }
 0x15a   : > { %v2770_v51 = vrot.slane %v1948_v16, 9  ;;  %v2106_v27 = vmax.f32 %v1947_v28, %v2768_v32  ;;  %v2107_v7 = vmax.f32 %v1946_v39, %v2769_v60  ;;  %v2121_v61 = vmax.f32 %v2101_v58, %v2105_v5 }
 0x15b   : > { %v2096_v20 = vmax.f32 %v1897_v46, %v2758_v15  ;;  %v1914_v13 = vcombine.high %v1912_v34, %v1912_v34  ;;  %v2759_v11 = vrot.slane %v1905_v35, 9  ;;  %v2760_v1 = vrot.slane %v1913_v33, 9 }
 0x15c   : > { %v2108_v3 = vmax.f32 %v1948_v16, %v2770_v51  ;;  %v2122_v24 = vmax.f32 %v2102_v38, %v2106_v27  ;;  %v2123_v37 = vmax.f32 %v2103_v14, %v2107_v7  ;;  %v2137_v36 = vpack.c.bf16 %v2121_v61, %v2121_v61 }
 0x15d   : > { %v2761_v29 = vrot.slane %v1912_v34, 9  ;;  %v2762_v44 = vrot.slane %v1914_v13, 9  ;;  %v2097_v25 = vmax.f32 %v1905_v35, %v2759_v11  ;;  %v2098_v54 = vmax.f32 %v1913_v33, %v2760_v1 }
 0x15e   : > { %v2124_v31 = vmax.f32 %v2104_v8, %v2108_v3  ;;  %v2138_v26 = vpack.c.bf16 %v2122_v24, %v2122_v24  ;;  %v2139_v49 = vpack.c.bf16 %v2123_v37, %v2123_v37  ;;  %v2247_v63 = vrot.slane %v2137_v36, %v3500_v2 }
 0x15f   : > { %v2099_v59 = vmax.f32 %v1912_v34, %v2761_v29  ;;  %v2100_v41 = vmax.f32 %v1914_v13, %v2762_v44  ;;  %v2117_v4 = vmax.f32 %v2093_v19, %v2097_v25  ;;  %v2118_v48 = vmax.f32 %v2094_v30, %v2098_v54 }
 0x160   : > { %v2140_v42 = vpack.c.bf16 %v2124_v31, %v2124_v31  ;;  %v2254_v55 = vrot.slane %v2138_v26, %v3500_v2  ;;  %v2261_v52 = vrot.slane %v2139_v49, %v3500_v2  ;;  %v2359_v56 = vrot.slane %v2247_v63, %v3500_v2 }
 0x161   : > { %v2119_v45 = vmax.f32 %v2095_v43, %v2099_v59  ;;  %v2120_v22 = vmax.f32 %v2096_v20, %v2100_v41  ;;  %v2133_v47 = vpack.c.bf16 %v2117_v4, %v2117_v4  ;;  %v2134_v38 = vpack.c.bf16 %v2118_v48, %v2118_v48 }
 0x162   : > { %v2268_v40 = vrot.slane %v2140_v42, %v3500_v2  ;;  %v2366_v58 = vrot.slane %v2254_v55, %v3500_v2  ;;  %v2373_v23 = vrot.slane %v2261_v52, %v3500_v2  ;;  %v2393_v0 = vunpack.c.l.b16 %v2359_v56 }
 0x163   : > { %v2135_v50 = vpack.c.bf16 %v2119_v45, %v2119_v45  ;;  %v2136_v21 = vpack.c.bf16 %v2120_v22, %v2120_v22  ;;  %v2219_v6 = vrot.slane %v2133_v47, %v3500_v2  ;;  %v2226_v9 = vrot.slane %v2134_v38, %v3500_v2 }
 0x164   : > { %v2380_v14 = vrot.slane %v2268_v40, %v3500_v2  ;;  %v2394_v8 = vunpack.c.l.b16 %v2366_v58  ;;  %v2395_v62 = vunpack.c.l.b16 %v2373_v23 }
 0x165   : > { %v2233_v53 = vrot.slane %v2135_v50, %v3500_v2  ;;  %v2240_v10 = vrot.slane %v2136_v21, %v3500_v2  ;;  %v2331_v17 = vrot.slane %v2219_v6, %v3500_v2  ;;  %v2338_v35 = vrot.slane %v2226_v9, %v3500_v2 }
 0x166   : > { %v2396_v12 = vunpack.c.l.b16 %v2380_v14  ;;  %v2418_v39 = vrot.slane %v2394_v8, 7  ;;  %v2420_v28 = vrot.slane %v2395_v62, 6 }
 0x167   : > { %v2345_v46 = vrot.slane %v2233_v53, %v3500_v2  ;;  %v2352_v57 = vrot.slane %v2240_v10, %v3500_v2  ;;  %v2390_v32 = vunpack.c.l.b16 %v2338_v35  ;;  %v2389_v30 = vunpack.c.l.b16 %v2331_v17 }
 0x168   : > { %v2419_v18 = vsel %vm2398_vm7, %v2418_v39, %v2393_v0  ;;  %v2422_v19 = vrot.slane %v2396_v12, 5 }
 0x169   : > { %v2421_v16 = vsel %vm2401_vm8, %v2420_v28, %v2419_v18  ;;  %v2391_v60 = vunpack.c.l.b16 %v2345_v46  ;;  %v2392_v5 = vunpack.c.l.b16 %v2352_v57  ;;  %v2412_v34 = vrot.slane %v2390_v32, 7 }
 0x16a   : > { %v2423_v15 = vsel %vm2404_vm9, %v2422_v19, %v2421_v16 }
 0x16b   : > { %v2427_v43 = vpack.c.b16 %v2423_v15, %v2423_v15  ;;  %v2414_v51 = vrot.slane %v2391_v60, 6  ;;  %v2416_v27 = vrot.slane %v2392_v5, 5  ;;  %v2413_v61 = vsel %vm2398_vm7, %v2412_v34, %v2389_v30 }
 0x16d   : > { %v2455_v7 = vrot.slane %v2427_v43, %v3500_v2  ;;  %v2415_v20 = vsel %vm2401_vm8, %v2414_v51, %v2413_v61 }
 0x16e   : > { %v2417_v33 = vsel %vm2404_vm9, %v2416_v27, %v2415_v20 }
 0x16f   : > { %2464 = vst.msk [vmem:[%s3567_s6 + $0x6] sm:$0x3] %vm2460_vm10, %v2455_v7  ;;  %v2426_v13 = vpack.c.b16 %v2417_v33, %v2417_v33 }
 0x171   : > { %v2448_v11 = vrot.slane %v2426_v13, %v3500_v2 }
 0x173   : > { %2463 = vst.msk [vmem:[%s3567_s6 + $0x4] sm:$0x3] %vm2460_vm10, %v2448_v11 }
 0x174 PF: > { %s13_s12 = sadd.s32 1, %s2986_s12  }
 0x175   : > { %p10_p4 = scmp.ge.s32.totalorder %s13_s12, 4  }
 0x177   :  { %12 = sbr.rel (!%p10_p4) target bundleno = 1 (0x1), region = 72 }

// kernel: tile.18
= control target key start
LH: loop header
LB: loop body
LE: loop exit
PB: predicated region body
PF: predicated region fallthrough
CT: control target
= control target key end

     0   :  { %s22_s0 = inlined_call_operand.vmem [shape: f32[64], index: 0, kind: input, shape index: {}]   ;;  %s23_s1 = inlined_call_operand.vmem [shape: f32[4,64], index: 1, kind: output, shape index: {}]  }
   0x1   :  { %v4_v0 = vld [vmem:[%s22_s0] ss:$0 sm:$0xff] }
   0x2   :  { %5 = vst [vmem:[%s23_s1] sm:$0xf] %v4_v0 }

// kernel: tile.19
= control target key start
LH: loop header
LB: loop body
LE: loop exit
PB: predicated region body
PF: predicated region fallthrough
CT: control target
= control target key end

     0   :  { %s7_s8 = smov 3  ;;  %vm9_vm0 = vcmask 523264   ;;  %s34_s9 = smov 64   ;;  %vm16_vm1 = vcmask 1048064   ;;  %s54_s0 = inlined_call_operand.vmem [shape: f32[4,64], index: 0, kind: input, shape index: {}]   ;;  %s55_s1 = inlined_call_operand.vmem [shape: f32[1,256], index: 1, kind: output, shape index: {}]  }
   0x1   :  { %v5_v0 = vld [vmem:[%s54_s0] sm:$0xf]  ;;  %s12_s0 = smov 3 }
   0x2   :  { %6 = vst [vmem:[#allocation1] sm:$0xf] %v5_v0 }
   0x9   :  { %v13_v1 = vld [vmem:[#allocation1 + $0x1] ss:$2 sm:%s12_s0]   ;;  %v8_v2 = vld [vmem:[#allocation1] ss:$2 sm:%s7_s8]  }
   0xa   :  { %14 = vrot.lane.b32.xlu0 %v13_v1, %s34_s9  ;;  %10 = vst.msk [vmem:[#allocation0] ss:$8 sm:$0x3] %vm9_vm0, %v8_v2  }
  0x7c   :  { %v15_v3 = vpop.permute.xlu0 %14  }
  0x7d   :  { %17 = vst.msk [vmem:[#allocation0] ss:$8 sm:$0x3] %vm16_vm1, %v15_v3  }
  0x84   :  { %v22_v4 = vld [vmem:[#allocation0] sm:$0x1]  ;;  %v27_v5 = vld [vmem:[#allocation0 + $0x8] sm:$0x1] }
  0x85   :  { %25 = vst [vmem:[%s55_s1] sm:$0x1] %v22_v4  ;;  %32 = vst [vmem:[%s55_s1 + $0x1] sm:$0x1] %v27_v5 }

// kernel: tile.23
= control target key start
LH: loop header
LB: loop body
LE: loop exit
PB: predicated region body
PF: predicated region fallthrough
CT: control target
= control target key end

     0   :  { %s22_s0 = inlined_call_operand.vmem [shape: f32[32], index: 0, kind: input, shape index: {}]   ;;  %s23_s1 = inlined_call_operand.vmem [shape: f32[4,32], index: 1, kind: output, shape index: {}]  }
   0x1   :  { %v4_v0 = vld [vmem:[%s22_s0] ss:$0 sm:$0xff] }
   0x2   :  { %5 = vst [vmem:[%s23_s1] sm:$0xf] %v4_v0 }

// kernel: tile.24
= control target key start
LH: loop header
LB: loop body
LE: loop exit
PB: predicated region body
PF: predicated region fallthrough
CT: control target
= control target key end

     0   :  { %vm8_vm0 = vcmask 261120   ;;  %s40_s8 = smov 32   ;;  %s41_s9 = smov 64   ;;  %vm14_vm1 = vcmask 1048320   ;;  %vm20_vm2 = vcmask 785920   ;;  %vm26_vm3 = vcmask 523520   ;;  %s58_s0 = inlined_call_operand.vmem [shape: f32[4,32], index: 0, kind: input, shape index: {}]   ;;  %s59_s1 = inlined_call_operand.vmem [shape: f32[1,128], index: 1, kind: output, shape index: {}]  }
   0x1   :  { %v5_v0 = vld [vmem:[%s58_s0] sm:$0xf]  ;;  %s39_s0 = smov 96  }
   0x2   :  { %6 = vst [vmem:[#allocation1] sm:$0xf] %v5_v0 }
   0x9   :  { %v11_v1 = vld [vmem:[#allocation1 + $0x3] sm:$0x1]   ;;  %v23_v2 = vld [vmem:[#allocation1 + $0x1] sm:$0x1]   ;;  %v7_v3 = vld [vmem:[#allocation1] sm:$0x1]  }
   0xa   :  { %12 = vrot.lane.b32.xlu0 %v11_v1, %s39_s0  ;;  %24 = vrot.lane.b32.xlu1 %v23_v2, %s40_s8  ;;  %v17_v4 = vld [vmem:[#allocation1 + $0x2] sm:$0x1]   ;;  %9 = vst.msk [vmem:[#allocation0] sm:$0x1] %vm8_vm0, %v7_v3  }
   0xe   :  { %18 = vrot.lane.b32.xlu0 %v17_v4, %s41_s9 }
  0x7c   :  { %v13_v5 = vpop.permute.xlu0 %12   ;;  %v25_v6 = vpop.permute.xlu1 %24  }
  0x7d   :  { %15 = vst.msk [vmem:[#allocation0] sm:$0x1] %vm14_vm1, %v13_v5  }
  0x80   :  { %v19_v7 = vpop.permute.xlu0 %18  }
  0x81   :  { %21 = vst.msk [vmem:[#allocation0] sm:$0x1] %vm20_vm2, %v19_v7  }
  0x82   :  { %27 = vst.msk [vmem:[#allocation0] sm:$0x1] %vm26_vm3, %v25_v6  }
  0x89   :  { %v32_v8 = vld [vmem:[#allocation0] sm:$0x1] }
  0x8a   :  { %35 = vst [vmem:[%s59_s1] sm:$0x1] %v32_v8 }

// kernel: forward.10
= control target key start
LH: loop header
LB: loop body
LE: loop exit
PB: predicated region body
PF: predicated region fallthrough
CT: control target
= control target key end

     0   :  { %v223_v1 = vmov 0   ;;  %v34_v18 = vlaneseq  ;;  %s301_s1 = inlined_call_operand.vmem [shape: bf16[128,256], index: 1, kind: input, shape index: {}]   ;;  %s302_s0 = inlined_call_operand.vmem [shape: bf16[8,128], index: 0, kind: input, shape index: {}]   ;;  %s303_s2 = inlined_call_operand.vmem [shape: f32[1,256], index: 2, kind: input, shape index: {}]   ;;  %s304_s3 = inlined_call_operand.vmem [shape: bf16[8,256], index: 3, kind: output, shape index: {}]  }
   0x1   :  { %v199_v0 = vld [vmem:[%s301_s1 + $0x74] ss:$8 sps:$4 sm:$0xff]   ;;  %156 = vmatprep.mubr.bf16.mxu0 %v223_v1  ;;  %v201_v2 = vld [vmem:[%s301_s1 + $0x70] ss:$8 sps:$4 sm:$0xff]   ;;  %v202_v3 = vld [vmem:[%s301_s1 + $0x64] ss:$8 sps:$4 sm:$0xff]  }
   0x2   :  { %124 = vmatprep.subr.bf16.mxu0 %v199_v0  ;;  %v204_v4 = vld [vmem:[%s301_s1 + $0x60] ss:$8 sps:$4 sm:$0xff]   ;;  %v205_v5 = vld [vmem:[%s301_s1 + $0x54] ss:$8 sps:$4 sm:$0xff]   ;;  %v207_v6 = vld [vmem:[%s301_s1 + $0x50] ss:$8 sps:$4 sm:$0xff]  }
   0x3   :  { %125 = vmatpush1.bf16.msra.mxu0 %v201_v2  ;;  %v208_v7 = vld [vmem:[%s301_s1 + $0x44] ss:$8 sps:$4 sm:$0xff]   ;;  %v210_v8 = vld [vmem:[%s301_s1 + $0x40] ss:$8 sps:$4 sm:$0xff]   ;;  %v211_v9 = vld [vmem:[%s301_s1 + $0x34] ss:$8 sps:$4 sm:$0xff]  }
   0x4   :  { %126 = vmatprep.subr.bf16.mxu0 %v202_v3  ;;  %v213_v10 = vld [vmem:[%s301_s1 + $0x30] ss:$8 sps:$4 sm:$0xff]   ;;  %v214_v11 = vld [vmem:[%s301_s1 + $0x24] ss:$8 sps:$4 sm:$0xff]   ;;  %v216_v12 = vld [vmem:[%s301_s1 + $0x20] ss:$8 sps:$4 sm:$0xff]  }
   0x5   :  { %v217_v13 = vld [vmem:[%s301_s1 + $0x14] ss:$8 sps:$4 sm:$0xff]   ;;  %v219_v14 = vld [vmem:[%s301_s1 + $0x10] ss:$8 sps:$4 sm:$0xff]   ;;  %v220_v15 = vld [vmem:[%s301_s1 + $0x4] ss:$8 sps:$4 sm:$0xff]  }
   0x6   :  { %v222_v16 = vld [vmem:[%s301_s1] ss:$8 sps:$4 sm:$0xff]   ;;  %v35_v19 = vshrl.u32 %v34_v18, 7 }
   0x7   :  { %127 = vmatpush1.bf16.msra.mxu0 %v204_v4  ;;  %v15_v17 = vld [vmem:[%s302_s0] sm:$0xf] }
   0x8   :  { %128 = vmatprep.subr.bf16.mxu0 %v205_v5  ;;  %v36_v20 = vsub.s32 0, %v35_v19  ;;  %v32_v21 = vld [vmem:[%s303_s2] sm:$0x3]  ;;  %v40_v22 = vsub.s32 1, %v35_v19 }
   0xa   :  { %v37_v23 = vrot.slane %v32_v21, %v36_v20  ;;  %v41_v24 = vrot.slane %v32_v21, %v40_v22 }
   0xb   :  { %129 = vmatpush1.bf16.msra.mxu0 %v207_v6 }
   0xc   :  { %130 = vmatprep.subr.bf16.mxu0 %v208_v7 }
   0xf   :  { %131 = vmatpush1.bf16.msra.mxu0 %v210_v8 }
  0x10   :  { %132 = vmatprep.subr.bf16.mxu0 %v211_v9 }
  0x13   :  { %133 = vmatpush1.bf16.msra.mxu0 %v213_v10 }
  0x14   :  { %134 = vmatprep.subr.bf16.mxu0 %v214_v11 }
  0x17   :  { %135 = vmatpush1.bf16.msra.mxu0 %v216_v12 }
  0x18   :  { %136 = vmatprep.subr.bf16.mxu0 %v217_v13 }
  0x1b   :  { %137 = vmatpush1.bf16.msra.mxu0 %v219_v14 }
  0x1c   :  { %138 = vmatprep.subr.bf16.mxu0 %v220_v15 }
  0x1f   :  { %139 = vmatpush1.bf16.msra.mxu0 %v222_v16 }
  0x22   :  { %157 = vmatmul.mubr.bf16.vlgmr.msra.gmra.mxu0 %v15_v17 }
  0xe2   :  { %v158_v25 = vpop.f32.mrf.mxu0 }
  0xe3   :  { %v159_v26 = vadd.f32 %v158_v25, %v37_v23 }
  0xe4   :  { %v160_v27 = vpop.f32.mrf.mxu0 }
  0xe5   :  { %v161_v28 = vadd.f32 %v160_v27, %v41_v24  ;;  %v165_v30 = vmax.f32 %v159_v26, 0.0 }
  0xe6   :  { %v162_v29 = vpop.f32.mrf.mxu0 }
  0xe7   :  { %v166_v31 = vmax.f32 %v161_v28, 0.0 }
  0xe8   :  { %v163_v32 = vpop.f32.mrf.mxu0 }
  0xe9   :  { %v197_v33 = vpack.c.bf16 %v166_v31, %v165_v30 }
  0xeb   :  { %175 = vst [vmem:[%s304_s3] sm:$0xff] %v197_v33 }

// kernel: forward.11
= control target key start
LH: loop header
LB: loop body
LE: loop exit
PB: predicated region body
PF: predicated region fallthrough
CT: control target
= control target key end

     0   :  { %vm68_vm0 = vcmask 523264   ;;  %s251_s1 = inlined_call_operand.vmem [shape: bf16[64,128], index: 1, kind: input, shape index: {}]   ;;  %s252_s0 = inlined_call_operand.vmem [shape: bf16[32,64], index: 0, kind: input, shape index: {}]   ;;  %s253_s2 = inlined_call_operand.vmem [shape: f32[1,128], index: 2, kind: input, shape index: {}]   ;;  %s254_s3 = inlined_call_operand.vmem [shape: bf16[32,128], index: 3, kind: output, shape index: {}]  }
   0x1   :  { %v198_v0 = vld [vmem:[%s251_s1 + $0x18] sm:$0xff]   ;;  %v199_v1 = vld [vmem:[%s251_s1 + $0x10] sm:$0xff]   ;;  %v200_v2 = vld [vmem:[%s251_s1 + $0x8] sm:$0xff]  }
   0x2   :  { %186 = vmatprep.subr.bf16.mxu0 %v198_v0  ;;  %v202_v3 = vld [vmem:[%s252_s0] sm:$0xff]   ;;  %v203_v5 = vld [vmem:[%s252_s0 + $0x8] sm:$0xff]  }
   0x3   :  { %187 = vmatpush3.bf16.msra.mxu0 %v198_v0  ;;  %194 = vmatprep.mubr.msk.bf16.mxu0 %vm68_vm0, %v202_v3  ;;  %v201_v4 = vld [vmem:[%s251_s1] sm:$0xff]  }
   0x4   :  { %188 = vmatprep.subr.bf16.mxu0 %v199_v1  ;;  %v152_v7 = vld [vmem:[%s253_s2] ss:$0 sm:$0xff] }
   0x7   :  { %189 = vmatpush3.bf16.msra.mxu0 %v199_v1 }
   0x8   :  { %190 = vmatprep.subr.bf16.mxu0 %v200_v2 }
   0xb   :  { %191 = vmatpush3.bf16.msra.mxu0 %v200_v2 }
   0xc   :  { %192 = vmatprep.subr.bf16.mxu0 %v201_v4 }
   0xf   :  { %193 = vmatpush3.bf16.msra.mxu0 %v201_v4 }
  0x12   :  { %195 = vmatmul.mubr.msk.bf16.vlgmr.msra.gmra.mxu0 %vm68_vm0, %v203_v5 }
  0xd2   :  { %v196_v6 = vpop.f32.mrf.mxu0 }
  0xd3   :  { %v118_v9 = vadd.f32 %v196_v6, %v152_v7 }
  0xd4   :  { %v109_v8 = vpop.f32.mrf.mxu0 }
  0xd5   :  { %v110_v11 = vadd.f32 %v152_v7, %v109_v8  ;;  %v126_v14 = vmax.f32 %v118_v9, 0.0 }
  0xd6   :  { %v197_v10 = vpop.f32.mrf.mxu0 }
  0xd7   :  { %v121_v12 = vadd.f32 %v197_v10, %v152_v7  ;;  %v124_v17 = vmax.f32 %v110_v11, 0.0 }
  0xd8   :  { %v112_v13 = vpop.f32.mrf.mxu0 }
  0xd9   :  { %v127_v15 = vmax.f32 %v121_v12, 0.0  ;;  %v113_v16 = vadd.f32 %v152_v7, %v112_v13 }
  0xdb   :  { %v177_v18 = vpack.c.bf16 %v127_v15, %v126_v14  ;;  %v125_v19 = vmax.f32 %v113_v16, 0.0 }
  0xdd   :  { %179 = vst [vmem:[%s254_s3 + $0x8] sm:$0xff] %v177_v18   ;;  %v172_v20 = vpack.c.bf16 %v125_v19, %v124_v17 }
  0xdf   :  { %173 = vst [vmem:[%s254_s3] sm:$0xff] %v172_v20  }

// kernel: tile.28
= control target key start
LH: loop header
LB: loop body
LE: loop exit
PB: predicated region body
PF: predicated region fallthrough
CT: control target
= control target key end

     0   :  { %s22_s0 = inlined_call_operand.vmem [shape: f32[3], index: 0, kind: input, shape index: {}]   ;;  %s23_s1 = inlined_call_operand.vmem [shape: f32[4,3], index: 1, kind: output, shape index: {}]  }
   0x1   :  { %v4_v0 = vld [vmem:[%s22_s0] ss:$0 sm:$0xff] }
   0x2   :  { %5 = vst [vmem:[%s23_s1] sm:$0xf] %v4_v0 }

// kernel: tile.29
= control target key start
LH: loop header
LB: loop body
LE: loop exit
PB: predicated region body
PF: predicated region fallthrough
CT: control target
= control target key end

     0   :  { %vm8_vm0 = vcmask 23552   ;;  %s40_s8 = smov 3   ;;  %s41_s9 = smov 6   ;;  %vm14_vm1 = vcmask 97352   ;;  %vm20_vm2 = vcmask 72752   ;;  %vm26_vm3 = vcmask 48152   ;;  %s58_s0 = inlined_call_operand.vmem [shape: f32[4,3], index: 0, kind: input, shape index: {}]   ;;  %s59_s1 = inlined_call_operand.vmem [shape: f32[1,12], index: 1, kind: output, shape index: {}]  }
   0x1   :  { %v5_v0 = vld [vmem:[%s58_s0] sm:$0xf]  ;;  %s39_s0 = smov 9  }
   0x2   :  { %6 = vst [vmem:[#allocation1] sm:$0xf] %v5_v0 }
   0x9   :  { %v11_v1 = vld [vmem:[#allocation1 + $0x3] sm:$0x1]   ;;  %v23_v2 = vld [vmem:[#allocation1 + $0x1] sm:$0x1]   ;;  %v7_v3 = vld [vmem:[#allocation1] sm:$0x1]  }
   0xa   :  { %12 = vrot.lane.b32.xlu0 %v11_v1, %s39_s0  ;;  %24 = vrot.lane.b32.xlu1 %v23_v2, %s40_s8  ;;  %v17_v4 = vld [vmem:[#allocation1 + $0x2] sm:$0x1]   ;;  %9 = vst.msk [vmem:[#allocation0] sm:$0x1] %vm8_vm0, %v7_v3  }
   0xe   :  { %18 = vrot.lane.b32.xlu0 %v17_v4, %s41_s9 }
  0x7c   :  { %v13_v5 = vpop.permute.xlu0 %12   ;;  %v25_v6 = vpop.permute.xlu1 %24  }
  0x7d   :  { %15 = vst.msk [vmem:[#allocation0] sm:$0x1] %vm14_vm1, %v13_v5  }
  0x80   :  { %v19_v7 = vpop.permute.xlu0 %18  }
  0x81   :  { %21 = vst.msk [vmem:[#allocation0] sm:$0x1] %vm20_vm2, %v19_v7  }
  0x82   :  { %27 = vst.msk [vmem:[#allocation0] sm:$0x1] %vm26_vm3, %v25_v6  }
  0x89   :  { %v32_v8 = vld [vmem:[#allocation0] sm:$0x1] }
  0x8a   :  { %35 = vst [vmem:[%s59_s1] sm:$0x1] %v32_v8 }

// kernel: forward.12
= control target key start
LH: loop header
LB: loop body
LE: loop exit
PB: predicated region body
PF: predicated region fallthrough
CT: control target
= control target key end

     0   :  { %vm94_vm0 = vcmask 261120   ;;  %vm232_vm1 = vcmask 97280   ;;  %s473_s1 = inlined_call_operand.vmem [shape: bf16[32,12], index: 1, kind: input, shape index: {}]   ;;  %s474_s0 = inlined_call_operand.vmem [shape: bf16[128,32], index: 0, kind: input, shape index: {}]   ;;  %s475_s2 = inlined_call_operand.vmem [shape: f32[1,12], index: 2, kind: input, shape index: {}]   ;;  %s476_s3 = inlined_call_operand.vmem [shape: f32[128,12], index: 3, kind: output, shape index: {}]  }
   0x1   :  { %v306_v0 = vld [vmem:[%s473_s1 + $0x8] sm:$0xff]   ;;  %v307_v1 = vld [vmem:[%s473_s1] sm:$0xff]   ;;  %v312_v6 = vld [vmem:[%s474_s0 + $0x10] sm:$0xff]  }
   0x2   :  { %282 = vmatprep.subr.bf16.mxu0 %v306_v0  ;;  %302 = vmatprep.subr.bf16.mxu1 %v306_v0  ;;  %v308_v2 = vld [vmem:[%s474_s0] sm:$0xff]   ;;  %v310_v4 = vld [vmem:[%s474_s0 + $0x8] sm:$0xff]   ;;  %v313_v7 = vld [vmem:[%s474_s0 + $0x30] sm:$0xff]  }
   0x3   :  { %283 = vmatpush3.bf16.msra.mxu0 %v306_v0  ;;  %304 = vmatpush3.bf16.msra.mxu1 %v306_v0  ;;  %v309_v3 = vld [vmem:[%s474_s0 + $0x20] sm:$0xff]   ;;  %v311_v5 = vld [vmem:[%s474_s0 + $0x28] sm:$0xff]   ;;  %v314_v8 = vld [vmem:[%s474_s0 + $0x18] sm:$0xff]  }
   0x4   :  { %284 = vmatprep.subr.bf16.mxu0 %v307_v1  ;;  %303 = vmatprep.subr.bf16.mxu1 %v307_v1  ;;  %v315_v9 = vld [vmem:[%s474_s0 + $0x38] sm:$0xff]   ;;  %v253_v10 = vld [vmem:[%s475_s2] ss:$0 sm:$0xff] }
   0x5   :  { %286 = vmatprep.mubr.msk.bf16.mxu0 %vm94_vm0, %v308_v2  ;;  %294 = vmatprep.mubr.msk.bf16.mxu1 %vm94_vm0, %v309_v3 }
   0x7   :  { %285 = vmatpush3.bf16.msra.mxu0 %v307_v1  ;;  %305 = vmatpush3.bf16.msra.mxu1 %v307_v1 }
   0xa   :  { %287 = vmatmul.mubr.msk.bf16.vlgmr.msra.gmra.mxu0 %vm94_vm0, %v310_v4  ;;  %295 = vmatmul.mubr.msk.bf16.vlgmr.msra.gmra.mxu1 %vm94_vm0, %v311_v5 }
   0xb   :  { %290 = vmatprep.mubr.msk.bf16.mxu0 %vm94_vm0, %v312_v6  ;;  %298 = vmatprep.mubr.msk.bf16.mxu1 %vm94_vm0, %v313_v7 }
  0x12   :  { %291 = vmatmul.mubr.msk.bf16.gmra.mxu0 %vm94_vm0, %v314_v8  ;;  %299 = vmatmul.mubr.msk.bf16.gmra.mxu1 %vm94_vm0, %v315_v9 }
  0xca   :  { %v288_v11 = vpop.f32.mrf.mxu0  ;;  %v296_v12 = vpop.f32.mrf.mxu1 }
  0xcb   :  { %v162_v13 = vadd.f32 %v288_v11, %v253_v10  ;;  %v194_v14 = vadd.f32 %v296_v12, %v253_v10 }
  0xcc   :  { %v153_v15 = vpop.f32.mrf.mxu0  ;;  %v185_v16 = vpop.f32.mrf.mxu1 }
  0xcd   :  { %316 = vtanh.f32 %v162_v13  ;;  %v154_v17 = vadd.f32 %v253_v10, %v153_v15  ;;  %v186_v18 = vadd.f32 %v253_v10, %v185_v16 }
  0xce   :  { %318 = vtanh.f32 %v194_v14  ;;  %v289_v19 = vpop.f32.mrf.mxu0  ;;  %v297_v20 = vpop.f32.mrf.mxu1 }
  0xcf   :  { %320 = vtanh.f32 %v154_v17  ;;  %v165_v21 = vadd.f32 %v289_v19, %v253_v10  ;;  %v197_v22 = vadd.f32 %v297_v20, %v253_v10 }
  0xd0   :  { %322 = vtanh.f32 %v186_v18  ;;  %v156_v23 = vpop.f32.mrf.mxu0  ;;  %v188_v24 = vpop.f32.mrf.mxu1 }
  0xd1   :  { %324 = vtanh.f32 %v165_v21  ;;  %v157_v25 = vadd.f32 %v253_v10, %v156_v23  ;;  %v189_v26 = vadd.f32 %v253_v10, %v188_v24 }
  0xd2   :  { %326 = vtanh.f32 %v197_v22  ;;  %v292_v27 = vpop.f32.mrf.mxu0  ;;  %v300_v28 = vpop.f32.mrf.mxu1 }
  0xd3   :  { %328 = vtanh.f32 %v157_v25  ;;  %v178_v29 = vadd.f32 %v292_v27, %v253_v10  ;;  %v210_v30 = vadd.f32 %v300_v28, %v253_v10 }
  0xd4   :  { %330 = vtanh.f32 %v189_v26  ;;  %v169_v31 = vpop.f32.mrf.mxu0  ;;  %v201_v32 = vpop.f32.mrf.mxu1 }
  0xd5   :  { %332 = vtanh.f32 %v178_v29  ;;  %v170_v33 = vadd.f32 %v253_v10, %v169_v31  ;;  %v202_v34 = vadd.f32 %v253_v10, %v201_v32 }
  0xd6   :  { %334 = vtanh.f32 %v210_v30  ;;  %v293_v35 = vpop.f32.mrf.mxu0  ;;  %v301_v36 = vpop.f32.mrf.mxu1 }
  0xd7   :  { %336 = vtanh.f32 %v170_v33  ;;  %v181_v37 = vadd.f32 %v293_v35, %v253_v10  ;;  %v213_v38 = vadd.f32 %v301_v36, %v253_v10 }
  0xd8   :  { %338 = vtanh.f32 %v202_v34  ;;  %v172_v39 = vpop.f32.mrf.mxu0  ;;  %v204_v40 = vpop.f32.mrf.mxu1 }
  0xd9   :  { %340 = vtanh.f32 %v181_v37  ;;  %v173_v41 = vadd.f32 %v253_v10, %v172_v39  ;;  %v205_v42 = vadd.f32 %v253_v10, %v204_v40 }
  0xda   :  { %v317_v43 = vpop.eup %316  ;;  %342 = vtanh.f32 %v213_v38 }
  0xdb   :  { %v319_v44 = vpop.eup %318  ;;  %235 = vst.msk [vmem:[%s476_s3 + $0x10] sm:$0xff] %vm232_vm1, %v317_v43  ;;  %344 = vtanh.f32 %v173_v41 }
  0xdc   :  { %v321_v45 = vpop.eup %320  ;;  %243 = vst.msk [vmem:[%s476_s3 + $0x50] sm:$0xff] %vm232_vm1, %v319_v44  ;;  %346 = vtanh.f32 %v205_v42 }
  0xdd   :  { %v323_v46 = vpop.eup %322  ;;  %233 = vst.msk [vmem:[%s476_s3] sm:$0xff] %vm232_vm1, %v321_v45 }
  0xde   :  { %v325_v47 = vpop.eup %324  ;;  %241 = vst.msk [vmem:[%s476_s3 + $0x40] sm:$0xff] %vm232_vm1, %v323_v46 }
  0xdf   :  { %v327_v48 = vpop.eup %326  ;;  %236 = vst.msk [vmem:[%s476_s3 + $0x18] sm:$0xff] %vm232_vm1, %v325_v47 }
  0xe0   :  { %v329_v49 = vpop.eup %328  ;;  %244 = vst.msk [vmem:[%s476_s3 + $0x58] sm:$0xff] %vm232_vm1, %v327_v48 }
  0xe1   :  { %v331_v50 = vpop.eup %330  ;;  %234 = vst.msk [vmem:[%s476_s3 + $0x8] sm:$0xff] %vm232_vm1, %v329_v49 }
  0xe2   :  { %v333_v51 = vpop.eup %332  ;;  %242 = vst.msk [vmem:[%s476_s3 + $0x48] sm:$0xff] %vm232_vm1, %v331_v50 }
  0xe3   :  { %v335_v52 = vpop.eup %334  ;;  %239 = vst.msk [vmem:[%s476_s3 + $0x30] sm:$0xff] %vm232_vm1, %v333_v51 }
  0xe4   :  { %v337_v53 = vpop.eup %336  ;;  %247 = vst.msk [vmem:[%s476_s3 + $0x70] sm:$0xff] %vm232_vm1, %v335_v52 }
  0xe5   :  { %v339_v54 = vpop.eup %338  ;;  %237 = vst.msk [vmem:[%s476_s3 + $0x20] sm:$0xff] %vm232_vm1, %v337_v53 }
  0xe6   :  { %v341_v55 = vpop.eup %340  ;;  %245 = vst.msk [vmem:[%s476_s3 + $0x60] sm:$0xff] %vm232_vm1, %v339_v54 }
  0xe7   :  { %v343_v56 = vpop.eup %342  ;;  %240 = vst.msk [vmem:[%s476_s3 + $0x38] sm:$0xff] %vm232_vm1, %v341_v55 }
  0xe8   :  { %v345_v57 = vpop.eup %344  ;;  %248 = vst.msk [vmem:[%s476_s3 + $0x78] sm:$0xff] %vm232_vm1, %v343_v56 }
  0xe9   :  { %v347_v58 = vpop.eup %346  ;;  %238 = vst.msk [vmem:[%s476_s3 + $0x28] sm:$0xff] %vm232_vm1, %v345_v57 }
  0xea   :  { %246 = vst.msk [vmem:[%s476_s3 + $0x68] sm:$0xff] %vm232_vm1, %v347_v58 }

// kernel: forward.7
= control target key start
LH: loop header
LB: loop body
LE: loop exit
PB: predicated region body
PF: predicated region fallthrough
CT: control target
= control target key end

     0   :  { %s7964_s12 = smov 0   ;;  %s10641_s0 = inlined_call_operand.vmem [shape: bf16[2,18,18,3], index: 0, kind: input, shape index: {}]   ;;  %s10642_s1 = inlined_call_operand.vmem [shape: bf16[3,3,3,32], index: 1, kind: input, shape index: {}]   ;;  %s10643_s2 = inlined_call_operand.vmem [shape: f32[1,32], index: 2, kind: input, shape index: {}]   ;;  %s10644_s3 = inlined_call_operand.vmem [shape: bf16[2,8,8,32], index: 3, kind: output, shape index: {}]  }
   0x1 LB: > { %s6604_s13 = sadd.s32 4294967295, %s7940_s12   ;;  %p6608_p0 = scmp.ge.s32.totalorder %s7940_s12, 1  ;;  %s7940_s12 = sphi %s7964_s12, %s13_s12  }
   0x2   : > { %p137_p1 = scmp.lt.s32.totalorder %s7940_s12, 3 }
   0x4   : > { %p138_p2 = pnand %p6608_p0, %p137_p1 }
   0x6   : > { %141 = sbr.rel (%p138_p2) target bundleno = 715 (0x2cb), region = 32 }
   0xb   : > { %v6612_v0 = vld [vmem:[%s10642_s1 + $0x2] sm:$0x3]  ;;  %vm707_vm0 = vcmask 1040384   ;;  %vm708_vm1 = vcmask 1041408   ;;  %p161_p3 = scmp.lt.s32.totalorder %s6604_s13, 1  ;;  %v7942_v1 = vmov 65535  }
   0xc   : > { %v709_v2 = vsel %vm707_vm0, 4294967295, %v7942_v1  ;;  %v204_v4 = vld [vmem:[%s10642_s1] sm:$0x3]  ;;  %v6693_v5 = vld [vmem:[%s10642_s1 + $0x4] sm:$0x3]  ;;  %vm658_vm4 = vcmask 23552  }
   0xd   : > { %v7975_v3 = vsel %vm708_vm1, %v709_v2, 0  ;;  %s10820_s13 = smov (!%p161_p3, %s6604_s13), 1  ;;  %vm221_vm2 = vsmask.f32 3328  ;;  %vm222_vm3 = vsmask.f32 7440 }
   0xe   : > { %10674 = vst [vmem:[#allocation2_spill] sm:$0xff] %v7975_v3  ;;  %v712_v6 = vand.u32 %v6612_v0, %v7975_v3  ;;  %v7987_v7 = vand.u32 %v7975_v3, %v204_v4  ;;  %v7990_v8 = vand.u32 %v6693_v5, %v7975_v3  ;;  %s7869_s20 = smul.u32 216, %s10820_s13  ;;  %v6758_v9 = vld [vmem:[%s10642_s1 + $0x6] sm:$0x3]  ;;  %v6839_v10 = vld [vmem:[%s10642_s1 + $0x8] sm:$0x3]  ;;  %vm8048_vm5 = vmor %vm221_vm2, %vm222_vm3 }
   0xf   : > { %v8030_v22 = vand.u32 %v6758_v9, %v7975_v3  ;;  %v8033_v23 = vand.u32 %v6839_v10, %v7975_v3  ;;  %vm1215_vm6 = vcmask 1042432   ;;  %vm1216_vm7 = vcmask 1046532   ;;  %s7343_s11 = sshll.u32 %s10820_s13, 5 }
  0x10   : > { %7867 = vmatprep.subr.bf16.mxu1 %v712_v6  ;;  %7561 = vmatprep.subr.bf16.mxu0 %v712_v6  ;;  %s7996_s23 = scalar_lea.vmem %s10641_s0, %s7869_s20  ;;  %vm8314_vm8 = vmor %vm1215_vm6, %vm1216_vm7  ;;  %vm6406_vm9 = vcmask 1041409   ;;  %vm6409_vm10 = vcmask 1042434   ;;  %vm6412_vm11 = vcmask 1043459   ;;  %vm6415_vm12 = vcmask 1044484   ;;  %s10460_s15 = scalar_lea.vmem %s10644_s3, %s7343_s11 }
  0x11   : > { %7868 = vmatpush3.bf16.msra.mxu1 %v712_v6  ;;  %7562 = vmatpush3.bf16.msra.mxu0 %v712_v6  ;;  %v8005_v11 = vld [vmem:[%s7996_s23] sm:$0xf]  ;;  %v8008_v12 = vld [vmem:[%s7996_s23 + $0x4] sm:$0xf]  ;;  %v8011_v13 = vld [vmem:[%s7996_s23 + $0x8] sm:$0x1] }
  0x12   : > { %7595 = vmatprep.subr.bf16.mxu1 %v7987_v7  ;;  %7629 = vmatprep.subr.bf16.mxu0 %v7990_v8  ;;  %v225_v14 = vshrl.u32 %v8005_v11, 16  ;;  %v228_v15 = vshll.u32 %v8005_v11, 16  ;;  %v234_v16 = vshll.u32 %v8008_v12, 16  ;;  %v238_v17 = vshrl.u32 %v8008_v12, 16  ;;  %v8020_v18 = vld [vmem:[%s7996_s23 + $0x60] sm:$0xf] }
  0x13   : > { %v244_v19 = vshll.u32 %v8011_v13, 16  ;;  %v8024_v20 = vld [vmem:[%s7996_s23 + $0x64] sm:$0xf]  ;;  %v8027_v21 = vld [vmem:[%s7996_s23 + $0x68] sm:$0x1]  ;;  %v417_v29 = vshrl.u32 %v8020_v18, 16 }
  0x14   : > { %v227_v24 = vrot.slane %v225_v14, 4  ;;  %v230_v25 = vrot.slane %v228_v15, 5  ;;  %v236_v26 = vrot.slane %v234_v16, 5  ;;  %v240_v27 = vrot.slane %v238_v17, 4  ;;  %v8041_v36 = vld [vmem:[%s7996_s23 + $0xc] sm:$0xf] }
  0x15   : > { %v246_v28 = vrot.slane %v244_v19, 5  ;;  %v420_v30 = vshll.u32 %v8020_v18, 16  ;;  %v426_v31 = vshll.u32 %v8024_v20, 16  ;;  %v430_v34 = vshrl.u32 %v8024_v20, 16  ;;  %v8044_v37 = vld [vmem:[%s7996_s23 + $0x10] sm:$0xf] }
  0x16   : > { %v231_v32 = vor.u32 %v230_v25, %v227_v24  ;;  %v241_v33 = vor.u32 %v240_v27, %v236_v26  ;;  %v436_v35 = vshll.u32 %v8027_v21, 16  ;;  %v419_v40 = vrot.slane %v417_v29, 4  ;;  %v8054_v48 = vld [vmem:[%s7996_s23 + $0x14] sm:$0x1]  ;;  %v190_v60 = vld [vmem:[%s7996_s23 + $0x6c] sm:$0xf] }
  0x17   : > { %v422_v41 = vrot.slane %v420_v30, 5  ;;  %v428_v42 = vrot.slane %v426_v31, 5  ;;  %v432_v45 = vrot.slane %v430_v34, 4  ;;  %v249_v49 = vshrl.u32 %v8041_v36, 16  ;;  %v8067_v1 = vld [vmem:[%s7996_s23 + $0x70] sm:$0xf] }
  0x18   : > { %v232_v43 = vrot.slane %v231_v32, 4  ;;  %v242_v44 = vrot.slane %v241_v33, 4  ;;  %v438_v46 = vrot.slane %v436_v35, 5  ;;  %v252_v50 = vshll.u32 %v8041_v36, 16  ;;  %v8075_v9 = vld [vmem:[%s7996_s23 + $0x74] sm:$0x1] }
  0x19   : > { %v423_v47 = vor.u32 %v422_v41, %v419_v40  ;;  %v258_v51 = vshll.u32 %v8044_v37, 16  ;;  %v433_v54 = vor.u32 %v432_v45, %v428_v42  ;;  %v262_v55 = vshrl.u32 %v8044_v37, 16  ;;  %v8080_v17 = vld [vmem:[%s7996_s23 + $0x18] sm:$0xf]  ;;  %v8086_v31 = vld [vmem:[%s7996_s23 + $0x1c] sm:$0xf] }
  0x1a   : > { %v237_v52 = vsel %vm8048_vm5, %v232_v43, %v236_v26  ;;  %v247_v53 = vsel %vm8048_vm5, %v242_v44, %v246_v28  ;;  %v251_v58 = vrot.slane %v249_v49, 4  ;;  %v254_v59 = vrot.slane %v252_v50, 5  ;;  %v8092_v35 = vld [vmem:[%s7996_s23 + $0x20] sm:$0x1]  ;;  %v192_v45 = vld [vmem:[%s7996_s23 + $0x78] sm:$0xf] }
  0x1b   : > { %v6613_v56 = vcombine.low %v237_v52, %v247_v53  ;;  %v424_v57 = vrot.slane %v423_v47, 4  ;;  %v434_v61 = vrot.slane %v433_v54, 4  ;;  %v260_v62 = vrot.slane %v258_v51, 5 }
  0x1c   : > { %v264_v63 = vrot.slane %v262_v55, 4  ;;  %v268_v0 = vshll.u32 %v8054_v48, 16  ;;  %v255_v4 = vor.u32 %v254_v59, %v251_v58  ;;  %v441_v16 = vshrl.u32 %v190_v60, 16  ;;  %v8103_v55 = vld [vmem:[%s7996_s23 + $0x7c] sm:$0xf] }
  0x1d   : > { %7563 = vmatprep.mubr.msk.bf16.mxu0 %vm658_vm4, %v6613_v56  ;;  %v429_v2 = vsel %vm8048_vm5, %v424_v57, %v428_v42  ;;  %v439_v10 = vsel %vm8048_vm5, %v434_v61, %v438_v46  ;;  %v444_v25 = vshll.u32 %v190_v60, 16  ;;  %v450_v26 = vshll.u32 %v8067_v1, 16  ;;  %10677 = vst [vmem:[#allocation3_spill] sm:$0xff] %v8103_v55 }
  0x1e   : > { %v265_v14 = vor.u32 %v264_v63, %v260_v62  ;;  %v270_v15 = vrot.slane %v268_v0, 5  ;;  %v6621_v19 = vcombine.low %v429_v2, %v439_v10  ;;  %v256_v24 = vrot.slane %v255_v4, 4  ;;  %v8108_v0 = vld [vmem:[%s7996_s23 + $0x80] sm:$0x1] }
  0x1f   : > { %v443_v28 = vrot.slane %v441_v16, 4  ;;  %v454_v29 = vshrl.u32 %v8067_v1, 16  ;;  %v460_v30 = vshll.u32 %v8075_v9, 16  ;;  %v446_v33 = vrot.slane %v444_v25, 5  ;;  %10678 = vst [vmem:[#allocation4_spill] sm:$0xff] %v8108_v0 }
  0x20   : > { %v266_v27 = vrot.slane %v265_v14, 4  ;;  %7579 = vmatprep.mubr.msk.bf16.mxu1 %vm658_vm4, %v6621_v19  ;;  %v261_v32 = vsel %vm8048_vm5, %v256_v24, %v260_v62  ;;  %v452_v34 = vrot.slane %v450_v26, 5  ;;  %v273_v40 = vshrl.u32 %v8080_v17, 16  ;;  %v8121_v25 = vld [vmem:[%s7996_s23 + $0x28] sm:$0xf] }
  0x21   : > { %v456_v42 = vrot.slane %v454_v29, 4  ;;  %v462_v43 = vrot.slane %v460_v30, 5  ;;  %v276_v44 = vshll.u32 %v8080_v17, 16  ;;  %v447_v47 = vor.u32 %v446_v33, %v443_v28 }
  0x22   : > { %v271_v41 = vsel %vm8048_vm5, %v266_v27, %v270_v15  ;;  %v275_v49 = vrot.slane %v273_v40, 4  ;;  %v282_v50 = vshll.u32 %v8086_v31, 16  ;;  %v286_v53 = vshrl.u32 %v8086_v31, 16  ;;  %v8114_v15 = vld [vmem:[%s7996_s23 + $0x24] sm:$0xf] }
  0x23   : > { %v6614_v46 = vcombine.low %v261_v32, %v271_v41  ;;  %v457_v51 = vor.u32 %v456_v42, %v452_v34  ;;  %v278_v52 = vrot.slane %v276_v44, 5  ;;  %v292_v54 = vshll.u32 %v8092_v35, 16 }
  0x24   : > { %v448_v56 = vrot.slane %v447_v47, 4  ;;  %v284_v57 = vrot.slane %v282_v50, 5  ;;  %v465_v58 = vshrl.u32 %v192_v45, 16  ;;  %v468_v59 = vshll.u32 %v192_v45, 16  ;;  %v8134_v45 = vld [vmem:[%s7996_s23 + $0x84] sm:$0xf] }
  0x25   : > { %7564 = vmatmul.mubr.msk.bf16.vlgmr.msra.gmra.mxu0 %vm658_vm4, %v6614_v46  ;;  %v458_v60 = vrot.slane %v457_v51, 4  ;;  %v279_v61 = vor.u32 %v278_v52, %v275_v49  ;;  %v288_v62 = vrot.slane %v286_v53, 4  ;;  %v294_v63 = vrot.slane %v292_v54, 5  ;;  %v8141_v51 = vld [vmem:[%s7996_s23 + $0x88] sm:$0xf] }
  0x26   : > { %7630 = vmatpush3.bf16.msra.mxu0 %v7990_v8  ;;  %v453_v2 = vsel %vm8048_vm5, %v448_v56, %v452_v34  ;;  %v467_v4 = vrot.slane %v465_v58, 4  ;;  %v470_v10 = vrot.slane %v468_v59, 5  ;;  %v474_v14 = vshll.u32 %v8103_v55, 16  ;;  %v8127_v34 = vld [vmem:[%s7996_s23 + $0x2c] sm:$0x1] }
  0x27   : > { %7697 = vmatprep.subr.bf16.mxu0 %v8033_v23  ;;  %v463_v8 = vsel %vm8048_vm5, %v458_v60, %v462_v43  ;;  %v280_v16 = vrot.slane %v279_v61, 4  ;;  %v289_v19 = vor.u32 %v288_v62, %v284_v57  ;;  %v478_v24 = vshrl.u32 %v8103_v55, 16  ;;  %v8148_v59 = vld [vmem:[%s7996_s23 + $0x8c] sm:$0x1] }
  0x28   : > { %v6622_v26 = vcombine.low %v453_v2, %v463_v8  ;;  %v471_v27 = vor.u32 %v470_v10, %v467_v4  ;;  %v476_v28 = vrot.slane %v474_v14, 5  ;;  %v484_v29 = vshll.u32 %v8108_v0, 16  ;;  %v8156_v4 = vld [vmem:[%s7996_s23 + $0x30] sm:$0xf] }
  0x29   : > { %v285_v30 = vsel %vm8048_vm5, %v280_v16, %v284_v57  ;;  %v290_v32 = vrot.slane %v289_v19, 4  ;;  %v480_v33 = vrot.slane %v478_v24, 4  ;;  %v297_v40 = vshrl.u32 %v8114_v15, 16  ;;  %v8161_v19 = vld [vmem:[%s7996_s23 + $0x34] sm:$0xf] }
  0x2a   : > { %7580 = vmatmul.mubr.msk.bf16.vlgmr.msra.gmra.mxu1 %vm658_vm4, %v6622_v26  ;;  %v472_v41 = vrot.slane %v471_v27, 4  ;;  %v486_v42 = vrot.slane %v484_v29, 5  ;;  %v300_v43 = vshll.u32 %v8114_v15, 16  ;;  %v306_v44 = vshll.u32 %v8121_v25, 16 }
  0x2b   : > { %7596 = vmatpush3.bf16.msra.mxu1 %v7987_v7  ;;  %v295_v46 = vsel %vm8048_vm5, %v290_v32, %v294_v63  ;;  %v481_v47 = vor.u32 %v480_v33, %v476_v28  ;;  %v299_v49 = vrot.slane %v297_v40, 4  ;;  %v310_v50 = vshrl.u32 %v8121_v25, 16 }
  0x2c   : > { %v6615_v52 = vcombine.low %v285_v30, %v295_v46  ;;  %v477_v53 = vsel %vm8048_vm5, %v472_v41, %v476_v28  ;;  %v302_v54 = vrot.slane %v300_v43, 5  ;;  %v308_v56 = vrot.slane %v306_v44, 5  ;;  %7663 = vmatprep.subr.bf16.mxu1 %v8030_v22  ;;  %v8174_v46 = vld [vmem:[%s7996_s23 + $0x90] sm:$0xf] }
  0x2d   : > { %v482_v7 = vrot.slane %v481_v47, 4  ;;  %v312_v57 = vrot.slane %v310_v50, 4  ;;  %v316_v58 = vshll.u32 %v8127_v34, 16  ;;  %v489_v60 = vshrl.u32 %v8134_v45, 16 }
  0x2e   : > { %7567 = vmatprep.mubr.msk.bf16.mxu0 %vm658_vm4, %v6615_v52  ;;  %v303_v61 = vor.u32 %v302_v54, %v299_v49  ;;  %v492_v62 = vshll.u32 %v8134_v45, 16  ;;  %v498_v63 = vshll.u32 %v8141_v51, 16  ;;  %v502_v2 = vshrl.u32 %v8141_v51, 16 }
  0x2f   : > { %v487_v10 = vsel %vm8048_vm5, %v482_v7, %v486_v42  ;;  %v313_v14 = vor.u32 %v312_v57, %v308_v56  ;;  %v318_v8 = vrot.slane %v316_v58, 5  ;;  %v491_v16 = vrot.slane %v489_v60, 4  ;;  %v8169_v42 = vld [vmem:[%s7996_s23 + $0x38] sm:$0x1] }
  0x30   : > { %v6623_v24 = vcombine.low %v477_v53, %v487_v10  ;;  %v304_v26 = vrot.slane %v303_v61, 4  ;;  %v494_v27 = vrot.slane %v492_v62, 5  ;;  %v500_v28 = vrot.slane %v498_v63, 5  ;;  %v8179_v53 = vld [vmem:[%s7996_s23 + $0x94] sm:$0xf] }
  0x31   : > { %v314_v29 = vrot.slane %v313_v14, 4  ;;  %v504_v30 = vrot.slane %v502_v2, 4  ;;  %v508_v32 = vshll.u32 %v8148_v59, 16  ;;  %v321_v33 = vshrl.u32 %v8156_v4, 16  ;;  %v8188_v10 = vld [vmem:[%s7996_s23 + $0x98] sm:$0x1] }
  0x32   : > { %7583 = vmatprep.mubr.msk.bf16.mxu1 %vm658_vm4, %v6623_v24  ;;  %v309_v40 = vsel %vm8048_vm5, %v304_v26, %v308_v56  ;;  %v495_v41 = vor.u32 %v494_v27, %v491_v16  ;;  %v324_v43 = vshll.u32 %v8156_v4, 16  ;;  %v330_v44 = vshll.u32 %v8161_v19, 16  ;;  %10679 = vst [vmem:[#allocation5_spill] sm:$0xff] %v8188_v10  ;;  %v8193_v16 = vld [vmem:[%s7996_s23 + $0x3c] sm:$0xf] }
  0x33   : > { %v319_v47 = vsel %vm8048_vm5, %v314_v29, %v318_v8  ;;  %v505_v49 = vor.u32 %v504_v30, %v500_v28  ;;  %v510_v50 = vrot.slane %v508_v32, 5  ;;  %v323_v52 = vrot.slane %v321_v33, 4  ;;  %v8198_v30 = vld [vmem:[%s7996_s23 + $0x40] sm:$0xf] }
  0x34   : > { %v6616_v54 = vcombine.low %v309_v40, %v319_v47  ;;  %v496_v56 = vrot.slane %v495_v41, 4  ;;  %v326_v7 = vrot.slane %v324_v43, 5  ;;  %v332_v57 = vrot.slane %v330_v44, 5 }
  0x35   : > { %v506_v58 = vrot.slane %v505_v49, 4  ;;  %v334_v60 = vshrl.u32 %v8161_v19, 16  ;;  %v340_v61 = vshll.u32 %v8169_v42, 16  ;;  %v513_v62 = vshrl.u32 %v8174_v46, 16 }
  0x36   : > { %7568 = vmatmul.mubr.msk.bf16.gmra.mxu0 %vm658_vm4, %v6616_v54  ;;  %v501_v63 = vsel %vm8048_vm5, %v496_v56, %v500_v28  ;;  %v327_v2 = vor.u32 %v326_v7, %v323_v52  ;;  %v516_v14 = vshll.u32 %v8174_v46, 16  ;;  %v522_v8 = vshll.u32 %v8179_v53, 16  ;;  %v8207_v52 = vld [vmem:[%s7996_s23 + $0x44] sm:$0x1]  ;;  %v8212_v7 = vld [vmem:[%s7996_s23 + $0x9c] sm:$0xf] }
  0x37   : > { %v511_v24 = vsel %vm8048_vm5, %v506_v58, %v510_v50  ;;  %v336_v26 = vrot.slane %v334_v60, 4  ;;  %v342_v27 = vrot.slane %v340_v61, 5  ;;  %v515_v29 = vrot.slane %v513_v62, 4  ;;  %10680 = vst [vmem:[#allocation6_spill] sm:$0xff] %v8212_v7 }
  0x38   : > { %v6624_v28 = vcombine.low %v501_v63, %v511_v24  ;;  %v328_v32 = vrot.slane %v327_v2, 4  ;;  %v518_v33 = vrot.slane %v516_v14, 5  ;;  %v524_v40 = vrot.slane %v522_v8, 5  ;;  %v8216_v8 = vld [vmem:[%s7996_s23 + $0xa0] sm:$0xf] }
  0x39   : > { %v337_v41 = vor.u32 %v336_v26, %v332_v57  ;;  %v526_v43 = vshrl.u32 %v8179_v53, 16  ;;  %v532_v44 = vshll.u32 %v8188_v10, 16  ;;  %v345_v47 = vshrl.u32 %v8193_v16, 16  ;;  %10681 = vst [vmem:[#allocation7_spill] sm:$0xff] %v8216_v8  ;;  %v1168_v10 = vld [vmem:[%s7996_s23 + $0xc] sm:$0xe] }
  0x3a   : > { %7584 = vmatmul.mubr.msk.bf16.gmra.mxu1 %vm658_vm4, %v6624_v28  ;;  %v333_v49 = vsel %vm8048_vm5, %v328_v32, %v332_v57  ;;  %v519_v50 = vor.u32 %v518_v33, %v515_v29  ;;  %v348_v54 = vshll.u32 %v8193_v16, 16  ;;  %v354_v56 = vshll.u32 %v8198_v30, 16  ;;  %v8222_v28 = vld [vmem:[%s7996_s23 + $0xa4] sm:$0x1]  ;;  %v8226_v33 = vld [vmem:[%s7996_s23 + $0x48] sm:$0xf] }
  0x3b   : > { %v338_v58 = vrot.slane %v337_v41, 4  ;;  %v528_v60 = vrot.slane %v526_v43, 4  ;;  %v534_v61 = vrot.slane %v532_v44, 5  ;;  %v347_v62 = vrot.slane %v345_v47, 4  ;;  %10682 = vst [vmem:[#allocation8_spill] sm:$0xff] %v8222_v28 }
  0x3c   : > { %v520_v63 = vrot.slane %v519_v50, 4  ;;  %v350_v2 = vrot.slane %v348_v54, 5  ;;  %v356_v14 = vrot.slane %v354_v56, 5  ;;  %v358_v57 = vshrl.u32 %v8198_v30, 16 }
  0x3d   : > { %v343_v24 = vsel %vm8048_vm5, %v338_v58, %v342_v27  ;;  %v529_v26 = vor.u32 %v528_v60, %v524_v40  ;;  %v364_v29 = vshll.u32 %v8207_v52, 16  ;;  %v537_v32 = vshrl.u32 %v8212_v7, 16 }
  0x3e   : > { %v6617_v41 = vcombine.low %v333_v49, %v343_v24  ;;  %v525_v43 = vsel %vm8048_vm5, %v520_v63, %v524_v40  ;;  %v351_v44 = vor.u32 %v350_v2, %v347_v62  ;;  %v360_v47 = vrot.slane %v358_v57, 4  ;;  %v8235_v24 = vld [vmem:[%s7996_s23 + $0x4c] sm:$0xf]  ;;  %v8241_v2 = vld [vmem:[%s7996_s23 + $0x50] sm:$0x1] }
  0x3f   : > { %v530_v50 = vrot.slane %v529_v26, 4  ;;  %v366_v54 = vrot.slane %v364_v29, 5  ;;  %v539_v27 = vrot.slane %v537_v32, 4  ;;  %v540_v56 = vshll.u32 %v8212_v7, 16 }
  0x40   : > { %7571 = vmatprep.mubr.msk.bf16.mxu0 %vm658_vm4, %v6617_v41  ;;  %v352_v58 = vrot.slane %v351_v44, 4  ;;  %v361_v60 = vor.u32 %v360_v47, %v356_v14  ;;  %v546_v6 = vshll.u32 %v8216_v8, 16  ;;  %v550_v49 = vshrl.u32 %v8216_v8, 16  ;;  %v8247_v44 = vld [vmem:[%s7996_s23 + $0xa8] sm:$0xf] }
  0x41   : > { %v535_v40 = vsel %vm8048_vm5, %v530_v50, %v534_v61  ;;  %v542_v62 = vrot.slane %v540_v56, 5  ;;  %v556_v63 = vshll.u32 %v8222_v28, 16  ;;  %v369_v57 = vshrl.u32 %v8226_v33, 16  ;;  %10683 = vst [vmem:[#allocation9_spill] sm:$0xff] %v8247_v44 }
  0x42   : > { %v6625_v26 = vcombine.low %v525_v43, %v535_v40  ;;  %v357_v29 = vsel %vm8048_vm5, %v352_v58, %v356_v14  ;;  %v362_v32 = vrot.slane %v361_v60, 4  ;;  %v548_v41 = vrot.slane %v546_v6, 5 }
  0x43   : > { %v543_v47 = vor.u32 %v542_v62, %v539_v27  ;;  %v552_v39 = vrot.slane %v550_v49, 4  ;;  %v558_v61 = vrot.slane %v556_v63, 5  ;;  %v371_v50 = vrot.slane %v369_v57, 4  ;;  %v8257_v49 = vld [vmem:[%s7996_s23 + $0xac] sm:$0xf] }
  0x44   : > { %7587 = vmatprep.mubr.msk.bf16.mxu1 %vm658_vm4, %v6625_v26  ;;  %v367_v56 = vsel %vm8048_vm5, %v362_v32, %v366_v54  ;;  %v372_v43 = vshll.u32 %v8226_v33, 16  ;;  %v378_v40 = vshll.u32 %v8235_v24, 16  ;;  %v382_v14 = vshrl.u32 %v8235_v24, 16  ;;  %10684 = vst [vmem:[#allocation10_spill] sm:$0xff] %v8257_v49  ;;  %v8260_v26 = vld [vmem:[%s7996_s23 + $0xb0] sm:$0x1] }
  0x45   : > { %v6618_v58 = vcombine.low %v357_v29, %v367_v56  ;;  %v544_v6 = vrot.slane %v543_v47, 4  ;;  %v553_v60 = vor.u32 %v552_v39, %v548_v41  ;;  %v388_v27 = vshll.u32 %v8241_v2, 16  ;;  %10685 = vst [vmem:[#allocation11_spill] sm:$0xff] %v8260_v26 }
  0x46   : > { %v374_v62 = vrot.slane %v372_v43, 5  ;;  %v380_v63 = vrot.slane %v378_v40, 5  ;;  %v384_v57 = vrot.slane %v382_v14, 4  ;;  %v561_v54 = vshrl.u32 %v8247_v44, 16  ;;  %v8269_v14 = vld [vmem:[%s7996_s23 + $0x54] sm:$0xf] }
  0x47   : > { %7572 = vmatmul.mubr.msk.bf16.gmra.mxu0 %vm658_vm4, %v6618_v58  ;;  %v549_v29 = vsel %vm8048_vm5, %v544_v6, %v548_v41  ;;  %v554_v32 = vrot.slane %v553_v60, 4  ;;  %v390_v39 = vrot.slane %v388_v27, 5  ;;  %v564_v47 = vshll.u32 %v8247_v44, 16  ;;  %v8276_v60 = vld [vmem:[%s7996_s23 + $0x58] sm:$0xf] }
  0x48   : > { %v375_v56 = vor.u32 %v374_v62, %v371_v50  ;;  %v385_v5 = vor.u32 %v384_v57, %v380_v63  ;;  %v563_v43 = vrot.slane %v561_v54, 4  ;;  %v570_v40 = vshll.u32 %v8257_v49, 16  ;;  %v8279_v54 = vld [vmem:[%s7996_s23 + $0x5c] sm:$0x1] }
  0x49   : > { %v559_v58 = vsel %vm8048_vm5, %v554_v32, %v558_v61  ;;  %v566_v3 = vrot.slane %v564_v47, 5  ;;  %v574_v41 = vshrl.u32 %v8257_v49, 16  ;;  %v580_v6 = vshll.u32 %v8260_v26, 16  ;;  %v1167_v26 = vld [vmem:[%s7996_s23] sm:$0xe] }
  0x4a   : > { %v6626_v50 = vcombine.low %v549_v29, %v559_v58  ;;  %v376_v27 = vrot.slane %v375_v56, 4  ;;  %v386_v62 = vrot.slane %v385_v5, 4  ;;  %v572_v57 = vrot.slane %v570_v40, 5  ;;  %v8290_v56 = vld [vmem:[%s7996_s23 + $0xb4] sm:$0xf] }
  0x4b   : > { %v567_v0 = vor.u32 %v566_v3, %v563_v43  ;;  %v576_v44 = vrot.slane %v574_v41, 4  ;;  %v582_v28 = vrot.slane %v580_v6, 5  ;;  %v393_v61 = vshrl.u32 %v8269_v14, 16  ;;  %10686 = vst [vmem:[#allocation12_spill] sm:$0xff] %v8290_v56  ;;  %v8293_v41 = vld [vmem:[%s7996_s23 + $0xb8] sm:$0xf] }
  0x4c   : > { %7588 = vmatmul.mubr.msk.bf16.gmra.mxu1 %vm658_vm4, %v6626_v50  ;;  %v381_v32 = vsel %vm8048_vm5, %v376_v27, %v380_v63  ;;  %v391_v29 = vsel %vm8048_vm5, %v386_v62, %v390_v39  ;;  %v396_v5 = vshll.u32 %v8269_v14, 16  ;;  %v402_v47 = vshll.u32 %v8276_v60, 16  ;;  %v8298_v39 = vld [vmem:[%s7996_s23 + $0xbc] sm:$0x1] }
  0x4d   : > { %v6619_v3 = vcombine.low %v381_v32, %v391_v29  ;;  %v568_v43 = vrot.slane %v567_v0, 4  ;;  %v577_v40 = vor.u32 %v576_v44, %v572_v57  ;;  %v395_v58 = vrot.slane %v393_v61, 4 }
  0x4e   : > { %v398_v6 = vrot.slane %v396_v5, 5  ;;  %v404_v50 = vrot.slane %v402_v47, 5  ;;  %v406_v63 = vshrl.u32 %v8276_v60, 16  ;;  %v412_v27 = vshll.u32 %v8279_v54, 16 }
  0x4f   : > { %7575 = vmatprep.mubr.msk.bf16.mxu0 %vm658_vm4, %v6619_v3  ;;  %v573_v62 = vsel %vm8048_vm5, %v568_v43, %v572_v57  ;;  %v578_v32 = vrot.slane %v577_v40, 4  ;;  %v585_v0 = vshrl.u32 %v8290_v56, 16  ;;  %v588_v44 = vshll.u32 %v8290_v56, 16 }
  0x50   : > { %v399_v61 = vor.u32 %v398_v6, %v395_v58  ;;  %v408_v29 = vrot.slane %v406_v63, 4  ;;  %v414_v5 = vrot.slane %v412_v27, 5  ;;  %v594_v47 = vshll.u32 %v8293_v41, 16 }
  0x51   : > { %v583_v49 = vsel %vm8048_vm5, %v578_v32, %v582_v28  ;;  %v587_v55 = vrot.slane %v585_v0, 4  ;;  %v590_v3 = vrot.slane %v588_v44, 5  ;;  %v598_v7 = vshrl.u32 %v8293_v41, 16 }
  0x52   : > { %v6627_v57 = vcombine.low %v573_v62, %v583_v49  ;;  %v400_v43 = vrot.slane %v399_v61, 4  ;;  %v409_v40 = vor.u32 %v408_v29, %v404_v50  ;;  %v596_v8 = vrot.slane %v594_v47, 5  ;;  %v1169_v61 = vld [vmem:[%s7996_s23 + $0x18] sm:$0xe] }
  0x53   : > { %v591_v56 = vor.u32 %v590_v3, %v587_v55  ;;  %v600_v58 = vrot.slane %v598_v7, 4  ;;  %v604_v6 = vshll.u32 %v8298_v39, 16  ;;  %v6677_v28 = vrot.slane %v1167_v26, 9 }
  0x54   : > { %7591 = vmatprep.mubr.msk.bf16.mxu1 %vm658_vm4, %v6627_v57  ;;  %v405_v49 = vsel %vm8048_vm5, %v400_v43, %v404_v50  ;;  %v410_v27 = vrot.slane %v409_v40, 4  ;;  %v1220_v62 = vrot.slane %v8008_v12, 5  ;;  %v6646_v55 = vcombine.low %v8041_v36, %v8044_v37 }
  0x55   : > { %v592_v7 = vrot.slane %v591_v56, 4  ;;  %v601_v32 = vor.u32 %v600_v58, %v596_v8  ;;  %v606_v0 = vrot.slane %v604_v6, 5  ;;  %v6678_v44 = vrot.slane %v1168_v10, 9  ;;  %v1170_v6 = vld [vmem:[%s7996_s23 + $0x24] sm:$0xe] }
  0x56   : > { %v415_v26 = vsel %vm8048_vm5, %v410_v27, %v414_v5  ;;  %v1221_v29 = vsel %vm8314_vm8, %v6677_v28, %v1220_v62  ;;  %v1222_v47 = vrot.slane %v1220_v62, 4  ;;  %v10689_v50 = vrot.slane %v8044_v37, 5 }
  0x57   : > { %v6620_v57 = vcombine.low %v405_v49, %v415_v26  ;;  %v597_v43 = vsel %vm8048_vm5, %v592_v7, %v596_v8  ;;  %v602_v56 = vrot.slane %v601_v32, 4  ;;  %v10690_v40 = vrot.slane %v8011_v13, 5 }
  0x58   : > { %v1229_v3 = vrot.slane %v10689_v50, 4  ;;  %v6647_v5 = vcombine.low %v8080_v17, %v8086_v31  ;;  %v6679_v58 = vrot.slane %v1169_v61, 9  ;;  %v6645_v49 = vcombine.low %v8005_v11, %v8008_v12  ;;  %v1171_v61 = vld [vmem:[%s7996_s23 + $0x30] sm:$0xe] }
  0x59   : > { %v1224_v10 = vsel %vm8314_vm8, %v1222_v47, %v10690_v40  ;;  %7576 = vmatmul.mubr.msk.bf16.gmra.mxu0 %vm658_vm4, %v6620_v57  ;;  %v607_v28 = vsel %vm8048_vm5, %v602_v56, %v606_v0  ;;  %v1234_v13 = vrot.slane %v8086_v31, 5  ;;  %v10691_v62 = vmov %v10689_v50 }
  0x5a   : > { %v6694_v8 = vcombine.low %v1221_v29, %v1224_v10  ;;  %v6628_v27 = vcombine.low %v597_v43, %v607_v28  ;;  %v1228_v17 = vsel %vm8314_vm8, %v6678_v44, %v10691_v62  ;;  %v10692_v7 = vrot.slane %v8054_v48, 5  ;;  %v1172_v29 = vld [vmem:[%s7996_s23 + $0x3c] sm:$0xe] }
  0x5b   : > { %v1237_v0 = vrot.slane %v8092_v35, 5  ;;  %v1235_v11 = vsel %vm8314_vm8, %v6679_v58, %v1234_v13  ;;  %v1236_v12 = vrot.slane %v1234_v13, 4  ;;  %v6680_v31 = vrot.slane %v1170_v6, 9  ;;  %v1174_v13 = vld [vmem:[%s7996_s23 + $0x54] sm:$0xe] }
  0x5c   : > { %v1231_v32 = vsel %vm8314_vm8, %v1229_v3, %v10692_v7  ;;  %7631 = vmatprep.mubr.msk.bf16.mxu0 %vm658_vm4, %v6694_v8  ;;  %v1241_v26 = vrot.slane %v8121_v25, 5  ;;  %7592 = vmatmul.mubr.msk.bf16.gmra.mxu1 %vm658_vm4, %v6628_v27  ;;  %v1244_v48 = vrot.slane %v8127_v34, 5  ;;  %v1248_v44 = vrot.slane %v8161_v19, 5  ;;  %v1173_v3 = vld [vmem:[%s7996_s23 + $0x48] sm:$0xe] }
  0x5d   : > { %7597 = vmatprep.mubr.msk.bf16.mxu1 %vm658_vm4, %v6645_v49  ;;  %v6695_v35 = vcombine.low %v1228_v17, %v1231_v32  ;;  %v1238_v47 = vsel %vm8314_vm8, %v1236_v12, %v1237_v0  ;;  %v6681_v43 = vrot.slane %v1171_v61, 9  ;;  %v1251_v56 = vrot.slane %v8169_v42, 5 }
  0x5e   : > { %v1243_v50 = vrot.slane %v1241_v26, 4  ;;  %v6696_v57 = vcombine.low %v1235_v11, %v1238_v47  ;;  %v1242_v40 = vsel %vm8314_vm8, %v6680_v31, %v1241_v26  ;;  %v1250_v34 = vrot.slane %v1248_v44, 4 }
  0x5f   : > { %v6682_v10 = vrot.slane %v1172_v29, 9  ;;  %v1255_v58 = vrot.slane %v8198_v30, 5  ;;  %v1258_v28 = vrot.slane %v8207_v52, 5  ;;  %v6683_v49 = vrot.slane %v1173_v3, 9  ;;  %v1175_v52 = vld [vmem:[%s7996_s23 + $0x60] sm:$0xe] }
  0x60   : > { %v1245_v6 = vsel %vm8314_vm8, %v1243_v50, %v1244_v48  ;;  %v1262_v8 = vrot.slane %v8235_v24, 5  ;;  %v1265_v27 = vrot.slane %v8241_v2, 5  ;;  %v1279_v62 = vrot.slane %v8027_v21, 5  ;;  %v8417_v48 = vld [vmem:[%s7996_s23 + $0x6c] sm:$0xe] }
  0x61   : > { %7632 = vmatmul.mubr.msk.bf16.vlgmr.msra.gmra.mxu0 %vm658_vm4, %v6695_v35  ;;  %v1257_v42 = vrot.slane %v1255_v58, 4  ;;  %v1249_v17 = vsel %vm8314_vm8, %v6681_v43, %v1248_v44  ;;  %v6697_v32 = vcombine.low %v1242_v40, %v1245_v6  ;;  %v1252_v0 = vsel %vm8314_vm8, %v1250_v34, %v1251_v56  ;;  %v8438_v3 = vld [vmem:[%s7996_s23 + $0x78] sm:$0xe] }
  0x62   : > { %7698 = vmatpush3.bf16.msra.mxu0 %v8033_v23  ;;  %7635 = vmatprep.mubr.msk.bf16.mxu0 %vm658_vm4, %v6696_v57  ;;  %v1264_v7 = vrot.slane %v1262_v8, 4  ;;  %v8389_v61 = vsel %vm8314_vm8, %v6682_v10, %v1255_v58  ;;  %v1269_v2 = vrot.slane %v8276_v60, 5  ;;  %v8398_v21 = vsel %vm8314_vm8, %v6683_v49, %v1262_v8  ;;  %v1179_v57 = vld [vmem:[%s7996_s23 + $0x90] sm:$0xe]  ;;  %v1180_v49 = vld [vmem:[%s7996_s23 + $0x9c] sm:$0xe] }
  0x63   : > { %v6684_v23 = vrot.slane %v1174_v13, 9  ;;  %v1272_v11 = vrot.slane %v8279_v54, 5  ;;  %v1276_v12 = vrot.slane %v8024_v20, 5  ;;  %v1259_v36 = vsel %vm8314_vm8, %v1257_v42, %v1258_v28 }
  0x64   : > { %7598 = vmatmul.mubr.msk.bf16.vlgmr.msra.gmra.mxu1 %vm658_vm4, %v6646_v55  ;;  %v8408_v37 = vsel %vm8314_vm8, %v1264_v7, %v1265_v27  ;;  %v1271_v55 = vrot.slane %v1269_v2, 4  ;;  %v6685_v31 = vrot.slane %v1175_v52, 9  ;;  %v6648_v54 = vcombine.low %v8114_v15, %v8121_v25  ;;  %v1178_v15 = vld [vmem:[%s7996_s23 + $0x84] sm:$0xe]  ;;  %v1181_v27 = vld [vmem:[%s7996_s23 + $0xa8] sm:$0xe] }
  0x65   : > { %7664 = vmatpush3.bf16.msra.mxu1 %v8030_v22  ;;  %7601 = vmatprep.mubr.msk.bf16.mxu1 %vm658_vm4, %v6647_v5  ;;  %v6649_v26 = vcombine.low %v8156_v4, %v8161_v19  ;;  %v6698_v22 = vcombine.low %v1249_v17, %v1252_v0  ;;  %v6650_v5 = vcombine.low %v8193_v16, %v8198_v30  ;;  %v1278_v47 = vrot.slane %v1276_v12, 4  ;;  %v10693_v52 = vld [vmem:[#allocation5_spill] sm:$0xff]  ;;  %v10694_v0 = vld [vmem:[#allocation7_spill] sm:$0xff] }
  0x66   : > { %v6651_v44 = vcombine.low %v8226_v33, %v8235_v24  ;;  %v6652_v29 = vcombine.low %v8269_v14, %v8276_v60  ;;  %v6653_v35 = vcombine.low %v8020_v18, %v8024_v20  ;;  %v6699_v25 = vcombine.low %v8389_v61, %v1259_v36  ;;  %v10695_v61 = vld [vmem:[#allocation6_spill] sm:$0xff] }
  0x67   : > { %v6700_v4 = vcombine.low %v8398_v21, %v8408_v37  ;;  %v8431_v19 = vsel %vm8314_vm8, %v6684_v23, %v1269_v2  ;;  %v8435_v50 = vsel %vm8314_vm8, %v1271_v55, %v1272_v11  ;;  %v8444_v43 = vsel %vm8314_vm8, %v6685_v31, %v1276_v12  ;;  %v10696_v23 = vld [vmem:[#allocation3_spill] sm:$0xff]  ;;  %v6797_v2 = vld [vmem:[%s7996_s23 + $0x24] sm:$0xf] }
  0x68   : > { %v6686_v56 = vrot.slane %v8417_v48, 9  ;;  %v1283_v40 = vrot.slane %v8067_v1, 5  ;;  %v6656_v34 = vcombine.low %v8134_v45, %v8141_v51  ;;  %v1286_v10 = vrot.slane %v8075_v9, 5  ;;  %v10699_v48 = vld [vmem:[#allocation9_spill] sm:$0xff] }
  0x69   : > { %7636 = vmatmul.mubr.msk.bf16.gmra.mxu0 %vm658_vm4, %v6697_v32  ;;  %v6688_v58 = vrot.slane %v1178_v15, 9  ;;  %v1297_v6 = vrot.slane %v8141_v51, 5  ;;  %v1300_v28 = vrot.slane %v8148_v59, 5  ;;  %v6701_v8 = vcombine.low %v8431_v19, %v8435_v50 }
  0x6a   : > { %7639 = vmatprep.mubr.msk.bf16.mxu0 %vm658_vm4, %v6698_v22  ;;  %v8459_v13 = vsel %vm8314_vm8, %v1278_v47, %v1279_v62  ;;  %v6687_v1 = vrot.slane %v8438_v3, 9  ;;  %v6689_v17 = vrot.slane %v1179_v57, 9  ;;  %v1304_v7 = vrot.slane %v8179_v53, 5  ;;  %v10698_v22 = vld [vmem:[#allocation10_spill] sm:$0xff]  ;;  %v8514_v47 = vld [vmem:[%s7996_s23 + $0x10] sm:$0xf] }
  0x6b   : > { %v8468_v9 = vsel %vm8314_vm8, %v6688_v58, %v1297_v6  ;;  %v1299_v59 = vrot.slane %v1297_v6, 4  ;;  %v1285_v62 = vrot.slane %v1283_v40, 4  ;;  %v1307_v32 = vrot.slane %v10693_v52, 5  ;;  %v10700_v58 = vld [vmem:[#allocation11_spill] sm:$0xff] }
  0x6c   : > { %7602 = vmatmul.mubr.msk.bf16.gmra.mxu1 %vm658_vm4, %v6648_v54  ;;  %v6690_v21 = vrot.slane %v1180_v49, 9  ;;  %v1290_v11 = vrot.slane %v10696_v23, 5  ;;  %v8482_v36 = vsel %vm8314_vm8, %v6689_v17, %v1304_v7  ;;  %v1306_v37 = vrot.slane %v1304_v7, 4  ;;  %v10697_v54 = vld [vmem:[#allocation8_spill] sm:$0xff] }
  0x6d   : > { %7605 = vmatprep.mubr.msk.bf16.mxu1 %vm658_vm4, %v6649_v26  ;;  %v8478_v12 = vsel %vm8314_vm8, %v1299_v59, %v1300_v28  ;;  %v1311_v31 = vrot.slane %v10694_v0, 5  ;;  %v1314_v26 = vrot.slane %v10697_v54, 5  ;;  %v6691_v3 = vrot.slane %v1181_v27, 9  ;;  %v6791_v28 = vld [vmem:[%s7996_s23 + $0xc] sm:$0xf]  ;;  %v10701_v7 = vld [vmem:[#allocation12_spill] sm:$0xff] }
  0x6e   : > { %v6705_v55 = vcombine.low %v8468_v9, %v8478_v12  ;;  %v8492_v15 = vsel %vm8314_vm8, %v1306_v37, %v1307_v32  ;;  %v1318_v57 = vrot.slane %v10698_v22, 5  ;;  %v1321_v6 = vrot.slane %v10700_v58, 5  ;;  %v1182_v32 = vld [vmem:[%s7996_s23 + $0xb4] sm:$0xe] }
  0x6f   : > { %v6706_v49 = vcombine.low %v8482_v36, %v8492_v15  ;;  %v8502_v59 = vsel %vm8314_vm8, %v6690_v21, %v1311_v31  ;;  %v1313_v17 = vrot.slane %v1311_v31, 4  ;;  %v1292_v27 = vrot.slane %v1290_v11, 4  ;;  %v10702_v37 = vld [vmem:[#allocation4_spill] sm:$0xff] }
  0x70   : > { %v1293_v54 = vrot.slane %v10702_v37, 5  ;;  %v1320_v58 = vrot.slane %v1318_v57, 4  ;;  %v8518_v21 = vsel %vm8314_vm8, %v6686_v56, %v1283_v40  ;;  %v2035_v52 = vshll.u32 %v6791_v28, 16  ;;  %v6904_v37 = vld [vmem:[%s10642_s1 + $0xa] sm:$0x3] }
  0x71   : > { %7640 = vmatmul.mubr.msk.bf16.gmra.mxu0 %vm658_vm4, %v6699_v25  ;;  %v8511_v25 = vsel %vm8314_vm8, %v6691_v3, %v1318_v57  ;;  %v8522_v31 = vsel %vm8314_vm8, %v1313_v17, %v1314_v26  ;;  %v6702_v56 = vcombine.low %v8444_v43, %v8459_v13  ;;  %v8535_v40 = vsel %vm8314_vm8, %v1285_v62, %v1286_v10  ;;  %v8544_v57 = vld [vmem:[%s7996_s23 + $0x14] sm:$0x1]  ;;  %v6795_v10 = vld [vmem:[%s7996_s23 + $0x1c] sm:$0xf]  ;;  %v6969_v13 = vld [vmem:[%s10642_s1 + $0xc] sm:$0x3] }
  0x72   : > { %7643 = vmatprep.mubr.msk.bf16.mxu0 %vm658_vm4, %v6700_v4  ;;  %v2032_v4 = vshrl.u32 %v6791_v28, 16  ;;  %v8541_v3 = vsel %vm8314_vm8, %v1320_v58, %v1321_v6  ;;  %v6794_v28 = vld [vmem:[%s7996_s23 + $0x18] sm:$0xf]  ;;  %v8553_v16 = vsel %vm8314_vm8, %v6687_v1, %v1290_v11  ;;  %v2041_v43 = vshll.u32 %v8514_v47, 16  ;;  %v10703_v1 = vld [vmem:[#allocation2_spill] sm:$0xff] }
  0x73   : > { %v8565_v33 = vsel %vm8314_vm8, %v1292_v27, %v1293_v54  ;;  %v6692_v24 = vrot.slane %v1182_v32, 9  ;;  %v8569_v62 = vand.u32 %v6904_v37, %v10703_v1  ;;  %v2037_v6 = vrot.slane %v2035_v52, 5 }
  0x74   : > { %7606 = vmatmul.mubr.msk.bf16.gmra.mxu1 %vm658_vm4, %v6650_v5  ;;  %v1325_v5 = vrot.slane %v8293_v41, 5  ;;  %v2034_v11 = vrot.slane %v2032_v4, 4  ;;  %v8571_v17 = vrot.slane %v2041_v43, 5  ;;  %v2056_v58 = vshrl.u32 %v6794_v28, 16  ;;  %v6796_v43 = vld [vmem:[%s7996_s23 + $0x20] sm:$0x1] }
  0x75   : > { %7609 = vmatprep.mubr.msk.bf16.mxu1 %vm658_vm4, %v6651_v44  ;;  %v2045_v44 = vshrl.u32 %v8514_v47, 16  ;;  %v1328_v30 = vrot.slane %v8298_v39, 5  ;;  %7731 = vmatprep.subr.bf16.mxu1 %v8569_v62  ;;  %v2059_v27 = vshll.u32 %v6794_v28, 16  ;;  %v2065_v32 = vshll.u32 %v6795_v10, 16 }
  0x76   : > { %v1327_v54 = vrot.slane %v1325_v5, 4  ;;  %v2051_v52 = vshll.u32 %v8544_v57, 16  ;;  %v2058_v4 = vrot.slane %v2056_v58, 4  ;;  %v2069_v37 = vshrl.u32 %v6795_v10, 16  ;;  %v8592_v10 = vld [vmem:[%s7996_s23 + $0x28] sm:$0xf] }
  0x77   : > { %v2047_v26 = vrot.slane %v2045_v44, 4  ;;  %v6703_v39 = vcombine.low %v8518_v21, %v8535_v40  ;;  %v2061_v28 = vrot.slane %v2059_v27, 5  ;;  %v8585_v44 = vrot.slane %v2065_v32, 5  ;;  %v7928_v32 = vld [vmem:[%s7996_s23 + $0x6c] sm:$0xf] }
  0x78   : > { %v8588_v19 = vand.u32 %v6969_v13, %v10703_v1  ;;  %v2038_v50 = vor.u32 %v2037_v6, %v2034_v11  ;;  %v2071_v42 = vrot.slane %v2069_v37, 4  ;;  %v6704_v21 = vcombine.low %v8553_v16, %v8565_v33  ;;  %v6800_v6 = vld [vmem:[%s7996_s23 + $0x30] sm:$0xf] }
  0x79   : > { %7644 = vmatmul.mubr.msk.bf16.gmra.mxu0 %vm658_vm4, %v6701_v8  ;;  %v2048_v8 = vor.u32 %v2047_v26, %v8571_v17  ;;  %v8602_v40 = vsel %vm8314_vm8, %v6692_v24, %v1325_v5  ;;  %v2062_v13 = vor.u32 %v2061_v28, %v2058_v4  ;;  %v8606_v26 = vld [vmem:[%s7996_s23 + $0x2c] sm:$0x1]  ;;  %v2083_v11 = vshll.u32 %v6797_v2, 16  ;;  %v8619_v5 = vld [vmem:[%s7996_s23 + $0x34] sm:$0xf] }
  0x7a   : > { %7647 = vmatprep.mubr.msk.bf16.mxu0 %vm658_vm4, %v6702_v56  ;;  %v2080_v56 = vshrl.u32 %v6797_v2, 16  ;;  %7765 = vmatprep.subr.bf16.mxu0 %v8588_v19  ;;  %v8615_v14 = vsel %vm8314_vm8, %v1327_v54, %v1328_v30  ;;  %v2053_v60 = vrot.slane %v2051_v52, 5  ;;  %v2075_v16 = vshll.u32 %v6796_v43, 16  ;;  %v6803_v30 = vld [vmem:[%s7996_s23 + $0x3c] sm:$0xf] }
  0x7b   : > { %v2085_v33 = vrot.slane %v2083_v11, 5  ;;  %v2089_v24 = vshll.u32 %v8592_v10, 16  ;;  %v2093_v18 = vshrl.u32 %v8592_v10, 16  ;;  %v2039_v20 = vrot.slane %v2038_v50, 4  ;;  %v7929_v54 = vld [vmem:[%s7996_s23 + $0x70] sm:$0xf] }
  0x7c   : > { %7610 = vmatmul.mubr.msk.bf16.gmra.mxu1 %vm658_vm4, %v6652_v29  ;;  %v2072_v29 = vor.u32 %v2071_v42, %v8585_v44  ;;  %v2082_v2 = vrot.slane %v2080_v56, 4  ;;  %v2063_v58 = vrot.slane %v2062_v13, 4  ;;  %v2099_v27 = vshll.u32 %v8606_v26, 16  ;;  %v7930_v42 = vld [vmem:[%s7996_s23 + $0x78] sm:$0xf] }
  0x7d   : > { %7613 = vmatprep.mubr.msk.bf16.mxu1 %vm658_vm4, %v6653_v35  ;;  %v2049_v35 = vrot.slane %v2048_v8, 4  ;;  %v6654_v52 = vcombine.low %v7928_v32, %v7929_v54  ;;  %v6655_v4 = vcombine.low %v7930_v42, %v10696_v23  ;;  %v2104_v37 = vshrl.u32 %v6800_v6, 16  ;;  %v6806_v42 = vld [vmem:[%s7996_s23 + $0x48] sm:$0xf]  ;;  %v8656_v13 = vld [vmem:[%s7996_s23 + $0x4c] sm:$0xf] }
  0x7e   : > { %v2107_v43 = vshll.u32 %v6800_v6, 16  ;;  %v2073_v28 = vrot.slane %v2072_v29, 4  ;;  %v2077_v50 = vrot.slane %v2075_v16, 5  ;;  %v2113_v8 = vshll.u32 %v8619_v5, 16  ;;  %v8638_v6 = vld [vmem:[%s7996_s23 + $0x38] sm:$0x1] }
  0x7f   : > { %v2117_v56 = vshrl.u32 %v8619_v5, 16  ;;  %v2086_v11 = vor.u32 %v2085_v33, %v2082_v2  ;;  %v8635_v32 = vrot.slane %v2089_v24, 5  ;;  %v2095_v23 = vrot.slane %v2093_v18, 4 }
  0x80   : > { %v2044_v29 = vsel %vm8048_vm5, %v2039_v20, %v8571_v17  ;;  %v8646_v16 = vrot.slane %v2099_v27, 5  ;;  %v2106_v54 = vrot.slane %v2104_v37, 4  ;;  %v2054_v2 = vsel %vm8048_vm5, %v2049_v35, %v2053_v60  ;;  %v8669_v37 = vld [vmem:[%s7996_s23 + $0x44] sm:$0x1] }
  0x81   : > { %7648 = vmatmul.mubr.msk.bf16.gmra.mxu0 %vm658_vm4, %v6703_v39  ;;  %v8641_v39 = vld [vmem:[%s7996_s23 + $0x40] sm:$0xf]  ;;  %v2068_v33 = vsel %vm8048_vm5, %v2063_v58, %v8585_v44  ;;  %v2128_v24 = vshrl.u32 %v6803_v30, 16  ;;  %v2131_v18 = vshll.u32 %v6803_v30, 16  ;;  %v2078_v17 = vsel %vm8048_vm5, %v2073_v28, %v2077_v50 }
  0x82   : > { %7651 = vmatprep.mubr.msk.bf16.mxu0 %vm658_vm4, %v6704_v21  ;;  %v2109_v21 = vrot.slane %v2107_v43, 5  ;;  %v8661_v20 = vrot.slane %v2113_v8, 5  ;;  %v2119_v27 = vrot.slane %v2117_v56, 4  ;;  %v8664_v60 = vrot.slane %v2086_v11, 4 }
  0x83   : > { %v2096_v35 = vor.u32 %v2095_v23, %v8635_v32  ;;  %v2130_v44 = vrot.slane %v2128_v24, 4  ;;  %v2133_v58 = vrot.slane %v2131_v18, 5  ;;  %v2141_v28 = vshrl.u32 %v8641_v39, 16  ;;  %v8684_v24 = vld [vmem:[%s7996_s23 + $0x50] sm:$0x1] }
  0x84   : > { %7614 = vmatmul.mubr.msk.bf16.gmra.mxu1 %vm658_vm4, %v6654_v52  ;;  %v2137_v52 = vshll.u32 %v8641_v39, 16  ;;  %v2110_v30 = vor.u32 %v2109_v21, %v2106_v54  ;;  %v8674_v50 = vcombine.low %v2044_v29, %v2054_v2  ;;  %v8676_v8 = vcombine.low %v2068_v33, %v2078_v17  ;;  %v8689_v29 = vld [vmem:[%s7996_s23 + $0x58] sm:$0xf] }
  0x85   : > { %7617 = vmatprep.mubr.msk.bf16.mxu1 %vm658_vm4, %v6655_v4  ;;  %v2123_v4 = vshll.u32 %v8638_v6, 16  ;;  %v2152_v56 = vshrl.u32 %v6806_v42, 16  ;;  %v2155_v11 = vshll.u32 %v6806_v42, 16  ;;  %v2120_v23 = vor.u32 %v2119_v27, %v8661_v20 }
  0x86   : > { %v8671_v43 = vrot.slane %v2137_v52, 5  ;;  %v2134_v54 = vor.u32 %v2133_v58, %v2130_v44  ;;  %v2143_v21 = vrot.slane %v2141_v28, 4  ;;  %v2161_v18 = vshll.u32 %v8656_v13, 16  ;;  %v6809_v52 = vld [vmem:[%s7996_s23 + $0x54] sm:$0xf] }
  0x87   : > { %v2097_v9 = vrot.slane %v2096_v35, 4  ;;  %v2147_v12 = vshll.u32 %v8669_v37, 16  ;;  %v2157_v42 = vrot.slane %v2155_v11, 5  ;;  %v2092_v2 = vsel %vm8048_vm5, %v8664_v60, %v8635_v32  ;;  %v6812_v44 = vld [vmem:[%s7996_s23 + $0x60] sm:$0xf] }
  0x88   : > { %v2111_v33 = vrot.slane %v2110_v30, 4  ;;  %v2125_v17 = vrot.slane %v2123_v4, 5  ;;  %v2165_v27 = vshrl.u32 %v8656_v13, 16  ;;  %v2144_v36 = vor.u32 %v2143_v21, %v8671_v43  ;;  %v8716_v28 = vld [vmem:[%s7996_s23 + $0x5c] sm:$0x1] }
  0x89   : > { %7652 = vmatmul.mubr.msk.bf16.gmra.mxu0 %vm658_vm4, %v6705_v55  ;;  %v2154_v55 = vrot.slane %v2152_v56, 4  ;;  %v8706_v15 = vrot.slane %v2161_v18, 5  ;;  %v2179_v35 = vshll.u32 %v6809_v52, 16  ;;  %v10704_v32 = vcombine.low %v8174_v46, %v8179_v53  ;;  %v8720_v11 = vld [vmem:[%s7996_s23 + $0x64] sm:$0xf] }
  0x8a   : > { %7655 = vmatprep.mubr.msk.bf16.mxu0 %vm658_vm4, %v6706_v49  ;;  %v2176_v49 = vshrl.u32 %v6809_v52, 16  ;;  %v2121_v60 = vrot.slane %v2120_v23, 4  ;;  %v2135_v58 = vrot.slane %v2134_v54, 4  ;;  %v2167_v30 = vrot.slane %v2165_v27, 4  ;;  %v8742_v27 = vld [vmem:[%s7996_s23 + $0x70] sm:$0xf] }
  0x8b   : > { %v2185_v45 = vshll.u32 %v8689_v29, 16  ;;  %v2149_v51 = vrot.slane %v2147_v12, 5  ;;  %v2171_v4 = vshll.u32 %v8684_v24, 16  ;;  %v2189_v56 = vshrl.u32 %v8689_v29, 16 }
  0x8c   : > { %7618 = vmatmul.mubr.msk.bf16.gmra.mxu1 %vm658_vm4, %v6656_v34  ;;  %v2158_v34 = vor.u32 %v2157_v42, %v2154_v55  ;;  %v2102_v46 = vsel %vm8048_vm5, %v2097_v9, %v8646_v16  ;;  %v2116_v53 = vsel %vm8048_vm5, %v2111_v33, %v8661_v20  ;;  %v2178_v23 = vrot.slane %v2176_v49, 4  ;;  %v6815_v55 = vld [vmem:[%s7996_s23 + $0x6c] sm:$0xf] }
  0x8d   : > { %7621 = vmatprep.mubr.msk.bf16.mxu1 %vm658_vm4, %v10704_v32  ;;  %v2181_v54 = vrot.slane %v2179_v35, 5  ;;  %v2145_v21 = vrot.slane %v2144_v36, 4  ;;  %v2168_v18 = vor.u32 %v2167_v30, %v8706_v15  ;;  %v8729_v52 = vrot.slane %v2185_v45, 5 }
  0x8e   : > { %v2191_v12 = vrot.slane %v2189_v56, 4  ;;  %v10705_v42 = vcombine.low %v8502_v59, %v8522_v31  ;;  %v2126_v16 = vsel %vm8048_vm5, %v2121_v60, %v2125_v17  ;;  %v2140_v20 = vsel %vm8048_vm5, %v2135_v58, %v8671_v43 }
  0x8f   : > { %v2200_v9 = vshrl.u32 %v6812_v44, 16  ;;  %v2203_v33 = vshll.u32 %v6812_v44, 16  ;;  %v10706_v36 = vcombine.low %v8511_v25, %v8541_v3  ;;  %v2159_v49 = vrot.slane %v2158_v34, 4 }
  0x90   : > { %v2173_v59 = vrot.slane %v2171_v4, 5  ;;  %v2209_v31 = vshll.u32 %v8720_v11, 16  ;;  %v2213_v17 = vshrl.u32 %v8720_v11, 16  ;;  %v2182_v35 = vor.u32 %v2181_v54, %v2178_v23 }
  0x91   : > { %7656 = vmatmul.mubr.msk.bf16.gmra.mxu0 %vm658_vm4, %v10705_v42  ;;  %v2195_v32 = vshll.u32 %v8716_v28, 16  ;;  %v2202_v43 = vrot.slane %v2200_v9, 4  ;;  %v2205_v60 = vrot.slane %v2203_v33, 5  ;;  %v10707_v44 = vcombine.low %v10695_v61, %v10694_v0  ;;  %v8769_v61 = vld [vmem:[%s7996_s23 + $0x68] sm:$0x1]  ;;  %v7896_v9 = vld [vmem:[%s7996_s23 + $0xc] sm:$0xff]  }
  0x92   : > { %7659 = vmatprep.mubr.msk.bf16.mxu0 %vm658_vm4, %v10706_v36  ;;  %v2150_v25 = vsel %vm8048_vm5, %v2145_v21, %v2149_v51  ;;  %v2169_v3 = vrot.slane %v2168_v18, 4  ;;  %v2192_v58 = vor.u32 %v2191_v12, %v8729_v52  ;;  %v8758_v30 = vrot.slane %v2209_v31, 5  ;;  %v8784_v18 = vld [vmem:[%s7996_s23 + $0x7c] sm:$0xf] }
  0x93   : > { %v10708_v45 = vcombine.low %v10699_v48, %v10698_v22  ;;  %v8764_v34 = vcombine.low %v2092_v2, %v2102_v46  ;;  %v8766_v0 = vcombine.low %v2116_v53, %v2126_v16  ;;  %v2215_v4 = vrot.slane %v2213_v17, 4  ;;  %v6818_v22 = vld [vmem:[%s7996_s23 + $0x78] sm:$0xf]  ;;  %10709 = vst [vmem:[#allocation5_spill] sm:$0xff] %v8784_v18 }
  0x94   : > { %7622 = vmatmul.mubr.msk.bf16.gmra.mxu1 %vm658_vm4, %v10707_v44  ;;  %v2224_v51 = vshrl.u32 %v6815_v55, 16  ;;  %v2206_v56 = vor.u32 %v2205_v60, %v2202_v43  ;;  %v2227_v23 = vshll.u32 %v6815_v55, 16  ;;  %v2233_v54 = vshll.u32 %v8742_v27, 16 }
  0x95   : > { %7625 = vmatprep.mubr.msk.bf16.mxu1 %vm658_vm4, %v10708_v45  ;;  %v2237_v21 = vshrl.u32 %v8742_v27, 16  ;;  %v8774_v48 = vcombine.low %v2140_v20, %v2150_v25  ;;  %v2164_v2 = vsel %vm8048_vm5, %v2159_v49, %v8706_v15  ;;  %v8779_v46 = vrot.slane %v2182_v35, 4  ;;  %v8793_v20 = vld [vmem:[%s7996_s23 + $0x74] sm:$0x1]  ;;  %v8811_v25 = vld [vmem:[%s7996_s23 + $0x88] sm:$0xf] }
  0x96   : > { %v8781_v53 = vrot.slane %v2195_v32, 5  ;;  %v2174_v12 = vsel %vm8048_vm5, %v2169_v3, %v2173_v59  ;;  %v8788_v55 = vrot.slane %v2192_v58, 4  ;;  %v2216_v42 = vor.u32 %v2215_v4, %v8758_v30  ;;  %10711 = vst [vmem:[#allocation7_spill] sm:$0xff] %v8811_v25 }
  0x97   : > { %v2219_v16 = vshll.u32 %v8769_v61, 16  ;;  %v10710_v15 = vcombine.low %v8602_v40, %v8615_v14  ;;  %v2226_v33 = vrot.slane %v2224_v51, 4  ;;  %v2229_v36 = vrot.slane %v2227_v23, 5  ;;  %v6821_v40 = vld [vmem:[%s7996_s23 + $0x84] sm:$0xf] }
  0x98   : > { %v2248_v49 = vshrl.u32 %v6818_v22, 16  ;;  %v2251_v59 = vshll.u32 %v6818_v22, 16  ;;  %v8802_v31 = vrot.slane %v2206_v56, 4  ;;  %v8804_v17 = vrot.slane %v2233_v54, 5  ;;  %v8824_v51 = vld [vmem:[%s7996_s23 + $0x80] sm:$0x1] }
  0x99   : > { %7660 = vmatmul.mubr.msk.bf16.gmra.mxu0 %vm658_vm4, %v10710_v15  ;;  %v2239_v35 = vrot.slane %v2237_v21, 4  ;;  %v2257_v32 = vshll.u32 %v8784_v18, 16  ;;  %v2243_v14 = vshll.u32 %v8793_v20, 16  ;;  %v2261_v44 = vshrl.u32 %v8784_v18, 16  ;;  %10713 = vst [vmem:[#allocation6_spill] sm:$0xff] %v8824_v51 }
  0x9a   : > { %7699 = vmatprep.mubr.msk.bf16.mxu0 %vm658_vm4, %v8674_v50  ;;  %v2250_v43 = vrot.slane %v2248_v49, 4  ;;  %v2253_v60 = vrot.slane %v2251_v59, 5  ;;  %v10712_v50 = vcombine.low %v10701_v7, %v8293_v41  ;;  %v8817_v3 = vcombine.low %v2164_v2, %v2174_v12  ;;  %v6824_v2 = vld [vmem:[%s7996_s23 + $0x90] sm:$0xf]  ;;  %v7898_v49 = vld [vmem:[%s7996_s23 + $0x24] sm:$0xff]  }
  0x9b   : > { %v2188_v58 = vsel %vm8048_vm5, %v8779_v46, %v8729_v52  ;;  %v2217_v45 = vrot.slane %v2216_v42, 4  ;;  %v2221_v4 = vrot.slane %v2219_v16, 5  ;;  %v2230_v41 = vor.u32 %v2229_v36, %v2226_v33  ;;  %v7897_v46 = vld [vmem:[%s7996_s23 + $0x18] sm:$0xff]  }
  0x9c   : > { %7626 = vmatmul.mubr.msk.bf16.gmra.mxu1 %vm658_vm4, %v10712_v50  ;;  %v8827_v7 = vrot.slane %v2257_v32, 5  ;;  %v2263_v56 = vrot.slane %v2261_v44, 4  ;;  %v2272_v23 = vshrl.u32 %v6821_v40, 16  ;;  %v2198_v54 = vsel %vm8048_vm5, %v8788_v55, %v8781_v53  ;;  %v8848_v53 = vld [vmem:[%s7996_s23 + $0x8c] sm:$0x1] }
  0x9d   : > { %7665 = vmatprep.mubr.msk.bf16.mxu1 %vm658_vm4, %v7896_v9  ;;  %v2212_v52 = vsel %vm8048_vm5, %v8802_v31, %v8758_v30  ;;  %v2275_v21 = vshll.u32 %v6821_v40, 16  ;;  %v2281_v22 = vshll.u32 %v8811_v25, 16  ;;  %v2240_v12 = vor.u32 %v2239_v35, %v8804_v17  ;;  %v8845_v9 = vld [vmem:[%s7996_s23 + $0x94] sm:$0xf]  ;;  %10715 = vst [vmem:[#allocation8_spill] sm:$0xff] %v8848_v53 }
  0x9e   : > { %v8841_v42 = vrot.slane %v2243_v14, 5  ;;  %v2254_v16 = vor.u32 %v2253_v60, %v2250_v43  ;;  %v2267_v15 = vshll.u32 %v8824_v51, 16  ;;  %10714 = vst [vmem:[#allocation3_spill] sm:$0xff] %v8845_v9  ;;  %v2274_v55 = vrot.slane %v2272_v23, 4  ;;  %v8877_v23 = vld [vmem:[%s7996_s23 + $0xa0] sm:$0xf] }
  0x9f   : > { %v2277_v33 = vrot.slane %v2275_v21, 5  ;;  %v8850_v30 = vrot.slane %v2281_v22, 5  ;;  %v2285_v36 = vshrl.u32 %v8811_v25, 16  ;;  %v2222_v59 = vsel %vm8048_vm5, %v2217_v45, %v2221_v4  ;;  %v6827_v4 = vld [vmem:[%s7996_s23 + $0x9c] sm:$0xf]  ;;  %10716 = vst [vmem:[#allocation10_spill] sm:$0xff] %v8877_v23 }
  0xa0   : > { %v8858_v31 = vrot.slane %v2230_v41, 4  ;;  %v2264_v35 = vor.u32 %v2263_v56, %v8827_v7  ;;  %v2296_v32 = vshrl.u32 %v6824_v2, 16  ;;  %v2299_v43 = vshll.u32 %v6824_v2, 16  ;;  %v8886_v2 = vld [vmem:[%s7996_s23 + $0x98] sm:$0x1] }
  0xa1   : > { %7700 = vmatmul.mubr.msk.bf16.vlgmr.msra.gmra.mxu0 %vm658_vm4, %v8676_v8  ;;  %v2278_v40 = vor.u32 %v2277_v33, %v2274_v55  ;;  %v2287_v14 = vrot.slane %v2285_v36, 4  ;;  %v2305_v8 = vshll.u32 %v8845_v9, 16  ;;  %v8865_v60 = vrot.slane %v2240_v12, 4  ;;  %10717 = vst [vmem:[#allocation9_spill] sm:$0xff] %v8886_v2 }
  0xa2   : > { %7766 = vmatpush3.bf16.msra.mxu0 %v8588_v19  ;;  %7703 = vmatprep.mubr.msk.bf16.mxu0 %vm658_vm4, %v8764_v34  ;;  %v2291_v44 = vshll.u32 %v8848_v53, 16  ;;  %v2298_v50 = vrot.slane %v2296_v32, 4  ;;  %v2309_v45 = vshrl.u32 %v8845_v9, 16  ;;  %v8871_v19 = vrot.slane %v2254_v16, 4  ;;  %v6830_v32 = vld [vmem:[%s7996_s23 + $0xa8] sm:$0xf] }
  0xa3   : > { %v8873_v41 = vrot.slane %v2267_v15, 5  ;;  %v2288_v34 = vor.u32 %v2287_v14, %v8850_v30  ;;  %v2301_v56 = vrot.slane %v2299_v43, 5  ;;  %v8881_v21 = vrot.slane %v2264_v35, 4  ;;  %v8909_v14 = vld [vmem:[%s7996_s23 + $0xac] sm:$0xf]  ;;  %v7900_v43 = vld [vmem:[%s7996_s23 + $0x3c] sm:$0xff]  }
  0xa4   : > { %7666 = vmatmul.mubr.msk.bf16.vlgmr.msra.gmra.mxu1 %vm658_vm4, %v7897_v46  ;;  %v8883_v22 = vrot.slane %v2278_v40, 4  ;;  %v8888_v46 = vrot.slane %v2305_v8, 5  ;;  %v2311_v12 = vrot.slane %v2309_v45, 4  ;;  %v8890_v16 = vcombine.low %v2188_v58, %v2198_v54  ;;  %v7899_v40 = vld [vmem:[%s7996_s23 + $0x30] sm:$0xff]   ;;  %10718 = vst [vmem:[#allocation11_spill] sm:$0xff] %v8909_v14  ;;  %v7901_v9 = vld [vmem:[%s7996_s23 + $0x48] sm:$0xff]  }
  0xa5   : > { %7732 = vmatpush3.bf16.msra.mxu1 %v8569_v62  ;;  %7669 = vmatprep.mubr.msk.bf16.mxu1 %vm658_vm4, %v7898_v49  ;;  %v2302_v15 = vor.u32 %v2301_v56, %v2298_v50  ;;  %v2320_v55 = vshrl.u32 %v6827_v4, 16  ;;  %v2323_v33 = vshll.u32 %v6827_v4, 16  ;;  %v8892_v62 = vcombine.low %v2212_v52, %v2222_v59  ;;  %v8931_v45 = vld [vmem:[%s7996_s23 + $0xa4] sm:$0x1] }
  0xa6   : > { %v8898_v49 = vrot.slane %v2291_v44, 5  ;;  %v2329_v35 = vshll.u32 %v8877_v23, 16  ;;  %v8903_v58 = vrot.slane %v2288_v34, 4  ;;  %v2312_v54 = vor.u32 %v2311_v12, %v8888_v46  ;;  %10719 = vst [vmem:[#allocation12_spill] sm:$0xff] %v8931_v45  ;;  %v8938_v12 = vld [vmem:[%s7996_s23 + $0xb0] sm:$0x1] }
  0xa7   : > { %v2315_v52 = vshll.u32 %v8886_v2, 16  ;;  %v2333_v59 = vshrl.u32 %v8877_v23, 16  ;;  %v8935_v4 = vrot.slane %v2302_v15, 4  ;;  %v2322_v34 = vrot.slane %v2320_v55, 4  ;;  %10720 = vst [vmem:[#allocation4_spill] sm:$0xff] %v8938_v12 }
  0xa8   : > { %v2325_v56 = vrot.slane %v2323_v33, 5  ;;  %v2344_v44 = vshrl.u32 %v6830_v32, 16  ;;  %v8940_v36 = vrot.slane %v2329_v35, 5  ;;  %v2347_v8 = vshll.u32 %v6830_v32, 16  ;;  %v6833_v23 = vld [vmem:[%s7996_s23 + $0xb4] sm:$0xf] }
  0xa9   : > { %7704 = vmatmul.mubr.msk.bf16.gmra.mxu0 %vm658_vm4, %v8766_v0  ;;  %v2335_v50 = vrot.slane %v2333_v59, 4  ;;  %v2353_v0 = vshll.u32 %v8909_v14, 16  ;;  %v8949_v15 = vrot.slane %v2312_v54, 4  ;;  %v2317_v55 = vrot.slane %v2315_v52, 5  ;;  %v8952_v35 = vld [vmem:[%s7996_s23 + $0xb8] sm:$0xf] }
  0xaa   : > { %7707 = vmatprep.mubr.msk.bf16.mxu0 %vm658_vm4, %v8774_v48  ;;  %v2294_v48 = vsel %vm8048_vm5, %v8903_v58, %v8898_v49  ;;  %v2346_v33 = vrot.slane %v2344_v44, 4  ;;  %10721 = vst [vmem:[#allocation2_spill] sm:$0xff] %v8952_v35  ;;  %v2339_v32 = vshll.u32 %v8931_v45, 16  ;;  %v2349_v59 = vrot.slane %v2347_v8, 5  ;;  %v8964_v54 = vld [vmem:[%s7996_s23 + $0xbc] sm:$0x1] }
  0xab   : > { %v8956_v2 = vrot.slane %v2353_v0, 5  ;;  %v2308_v49 = vsel %vm8048_vm5, %v8935_v4, %v8888_v46  ;;  %v2326_v58 = vor.u32 %v2325_v56, %v2322_v34  ;;  %v2368_v52 = vshrl.u32 %v6833_v23, 16  ;;  %v8973_v4 = vld [vmem:[%s7996_s23 + $0xc4] sm:$0xf] }
  0xac   : > { %7670 = vmatmul.mubr.msk.bf16.gmra.mxu1 %vm658_vm4, %v7899_v40  ;;  %v2357_v40 = vshrl.u32 %v8909_v14, 16  ;;  %v2371_v44 = vshll.u32 %v6833_v23, 16  ;;  %v2363_v8 = vshll.u32 %v8938_v12, 16  ;;  %v2377_v0 = vshll.u32 %v8952_v35, 16  ;;  %v6836_v14 = vld [vmem:[%s7996_s23 + $0xc0] sm:$0xf] }
  0xad   : > { %7673 = vmatprep.mubr.msk.bf16.mxu1 %vm658_vm4, %v7900_v43  ;;  %v2336_v43 = vor.u32 %v2335_v50, %v8940_v36  ;;  %v2350_v53 = vor.u32 %v2349_v59, %v2346_v33  ;;  %v2370_v25 = vrot.slane %v2368_v52, 4  ;;  %v2381_v46 = vshrl.u32 %v8952_v35, 16  ;;  %v7902_v23 = vld [vmem:[%s7996_s23 + $0x54] sm:$0xff]  }
  0xae   : > { %v2359_v45 = vrot.slane %v2357_v40, 4  ;;  %v2373_v51 = vrot.slane %v2371_v44, 5  ;;  %v2318_v50 = vsel %vm8048_vm5, %v8949_v15, %v2317_v55  ;;  %v2341_v34 = vrot.slane %v2339_v32, 5  ;;  %v8991_v32 = vld [vmem:[%s7996_s23 + $0xc8] sm:$0x1] }
  0xaf   : > { %v8982_v40 = vrot.slane %v2377_v0, 5  ;;  %v2383_v59 = vrot.slane %v2381_v46, 4  ;;  %v2387_v52 = vshll.u32 %v8964_v54, 16  ;;  %v2392_v44 = vshrl.u32 %v6836_v14, 16 }
  0xb0   : > { %v2360_v56 = vor.u32 %v2359_v45, %v8956_v2  ;;  %v2374_v33 = vor.u32 %v2373_v51, %v2370_v25  ;;  %v2337_v35 = vrot.slane %v2336_v43, 4  ;;  %v2395_v12 = vshll.u32 %v6836_v14, 16 }
  0xb1   : > { %7708 = vmatmul.mubr.msk.bf16.gmra.mxu0 %vm658_vm4, %v8817_v3  ;;  %v2327_v3 = vrot.slane %v2326_v58, 4  ;;  %v2401_v18 = vshll.u32 %v8973_v4, 16  ;;  %v2351_v15 = vrot.slane %v2350_v53, 4  ;;  %v2365_v55 = vrot.slane %v2363_v8, 5 }
  0xb2   : > { %7711 = vmatprep.mubr.msk.bf16.mxu0 %vm658_vm4, %v8890_v16  ;;  %v2384_v45 = vor.u32 %v2383_v59, %v8982_v40  ;;  %v2394_v16 = vrot.slane %v2392_v44, 4  ;;  %v2361_v25 = vrot.slane %v2360_v56, 4  ;;  %v2397_v51 = vrot.slane %v2395_v12, 5  ;;  %v6875_v44 = vld [vmem:[%s7996_s23 + $0x30] sm:$0xe] }
  0xb3   : > { %v8994_v0 = vrot.slane %v2401_v18, 5  ;;  %v2405_v14 = vshrl.u32 %v8973_v4, 16  ;;  %v10722_v53 = vsel %vm8048_vm5, %v8865_v60, %v8841_v42  ;;  %v10723_v58 = vsel %vm8048_vm5, %v8858_v31, %v8804_v17  ;;  %v7903_v31 = vld [vmem:[%s7996_s23 + $0x60] sm:$0xff]  }
  0xb4   : > { %7674 = vmatmul.mubr.msk.bf16.gmra.mxu1 %vm658_vm4, %v7901_v9  ;;  %v7050_v9 = vld [vmem:[%s10642_s1 + $0xe] sm:$0x3]  ;;  %v6848_v12 = vcombine.low %v10723_v58, %v10722_v53  ;;  %v2375_v18 = vrot.slane %v2374_v33, 4  ;;  %v2385_v43 = vrot.slane %v2384_v45, 4  ;;  %v2389_v8 = vrot.slane %v2387_v52, 5 }
  0xb5   : > { %7677 = vmatprep.mubr.msk.bf16.mxu1 %vm658_vm4, %v7902_v23  ;;  %v10724_v46 = vsel %vm8048_vm5, %v8881_v21, %v8873_v41  ;;  %v10725_v42 = vsel %vm8048_vm5, %v8871_v19, %v8827_v7  ;;  %v2398_v23 = vor.u32 %v2397_v51, %v2394_v16  ;;  %v2407_v56 = vrot.slane %v2405_v14, 4  ;;  %v7115_v19 = vld [vmem:[%s10642_s1 + $0x10] sm:$0x3]  ;;  %v6874_v21 = vld [vmem:[%s7996_s23 + $0x24] sm:$0xe] }
  0xb6   : > { %v6849_v60 = vcombine.low %v10725_v42, %v10724_v46  ;;  %v2411_v17 = vshll.u32 %v8991_v32, 16  ;;  %v10726_v33 = vsel %vm8048_vm5, %v8883_v22, %v8850_v30  ;;  %v9027_v52 = vcombine.low %v2308_v49, %v2318_v50  ;;  %v7904_v30 = vld [vmem:[%s7996_s23 + $0x6c] sm:$0xff]   ;;  %v6876_v14 = vld [vmem:[%s7996_s23 + $0x3c] sm:$0xe] }
  0xb7   : > { %v6850_v59 = vcombine.low %v10726_v33, %v2294_v48  ;;  %v2332_v41 = vsel %vm8048_vm5, %v2327_v3, %v8940_v36  ;;  %v9033_v7 = vand.u32 %v7050_v9, %v10703_v1  ;;  %v2342_v22 = vsel %vm8048_vm5, %v2337_v35, %v2341_v34  ;;  %v9051_v50 = vld [vmem:[%s7996_s23 + $0xc] sm:$0xe] }
  0xb8   : > { %v2356_v36 = vsel %vm8048_vm5, %v2351_v15, %v8956_v2  ;;  %v2366_v48 = vsel %vm8048_vm5, %v2361_v25, %v2365_v55  ;;  %v2408_v49 = vor.u32 %v2407_v56, %v8994_v0  ;;  %v2390_v35 = vsel %vm8048_vm5, %v2385_v43, %v2389_v8  ;;  %v6878_v56 = vld [vmem:[%s7996_s23 + $0x54] sm:$0xe] }
  0xb9   : > { %7712 = vmatmul.mubr.msk.bf16.gmra.mxu0 %vm658_vm4, %v8892_v62  ;;  %v2380_v62 = vsel %vm8048_vm5, %v2375_v18, %v8982_v40  ;;  %v9059_v34 = vrot.slane %v2398_v23, 4  ;;  %v2775_v2 = vrot.slane %v8514_v47, 5  ;;  %7799 = vmatprep.subr.bf16.mxu1 %v9033_v7  ;;  %v9066_v15 = vrot.slane %v2411_v17, 5  ;;  %v7905_v17 = vld [vmem:[%s7996_s23 + $0x78] sm:$0xff]  }
  0xba   : > { %7715 = vmatprep.mubr.msk.bf16.mxu0 %vm658_vm4, %v6848_v12  ;;  %v9064_v3 = vrot.slane %v2408_v49, 4  ;;  %v9069_v55 = vand.u32 %v7115_v19, %v10703_v1  ;;  %v6890_v45 = vrot.slane %v6874_v21, 9  ;;  %v9072_v40 = vcombine.low %v2332_v41, %v2342_v22  ;;  %v6877_v12 = vld [vmem:[%s7996_s23 + $0x48] sm:$0xe]  ;;  %v7912_v47 = vld [vmem:[%s7996_s23 + $0x18] sm:$0xff]  }
  0xbb   : > { %v9074_v16 = vcombine.low %v2356_v36, %v2366_v48  ;;  %v6888_v25 = vrot.slane %v9051_v50, 9  ;;  %v2789_v51 = vrot.slane %v8592_v10, 5  ;;  %v9080_v9 = vcombine.low %v2380_v62, %v2390_v35  ;;  %v7906_v21 = vld [vmem:[%s7996_s23 + $0x84] sm:$0xff]   ;;  %v6879_v36 = vld [vmem:[%s7996_s23 + $0x60] sm:$0xe] }
  0xbc   : > { %7678 = vmatmul.mubr.msk.bf16.gmra.mxu1 %vm658_vm4, %v7903_v31  ;;  %v2778_v1 = vrot.slane %v8544_v57, 5  ;;  %7833 = vmatprep.subr.bf16.mxu0 %v9069_v55  ;;  %v2792_v53 = vrot.slane %v8606_v26, 5  ;;  %v6891_v58 = vrot.slane %v6875_v44, 9  ;;  %v2404_v10 = vsel %vm8048_vm5, %v9059_v34, %v8994_v0 }
  0xbd   : > { %7681 = vmatprep.mubr.msk.bf16.mxu1 %vm658_vm4, %v7904_v30  ;;  %v9092_v18 = vrot.slane %v2775_v2, 4  ;;  %v9096_v43 = vsel %vm8314_vm8, %v6890_v45, %v2789_v51  ;;  %v2791_v8 = vrot.slane %v2789_v51, 4  ;;  %v2414_v26 = vsel %vm8048_vm5, %v9064_v3, %v9066_v15  ;;  %v7911_v15 = vld [vmem:[%s7996_s23 + $0xc0] sm:$0xff]  }
  0xbe   : > { %v2796_v46 = vrot.slane %v8619_v5, 5  ;;  %v2799_v42 = vrot.slane %v8638_v6, 5  ;;  %v6892_v23 = vrot.slane %v6876_v14, 9  ;;  %v2803_v33 = vrot.slane %v8641_v39, 5  ;;  %v6881_v14 = vld [vmem:[%s7996_s23 + $0x78] sm:$0xe] }
  0xbf   : > { %v9108_v31 = vsel %vm8314_vm8, %v2791_v8, %v2792_v53  ;;  %v2806_v41 = vrot.slane %v8669_v37, 5  ;;  %v6893_v19 = vrot.slane %v6877_v12, 9  ;;  %v2810_v22 = vrot.slane %v8656_v13, 5 }
  0xc0   : > { %v6907_v5 = vcombine.low %v9096_v43, %v9108_v31  ;;  %v9118_v6 = vsel %vm8314_vm8, %v6891_v58, %v2796_v46  ;;  %v2798_v30 = vrot.slane %v2796_v46, 4  ;;  %v9125_v39 = vsel %vm8314_vm8, %v6892_v23, %v2803_v33  ;;  %v6882_v23 = vld [vmem:[%s7996_s23 + $0x84] sm:$0xe] }
  0xc1   : > { %7716 = vmatmul.mubr.msk.bf16.gmra.mxu0 %vm658_vm4, %v6849_v60  ;;  %v2805_v37 = vrot.slane %v2803_v33, 4  ;;  %v2813_v60 = vrot.slane %v8684_v24, 5  ;;  %v6894_v48 = vrot.slane %v6878_v56, 9  ;;  %v9134_v62 = vsel %vm8314_vm8, %v6893_v19, %v2810_v22  ;;  %v7907_v19 = vld [vmem:[%s7996_s23 + $0x90] sm:$0xff]  }
  0xc2   : > { %7719 = vmatprep.mubr.msk.bf16.mxu0 %vm658_vm4, %v6850_v59  ;;  %v9130_v49 = vsel %vm8314_vm8, %v2798_v30, %v2799_v42  ;;  %v2812_v13 = vrot.slane %v2810_v22, 4  ;;  %v2817_v35 = vrot.slane %v8689_v29, 5  ;;  %v6880_v59 = vld [vmem:[%s7996_s23 + $0x6c] sm:$0xe]  ;;  %v2820_v45 = vrot.slane %v8716_v28, 5  ;;  %v10727_v30 = vld [vmem:[#allocation5_spill] sm:$0xff] }
  0xc3   : > { %v6908_v44 = vcombine.low %v9118_v6, %v9130_v49  ;;  %v9143_v24 = vsel %vm8314_vm8, %v2805_v37, %v2806_v41  ;;  %v6895_v51 = vrot.slane %v6879_v36, 9  ;;  %v2824_v8 = vrot.slane %v8720_v11, 5  ;;  %v6883_v36 = vld [vmem:[%s7996_s23 + $0x90] sm:$0xe]  ;;  %v10737_v28 = vld [vmem:[#allocation2_spill] sm:$0xff] }
  0xc4   : > { %7682 = vmatmul.mubr.msk.bf16.gmra.mxu1 %vm658_vm4, %v7905_v17  ;;  %v6909_v29 = vcombine.low %v9125_v39, %v9143_v24  ;;  %v9152_v53 = vsel %vm8314_vm8, %v2812_v13, %v2813_v60  ;;  %v9156_v58 = vsel %vm8314_vm8, %v6894_v48, %v2817_v35  ;;  %v2819_v12 = vrot.slane %v2817_v35, 4  ;;  %v10728_v60 = vld [vmem:[#allocation6_spill] sm:$0xff] }
  0xc5   : > { %7685 = vmatprep.mubr.msk.bf16.mxu1 %vm658_vm4, %v7906_v21  ;;  %v2827_v46 = vrot.slane %v8769_v61, 5  ;;  %v6896_v42 = vrot.slane %v6880_v59, 9  ;;  %v2831_v17 = vrot.slane %v8742_v27, 5  ;;  %v2834_v33 = vrot.slane %v8793_v20, 5  ;;  %v7908_v27 = vld [vmem:[%s7996_s23 + $0x9c] sm:$0xff]   ;;  %v7909_v21 = vld [vmem:[%s7996_s23 + $0xa8] sm:$0xff]  }
  0xc6   : > { %v9165_v56 = vsel %vm8314_vm8, %v2819_v12, %v2820_v45  ;;  %v6897_v41 = vrot.slane %v6881_v14, 9  ;;  %v9174_v11 = vsel %vm8314_vm8, %v6895_v51, %v2824_v8  ;;  %v2826_v61 = vrot.slane %v2824_v8, 4  ;;  %v10729_v45 = vld [vmem:[#allocation7_spill] sm:$0xff]  ;;  %v6884_v14 = vld [vmem:[%s7996_s23 + $0x9c] sm:$0xe] }
  0xc7   : > { %v2838_v22 = vrot.slane %v10727_v30, 5  ;;  %v9183_v20 = vsel %vm8314_vm8, %v6896_v42, %v2831_v17  ;;  %v2833_v37 = vrot.slane %v2831_v17, 4  ;;  %v2841_v48 = vrot.slane %v10728_v60, 5  ;;  %v6887_v12 = vld [vmem:[%s7996_s23 + $0xc0] sm:$0xe] }
  0xc8   : > { %v6898_v13 = vrot.slane %v6882_v23, 9  ;;  %v9190_v35 = vsel %vm8314_vm8, %v2826_v61, %v2827_v46  ;;  %v2845_v51 = vrot.slane %v10729_v45, 5  ;;  %v6899_v46 = vrot.slane %v6883_v36, 9  ;;  %v6885_v23 = vld [vmem:[%s7996_s23 + $0xa8] sm:$0xe]  ;;  %v10732_v36 = vld [vmem:[#allocation9_spill] sm:$0xff] }
  0xc9   : > { %7720 = vmatmul.mubr.msk.bf16.gmra.mxu0 %vm658_vm4, %v9027_v52  ;;  %v9194_v52 = vsel %vm8314_vm8, %v6897_v41, %v2838_v22  ;;  %v2840_v59 = vrot.slane %v2838_v22, 4  ;;  %v9202_v8 = vsel %vm8314_vm8, %v2833_v37, %v2834_v33  ;;  %v2855_v37 = vrot.slane %v10732_v36, 5  ;;  %v6886_v45 = vld [vmem:[%s7996_s23 + $0xb4] sm:$0xe] }
  0xca   : > { %7723 = vmatprep.mubr.msk.bf16.mxu0 %vm658_vm4, %v9072_v40  ;;  %v10730_v40 = vld [vmem:[#allocation8_spill] sm:$0xff]  ;;  %v9215_v61 = vsel %vm8314_vm8, %v6898_v13, %v2845_v51  ;;  %v2847_v33 = vrot.slane %v2845_v51, 4  ;;  %v6900_v60 = vrot.slane %v6884_v14, 9  ;;  %v10733_v13 = vld [vmem:[#allocation10_spill] sm:$0xff]  ;;  %v6901_v17 = vrot.slane %v6885_v23, 9  ;;  %v10735_v14 = vld [vmem:[#allocation11_spill] sm:$0xff] }
  0xcb   : > { %v2848_v42 = vrot.slane %v10730_v40, 5  ;;  %v9211_v41 = vsel %vm8314_vm8, %v2840_v59, %v2841_v48  ;;  %v2859_v59 = vrot.slane %v10733_v13, 5  ;;  %v10734_v51 = vld [vmem:[#allocation12_spill] sm:$0xff]  ;;  %v2866_v30 = vrot.slane %v10735_v14, 5 }
  0xcc   : > { %7686 = vmatmul.mubr.msk.bf16.gmra.mxu1 %vm658_vm4, %v7907_v19  ;;  %v10731_v19 = vld [vmem:[#allocation3_spill] sm:$0xff]  ;;  %v2862_v40 = vrot.slane %v10734_v51, 5  ;;  %v10736_v13 = vld [vmem:[#allocation4_spill] sm:$0xff]  ;;  %v6902_v23 = vrot.slane %v6886_v45, 9  ;;  %v2779_v0 = vsel %vm8314_vm8, %v9092_v18, %v2778_v1  ;;  %v7932_v18 = vld [vmem:[%s7996_s23 + $0x20] sm:$0x1] }
  0xcd   : > { %7689 = vmatprep.mubr.msk.bf16.mxu1 %vm658_vm4, %v7908_v27  ;;  %v2852_v22 = vrot.slane %v10731_v19, 5  ;;  %v9225_v48 = vsel %vm8314_vm8, %v2847_v33, %v2848_v42  ;;  %v9240_v42 = vsel %vm8314_vm8, %v6900_v60, %v2859_v59  ;;  %v2861_v33 = vrot.slane %v2859_v59, 4  ;;  %v7910_v27 = vld [vmem:[%s7996_s23 + $0xb4] sm:$0xff]  }
  0xce   : > { %v2869_v51 = vrot.slane %v10736_v13, 5  ;;  %v2868_v14 = vrot.slane %v2866_v30, 4  ;;  %v2873_v60 = vrot.slane %v10737_v28, 5  ;;  %v6903_v59 = vrot.slane %v6887_v12, 9 }
  0xcf   : > { %v9233_v19 = vsel %vm8314_vm8, %v6899_v46, %v2852_v22  ;;  %v2854_v36 = vrot.slane %v2852_v22, 4  ;;  %v9252_v22 = vsel %vm8314_vm8, %v6901_v17, %v2866_v30  ;;  %v2880_v12 = vrot.slane %v8973_v4, 5 }
  0xd0   : > { %v9268_v28 = vsel %vm8314_vm8, %v2868_v14, %v2869_v51  ;;  %v2875_v30 = vrot.slane %v2873_v60, 4  ;;  %v2776_v4 = vsel %vm8314_vm8, %v6888_v25, %v2775_v2  ;;  %v7914_v14 = vld [vmem:[%s7996_s23 + $0x30] sm:$0xff]   ;;  %vm6418_vm13 = vcmask 1045509  }
  0xd1   : > { %7724 = vmatmul.mubr.msk.bf16.gmra.mxu0 %vm658_vm4, %v9074_v16  ;;  %v9248_v46 = vsel %vm8314_vm8, %v2854_v36, %v2855_v37  ;;  %v9261_v16 = vsel %vm8314_vm8, %v2861_v33, %v2862_v40  ;;  %v2876_v37 = vrot.slane %v8964_v54, 5  ;;  %v2883_v40 = vrot.slane %v8991_v32, 5  ;;  %v6873_v32 = vld [vmem:[%s7996_s23 + $0x18] sm:$0xe] }
  0xd2   : > { %7727 = vmatprep.mubr.msk.bf16.mxu0 %vm658_vm4, %v9080_v9  ;;  %v9272_v9 = vsel %vm8314_vm8, %v6902_v23, %v2873_v60  ;;  %v9312_v34 = vsel %vm8314_vm8, %v6903_v59, %v2880_v12  ;;  %v2882_v2 = vrot.slane %v2880_v12, 4  ;;  %v6889_v25 = vrot.slane %v6873_v32, 9  ;;  %v7913_v23 = vld [vmem:[%s7996_s23 + $0x24] sm:$0xff]   ;;  %v7002_v60 = vld [vmem:[%s7996_s23 + $0x18] sm:$0xf] }
  0xd3   : > { %v9300_v3 = vsel %vm8314_vm8, %v2875_v30, %v2876_v37  ;;  %v6905_v1 = vcombine.low %v2776_v4, %v2779_v0  ;;  %v7003_v59 = vld [vmem:[%s7996_s23 + $0x1c] sm:$0xf]  ;;  %v7005_v30 = vld [vmem:[%s7996_s23 + $0x24] sm:$0xf]  ;;  %v3587_v12 = vshrl.u32 %v7002_v60, 16  ;;  %vm6421_vm14 = vcmask 1046534  }
  0xd4   : > { %7690 = vmatmul.mubr.msk.bf16.gmra.mxu1 %vm658_vm4, %v7909_v21  ;;  %v6855_v21 = vcombine.low %v2404_v10, %v2414_v26  ;;  %v9317_v57 = vsel %vm8314_vm8, %v2882_v2, %v2883_v40  ;;  %v2785_v26 = vrot.slane %v7932_v18, 5  ;;  %v3590_v40 = vshll.u32 %v7002_v60, 16  ;;  %v7916_v2 = vld [vmem:[%s7996_s23 + $0x48] sm:$0xff]  }
  0xd5   : > { %7693 = vmatprep.mubr.msk.bf16.mxu1 %vm658_vm4, %v7910_v27  ;;  %v7931_v27 = vld [vmem:[%s7996_s23 + $0x1c] sm:$0xf]  ;;  %v3596_v4 = vshll.u32 %v7003_v59, 16  ;;  %v3600_v32 = vshrl.u32 %v7003_v59, 16  ;;  %vm6424_vm15 = vcmask 1047559   ;;  %vm6540_vm0 = vcmask 257024  }
  0xd6   : > { %v2782_v36 = vrot.slane %v7931_v27, 5  ;;  %v3611_v27 = vshrl.u32 %v7005_v30, 16 }
  0xd7   : > { %v3602_v18 = vrot.slane %v3600_v32, 4 }
  0xd8   : > { %v2784_v10 = vrot.slane %v2782_v36, 4  ;;  %v2783_v13 = vsel %vm8314_vm8, %v6889_v25, %v2782_v36  ;;  %v3614_v36 = vshll.u32 %v7005_v30, 16  ;;  %v3589_v25 = vrot.slane %v3587_v12, 4 }
  0xd9   : > { %7728 = vmatmul.mubr.msk.bf16.gmra.mxu0 %vm658_vm4, %v6855_v21  ;;  %v9339_v21 = vld [vmem:[%s7996_s23 + $0x28] sm:$0xf]  ;;  %v3613_v43 = vrot.slane %v3611_v27, 4 }
  0xda   : > { %7767 = vmatprep.mubr.msk.bf16.mxu0 %vm658_vm4, %v7912_v47  ;;  %v2786_v51 = vsel %vm8314_vm8, %v2784_v10, %v2785_v26  ;;  %v3620_v0 = vshll.u32 %v9339_v21, 16  ;;  %v3624_v47 = vshrl.u32 %v9339_v21, 16  ;;  %v9352_v10 = vrot.slane %v3596_v4, 5 }
  0xdb   : > { %v6906_v37 = vcombine.low %v2783_v13, %v2786_v51  ;;  %v4330_v26 = vrot.slane %v7003_v59, 5  ;;  %v9356_v13 = vld [vmem:[%s7996_s23 + $0x2c] sm:$0x1]  ;;  %v3616_v31 = vrot.slane %v3614_v36, 5  ;;  %v9366_v59 = vld [vmem:[%s7996_s23 + $0x34] sm:$0xf] }
  0xdc   : > { %7694 = vmatmul.mubr.msk.bf16.gmra.mxu1 %vm658_vm4, %v7911_v15  ;;  %v7004_v15 = vld [vmem:[%s7996_s23 + $0x20] sm:$0x1]  ;;  %v9361_v51 = vrot.slane %v3620_v0, 5  ;;  %v3603_v12 = vor.u32 %v3602_v18, %v9352_v10  ;;  %v3630_v32 = vshll.u32 %v9356_v13, 16  ;;  %v4337_v0 = vrot.slane %v9339_v21, 5 }
  0xdd   : > { %7733 = vmatprep.mubr.msk.bf16.mxu1 %vm658_vm4, %v6905_v1  ;;  %v3592_v1 = vrot.slane %v3590_v40, 5  ;;  %v4332_v40 = vrot.slane %v4330_v26, 4  ;;  %v4333_v4 = vrot.slane %v7004_v15, 5  ;;  %v3617_v36 = vor.u32 %v3616_v31, %v3613_v43  ;;  %v7011_v31 = vld [vmem:[%s7996_s23 + $0x3c] sm:$0xf] }
  0xde   : > { %v3604_v24 = vrot.slane %v3603_v12, 4  ;;  %v4339_v33 = vrot.slane %v4337_v0, 4  ;;  %v9405_v12 = vld [vmem:[%s7996_s23 + $0x38] sm:$0x1] }
  0xdf   : > { %v3593_v60 = vor.u32 %v3592_v1, %v3589_v25  ;;  %v3648_v25 = vshrl.u32 %v9366_v59, 16  ;;  %v7918_v1 = vld [vmem:[%s7996_s23 + $0x60] sm:$0xff]  }
  0xe1   : > { %7768 = vmatmul.mubr.msk.bf16.vlgmr.msra.gmra.mxu0 %vm658_vm4, %v7913_v23  ;;  %v3626_v23 = vrot.slane %v3624_v47, 4  ;;  %v3594_v18 = vrot.slane %v3593_v60, 4  ;;  %v4340_v60 = vrot.slane %v9356_v13, 5 }
  0xe2   : > { %7834 = vmatpush3.bf16.msra.mxu0 %v9069_v55  ;;  %7771 = vmatprep.mubr.msk.bf16.mxu0 %vm658_vm4, %v7914_v14  ;;  %v7915_v55 = vld [vmem:[%s7996_s23 + $0x3c] sm:$0xff]   ;;  %v7008_v14 = vld [vmem:[%s7996_s23 + $0x30] sm:$0xf] }
  0xe3   : > { %v3635_v47 = vshrl.u32 %v7008_v14, 16  ;;  %v3627_v6 = vor.u32 %v3626_v23, %v9361_v51  ;;  %v3638_v49 = vshll.u32 %v7008_v14, 16  ;;  %v3618_v14 = vrot.slane %v3617_v36, 4 }
  0xe4   : > { %7734 = vmatmul.mubr.msk.bf16.vlgmr.msra.gmra.mxu1 %vm658_vm4, %v6906_v37  ;;  %v3606_v37 = vshll.u32 %v7004_v15, 16  ;;  %v3659_v36 = vshrl.u32 %v7011_v31, 16  ;;  %v3599_v13 = vsel %vm8048_vm5, %v3594_v18, %v9352_v10  ;;  %v3654_v18 = vshll.u32 %v9405_v12, 16 }
  0xe5   : > { %7800 = vmatpush3.bf16.msra.mxu1 %v9033_v7  ;;  %7737 = vmatprep.mubr.msk.bf16.mxu1 %vm658_vm4, %v6907_v5  ;;  %v7083_v7 = vld [vmem:[%s7996_s23 + $0x18] sm:$0xe]  ;;  %v9359_v5 = vpop.f32.mrf.mxu0  ;;  %v3623_v10 = vsel %vm8048_vm5, %v3618_v14, %v9361_v51  ;;  %v4344_v14 = vrot.slane %v9366_v59, 5 }
  0xe6   : > { %v7099_v30 = vrot.slane %v7083_v7, 9  ;;  %v3608_v21 = vrot.slane %v3606_v37, 5  ;;  %v3632_v7 = vrot.slane %v3630_v32, 5  ;;  %v3637_v37 = vrot.slane %v3635_v47, 4 }
  0xe7   : > { %v9383_v15 = vpop.f32.mrf.mxu0  ;;  %v3650_v32 = vrot.slane %v3648_v25, 4  ;;  %v9473_v17 = vrot.slane %v3654_v18, 5  ;;  %v4346_v45 = vrot.slane %v4344_v14, 4 }
  0xe8   : > { %v9391_v39 = vsel %vm8314_vm8, %v7099_v30, %v4330_v26  ;;  %v3628_v30 = vrot.slane %v3627_v6, 4  ;;  %v3609_v47 = vsel %vm8048_vm5, %v3604_v24, %v3608_v21  ;;  %v9418_v6 = vld [vmem:[%s7996_s23 + $0x40] sm:$0xf]  ;;  %v10742_v21 = vcombine.low %v9156_v58, %v9165_v56  ;;  %v7919_v24 = vld [vmem:[%s7996_s23 + $0x6c] sm:$0xff]  }
  0xe9   : > { %7772 = vmatmul.mubr.msk.bf16.gmra.mxu0 %vm658_vm4, %v7915_v55  ;;  %v7084_v55 = vld [vmem:[%s7996_s23 + $0x24] sm:$0xe]  ;;  %v9402_v26 = vpop.f32.mrf.mxu0  ;;  %v3668_v58 = vshll.u32 %v9418_v6, 16  ;;  %v3672_v56 = vshrl.u32 %v9418_v6, 16 }
  0xea   : > { %7775 = vmatprep.mubr.msk.bf16.mxu0 %vm658_vm4, %v7916_v2  ;;  %v9374_v27 = vpop.f32.mrf.mxu1  ;;  %v7917_v2 = vld [vmem:[%s7996_s23 + $0x54] sm:$0xff]   ;;  %v7100_v43 = vrot.slane %v7084_v55, 9  ;;  %v3662_v55 = vshll.u32 %v7011_v31, 16  ;;  %v7085_v31 = vld [vmem:[%s7996_s23 + $0x30] sm:$0xe] }
  0xeb   : > { %10738 = vst [vmem:[#allocation5_spill] sm:$0xff] %v9374_v27  ;;  %v9447_v51 = vpop.f32.mrf.mxu0 }
  0xec   : > { %7738 = vmatmul.mubr.msk.bf16.gmra.mxu1 %vm658_vm4, %v6908_v44  ;;  %v3644_v44 = vshll.u32 %v9366_v59, 16  ;;  %v9398_v23 = vpop.f32.mrf.mxu1  ;;  %v9431_v25 = vsel %vm8314_vm8, %v7100_v43, %v4337_v0  ;;  %v3633_v0 = vsel %vm8048_vm5, %v3628_v30, %v3632_v7  ;;  %v9461_v30 = vcombine.low %v3599_v13, %v3609_v47  ;;  %v9477_v47 = vld [vmem:[%s7996_s23 + $0x58] sm:$0xf] }
  0xed   : > { %7741 = vmatprep.mubr.msk.bf16.mxu1 %vm658_vm4, %v6909_v29  ;;  %v9395_v29 = vsel %vm8314_vm8, %v4332_v40, %v4333_v4  ;;  %10739 = vst [vmem:[#allocation6_spill] sm:$0xff] %v9398_v23  ;;  %v3640_v40 = vrot.slane %v3638_v49, 5  ;;  %v10740_v49 = vcombine.low %v9134_v62, %v9152_v53  ;;  %v7014_v62 = vld [vmem:[%s7996_s23 + $0x48] sm:$0xf]  ;;  %v9440_v53 = vld [vmem:[%s7996_s23 + $0x4c] sm:$0xf]  ;;  %v9463_v59 = vcombine.low %v3623_v10, %v3633_v0 }
  0xee   : > { %v9407_v4 = vrot.slane %v3644_v44, 5  ;;  %v9424_v44 = vpop.f32.mrf.mxu1  ;;  %v3686_v50 = vshll.u32 %v7014_v62, 16  ;;  %v3692_v54 = vshll.u32 %v9440_v53, 16  ;;  %v3696_v7 = vshrl.u32 %v9440_v53, 16  ;;  %v9483_v0 = vld [vmem:[%s7996_s23 + $0x44] sm:$0x1] }
  0xef   : > { %10741 = vst [vmem:[#allocation7_spill] sm:$0xff] %v9424_v44  ;;  %v3641_v43 = vor.u32 %v3640_v40, %v3637_v37  ;;  %v4347_v13 = vrot.slane %v9405_v12, 5  ;;  %v7086_v40 = vld [vmem:[%s7996_s23 + $0x3c] sm:$0xe]  ;;  %v10745_v23 = vcombine.low %v9174_v11, %v9190_v35 }
  0xf0   : > { %v9459_v37 = vpop.f32.mrf.mxu1  ;;  %v9488_v44 = vrot.slane %v3692_v54, 5  ;;  %v3698_v12 = vrot.slane %v3696_v7, 4  ;;  %v10747_v54 = vcombine.low %v9183_v20, %v9202_v8  ;;  %v4351_v20 = vrot.slane %v9418_v6, 5  ;;  %v7922_v8 = vld [vmem:[%s7996_s23 + $0x90] sm:$0xff]   ;;  %v7020_v6 = vld [vmem:[%s7996_s23 + $0x60] sm:$0xf] }
  0xf1   : > { %7776 = vmatmul.mubr.msk.bf16.gmra.mxu0 %vm658_vm4, %v7917_v2  ;;  %v3664_v2 = vrot.slane %v3662_v55, 5  ;;  %10743 = vst [vmem:[#allocation8_spill] sm:$0xff] %v9459_v37  ;;  %v3688_v37 = vrot.slane %v3686_v50, 5  ;;  %v7921_v50 = vld [vmem:[%s7996_s23 + $0x84] sm:$0xff]   ;;  %v7102_v35 = vrot.slane %v7086_v40, 9 }
  0xf2   : > { %7779 = vmatprep.mubr.msk.bf16.mxu0 %vm658_vm4, %v7918_v1  ;;  %v9435_v1 = vsel %vm8314_vm8, %v4339_v33, %v4340_v60  ;;  %v3651_v33 = vor.u32 %v3650_v32, %v9407_v4  ;;  %v7920_v60 = vld [vmem:[%s7996_s23 + $0x78] sm:$0xff]   ;;  %v7101_v32 = vrot.slane %v7085_v31, 9 }
  0xf4   : > { %7742 = vmatmul.mubr.msk.bf16.gmra.mxu1 %vm658_vm4, %v10740_v49  ;;  %v3661_v49 = vrot.slane %v3659_v36, 4  ;;  %v7017_v36 = vld [vmem:[%s7996_s23 + $0x54] sm:$0xf]  ;;  %v9480_v10 = vrot.slane %v3651_v33, 4 }
  0xf5   : > { %7745 = vmatprep.mubr.msk.bf16.mxu1 %vm658_vm4, %v10742_v21  ;;  %v3683_v21 = vshrl.u32 %v7014_v62, 16  ;;  %v9471_v62 = vrot.slane %v3641_v43, 4  ;;  %v3674_v43 = vrot.slane %v3672_v56, 4  ;;  %v3720_v56 = vshrl.u32 %v9477_v47, 16 }
  0xf6   : > { %v9469_v55 = vpop.f32.mrf.mxu0  ;;  %v3665_v31 = vor.u32 %v3664_v2, %v3661_v49  ;;  %v3707_v2 = vshrl.u32 %v7017_v36, 16  ;;  %v3710_v49 = vshll.u32 %v7017_v36, 16 }
  0xf7   : > { %10744 = vst [vmem:[#allocation3_spill] sm:$0xff] %v9469_v55  ;;  %v3685_v18 = vrot.slane %v3683_v21, 4  ;;  %v9518_v21 = vsel %vm8314_vm8, %v4346_v45, %v4347_v13  ;;  %v3699_v45 = vor.u32 %v3698_v12, %v9488_v44  ;;  %v4358_v12 = vrot.slane %v9440_v53, 5  ;;  %v9545_v55 = vld [vmem:[%s7996_s23 + $0x5c] sm:$0x1] }
  0xf8   : > { %v9506_v11 = vpop.f32.mrf.mxu0  ;;  %v3709_v27 = vrot.slane %v3707_v2, 4  ;;  %v10751_v53 = vcombine.low %v9194_v52, %v9211_v41  ;;  %v10753_v52 = vcombine.low %v9215_v61, %v9225_v48  ;;  %v7923_v41 = vld [vmem:[%s7996_s23 + $0x9c] sm:$0xff]   ;;  %v4365_v61 = vrot.slane %v9477_v47, 5 }
  0xf9   : > { %7780 = vmatmul.mubr.msk.bf16.gmra.mxu0 %vm658_vm4, %v7919_v24  ;;  %v9485_v24 = vrot.slane %v3668_v58, 5  ;;  %v3716_v58 = vshll.u32 %v9477_v47, 16  ;;  %10748 = vst [vmem:[#allocation10_spill] sm:$0xff] %v9506_v11  ;;  %v3712_v11 = vrot.slane %v3710_v49, 5 }
  0xfa   : > { %7783 = vmatprep.mubr.msk.bf16.mxu0 %vm658_vm4, %v7920_v60  ;;  %v9494_v33 = vpop.f32.mrf.mxu1  ;;  %v9497_v60 = vld [vmem:[%s7996_s23 + $0x50] sm:$0x1]  ;;  %v9538_v40 = vpop.f32.mrf.mxu0 }
  0xfb   : > { %10746 = vst [vmem:[#allocation9_spill] sm:$0xff] %v9494_v33  ;;  %v3675_v36 = vor.u32 %v3674_v43, %v9485_v24  ;;  %v9528_v33 = vrot.slane %v3665_v31, 4  ;;  %v9535_v7 = vrot.slane %v3716_v58, 5  ;;  %v3722_v43 = vrot.slane %v3720_v56, 4  ;;  %10750 = vst [vmem:[#allocation11_spill] sm:$0xff] %v9538_v40 }
  0xfc   : > { %7746 = vmatmul.mubr.msk.bf16.gmra.mxu1 %vm658_vm4, %v10745_v23  ;;  %v9514_v23 = vsel %vm8314_vm8, %v7101_v32, %v4344_v14  ;;  %v3689_v14 = vor.u32 %v3688_v37, %v3685_v18  ;;  %v3702_v32 = vshll.u32 %v9497_v60, 16  ;;  %v9533_v13 = vpop.f32.mrf.mxu1  ;;  %v4353_v31 = vrot.slane %v4351_v20, 4  ;;  %v7087_v58 = vld [vmem:[%s7996_s23 + $0x48] sm:$0xe] }
  0xfd   : > { %7749 = vmatprep.mubr.msk.bf16.mxu1 %vm658_vm4, %v10747_v54  ;;  %v3678_v54 = vshll.u32 %v9483_v0, 16  ;;  %10749 = vst [vmem:[#allocation12_spill] sm:$0xff] %v9533_v13  ;;  %v4354_v18 = vrot.slane %v9483_v0, 5  ;;  %v3676_v2 = vrot.slane %v3675_v36, 4  ;;  %v3731_v56 = vshrl.u32 %v7020_v6, 16 }
  0xfe   : > { %v9551_v13 = vsel %vm8314_vm8, %v7102_v35, %v4351_v20  ;;  %v3690_v37 = vrot.slane %v3689_v14, 4  ;;  %v3700_v40 = vrot.slane %v3699_v45, 4  ;;  %v3704_v0 = vrot.slane %v3702_v32, 5  ;;  %v9566_v14 = vld [vmem:[%s7996_s23 + $0x64] sm:$0xf]  ;;  %v9573_v45 = vpop.f32.mrf.mxu0 }
  0xff   : > { %v3680_v49 = vrot.slane %v3678_v54, 5  ;;  %v3671_v36 = vsel %vm8048_vm5, %v9528_v33, %v9485_v24  ;;  %v3713_v54 = vor.u32 %v3712_v11, %v3709_v27  ;;  %v3723_v35 = vor.u32 %v3722_v43, %v9535_v7  ;;  %10754 = vst [vmem:[#allocation2_spill] sm:$0xff] %v9573_v45  ;;  %v7088_v11 = vld [vmem:[%s7996_s23 + $0x54] sm:$0xe]  ;;  %v7927_v45 = vld [vmem:[%s7996_s23 + $0xcc] sm:$0xff]  }
 0x100   : > { %v3726_v20 = vshll.u32 %v9545_v55, 16  ;;  %v9577_v32 = vsel %vm8314_vm8, %v4353_v31, %v4354_v18  ;;  %v7103_v24 = vrot.slane %v7087_v58, 9  ;;  %v4360_v27 = vrot.slane %v4358_v12, 4 }
 0x101   : > { %7784 = vmatmul.mubr.msk.bf16.gmra.mxu0 %vm658_vm4, %v7921_v50  ;;  %v3734_v50 = vshll.u32 %v7020_v6, 16  ;;  %v4361_v33 = vrot.slane %v9497_v60, 5  ;;  %v7924_v6 = vld [vmem:[%s7996_s23 + $0xa8] sm:$0xff]   ;;  %v3681_v43 = vsel %vm8048_vm5, %v3676_v2, %v3680_v49  ;;  %v3733_v48 = vrot.slane %v3731_v56, 4 }
 0x102   : > { %7787 = vmatprep.mubr.msk.bf16.mxu0 %vm658_vm4, %v7922_v8  ;;  %v9557_v8 = vpop.f32.mrf.mxu1  ;;  %v3705_v31 = vsel %vm8048_vm5, %v3700_v40, %v3704_v0  ;;  %v3740_v18 = vshll.u32 %v9566_v14, 16  ;;  %v3744_v60 = vshrl.u32 %v9566_v14, 16  ;;  %v3724_v2 = vrot.slane %v3723_v35, 4  ;;  %v9595_v56 = vld [vmem:[%s7996_s23 + $0x68] sm:$0x1] }
 0x103   : > { %10752 = vst [vmem:[#allocation4_spill] sm:$0xff] %v9557_v8  ;;  %v3714_v8 = vrot.slane %v3713_v54, 4  ;;  %v3728_v47 = vrot.slane %v3726_v20, 5  ;;  %v7104_v49 = vrot.slane %v7088_v11, 9  ;;  %v10757_v40 = vsel %vm8048_vm5, %v9480_v10, %v9473_v17  ;;  %v7023_v20 = vld [vmem:[%s7996_s23 + $0x6c] sm:$0xf] }
 0x104   : > { %7750 = vmatmul.mubr.msk.bf16.gmra.mxu1 %vm658_vm4, %v10751_v53  ;;  %v3736_v53 = vrot.slane %v3734_v50, 5  ;;  %v9592_v58 = vpop.f32.mrf.mxu1  ;;  %v9616_v54 = vsel %vm8314_vm8, %v7103_v24, %v4358_v12  ;;  %v9620_v35 = vsel %vm8314_vm8, %v4360_v27, %v4361_v33  ;;  %v9623_v17 = vcombine.low %v3671_v36, %v3681_v43  ;;  %v7089_v33 = vld [vmem:[%s7996_s23 + $0x60] sm:$0xe]  ;;  %v7029_v43 = vld [vmem:[%s7996_s23 + $0x84] sm:$0xf] }
 0x105   : > { %7753 = vmatprep.mubr.msk.bf16.mxu1 %vm658_vm4, %v10753_v52  ;;  %v3695_v52 = vsel %vm8048_vm5, %v3690_v37, %v9488_v44  ;;  %10755 = vst [vmem:[#allocation13_spill] sm:$0xff] %v9592_v58  ;;  %v10758_v37 = vsel %vm8048_vm5, %v9471_v62, %v9407_v4  ;;  %v4367_v4 = vrot.slane %v4365_v61, 4  ;;  %v4368_v62 = vrot.slane %v9545_v55, 5 }
 0x106   : > { %v9610_v50 = vcombine.low %v10758_v37, %v10757_v40  ;;  %10759 = vst [vmem:[#allocation15_spill] sm:$0xff] %v9623_v17  ;;  %v3737_v10 = vor.u32 %v3736_v53, %v3733_v48  ;;  %v9630_v11 = vcombine.low %v3695_v52, %v3705_v31  ;;  %v9632_v12 = vrot.slane %v3740_v18, 5 }
 0x107   : > { %v9598_v44 = vpop.f32.mrf.mxu0  ;;  %v9634_v24 = vrot.slane %v3744_v60, 4  ;;  %v3750_v27 = vshll.u32 %v9595_v56, 16  ;;  %v10761_v36 = vcombine.low %v9233_v19, %v9248_v46  ;;  %v3719_v48 = vsel %vm8048_vm5, %v3714_v8, %v9535_v7  ;;  %v7026_v19 = vld [vmem:[%s7996_s23 + $0x78] sm:$0xf] }
 0x108   : > { %10756 = vst [vmem:[#allocation14_spill] sm:$0xff] %v9598_v44  ;;  %10760 = vst [vmem:[#allocation16_spill] sm:$0xff] %v9630_v11  ;;  %v3729_v53 = vsel %vm8048_vm5, %v3724_v2, %v3728_v47  ;;  %v9654_v52 = vsel %vm8314_vm8, %v7104_v49, %v4365_v61  ;;  %v10763_v46 = vcombine.low %v9240_v42, %v9261_v16  ;;  %v3755_v18 = vshrl.u32 %v7023_v20, 16  ;;  %v9666_v2 = vld [vmem:[%s7996_s23 + $0x7c] sm:$0xf]  ;;  %v7926_v61 = vld [vmem:[%s7996_s23 + $0xc0] sm:$0xff]  }
 0x109   : > { %7788 = vmatmul.mubr.msk.bf16.gmra.mxu0 %vm658_vm4, %v7923_v41  ;;  %v9628_v41 = vld [vmem:[%s7996_s23 + $0x70] sm:$0xf]  ;;  %v9661_v31 = vpop.f32.mrf.mxu0  ;;  %v3758_v60 = vshll.u32 %v7023_v20, 16  ;;  %v9671_v47 = vsel %vm8314_vm8, %v4367_v4, %v4368_v62  ;;  %v9673_v42 = vrot.slane %v3737_v10, 4  ;;  %v7105_v16 = vrot.slane %v7089_v33, 9 }
 0x10a   : > { %7791 = vmatprep.mubr.msk.bf16.mxu0 %vm658_vm4, %v7924_v6  ;;  %v7925_v6 = vld [vmem:[%s7996_s23 + $0xb4] sm:$0xff]   ;;  %10764 = vst [vmem:[#allocation18_spill] sm:$0xff] %v9661_v31  ;;  %v3764_v7 = vshll.u32 %v9628_v41, 16  ;;  %v3768_v8 = vshrl.u32 %v9628_v41, 16  ;;  %v4372_v49 = vrot.slane %v9566_v14, 5  ;;  %v9676_v40 = vcombine.low %v3719_v48, %v3729_v53 }
 0x10b   : > { %v3747_v37 = vor.u32 %v9634_v24, %v9632_v12  ;;  %v9680_v20 = vrot.slane %v3750_v27, 5  ;;  %v3779_v4 = vshrl.u32 %v7026_v19, 16  ;;  %v3782_v62 = vshll.u32 %v7026_v19, 16  ;;  %v9692_v33 = vld [vmem:[%s7996_s23 + $0x88] sm:$0xf]  ;;  %v9695_v24 = vpop.f32.mrf.mxu0 }
 0x10c   : > { %7754 = vmatmul.mubr.msk.bf16.gmra.mxu1 %vm658_vm4, %v10761_v36  ;;  %v9642_v55 = vpop.f32.mrf.mxu1  ;;  %10765 = vst [vmem:[#allocation19_spill] sm:$0xff] %v9676_v40  ;;  %v4375_v36 = vrot.slane %v9595_v56, 5  ;;  %v3788_v14 = vshll.u32 %v9666_v2, 16  ;;  %v3792_v10 = vshrl.u32 %v9666_v2, 16  ;;  %10767 = vst [vmem:[#allocation21_spill] sm:$0xff] %v9695_v24  ;;  %v3757_v56 = vrot.slane %v3755_v18, 4 }
 0x10d   : > { %10762 = vst [vmem:[#allocation17_spill] sm:$0xff] %v9642_v55  ;;  %7757 = vmatprep.mubr.msk.bf16.mxu1 %vm658_vm4, %v10763_v46  ;;  %v9684_v46 = vld [vmem:[%s7996_s23 + $0x74] sm:$0x1]  ;;  %v3760_v27 = vrot.slane %v3758_v60, 5  ;;  %v9697_v48 = vrot.slane %v3764_v7, 5  ;;  %v3770_v53 = vrot.slane %v3768_v8, 4  ;;  %v10768_v19 = vcombine.low %v9252_v22, %v9268_v28  ;;  %v9725_v40 = vpop.f32.mrf.mxu0 }
 0x10e   : > { %v9687_v0 = vpop.f32.mrf.mxu1  ;;  %v4374_v55 = vrot.slane %v4372_v49, 4  ;;  %v9710_v18 = vld [vmem:[%s7996_s23 + $0x80] sm:$0x1]  ;;  %v9713_v60 = vld [vmem:[%s7996_s23 + $0x6c] sm:$0xe]  ;;  %v3803_v7 = vshrl.u32 %v7029_v43, 16 }
 0x10f   : > { %10766 = vst [vmem:[#allocation20_spill] sm:$0xff] %v9687_v0  ;;  %v9706_v0 = vsel %vm8314_vm8, %v7105_v16, %v4372_v49  ;;  %v3806_v8 = vshll.u32 %v7029_v43, 16  ;;  %v3816_v58 = vshrl.u32 %v9692_v33, 16  ;;  %v3781_v49 = vrot.slane %v3779_v4, 4  ;;  %10770 = vst [vmem:[#allocation23_spill] sm:$0xff] %v9725_v40 }
 0x110   : > { %v9721_v16 = vpop.f32.mrf.mxu1  ;;  %v3784_v24 = vrot.slane %v3782_v62, 5  ;;  %v9723_v31 = vrot.slane %v3788_v14, 5  ;;  %v3794_v44 = vrot.slane %v3792_v10, 4  ;;  %v10771_v43 = vcombine.low %v9272_v9, %v9300_v3  ;;  %v9744_v3 = vld [vmem:[%s7996_s23 + $0x8c] sm:$0x1] }
 0x111   : > { %7792 = vmatmul.mubr.msk.bf16.gmra.mxu0 %vm658_vm4, %v7925_v6  ;;  %v3774_v6 = vshll.u32 %v9684_v46, 16  ;;  %10769 = vst [vmem:[#allocation22_spill] sm:$0xff] %v9721_v16  ;;  %v3761_v22 = vor.u32 %v3760_v27, %v3757_v56  ;;  %v3771_v28 = vor.u32 %v3770_v53, %v9697_v48  ;;  %v3798_v4 = vshll.u32 %v9710_v18, 16  ;;  %v7091_v56 = vld [vmem:[%s7996_s23 + $0x78] sm:$0xe] }
 0x112   : > { %7795 = vmatprep.mubr.msk.bf16.mxu0 %vm658_vm4, %v7926_v61  ;;  %v3812_v61 = vshll.u32 %v9692_v33, 16  ;;  %v9735_v62 = vrot.slane %v3747_v37, 4  ;;  %v9739_v14 = vsel %vm8314_vm8, %v4374_v55, %v4375_v36  ;;  %v7106_v10 = vrot.slane %v9713_v60, 9  ;;  %v9749_v16 = vpop.f32.mrf.mxu1  ;;  %v7032_v60 = vld [vmem:[%s7996_s23 + $0x90] sm:$0xf] }
 0x113   : > { %v4386_v9 = vrot.slane %v9666_v2, 5  ;;  %v3805_v27 = vrot.slane %v3803_v7, 4  ;;  %v3808_v53 = vrot.slane %v3806_v8, 5  ;;  %10772 = vst [vmem:[#allocation24_spill] sm:$0xff] %v9749_v16  ;;  %v3776_v37 = vrot.slane %v3774_v6, 5 }
 0x114   : > { %7758 = vmatmul.mubr.msk.bf16.gmra.mxu1 %vm658_vm4, %v10768_v19  ;;  %v4379_v19 = vrot.slane %v9628_v41, 5  ;;  %v9747_v41 = vrot.slane %v3812_v61, 5  ;;  %v4382_v40 = vrot.slane %v9684_v46, 5  ;;  %v3785_v55 = vor.u32 %v3784_v24, %v3781_v49  ;;  %v9758_v61 = vld [vmem:[%s7996_s23 + $0x94] sm:$0xf] }
 0x115   : > { %7761 = vmatprep.mubr.msk.bf16.mxu1 %vm658_vm4, %v10771_v43  ;;  %v3818_v43 = vrot.slane %v3816_v58, 4  ;;  %v3795_v36 = vor.u32 %v3794_v44, %v9723_v31  ;;  %v3762_v2 = vrot.slane %v3761_v22, 4  ;;  %v3772_v7 = vrot.slane %v3771_v28, 4 }
 0x116   : > { %v4381_v17 = vrot.slane %v4379_v19, 4  ;;  %v3800_v8 = vrot.slane %v3798_v4, 5  ;;  %v10773_v58 = vcombine.low %v9391_v39, %v9395_v29  ;;  %v7107_v46 = vrot.slane %v7091_v56, 9 }
 0x117   : > { %v4388_v24 = vrot.slane %v4386_v9, 4  ;;  %v4389_v44 = vrot.slane %v9710_v18, 5  ;;  %v3822_v6 = vshll.u32 %v9744_v3, 16  ;;  %v3819_v22 = vor.u32 %v3818_v43, %v9747_v41 }
 0x118   : > { %v3827_v28 = vshrl.u32 %v7032_v60, 16  ;;  %v3830_v4 = vshll.u32 %v7032_v60, 16  ;;  %v10775_v39 = vcombine.low %v9312_v34, %v9317_v57  ;;  %v3786_v29 = vrot.slane %v3785_v55, 4 }
 0x119   : > { %v9754_v11 = vpop.f32.mrf.mxu0  ;;  %7796 = vmatmul.mubr.msk.bf16.gmra.mxu0 %vm658_vm4, %v7927_v45  ;;  %v3809_v45 = vor.u32 %v3808_v53, %v3805_v27  ;;  %v3796_v56 = vrot.slane %v3795_v36, 4  ;;  %v3836_v18 = vshll.u32 %v9758_v61, 16  ;;  %v3753_v27 = vsel %vm8048_vm5, %v9735_v62, %v9680_v20 }
 0x11a   : > { %7835 = vmatprep.mubr.msk.bf16.mxu0 %vm658_vm4, %v10773_v58  ;;  %v3840_v58 = vshrl.u32 %v9758_v61, 16  ;;  %v3767_v34 = vsel %vm8048_vm5, %v3762_v2, %v9697_v48  ;;  %v9790_v57 = vsel %vm8314_vm8, %v7106_v10, %v4379_v19  ;;  %v9794_v53 = vsel %vm8314_vm8, %v4381_v17, %v4382_v40  ;;  %v7092_v19 = vld [vmem:[%s7996_s23 + $0x84] sm:$0xe]  ;;  %v10814_v38 = vld [vmem:[#allocation24_spill] sm:$0xff] }
 0x11b   : > { %v9766_v49 = vpop.f32.mrf.mxu0  ;;  %v9802_v20 = vsel %vm8314_vm8, %v7107_v46, %v4386_v9  ;;  %v9806_v48 = vsel %vm8314_vm8, %v4388_v24, %v4389_v44  ;;  %v3824_v62 = vrot.slane %v3822_v6, 5  ;;  %v3810_v17 = vrot.slane %v3809_v45, 4  ;;  %v9830_v45 = vld [vmem:[%s7996_s23 + $0x98] sm:$0x1] }
 0x11c   : > { %10774 = vst [vmem:[#allocation25_spill] sm:$0xff] %v9766_v49  ;;  %v9769_v16 = vpop.f32.mrf.mxu1  ;;  %7762 = vmatmul.mubr.msk.bf16.gmra.mxu1 %vm658_vm4, %v10775_v39  ;;  %v3820_v40 = vrot.slane %v3819_v22, 4  ;;  %v3829_v55 = vrot.slane %v3827_v28, 4  ;;  %v3832_v36 = vrot.slane %v3830_v4, 5  ;;  %v3791_v9 = vsel %vm8048_vm5, %v3786_v29, %v9723_v31  ;;  %v7035_v22 = vld [vmem:[%s7996_s23 + $0x9c] sm:$0xf] }
 0x11d   : > { %v9777_v49 = vpop.f32.mrf.mxu0  ;;  %7801 = vmatprep.mubr.msk.bf16.mxu1 %vm658_vm4, %v9461_v30  ;;  %v3777_v30 = vsel %vm8048_vm5, %v3772_v7, %v3776_v37  ;;  %v3801_v37 = vsel %vm8048_vm5, %v3796_v56, %v3800_v8  ;;  %v9818_v2 = vrot.slane %v3836_v18, 5  ;;  %v3842_v7 = vrot.slane %v3840_v58, 4  ;;  %v9861_v58 = vld [vmem:[%s7996_s23 + $0xa0] sm:$0xf] }
 0x11e   : > { %v9796_v43 = vpop.f32.mrf.mxu1  ;;  %v10776_v24 = vcombine.low %v9431_v25, %v9435_v1  ;;  %v7121_v44 = vcombine.low %v9654_v52, %v9671_v47  ;;  %v7122_v6 = vcombine.low %v9706_v0, %v9739_v14  ;;  %v7108_v31 = vrot.slane %v7092_v19, 9 }
 0x11f   : > { %v9809_v10 = vpop.f32.mrf.mxu0  ;;  %v4393_v8 = vrot.slane %v9692_v33, 5  ;;  %v10777_v25 = vcombine.low %v9514_v23, %v9518_v21  ;;  %v10778_v1 = vsel %vm8048_vm5, %v9673_v42, %v9632_v12  ;;  %v9846_v39 = vcombine.low %v3767_v34, %v3777_v30  ;;  %v7093_v42 = vld [vmem:[%s7996_s23 + $0x90] sm:$0xe]  ;;  %v10785_v33 = vld [vmem:[#allocation11_spill] sm:$0xff] }
 0x120   : > { %v9811_v60 = vpop.f32.mrf.mxu1  ;;  %v9844_v4 = vcombine.low %v10778_v1, %v3753_v27  ;;  %v9852_v18 = vcombine.low %v3791_v9, %v3801_v37  ;;  %v3815_v23 = vsel %vm8048_vm5, %v3810_v17, %v9747_v41  ;;  %v3825_v21 = vsel %vm8048_vm5, %v3820_v40, %v3824_v62 }
 0x121   : > { %v7633_v46 = vpop.f32.mrf.mxu0  ;;  %7836 = vmatmul.mubr.msk.bf16.vlgmr.msra.gmra.mxu0 %vm658_vm4, %v10776_v24  ;;  %v3833_v12 = vor.u32 %v3832_v36, %v3829_v55  ;;  %v3843_v34 = vor.u32 %v3842_v7, %v9818_v2  ;;  %v3846_v30 = vshll.u32 %v9830_v45, 16  ;;  %v3851_v19 = vshrl.u32 %v7035_v22, 16 }
 0x122   : > { %v9833_v28 = vpop.f32.mrf.mxu1  ;;  %7839 = vmatprep.mubr.msk.bf16.mxu0 %vm658_vm4, %v10777_v25  ;;  %v3854_v9 = vshll.u32 %v7035_v22, 16  ;;  %v9872_v62 = vsel %vm8314_vm8, %v7108_v31, %v4393_v8  ;;  %v4395_v17 = vrot.slane %v4393_v8, 4  ;;  %v4396_v40 = vrot.slane %v9744_v3, 5 }
 0x123   : > { %v1465_v56 = vpop.f32.mrf.mxu0  ;;  %v7109_v55 = vrot.slane %v7093_v42, 9  ;;  %v4400_v36 = vrot.slane %v9758_v61, 5  ;;  %v3860_v7 = vshll.u32 %v9861_v58, 16  ;;  %v3864_v24 = vshrl.u32 %v9861_v58, 16 }
 0x124   : > { %v7599_v27 = vpop.f32.mrf.mxu1  ;;  %7802 = vmatmul.mubr.msk.bf16.vlgmr.msra.gmra.mxu1 %vm658_vm4, %v9463_v59  ;;  %v9881_v25 = vcombine.low %v3815_v23, %v3825_v21  ;;  %v9883_v31 = vrot.slane %v3833_v12, 4  ;;  %v3844_v3 = vrot.slane %v3843_v34, 4  ;;  %v3848_v1 = vrot.slane %v3846_v30, 5  ;;  %v7038_v21 = vld [vmem:[%s7996_s23 + $0xa8] sm:$0xf] }
 0x125   : > { %v1049_v37 = vadd.f32 %v7599_v27, %v9359_v5  ;;  %v7634_v41 = vpop.f32.mrf.mxu0  ;;  %7805 = vmatprep.mubr.msk.bf16.mxu1 %vm658_vm4, %v9610_v50  ;;  %v3853_v42 = vrot.slane %v3851_v19, 4  ;;  %v3856_v61 = vrot.slane %v3854_v9, 5  ;;  %v4403_v23 = vrot.slane %v9830_v45, 5  ;;  %v9909_v30 = vld [vmem:[%s7996_s23 + $0xac] sm:$0xf] }
 0x126   : > { %v1040_v59 = vpop.f32.mrf.mxu1  ;;  %v3866_v34 = vrot.slane %v3864_v24, 4  ;;  %v10782_v24 = vld [vmem:[#allocation3_spill] sm:$0xff] }
 0x127   : > { %v9878_v5 = vadd.f32 %v7633_v46, %v1049_v37  ;;  %v1041_v50 = vadd.f32 %v1040_v59, %v9383_v15  ;;  %v1468_v22 = vpop.f32.mrf.mxu0  ;;  %v10779_v37 = vcombine.low %v9551_v13, %v9577_v32  ;;  %v9894_v15 = vsel %vm8314_vm8, %v4395_v17, %v4396_v40  ;;  %v7094_v17 = vld [vmem:[%s7996_s23 + $0x9c] sm:$0xe] }
 0x128   : > { %v7600_v8 = vpop.f32.mrf.mxu1  ;;  %v4402_v13 = vrot.slane %v4400_v36, 4  ;;  %v9906_v32 = vrot.slane %v3860_v7, 5  ;;  %v4407_v40 = vrot.slane %v9861_v58, 5  ;;  %v3884_v58 = vshll.u32 %v9909_v30, 16 }
 0x129   : > { %v9885_v27 = vadd.f32 %v1465_v56, %v1041_v50  ;;  %v1052_v29 = vadd.f32 %v7600_v8, %v9402_v26  ;;  %v7637_v46 = vpop.f32.mrf.mxu0  ;;  %7840 = vmatmul.mubr.msk.bf16.gmra.mxu0 %vm658_vm4, %v10779_v37  ;;  %v10780_v56 = vcombine.low %v9616_v54, %v9620_v35  ;;  %v9904_v26 = vsel %vm8314_vm8, %v7109_v55, %v4400_v36  ;;  %v7037_v35 = vld [vmem:[%s7996_s23 + $0xa4] sm:$0x1]  ;;  %v10781_v55 = vld [vmem:[#allocation15_spill] sm:$0xff] }
 0x12a   : > { %v1043_v12 = vpop.f32.mrf.mxu1  ;;  %v3839_v54 = vsel %vm8048_vm5, %v9883_v31, %v9818_v2  ;;  %v3875_v36 = vshrl.u32 %v7038_v21, 16  ;;  %v10783_v2 = vld [vmem:[#allocation16_spill] sm:$0xff]  ;;  %v3888_v31 = vshrl.u32 %v9909_v30, 16 }
 0x12b   : > { %7843 = vmatprep.mubr.msk.bf16.mxu0 %vm658_vm4, %v10780_v56  ;;  %v9911_v19 = vadd.f32 %v7634_v41, %v1052_v29  ;;  %v1044_v45 = vadd.f32 %v1043_v12, %v9447_v51  ;;  %v1481_v9 = vpop.f32.mrf.mxu0  ;;  %v3849_v29 = vsel %vm8048_vm5, %v3844_v3, %v3848_v1  ;;  %v3857_v41 = vor.u32 %v3856_v61, %v3853_v42  ;;  %v10784_v61 = vld [vmem:[#allocation10_spill] sm:$0xff] }
 0x12c   : > { %v7603_v59 = vpop.f32.mrf.mxu1  ;;  %7806 = vmatmul.mubr.msk.bf16.gmra.mxu1 %vm658_vm4, %v10781_v55  ;;  %v3878_v51 = vshll.u32 %v7038_v21, 16  ;;  %v9934_v12 = vsel %vm8314_vm8, %v4402_v13, %v4403_v23  ;;  %v3867_v3 = vor.u32 %v3866_v34, %v9906_v32  ;;  %v3870_v1 = vshll.u32 %v7037_v35, 16 }
 0x12d   : > { %v9925_v7 = vadd.f32 %v1468_v22, %v1044_v45  ;;  %v1065_v50 = vadd.f32 %v7603_v59, %v10782_v24  ;;  %v7638_v8 = vpop.f32.mrf.mxu0  ;;  %7809 = vmatprep.mubr.msk.bf16.mxu1 %vm658_vm4, %v10783_v2  ;;  %v7110_v22 = vrot.slane %v7094_v17, 9  ;;  %v4409_v45 = vrot.slane %v4407_v40, 4 }
 0x12e   : > { %v1056_v37 = vpop.f32.mrf.mxu1  ;;  %v4410_v59 = vrot.slane %v7037_v35, 5  ;;  %v9942_v2 = vrot.slane %v3857_v41, 4  ;;  %v3877_v23 = vrot.slane %v3875_v36, 4  ;;  %v3880_v13 = vrot.slane %v3878_v51, 5  ;;  %v9952_v35 = vld [vmem:[%s7996_s23 + $0xb0] sm:$0x1] }
 0x12f   : > { %v9937_v42 = vadd.f32 %v7637_v46, %v1065_v50  ;;  %v1057_v21 = vadd.f32 %v1056_v37, %v10784_v61  ;;  %v1484_v56 = vpop.f32.mrf.mxu0  ;;  %v9954_v50 = vrot.slane %v3884_v58, 5  ;;  %v3890_v41 = vrot.slane %v3888_v31, 4  ;;  %v10786_v51 = vld [vmem:[#allocation2_spill] sm:$0xff] }
 0x130   : > { %v7604_v55 = vpop.f32.mrf.mxu1  ;;  %v9964_v52 = vrot.slane %v3867_v3, 4  ;;  %v9966_v47 = vrot.slane %v3870_v1, 5  ;;  %v9974_v0 = vsel %vm8314_vm8, %v7110_v22, %v4407_v40  ;;  %v9978_v14 = vsel %vm8314_vm8, %v4409_v45, %v4410_v59  ;;  %v9990_v22 = vld [vmem:[%s7996_s23 + $0xb8] sm:$0xf] }
 0x131   : > { %v9944_v34 = vadd.f32 %v1481_v9, %v1057_v21  ;;  %v1068_v17 = vadd.f32 %v7604_v55, %v10785_v33  ;;  %v7641_v46 = vpop.f32.mrf.mxu0  ;;  %7844 = vmatmul.mubr.msk.bf16.gmra.mxu0 %vm658_vm4, %v7121_v44  ;;  %v9960_v9 = vcombine.low %v3839_v54, %v3849_v29  ;;  %v7095_v44 = vld [vmem:[%s7996_s23 + $0xa8] sm:$0xe]  ;;  %v3881_v3 = vor.u32 %v3880_v13, %v3877_v23  ;;  %v10788_v21 = vld [vmem:[#allocation14_spill] sm:$0xff] }
 0x132   : > { %v1059_v37 = vpop.f32.mrf.mxu1  ;;  %7847 = vmatprep.mubr.msk.bf16.mxu0 %vm658_vm4, %v7122_v6  ;;  %v7041_v6 = vld [vmem:[%s7996_s23 + $0xb4] sm:$0xf]  ;;  %v10787_v29 = vld [vmem:[#allocation19_spill] sm:$0xff]  ;;  %v3894_v1 = vshll.u32 %v9952_v35, 16  ;;  %v4414_v40 = vrot.slane %v9909_v30, 5  ;;  %v3891_v55 = vor.u32 %v3890_v41, %v9954_v50  ;;  %v3873_v30 = vsel %vm8048_vm5, %v9964_v52, %v9966_v47 }
 0x133   : > { %v9969_v36 = vadd.f32 %v7638_v8, %v1068_v17  ;;  %v1060_v58 = vadd.f32 %v1059_v37, %v10786_v51  ;;  %v1497_v31 = vpop.f32.mrf.mxu0  ;;  %v7111_v17 = vrot.slane %v7095_v44, 9  ;;  %v3899_v23 = vshrl.u32 %v7041_v6, 16 }
 0x134   : > { %v7607_v54 = vpop.f32.mrf.mxu1  ;;  %7810 = vmatmul.mubr.msk.bf16.gmra.mxu1 %vm658_vm4, %v10787_v29  ;;  %v3902_v13 = vshll.u32 %v7041_v6, 16  ;;  %v3908_v41 = vshll.u32 %v9990_v22, 16  ;;  %v3912_v44 = vshrl.u32 %v9990_v22, 16  ;;  %v7044_v29 = vld [vmem:[%s7996_s23 + $0xc0] sm:$0xf]  ;;  %v3882_v33 = vrot.slane %v3881_v3, 4 }
 0x135   : > { %v9992_v61 = vadd.f32 %v1484_v56, %v1060_v58  ;;  %v1081_v45 = vadd.f32 %v7607_v54, %v10788_v21  ;;  %v7642_v59 = vpop.f32.mrf.mxu0  ;;  %7813 = vmatprep.mubr.msk.bf16.mxu1 %vm658_vm4, %v9844_v4  ;;  %v10790_v58 = vld [vmem:[#allocation18_spill] sm:$0xff]  ;;  %v3896_v52 = vrot.slane %v3894_v1, 5  ;;  %v4416_v47 = vrot.slane %v4414_v40, 4 }
 0x136   : > { %v1072_v37 = vpop.f32.mrf.mxu1  ;;  %v4417_v56 = vrot.slane %v9952_v35, 5  ;;  %v10020_v8 = vsel %vm8314_vm8, %v7111_v17, %v4414_v40  ;;  %v10023_v3 = vld [vmem:[%s7996_s23 + $0xc4] sm:$0xf]  ;;  %v10794_v35 = vcombine.low %v9802_v20, %v9806_v48  ;;  %v10035_v17 = vrot.slane %v3908_v41, 5 }
 0x137   : > { %v10004_v51 = vadd.f32 %v7641_v46, %v1081_v45  ;;  %v1073_v54 = vadd.f32 %v1072_v37, %v10790_v58  ;;  %v1500_v4 = vpop.f32.mrf.mxu0  ;;  %v10792_v46 = vld [vmem:[#allocation21_spill] sm:$0xff]  ;;  %v10793_v37 = vcombine.low %v9790_v57, %v9794_v53  ;;  %v3892_v58 = vrot.slane %v3891_v55, 4  ;;  %v10795_v55 = vld [vmem:[#allocation23_spill] sm:$0xff] }
 0x138   : > { %v7608_v21 = vpop.f32.mrf.mxu1  ;;  %v3923_v57 = vshrl.u32 %v7044_v29, 16  ;;  %v3926_v53 = vshll.u32 %v7044_v29, 16  ;;  %v3887_v20 = vsel %vm8048_vm5, %v3882_v33, %v9954_v50  ;;  %v10044_v48 = vsel %vm8314_vm8, %v4416_v47, %v4417_v56  ;;  %v7096_v29 = vld [vmem:[%s7996_s23 + $0xb4] sm:$0xe] }
 0x139   : > { %10789 = vst [vmem:[#allocation15_spill] sm:$0xff] %v10004_v51  ;;  %v10011_v24 = vadd.f32 %v1497_v31, %v1073_v54  ;;  %v1084_v6 = vadd.f32 %v7608_v21, %v10792_v46  ;;  %v7645_v45 = vpop.f32.mrf.mxu0  ;;  %7848 = vmatmul.mubr.msk.bf16.gmra.mxu0 %vm658_vm4, %v10793_v37  ;;  %v10030_v31 = vld [vmem:[%s7996_s23 + $0xbc] sm:$0x1]  ;;  %v3901_v54 = vrot.slane %v3899_v23, 4  ;;  %v3904_v21 = vrot.slane %v3902_v13, 5 }
 0x13a   : > { %v1075_v1 = vpop.f32.mrf.mxu1  ;;  %7851 = vmatprep.mubr.msk.bf16.mxu0 %vm658_vm4, %v10794_v35  ;;  %v3936_v23 = vshrl.u32 %v10023_v3, 16  ;;  %v3918_v50 = vshll.u32 %v10030_v31, 16  ;;  %v4421_v47 = vrot.slane %v9990_v22, 5  ;;  %v10796_v35 = vld [vmem:[#allocation25_spill] sm:$0xff] }
 0x13b   : > { %10791 = vst [vmem:[#allocation3_spill] sm:$0xff] %v10011_v24  ;;  %v10032_v46 = vadd.f32 %v7642_v59, %v1084_v6  ;;  %v1076_v37 = vadd.f32 %v1075_v1, %v10795_v55  ;;  %v1513_v40 = vpop.f32.mrf.mxu0  ;;  %v3914_v24 = vrot.slane %v3912_v44, 4  ;;  %v3932_v59 = vshll.u32 %v10023_v3, 16 }
 0x13c   : > { %v7611_v51 = vpop.f32.mrf.mxu1  ;;  %7814 = vmatmul.mubr.msk.bf16.gmra.mxu1 %vm658_vm4, %v9846_v39  ;;  %v3897_v39 = vsel %vm8048_vm5, %v3892_v58, %v3896_v52  ;;  %v3905_v56 = vor.u32 %v3904_v21, %v3901_v54  ;;  %v3925_v6 = vrot.slane %v3923_v57, 4  ;;  %v3928_v1 = vrot.slane %v3926_v53, 5 }
 0x13d   : > { %v10048_v13 = vadd.f32 %v1500_v4, %v1076_v37  ;;  %v1097_v41 = vadd.f32 %v7611_v51, %v9754_v11  ;;  %v7646_v44 = vpop.f32.mrf.mxu0  ;;  %7817 = vmatprep.mubr.msk.bf16.mxu1 %vm658_vm4, %v9852_v18  ;;  %v10797_v18 = vsel %vm8048_vm5, %v9942_v2, %v9906_v32  ;;  %v3915_v58 = vor.u32 %v3914_v24, %v10035_v17 }
 0x13e   : > { %v1088_v33 = vpop.f32.mrf.mxu1  ;;  %v10066_v52 = vcombine.low %v10797_v18, %v3873_v30  ;;  %v10069_v22 = vcombine.low %v3887_v20, %v3897_v39  ;;  %v10073_v21 = vrot.slane %v3932_v59, 5  ;;  %v3938_v57 = vrot.slane %v3936_v23, 4  ;;  %v7046_v30 = vld [vmem:[%s7996_s23 + $0xc8] sm:$0x1] }
 0x13f   : > { %v10058_v4 = vadd.f32 %v7645_v45, %v1097_v41  ;;  %v1089_v11 = vadd.f32 %v1088_v33, %v10796_v35  ;;  %v1516_v51 = vpop.f32.mrf.mxu0  ;;  %v7128_v45 = vcombine.low %v10020_v8, %v10044_v48  ;;  %v10798_v32 = vcombine.low %v9872_v62, %v9894_v15  ;;  %v7047_v8 = vld [vmem:[%s7996_s23 + $0xcc] sm:$0xf]  ;;  %v10094_v15 = vld [vmem:[%s7996_s23 + $0xd0] sm:$0xf]  ;;  %v7097_v33 = vld [vmem:[%s7996_s23 + $0xc0] sm:$0xe] }
 0x140   : > { %v7612_v54 = vpop.f32.mrf.mxu1  ;;  %v10082_v24 = vrot.slane %v3918_v50, 5  ;;  %v7112_v2 = vrot.slane %v7096_v29, 9  ;;  %v10799_v48 = vcombine.low %v9904_v26, %v9934_v12  ;;  %v4424_v59 = vrot.slane %v10030_v31, 5 }
 0x141   : > { %v10075_v53 = vadd.f32 %v1513_v40, %v1089_v11  ;;  %v1100_v55 = vadd.f32 %v7612_v54, %v9777_v49  ;;  %v7649_v37 = vpop.f32.mrf.mxu0  ;;  %7852 = vmatmul.mubr.msk.bf16.gmra.mxu0 %vm658_vm4, %v10798_v32  ;;  %v10090_v40 = vrot.slane %v3905_v56, 4  ;;  %v4423_v49 = vrot.slane %v4421_v47, 4 }
 0x142   : > { %v1091_v20 = vpop.f32.mrf.mxu1  ;;  %7855 = vmatprep.mubr.msk.bf16.mxu0 %vm658_vm4, %v10799_v48  ;;  %v3929_v62 = vor.u32 %v3928_v1, %v3925_v6  ;;  %v10099_v50 = vrot.slane %v3915_v58, 4  ;;  %v4428_v26 = vrot.slane %v10023_v3, 5  ;;  %v3939_v56 = vor.u32 %v3938_v57, %v10073_v21 }
 0x143   : > { %v10096_v23 = vadd.f32 %v7646_v44, %v1100_v55  ;;  %v1092_v41 = vadd.f32 %v1091_v20, %v9809_v10  ;;  %v1529_v39 = vpop.f32.mrf.mxu0  ;;  %v3942_v31 = vshll.u32 %v7046_v30, 16  ;;  %v3947_v29 = vshrl.u32 %v7047_v8, 16  ;;  %v10802_v44 = vld [vmem:[#allocation5_spill] sm:$0xff]  ;;  %v10803_v55 = vld [vmem:[#allocation6_spill] sm:$0xff] }
 0x144   : > { %v7615_v12 = vpop.f32.mrf.mxu1  ;;  %7818 = vmatmul.mubr.msk.bf16.gmra.mxu1 %vm658_vm4, %v9881_v25  ;;  %v3950_v6 = vshll.u32 %v7047_v8, 16  ;;  %v3956_v11 = vshll.u32 %v10094_v15, 16  ;;  %v3960_v3 = vshrl.u32 %v10094_v15, 16  ;;  %v4422_v25 = vsel %vm8314_vm8, %v7112_v2, %v4421_v47  ;;  %v10804_v47 = vld [vmem:[#allocation7_spill] sm:$0xff] }
 0x145   : > { %10800 = vst [vmem:[#allocation16_spill] sm:$0xff] %v10096_v23  ;;  %v10106_v1 = vadd.f32 %v1516_v51, %v1092_v41  ;;  %v1113_v35 = vadd.f32 %v7615_v12, %v10802_v44  ;;  %v7650_v10 = vpop.f32.mrf.mxu0  ;;  %7821 = vmatprep.mubr.msk.bf16.mxu1 %vm658_vm4, %v9960_v9  ;;  %v4425_v58 = vsel %vm8314_vm8, %v4423_v49, %v4424_v59  ;;  %v3930_v54 = vrot.slane %v3929_v62, 4 }
 0x146   : > { %v1104_v18 = vpop.f32.mrf.mxu1  ;;  %v7113_v51 = vrot.slane %v7097_v33, 9  ;;  %v4430_v20 = vrot.slane %v4428_v26, 4  ;;  %v4431_v9 = vrot.slane %v7046_v30, 5  ;;  %v3940_v41 = vrot.slane %v3939_v56, 4  ;;  %v7049_v56 = vld [vmem:[%s7996_s23 + $0xd4] sm:$0x1] }
 0x147   : > { %10801 = vst [vmem:[#allocation10_spill] sm:$0xff] %v10106_v1  ;;  %v10117_v57 = vadd.f32 %v7649_v37, %v1113_v35  ;;  %v1105_v32 = vadd.f32 %v1104_v18, %v10803_v55  ;;  %v1532_v8 = vpop.f32.mrf.mxu0  ;;  %v3944_v12 = vrot.slane %v3942_v31, 5  ;;  %v3949_v44 = vrot.slane %v3947_v29, 4  ;;  %v10806_v31 = vld [vmem:[#allocation8_spill] sm:$0xff] }
 0x148   : > { %v7616_v48 = vpop.f32.mrf.mxu1  ;;  %v3952_v1 = vrot.slane %v3950_v6, 5  ;;  %v10805_v37 = vcombine.low %v9974_v0, %v9978_v14  ;;  %v10127_v59 = vrot.slane %v3956_v11, 5  ;;  %v3962_v30 = vrot.slane %v3960_v3, 4 }
 0x149   : > { %v10120_v23 = vadd.f32 %v1529_v39, %v1105_v32  ;;  %v1116_v2 = vadd.f32 %v7616_v48, %v10804_v47  ;;  %v7653_v49 = vpop.f32.mrf.mxu0  ;;  %v3911_v39 = vsel %vm8048_vm5, %v10090_v40, %v10035_v17  ;;  %v3921_v33 = vsel %vm8048_vm5, %v10099_v50, %v10082_v24  ;;  %v7098_v17 = vld [vmem:[%s7996_s23 + $0xcc] sm:$0xe] }
 0x14a   : > { %7856 = vmatmul.mubr.msk.bf16.gmra.mxu0 %vm658_vm4, %v10805_v37  ;;  %v1107_v62 = vpop.f32.mrf.mxu1  ;;  %v4435_v0 = vrot.slane %v10094_v15, 5  ;;  %v4432_v35 = vsel %vm8314_vm8, %v4430_v20, %v4431_v9  ;;  %v7129_v24 = vcombine.low %v4422_v25, %v4425_v58  ;;  %v3935_v15 = vsel %vm8048_vm5, %v3930_v54, %v10073_v21  ;;  %v10808_v20 = vld [vmem:[#allocation12_spill] sm:$0xff] }
 0x14b   : > { %7859 = vmatprep.mubr.msk.bf16.mxu0 %vm658_vm4, %v7128_v45  ;;  %v10140_v14 = vadd.f32 %v7650_v10, %v1116_v2  ;;  %v1108_v29 = vadd.f32 %v1107_v62, %v10806_v31  ;;  %v1545_v6 = vpop.f32.mrf.mxu0  ;;  %v4429_v45 = vsel %vm8314_vm8, %v7113_v51, %v4428_v26  ;;  %v3945_v50 = vsel %vm8048_vm5, %v3940_v41, %v3944_v12  ;;  %v10807_v26 = vld [vmem:[#allocation9_spill] sm:$0xff] }
 0x14c   : > { %v7619_v40 = vpop.f32.mrf.mxu1  ;;  %7822 = vmatmul.mubr.msk.bf16.gmra.mxu1 %vm658_vm4, %v10066_v52  ;;  %v3953_v10 = vor.u32 %v3952_v1, %v3949_v44  ;;  %v3963_v51 = vor.u32 %v3962_v30, %v10127_v59  ;;  %v3966_v52 = vshll.u32 %v7049_v56, 16  ;;  %v7130_v58 = vcombine.low %v4429_v45, %v4432_v35 }
 0x14d   : > { %v10155_v11 = vadd.f32 %v1532_v8, %v1108_v29  ;;  %v1129_v3 = vadd.f32 %v7619_v40, %v10807_v26  ;;  %v7654_v18 = vpop.f32.mrf.mxu0  ;;  %7825 = vmatprep.mubr.msk.bf16.mxu1 %vm658_vm4, %v10069_v22  ;;  %v7114_v55 = vrot.slane %v7098_v17, 9  ;;  %v4437_v32 = vrot.slane %v4435_v0, 4  ;;  %v10809_v22 = vld [vmem:[#allocation4_spill] sm:$0xff]  ;;  %v10811_v17 = vld [vmem:[#allocation17_spill] sm:$0xff] }
 0x14e   : > { %v1120_v25 = vpop.f32.mrf.mxu1  ;;  %v4438_v21 = vrot.slane %v7049_v56, 5  ;;  %v7064_v48 = vcombine.low %v3911_v39, %v3921_v33  ;;  %v7065_v41 = vcombine.low %v3935_v15, %v3945_v50  ;;  %v3954_v12 = vrot.slane %v3953_v10, 4  ;;  %v10810_v56 = vld [vmem:[#allocation13_spill] sm:$0xff]  ;;  %v10812_v10 = vld [vmem:[#allocation20_spill] sm:$0xff] }
 0x14f   : > { %v10161_v54 = vadd.f32 %v7653_v49, %v1129_v3  ;;  %v1121_v1 = vadd.f32 %v1120_v25, %v10808_v20  ;;  %v1548_v8 = vpop.f32.mrf.mxu0  ;;  %v3964_v37 = vrot.slane %v3963_v51, 4  ;;  %v3968_v30 = vrot.slane %v3966_v52, 5  ;;  %v10813_v52 = vld [vmem:[#allocation22_spill] sm:$0xff] }
 0x150   : > { %v7620_v9 = vpop.f32.mrf.mxu1  ;;  %v4436_v49 = vsel %vm8314_vm8, %v7114_v55, %v4435_v0  ;;  %v4439_v39 = vsel %vm8314_vm8, %v4437_v32, %v4438_v21  ;;  %v3959_v45 = vsel %vm8048_vm5, %v3954_v12, %v10127_v59 }
 0x151   : > { %v10164_v44 = vadd.f32 %v1545_v6, %v1121_v1  ;;  %v1132_v47 = vadd.f32 %v7620_v9, %v10809_v22  ;;  %v7657_v2 = vpop.f32.mrf.mxu0  ;;  %v3969_v63 = vsel %vm8048_vm5, %v3964_v37, %v3968_v30 }
 0x152   : > { %7860 = vmatmul.mubr.msk.bf16.gmra.mxu0 %vm658_vm4, %v7129_v24  ;;  %v1123_v62 = vpop.f32.mrf.mxu1  ;;  %v7131_v24 = vcombine.low %v4436_v49, %v4439_v39  ;;  %v7066_v51 = vcombine.low %v3959_v45, %v3969_v63 }
 0x153   : > { %7863 = vmatprep.mubr.msk.bf16.mxu0 %vm658_vm4, %v7130_v58  ;;  %v10173_v33 = vadd.f32 %v7654_v18, %v1132_v47  ;;  %v1124_v31 = vadd.f32 %v1123_v62, %v10810_v56  ;;  %v1561_v29 = vpop.f32.mrf.mxu0 }
 0x154   : > { %v7623_v6 = vpop.f32.mrf.mxu1  ;;  %7826 = vmatmul.mubr.msk.bf16.gmra.mxu1 %vm658_vm4, %v7064_v48 }
 0x155   : > { %v10180_v35 = vadd.f32 %v1548_v8, %v1124_v31  ;;  %v1145_v40 = vadd.f32 %v7623_v6, %v10811_v17  ;;  %v7658_v0 = vpop.f32.mrf.mxu0  ;;  %7829 = vmatprep.mubr.msk.bf16.mxu1 %vm658_vm4, %v7065_v41 }
 0x156   : > { %v1136_v15 = vpop.f32.mrf.mxu1 }
 0x157   : > { %v10186_v50 = vadd.f32 %v7657_v2, %v1145_v40  ;;  %v1137_v26 = vadd.f32 %v1136_v15, %v10812_v10  ;;  %v1564_v3 = vpop.f32.mrf.mxu0 }
 0x158   : > { %v7624_v18 = vpop.f32.mrf.mxu1 }
 0x159   : > { %v10189_v59 = vadd.f32 %v1561_v29, %v1137_v26  ;;  %v1148_v25 = vadd.f32 %v7624_v18, %v10813_v52  ;;  %v7661_v58 = vpop.f32.mrf.mxu0 }
 0x15a   : > { %7864 = vmatmul.mubr.msk.bf16.gmra.mxu0 %vm658_vm4, %v7131_v24  ;;  %v1139_v55 = vpop.f32.mrf.mxu1 }
 0x15b   : > { %v10193_v32 = vadd.f32 %v7658_v0, %v1148_v25  ;;  %v1140_v21 = vadd.f32 %v1139_v55, %v10814_v38  ;;  %v1577_v20 = vpop.f32.mrf.mxu0 }
 0x15c   : > { %v7627_v1 = vpop.f32.mrf.mxu1  ;;  %7830 = vmatmul.mubr.msk.bf16.gmra.mxu1 %vm658_vm4, %v7066_v51 }
 0x15d   : > { %v10197_v8 = vadd.f32 %v1564_v3, %v1140_v21  ;;  %v1161_v9 = vadd.f32 %v7627_v1, %v9769_v16  ;;  %v7662_v48 = vpop.f32.mrf.mxu0 }
 0x15e   : > { %v1152_v41 = vpop.f32.mrf.mxu1 }
 0x15f   : > { %v10200_v12 = vadd.f32 %v7661_v58, %v1161_v9  ;;  %v1153_v22 = vadd.f32 %v1152_v41, %v9796_v43  ;;  %v1580_v47 = vpop.f32.mrf.mxu0 }
 0x160   : > { %v7628_v2 = vpop.f32.mrf.mxu1 }
 0x161   : > { %v10203_v37 = vadd.f32 %v1577_v20, %v1153_v22  ;;  %v1164_v30 = vadd.f32 %v7628_v2, %v9811_v60  ;;  %v7701_v62 = vpop.f32.mrf.mxu0  ;;  %v10815_v22 = vld [vmem:[#allocation15_spill] sm:$0xff] }
 0x162   : > { %v1155_v49 = vpop.f32.mrf.mxu1 }
 0x163   : > { %v10206_v39 = vadd.f32 %v7662_v48, %v1164_v30  ;;  %v1156_v56 = vadd.f32 %v1155_v49, %v9833_v28  ;;  %v2550_v31 = vpop.f32.mrf.mxu0 }
 0x164   : > { %v7667_v16 = vpop.f32.mrf.mxu1 }
 0x165   : > { %v10209_v29 = vadd.f32 %v1580_v47, %v1156_v56  ;;  %v1953_v6 = vadd.f32 %v7667_v16, %v9878_v5  ;;  %v7702_v45 = vpop.f32.mrf.mxu0 }
 0x166   : > { %v1824_v43 = vpop.f32.mrf.mxu1 }
 0x167   : > { %v10212_v17 = vadd.f32 %v7701_v62, %v1953_v6  ;;  %v1951_v40 = vadd.f32 %v1824_v43, %v9885_v27  ;;  %v2553_v0 = vpop.f32.mrf.mxu0  ;;  %v10816_v62 = vld [vmem:[#allocation3_spill] sm:$0xff] }
 0x168   : > { %v7668_v60 = vpop.f32.mrf.mxu1 }
 0x169   : > { %v10215_v63 = vadd.f32 %v2550_v31, %v1951_v40  ;;  %v1954_v24 = vadd.f32 %v7668_v60, %v9911_v19  ;;  %v7705_v15 = vpop.f32.mrf.mxu0 }
 0x16a   : > { %v1827_v28 = vpop.f32.mrf.mxu1 }
 0x16b   : > { %v10218_v10 = vadd.f32 %v7702_v45, %v1954_v24  ;;  %v1952_v26 = vadd.f32 %v1827_v28, %v9925_v7  ;;  %v2566_v3 = vpop.f32.mrf.mxu0 }
 0x16c   : > { %v7671_v5 = vpop.f32.mrf.mxu1 }
 0x16d   : > { %v10221_v18 = vadd.f32 %v2553_v0, %v1952_v26  ;;  %v1957_v51 = vadd.f32 %v7671_v5, %v9937_v42  ;;  %v7706_v52 = vpop.f32.mrf.mxu0 }
 0x16e   : > { %v1840_v27 = vpop.f32.mrf.mxu1 }
 0x16f   : > { %v10224_v25 = vadd.f32 %v7705_v15, %v1957_v51  ;;  %v1955_v58 = vadd.f32 %v1840_v27, %v9944_v34  ;;  %v2569_v55 = vpop.f32.mrf.mxu0 }
 0x170   : > { %v7672_v19 = vpop.f32.mrf.mxu1 }
 0x171   : > { %v10227_v38 = vadd.f32 %v2566_v3, %v1955_v58  ;;  %v1958_v21 = vadd.f32 %v7672_v19, %v9969_v36  ;;  %v7709_v20 = vpop.f32.mrf.mxu0  ;;  %v10818_v19 = vld [vmem:[#allocation10_spill] sm:$0xff] }
 0x172   : > { %v1843_v7 = vpop.f32.mrf.mxu1 }
 0x173   : > { %v10230_v1 = vadd.f32 %v7706_v52, %v1958_v21  ;;  %v1956_v9 = vadd.f32 %v1843_v7, %v9992_v61  ;;  %v2582_v48 = vpop.f32.mrf.mxu0  ;;  %v10817_v52 = vld [vmem:[#allocation16_spill] sm:$0xff] }
 0x174   : > { %v7675_v42 = vpop.f32.mrf.mxu1 }
 0x175   : > { %v10233_v41 = vadd.f32 %v2569_v55, %v1956_v9  ;;  %v1961_v47 = vadd.f32 %v7675_v42, %v10815_v22  ;;  %v7710_v2 = vpop.f32.mrf.mxu0 }
 0x176   : > { %v1856_v34 = vpop.f32.mrf.mxu1 }
 0x177   : > { %v10236_v30 = vadd.f32 %v7709_v20, %v1961_v47  ;;  %v1959_v49 = vadd.f32 %v1856_v34, %v10816_v62  ;;  %v2585_v56 = vpop.f32.mrf.mxu0 }
 0x178   : > { %v7676_v36 = vpop.f32.mrf.mxu1 }
 0x179   : > { %v10239_v31 = vadd.f32 %v2582_v48, %v1959_v49  ;;  %v1962_v16 = vadd.f32 %v7676_v36, %v10032_v46  ;;  %v7713_v6 = vpop.f32.mrf.mxu0 }
 0x17a   : > { %v1859_v61 = vpop.f32.mrf.mxu1 }
 0x17b   : > { %v10242_v45 = vadd.f32 %v7710_v2, %v1962_v16  ;;  %v1960_v43 = vadd.f32 %v1859_v61, %v10048_v13  ;;  %v2598_v40 = vpop.f32.mrf.mxu0 }
 0x17c   : > { %v7679_v0 = vpop.f32.mrf.mxu1 }
 0x17d   : > { %v10245_v60 = vadd.f32 %v2585_v56, %v1960_v43  ;;  %v1965_v24 = vadd.f32 %v7679_v0, %v10058_v4  ;;  %v7714_v15 = vpop.f32.mrf.mxu0 }
 0x17e   : > { %v1872_v28 = vpop.f32.mrf.mxu1 }
 0x17f   : > { %v10248_v26 = vadd.f32 %v7713_v6, %v1965_v24  ;;  %v1963_v3 = vadd.f32 %v1872_v28, %v10075_v53  ;;  %v2601_v5 = vpop.f32.mrf.mxu0 }
 0x180   : > { %v7680_v46 = vpop.f32.mrf.mxu1 }
 0x181   : > { %v10251_v51 = vadd.f32 %v2598_v40, %v1963_v3  ;;  %v1966_v27 = vadd.f32 %v7680_v46, %v10817_v52  ;;  %v7717_v58 = vpop.f32.mrf.mxu0 }
 0x182   : > { %v1875_v13 = vpop.f32.mrf.mxu1 }
 0x183   : > { %v10254_v55 = vadd.f32 %v7714_v15, %v1966_v27  ;;  %v1964_v21 = vadd.f32 %v1875_v13, %v10818_v19  ;;  %v2614_v20 = vpop.f32.mrf.mxu0 }
 0x184   : > { %v7683_v4 = vpop.f32.mrf.mxu1 }
 0x185   : > { %v10257_v7 = vadd.f32 %v2601_v5, %v1964_v21  ;;  %v1969_v9 = vadd.f32 %v7683_v4, %v10117_v57  ;;  %v7718_v48 = vpop.f32.mrf.mxu0 }
 0x186   : > { %v1888_v53 = vpop.f32.mrf.mxu1 }
 0x187   : > { %v10260_v42 = vadd.f32 %v7717_v58, %v1969_v9  ;;  %v1967_v22 = vadd.f32 %v1888_v53, %v10120_v23  ;;  %v2617_v47 = vpop.f32.mrf.mxu0 }
 0x188   : > { %v7684_v2 = vpop.f32.mrf.mxu1 }
 0x189   : > { %v10263_v34 = vadd.f32 %v2614_v20, %v1967_v22  ;;  %v1970_v62 = vadd.f32 %v7684_v2, %v10140_v14  ;;  %v7721_v49 = vpop.f32.mrf.mxu0 }
 0x18a   : > { %v1891_v56 = vpop.f32.mrf.mxu1 }
 0x18b   : > { %v10266_v36 = vadd.f32 %v7718_v48, %v1970_v62  ;;  %v1968_v16 = vadd.f32 %v1891_v56, %v10155_v11  ;;  %v2630_v6 = vpop.f32.mrf.mxu0 }
 0x18c   : > { %v7687_v57 = vpop.f32.mrf.mxu1 }
 0x18d   : > { %v10269_v61 = vadd.f32 %v2617_v47, %v1968_v16  ;;  %v1973_v43 = vadd.f32 %v7687_v57, %v10161_v54  ;;  %v7722_v40 = vpop.f32.mrf.mxu0 }
 0x18e   : > { %v1904_v23 = vpop.f32.mrf.mxu1 }
 0x18f   : > { %v10272_v0 = vadd.f32 %v7721_v49, %v1973_v43  ;;  %v1971_v24 = vadd.f32 %v1904_v23, %v10164_v44  ;;  %v2633_v15 = vpop.f32.mrf.mxu0 }
 0x190   : > { %v7688_v14 = vpop.f32.mrf.mxu1 }
 0x191   : > { %v10275_v28 = vadd.f32 %v2630_v6, %v1971_v24  ;;  %v1974_v3 = vadd.f32 %v7688_v14, %v10173_v33  ;;  %v7725_v5 = vpop.f32.mrf.mxu0 }
 0x192   : > { %v1907_v11 = vpop.f32.mrf.mxu1 }
 0x193   : > { %v10278_v46 = vadd.f32 %v7722_v40, %v1974_v3  ;;  %v1972_v52 = vadd.f32 %v1907_v11, %v10180_v35  ;;  %v2646_v27 = vpop.f32.mrf.mxu0 }
 0x194   : > { %v7691_v54 = vpop.f32.mrf.mxu1 }
 0x195   : > { %v10281_v58 = vadd.f32 %v2633_v15, %v1972_v52  ;;  %v1977_v13 = vadd.f32 %v7691_v54, %v10186_v50  ;;  %v7726_v19 = vpop.f32.mrf.mxu0 }
 0x196   : > { %v1920_v44 = vpop.f32.mrf.mxu1 }
 0x197   : > { %v10284_v21 = vadd.f32 %v7725_v5, %v1977_v13  ;;  %v1975_v20 = vadd.f32 %v1920_v44, %v10189_v59  ;;  %v2649_v4 = vpop.f32.mrf.mxu0 }
 0x198   : > { %v7692_v33 = vpop.f32.mrf.mxu1 }
 0x199   : > { %v10287_v9 = vadd.f32 %v2646_v27, %v1975_v20  ;;  %v1978_v48 = vadd.f32 %v7692_v33, %v10193_v32  ;;  %v7729_v53 = vpop.f32.mrf.mxu0 }
 0x19a   : > { %v1923_v35 = vpop.f32.mrf.mxu1 }
 0x19b   : > { %v10290_v22 = vadd.f32 %v7726_v19, %v1978_v48  ;;  %v1976_v47 = vadd.f32 %v1923_v35, %v10197_v8  ;;  %v2662_v2 = vpop.f32.mrf.mxu0 }
 0x19c   : > { %v7695_v50 = vpop.f32.mrf.mxu1 }
 0x19d   : > { %v10293_v62 = vadd.f32 %v2649_v4, %v1976_v47  ;;  %v1981_v49 = vadd.f32 %v7695_v50, %v10200_v12  ;;  %v7730_v56 = vpop.f32.mrf.mxu0 }
 0x19e   : > { %v1936_v59 = vpop.f32.mrf.mxu1 }
 0x19f   : > { %v10296_v16 = vadd.f32 %v7729_v53, %v1981_v49  ;;  %v1979_v6 = vadd.f32 %v1936_v59, %v10203_v37  ;;  %v2665_v57 = vpop.f32.mrf.mxu0 }
 0x1a0   : > { %v7696_v32 = vpop.f32.mrf.mxu1 }
 0x1a1   : > { %v10299_v43 = vadd.f32 %v2662_v2, %v1979_v6  ;;  %v1982_v40 = vadd.f32 %v7696_v32, %v10206_v39  ;;  %v10302_v23 = vpop.f32.mrf.mxu0 }
 0x1a2   : > { %v1939_v8 = vpop.f32.mrf.mxu1 }
 0x1a3   : > { %v10304_v24 = vadd.f32 %v7730_v56, %v1982_v40  ;;  %v1980_v15 = vadd.f32 %v1939_v8, %v10209_v29  ;;  %v10307_v12 = vpop.f32.mrf.mxu0 }
 0x1a4   : > { %v10309_v14 = vpop.f32.mrf.mxu1 }
 0x1a5   : > { %v10311_v3 = vadd.f32 %v2665_v57, %v1980_v15  ;;  %v10313_v37 = vpop.f32.mrf.mxu0 }
 0x1a6   : > { %v10315_v5 = vpop.f32.mrf.mxu1 }
 0x1a7   : > { %v10317_v11 = vpop.f32.mrf.mxu0 }
 0x1a8   : > { %v10319_v39 = vpop.f32.mrf.mxu1 }
 0x1a9   : > { %v7773_v52 = vpop.f32.mrf.mxu0 }
 0x1aa   : > { %v10321_v27 = vpop.f32.mrf.mxu1 }
 0x1ab   : > { %v3395_v54 = vpop.f32.mrf.mxu0 }
 0x1ac   : > { %v7739_v13 = vpop.f32.mrf.mxu1 }
 0x1ad   : > { %v3153_v29 = vadd.f32 %v7739_v13, %v10224_v25  ;;  %v7774_v19 = vpop.f32.mrf.mxu0 }
 0x1ae   : > { %v3036_v44 = vpop.f32.mrf.mxu1 }
 0x1af   : > { %v10324_v20 = vadd.f32 %v7773_v52, %v3153_v29  ;;  %v3151_v4 = vadd.f32 %v3036_v44, %v10227_v38  ;;  %v3398_v33 = vpop.f32.mrf.mxu0 }
 0x1b0   : > { %v7740_v48 = vpop.f32.mrf.mxu1 }
 0x1b1   : > { %v10327_v53 = vadd.f32 %v3395_v54, %v3151_v4  ;;  %v3154_v35 = vadd.f32 %v7740_v48, %v10230_v1  ;;  %v7777_v47 = vpop.f32.mrf.mxu0 }
 0x1b2   : > { %v3039_v2 = vpop.f32.mrf.mxu1 }
 0x1b3   : > { %v10330_v50 = vadd.f32 %v7774_v19, %v3154_v35  ;;  %v3152_v49 = vadd.f32 %v3039_v2, %v10233_v41  ;;  %v3411_v56 = vpop.f32.mrf.mxu0 }
 0x1b4   : > { %v7743_v25 = vpop.f32.mrf.mxu1 }
 0x1b5   : > { %v10333_v59 = vadd.f32 %v3398_v33, %v3152_v49  ;;  %v3157_v6 = vadd.f32 %v7743_v25, %v10236_v30  ;;  %v7778_v57 = vpop.f32.mrf.mxu0 }
 0x1b6   : > { %v3052_v38 = vpop.f32.mrf.mxu1 }
 0x1b7   : > { %v10336_v32 = vadd.f32 %v7777_v47, %v3157_v6  ;;  %v3155_v40 = vadd.f32 %v3052_v38, %v10239_v31  ;;  %v3414_v8 = vpop.f32.mrf.mxu0 }
 0x1b8   : > { %v7744_v1 = vpop.f32.mrf.mxu1 }
 0x1b9   : > { %v10339_v15 = vadd.f32 %v3411_v56, %v3155_v40  ;;  %v3158_v52 = vadd.f32 %v7744_v1, %v10242_v45  ;;  %v7781_v54 = vpop.f32.mrf.mxu0 }
 0x1ba   : > { %v3055_v41 = vpop.f32.mrf.mxu1 }
 0x1bb   : > { %v10342_v13 = vadd.f32 %v7778_v57, %v3158_v52  ;;  %v3156_v29 = vadd.f32 %v3055_v41, %v10245_v60  ;;  %v3427_v19 = vpop.f32.mrf.mxu0 }
 0x1bc   : > { %v7747_v30 = vpop.f32.mrf.mxu1 }
 0x1bd   : > { %v10345_v44 = vadd.f32 %v3414_v8, %v3156_v29  ;;  %v3161_v4 = vadd.f32 %v7747_v30, %v10248_v26  ;;  %v7782_v33 = vpop.f32.mrf.mxu0 }
 0x1be   : > { %v3068_v31 = vpop.f32.mrf.mxu1 }
 0x1bf   : > { %v10348_v48 = vadd.f32 %v7781_v54, %v3161_v4  ;;  %v3159_v35 = vadd.f32 %v3068_v31, %v10251_v51  ;;  %v3430_v47 = vpop.f32.mrf.mxu0 }
 0x1c0   : > { %v7748_v45 = vpop.f32.mrf.mxu1 }
 0x1c1   : > { %v10351_v2 = vadd.f32 %v3427_v19, %v3159_v35  ;;  %v3162_v49 = vadd.f32 %v7748_v45, %v10254_v55  ;;  %v7785_v56 = vpop.f32.mrf.mxu0 }
 0x1c2   : > { %v3071_v60 = vpop.f32.mrf.mxu1 }
 0x1c3   : > { %v10354_v25 = vadd.f32 %v7782_v33, %v3162_v49  ;;  %v3160_v6 = vadd.f32 %v3071_v60, %v10257_v7  ;;  %v3443_v57 = vpop.f32.mrf.mxu0 }
 0x1c4   : > { %v7751_v26 = vpop.f32.mrf.mxu1 }
 0x1c5   : > { %v10357_v38 = vadd.f32 %v3430_v47, %v3160_v6  ;;  %v3165_v40 = vadd.f32 %v7751_v26, %v10260_v42  ;;  %v7786_v8 = vpop.f32.mrf.mxu0 }
 0x1c6   : > { %v3084_v51 = vpop.f32.mrf.mxu1 }
 0x1c7   : > { %v10360_v1 = vadd.f32 %v7785_v56, %v3165_v40  ;;  %v3163_v52 = vadd.f32 %v3084_v51, %v10263_v34  ;;  %v3446_v54 = vpop.f32.mrf.mxu0 }
 0x1c8   : > { %v7752_v55 = vpop.f32.mrf.mxu1 }
 0x1c9   : > { %v10363_v41 = vadd.f32 %v3443_v57, %v3163_v52  ;;  %v3166_v29 = vadd.f32 %v7752_v55, %v10266_v36  ;;  %v7789_v19 = vpop.f32.mrf.mxu0 }
 0x1ca   : > { %v3087_v7 = vpop.f32.mrf.mxu1 }
 0x1cb   : > { %v10366_v30 = vadd.f32 %v7786_v8, %v3166_v29  ;;  %v3164_v4 = vadd.f32 %v3087_v7, %v10269_v61  ;;  %v3459_v33 = vpop.f32.mrf.mxu0 }
 0x1cc   : > { %v7755_v42 = vpop.f32.mrf.mxu1 }
 0x1cd   : > { %v10369_v31 = vadd.f32 %v3446_v54, %v3164_v4  ;;  %v3169_v35 = vadd.f32 %v7755_v42, %v10272_v0  ;;  %v7790_v47 = vpop.f32.mrf.mxu0 }
 0x1ce   : > { %v3100_v34 = vpop.f32.mrf.mxu1 }
 0x1cf   : > { %v10372_v45 = vadd.f32 %v7789_v19, %v3169_v35  ;;  %v3167_v49 = vadd.f32 %v3100_v34, %v10275_v28  ;;  %v3462_v56 = vpop.f32.mrf.mxu0 }
 0x1d0   : > { %v7756_v36 = vpop.f32.mrf.mxu1 }
 0x1d1   : > { %v10375_v60 = vadd.f32 %v3459_v33, %v3167_v49  ;;  %v3170_v6 = vadd.f32 %v7756_v36, %v10278_v46  ;;  %v7793_v57 = vpop.f32.mrf.mxu0  ;;  %v3149_v36 = vadd.f32 %v10309_v14, %v10212_v17  ;;  %v3150_v14 = vadd.f32 %v10319_v39, %v10218_v10  ;;  %v10420_v10 = vld [vmem:[%s10643_s2] ss:$0 sm:$0xff] }
 0x1d2   : > { %v3103_v61 = vpop.f32.mrf.mxu1 }
 0x1d3   : > { %v10378_v26 = vadd.f32 %v7790_v47, %v3170_v6  ;;  %v3168_v40 = vadd.f32 %v3103_v61, %v10281_v58  ;;  %v3475_v8 = vpop.f32.mrf.mxu0  ;;  %v3508_v17 = vadd.f32 %v10302_v23, %v3149_v36 }
 0x1d4   : > { %v7759_v0 = vpop.f32.mrf.mxu1 }
 0x1d5   : > { %v10381_v51 = vadd.f32 %v3462_v56, %v3168_v40  ;;  %v3173_v52 = vadd.f32 %v7759_v0, %v10284_v21  ;;  %v7794_v54 = vpop.f32.mrf.mxu0  ;;  %v7943_v40 = vmov 1983009808   ;;  %v3147_v0 = vadd.f32 %v10315_v5, %v10215_v63 }
 0x1d6   : > { %v3116_v28 = vpop.f32.mrf.mxu1 }
 0x1d7   : > { %v10384_v55 = vadd.f32 %v7793_v57, %v3173_v52  ;;  %v3171_v29 = vadd.f32 %v3116_v28, %v10287_v9  ;;  %v3478_v19 = vpop.f32.mrf.mxu0  ;;  %v3506_v63 = vadd.f32 %v10307_v12, %v3147_v0 }
 0x1d8   : > { %v7760_v46 = vpop.f32.mrf.mxu1 }
 0x1d9   : > { %v10387_v7 = vadd.f32 %v3475_v8, %v3171_v29  ;;  %v3174_v4 = vadd.f32 %v7760_v46, %v10290_v22  ;;  %v7797_v33 = vpop.f32.mrf.mxu0  ;;  %v4839_v8 = vunpack.c.l.s4 %v7943_v40 }
 0x1da   : > { %v3119_v58 = vpop.f32.mrf.mxu1 }
 0x1db   : > { %v10390_v42 = vadd.f32 %v7794_v54, %v3174_v4  ;;  %v3172_v35 = vadd.f32 %v3119_v58, %v10293_v62  ;;  %v3491_v47 = vpop.f32.mrf.mxu0  ;;  %v4841_v62 = vlaneseq  ;;  %v4840_v4 = vunpack.c.0.s8 %v4839_v8 }
 0x1dc   : > { %v7763_v21 = vpop.f32.mrf.mxu1 }
 0x1dd   : > { %v10393_v34 = vadd.f32 %v3478_v19, %v3172_v35  ;;  %v3177_v49 = vadd.f32 %v7763_v21, %v10296_v16  ;;  %v7798_v56 = vpop.f32.mrf.mxu0 }
 0x1de   : > { %v3132_v9 = vpop.f32.mrf.mxu1 }
 0x1df   : > { %v10398_v6 = vadd.f32 %v7797_v33, %v3177_v49  ;;  %v3175_v22 = vadd.f32 %v3132_v9, %v10299_v43  ;;  %v3494_v57 = vpop.f32.mrf.mxu0  ;;  %v4842_v33 = vshrl.u32 %v4841_v62, 7 }
 0x1e0   : > { %v7764_v61 = vpop.f32.mrf.mxu1 }
 0x1e1   : > { %v10403_v52 = vadd.f32 %v3491_v47, %v3175_v22  ;;  %v3178_v16 = vadd.f32 %v7764_v61, %v10304_v24  ;;  %v7837_v54 = vpop.f32.mrf.mxu0  ;;  %v3148_v24 = vadd.f32 %v10321_v27, %v10221_v18  ;;  %v10423_v21 = vsub.s32 %v4840_v4, %v4842_v33 }
 0x1e2   : > { %v3135_v28 = vpop.f32.mrf.mxu1 }
 0x1e3   : > { %v10409_v43 = vadd.f32 %v7798_v56, %v3178_v16  ;;  %v3176_v29 = vadd.f32 %v3135_v28, %v10311_v3  ;;  %v4575_v19 = vpop.f32.mrf.mxu0  ;;  %v3509_v3 = vadd.f32 %v10313_v37, %v3150_v14  ;;  %v3507_v49 = vadd.f32 %v10317_v11, %v3148_v24 }
 0x1e4   : > { %v7803_v46 = vpop.f32.mrf.mxu1 }
 0x1e5   : > { %v10415_v5 = vadd.f32 %v3494_v57, %v3176_v29  ;;  %v4234_v58 = vadd.f32 %v7803_v46, %v3508_v17  ;;  %v7838_v47 = vpop.f32.mrf.mxu0 }
 0x1e6   : > { %v4105_v23 = vpop.f32.mrf.mxu1 }
 0x1e7   : > { %v4704_v39 = vadd.f32 %v7837_v54, %v4234_v58  ;;  %v4232_v35 = vadd.f32 %v4105_v23, %v3506_v63  ;;  %v4578_v40 = vpop.f32.mrf.mxu0 }
 0x1e8   : > { %v7804_v12 = vpop.f32.mrf.mxu1 }
 0x1e9   : > { %v4743_v18 = vadd.f32 %v10420_v10, %v4704_v39  ;;  %v4702_v27 = vadd.f32 %v4575_v19, %v4232_v35  ;;  %v4235_v56 = vadd.f32 %v7804_v12, %v3509_v3  ;;  %v7841_v19 = vpop.f32.mrf.mxu0 }
 0x1ea   : > { %v4108_v9 = vpop.f32.mrf.mxu1 }
 0x1eb   : > { %v4775_v36 = vmax.f32 %v4743_v18, 0.0  ;;  %v4741_v22 = vadd.f32 %v10420_v10, %v4702_v27  ;;  %v4705_v57 = vadd.f32 %v7838_v47, %v4235_v56  ;;  %v4233_v61 = vadd.f32 %v4108_v9, %v3507_v49 }
 0x1ec   : > { %v7807_v37 = vpop.f32.mrf.mxu1 }
 0x1ed   : > { %v4871_v8 = vcombine.high %v4775_v36, %v4775_v36  ;;  %v4878_v62 = vrot.slane %v4775_v36, %v10423_v21  ;;  %v4773_v0 = vmax.f32 %v4741_v22, 0.0  ;;  %v4744_v16 = vadd.f32 %v10420_v10, %v4705_v57 }
 0x1ee   : > { %v4703_v54 = vadd.f32 %v4578_v40, %v4233_v61  ;;  %v4238_v11 = vadd.f32 %v7807_v37, %v10324_v20 }
 0x1ef   : > { %v4885_v28 = vrot.slane %v4871_v8, %v10423_v21  ;;  %v4886_v17 = vcombine.high %v4878_v62, %v4878_v62  ;;  %v7157_v14 = vrot.slane %v4878_v62, 9  ;;  %v4837_v29 = vcombine.high %v4773_v0, %v4773_v0 }
 0x1f0   : > { %v4844_v46 = vrot.slane %v4773_v0, %v10423_v21  ;;  %v4776_v4 = vmax.f32 %v4744_v16, 0.0  ;;  %v4742_v33 = vadd.f32 %v10420_v10, %v4703_v54  ;;  %v4708_v63 = vadd.f32 %v7841_v19, %v4238_v11 }
 0x1f1   : > { %v4887_v24 = vcombine.high %v4885_v28, %v4885_v28  ;;  %v7158_v58 = vrot.slane %v4886_v17, 9  ;;  %v7159_v23 = vrot.slane %v4885_v28, 9  ;;  %v5901_v3 = vmax.f32 %v4878_v62, %v7157_v14 }
 0x1f2   : > { %v4851_v39 = vrot.slane %v4837_v29, %v10423_v21  ;;  %v4852_v35 = vcombine.high %v4844_v46, %v4844_v46  ;;  %v7149_v20 = vrot.slane %v4844_v46, 9  ;;  %v4888_v47 = vcombine.high %v4776_v4, %v4776_v4 }
 0x1f3   : > { %v7160_v12 = vrot.slane %v4887_v24, 9  ;;  %v5902_v49 = vmax.f32 %v4886_v17, %v7158_v58  ;;  %v5903_v18 = vmax.f32 %v4885_v28, %v7159_v23  ;;  %v4895_v27 = vrot.slane %v4776_v4, %v10423_v21 }
 0x1f4   : > { %v4853_v56 = vcombine.high %v4851_v39, %v4851_v39  ;;  %v7150_v9 = vrot.slane %v4852_v35, 9  ;;  %v7151_v36 = vrot.slane %v4851_v39, 9  ;;  %v5893_v22 = vmax.f32 %v4844_v46, %v7149_v20  ;;  %v4121_v20 = vpop.f32.mrf.mxu1 }
 0x1f5   : > { %v5904_v57 = vmax.f32 %v4887_v24, %v7160_v12  ;;  %v4902_v61 = vrot.slane %v4888_v47, %v10423_v21  ;;  %v4903_v40 = vcombine.high %v4895_v27, %v4895_v27  ;;  %v7161_v37 = vrot.slane %v4895_v27, 9 }
 0x1f6   : > { %v7152_v8 = vrot.slane %v4853_v56, 9  ;;  %v5894_v62 = vmax.f32 %v4852_v35, %v7150_v9  ;;  %v5895_v0 = vmax.f32 %v4851_v39, %v7151_v36  ;;  %v6021_v16 = vmax.f32 %v5893_v22, %v5901_v3 }
 0x1f7   : > { %v4904_v54 = vcombine.high %v4902_v61, %v4902_v61  ;;  %v7162_v11 = vrot.slane %v4903_v40, 9  ;;  %v7163_v28 = vrot.slane %v4902_v61, 9  ;;  %v5905_v17 = vmax.f32 %v4895_v27, %v7161_v37 }
 0x1f8   : > { %v5896_v14 = vmax.f32 %v4853_v56, %v7152_v8  ;;  %v6022_v29 = vmax.f32 %v5894_v62, %v5902_v49  ;;  %v6023_v19 = vmax.f32 %v5895_v0, %v5903_v18  ;;  %v7344_v46 = vpack.c.bf16 %v6021_v16, %v6021_v16 }
 0x1f9   : > { %v7164_v4 = vrot.slane %v4904_v54, 9  ;;  %v5906_v24 = vmax.f32 %v4903_v40, %v7162_v11  ;;  %v5907_v58 = vmax.f32 %v4902_v61, %v7163_v28  ;;  %v4774_v23 = vmax.f32 %v4742_v33, 0.0 }
 0x1fa   : > { %v6024_v47 = vmax.f32 %v5896_v14, %v5904_v57  ;;  %v7345_v12 = vpack.c.bf16 %v6022_v29, %v6022_v29  ;;  %v7346_v35 = vpack.c.bf16 %v6023_v19, %v6023_v19  ;;  %v6341_v39 = vunpack.c.l.b16 %v7344_v46  ;;  %v4591_v57 = vpop.f32.mrf.mxu0 }
 0x1fb   : > { %v5908_v3 = vmax.f32 %v4904_v54, %v7164_v4  ;;  %v4854_v9 = vcombine.high %v4774_v23, %v4774_v23  ;;  %v4861_v36 = vrot.slane %v4774_v23, %v10423_v21  ;;  %v4747_v27 = vadd.f32 %v10420_v10, %v4708_v63  ;;  %v7808_v63 = vpop.f32.mrf.mxu1 }
 0x1fc   : > { %v7347_v22 = vpack.c.bf16 %v6024_v47, %v6024_v47  ;;  %v6342_v56 = vunpack.c.l.b16 %v7345_v12  ;;  %v6343_v49 = vunpack.c.l.b16 %v7346_v35  ;;  %v4236_v18 = vadd.f32 %v4121_v20, %v10327_v53 }
 0x1fd   : > { %v4868_v40 = vrot.slane %v4854_v9, %v10423_v21  ;;  %v4869_v61 = vcombine.high %v4861_v36, %v4861_v36  ;;  %v7153_v33 = vrot.slane %v4861_v36, 9  ;;  %v4779_v37 = vmax.f32 %v4747_v27, 0.0 }
 0x1fe   : > { %v6344_v8 = vunpack.c.l.b16 %v7347_v22  ;;  %v6405_v62 = vrot.slane %v6342_v56, 7  ;;  %v6408_v0 = vrot.slane %v6343_v49, 6  ;;  %v4706_v16 = vadd.f32 %v4591_v57, %v4236_v18  ;;  %v7842_v49 = vpop.f32.mrf.mxu0  ;;  %v4124_v18 = vpop.f32.mrf.mxu1 }
 0x1ff   : > { %v4870_v54 = vcombine.high %v4868_v40, %v4868_v40  ;;  %v7154_v11 = vrot.slane %v4869_v61, 9  ;;  %v7155_v28 = vrot.slane %v4868_v40, 9  ;;  %v5897_v14 = vmax.f32 %v4861_v36, %v7153_v33 }
 0x200   : > { %v6407_v29 = vsel %vm6406_vm9, %v6405_v62, %v6341_v39  ;;  %v6411_v19 = vrot.slane %v6344_v8, 5  ;;  %v4939_v53 = vcombine.high %v4779_v37, %v4779_v37  ;;  %v4946_v46 = vrot.slane %v4779_v37, %v10423_v21 }
 0x201   : > { %v6410_v4 = vsel %vm6409_vm10, %v6408_v0, %v6407_v29  ;;  %v7156_v23 = vrot.slane %v4870_v54, 9  ;;  %v5898_v20 = vmax.f32 %v4869_v61, %v7154_v11  ;;  %v5899_v47 = vmax.f32 %v4868_v40, %v7155_v28 }
 0x202   : > { %v6025_v12 = vmax.f32 %v5897_v14, %v5905_v17  ;;  %v6413_v35 = vsel %vm6412_vm11, %v6411_v19, %v6410_v4  ;;  %v4953_v9 = vrot.slane %v4939_v53, %v10423_v21  ;;  %v4954_v36 = vcombine.high %v4946_v46, %v4946_v46  ;;  %v4594_v19 = vpop.f32.mrf.mxu0  ;;  %v7811_v53 = vpop.f32.mrf.mxu1 }
 0x203   : > { %v5900_v27 = vmax.f32 %v4870_v54, %v7156_v23  ;;  %v6026_v39 = vmax.f32 %v5898_v20, %v5906_v24  ;;  %v6027_v22 = vmax.f32 %v5899_v47, %v5907_v58  ;;  %v7173_v56 = vrot.slane %v4946_v46, 9 }
 0x204   : > { %v7348_v33 = vpack.c.bf16 %v6025_v12, %v6025_v12  ;;  %v4955_v37 = vcombine.high %v4953_v9, %v4953_v9  ;;  %v7174_v57 = vrot.slane %v4954_v36, 9  ;;  %v7175_v8 = vrot.slane %v4953_v9, 9 }
 0x205   : > { %v6028_v61 = vmax.f32 %v5900_v27, %v5908_v3  ;;  %v7349_v40 = vpack.c.bf16 %v6026_v39, %v6026_v39  ;;  %v7350_v62 = vpack.c.bf16 %v6027_v22, %v6027_v22  ;;  %v5917_v17 = vmax.f32 %v4946_v46, %v7173_v56 }
 0x206   : > { %v6345_v0 = vunpack.c.l.b16 %v7348_v33  ;;  %v7176_v11 = vrot.slane %v4955_v37, 9  ;;  %v5918_v28 = vmax.f32 %v4954_v36, %v7174_v57  ;;  %v5919_v14 = vmax.f32 %v4953_v9, %v7175_v8 }
 0x207   : > { %v7351_v54 = vpack.c.bf16 %v6028_v61, %v6028_v61  ;;  %v6346_v24 = vunpack.c.l.b16 %v7349_v40  ;;  %v6347_v58 = vunpack.c.l.b16 %v7350_v62  ;;  %v4745_v29 = vadd.f32 %v10420_v10, %v4706_v16 }
 0x208   : > { %v6414_v4 = vrot.slane %v6345_v0, 4  ;;  %v5920_v23 = vmax.f32 %v4955_v37, %v7176_v11  ;;  %v4239_v3 = vadd.f32 %v7808_v63, %v10330_v50  ;;  %v4237_v20 = vadd.f32 %v4124_v18, %v10333_v59  ;;  %v7845_v50 = vpop.f32.mrf.mxu0 }
 0x209   : > { %v6348_v47 = vunpack.c.l.b16 %v7351_v54  ;;  %v6417_v46 = vrot.slane %v6346_v24, 3  ;;  %v6420_v12 = vrot.slane %v6347_v58, 2  ;;  %v4777_v27 = vmax.f32 %v4745_v29, 0.0 }
 0x20a   : > { %v6416_v9 = vsel %vm6415_vm12, %v6414_v4, %v6413_v35  ;;  %v4709_v36 = vadd.f32 %v7842_v49, %v4239_v3  ;;  %v4707_v39 = vadd.f32 %v4594_v19, %v4237_v20  ;;  %v4242_v22 = vadd.f32 %v7811_v53, %v10336_v32 }
 0x20b   : > { %v6419_v16 = vsel %vm6418_vm13, %v6417_v46, %v6416_v9  ;;  %v6423_v56 = vrot.slane %v6348_v47, 1  ;;  %v4905_v33 = vcombine.high %v4777_v27, %v4777_v27  ;;  %v4912_v37 = vrot.slane %v4777_v27, %v10423_v21 }
 0x20c   : > { %v6422_v59 = vsel %vm6421_vm14, %v6420_v12, %v6419_v16  ;;  %v4748_v63 = vadd.f32 %v10420_v10, %v4709_v36  ;;  %v4746_v18 = vadd.f32 %v10420_v10, %v4707_v39  ;;  %v4712_v57 = vadd.f32 %v7845_v50, %v4242_v22  ;;  %v4137_v39 = vpop.f32.mrf.mxu1 }
 0x20d   : > { %v6425_v32 = vsel %vm6424_vm15, %v6423_v56, %v6422_v59  ;;  %v4919_v35 = vrot.slane %v4905_v33, %v10423_v21  ;;  %v4920_v49 = vcombine.high %v4912_v37, %v4912_v37  ;;  %v7165_v8 = vrot.slane %v4912_v37, 9 }
 0x20e   : > { %v6524_v61 = vpack.c.b16 %v6425_v32, %v6425_v32  ;;  %v4780_v40 = vmax.f32 %v4748_v63, 0.0  ;;  %v4778_v62 = vmax.f32 %v4746_v18, 0.0  ;;  %v4751_v0 = vadd.f32 %v10420_v10, %v4712_v57 }
 0x20f   : > { %v4921_v11 = vcombine.high %v4919_v35, %v4919_v35  ;;  %v7166_v54 = vrot.slane %v4920_v49, 9  ;;  %v7167_v24 = vrot.slane %v4919_v35, 9  ;;  %v5909_v58 = vmax.f32 %v4912_v37, %v7165_v8 }
 0x210   : > { %6541 = vst.msk [vmem:[%s10460_s15] sm:$0xf] %vm6540_vm0, %v6524_v61  ;;  %v4956_v29 = vcombine.high %v4780_v40, %v4780_v40  ;;  %v4963_v19 = vrot.slane %v4780_v40, %v10423_v21  ;;  %v4922_v53 = vcombine.high %v4778_v62, %v4778_v62  ;;  %v4929_v4 = vrot.slane %v4778_v62, %v10423_v21  ;;  %v4607_v40 = vpop.f32.mrf.mxu0  ;;  %v7812_v62 = vpop.f32.mrf.mxu1 }
 0x211   : > { %v7168_v3 = vrot.slane %v4921_v11, 9  ;;  %v5910_v20 = vmax.f32 %v4920_v49, %v7166_v54  ;;  %v5911_v47 = vmax.f32 %v4919_v35, %v7167_v24  ;;  %v6029_v46 = vmax.f32 %v5909_v58, %v5917_v17 }
 0x212   : > { %v4970_v12 = vrot.slane %v4956_v29, %v10423_v21  ;;  %v4971_v27 = vcombine.high %v4963_v19, %v4963_v19  ;;  %v7177_v9 = vrot.slane %v4963_v19, 9  ;;  %v4936_v36 = vrot.slane %v4922_v53, %v10423_v21 }
 0x213   : > { %v5912_v22 = vmax.f32 %v4921_v11, %v7168_v3  ;;  %v6030_v16 = vmax.f32 %v5910_v20, %v5918_v28  ;;  %v6031_v56 = vmax.f32 %v5911_v47, %v5919_v14  ;;  %v7352_v33 = vpack.c.bf16 %v6029_v46, %v6029_v46 }
 0x214   : > { %v4972_v37 = vcombine.high %v4970_v12, %v4970_v12  ;;  %v7178_v50 = vrot.slane %v4971_v27, 9  ;;  %v7179_v59 = vrot.slane %v4970_v12, 9  ;;  %v5921_v63 = vmax.f32 %v4963_v19, %v7177_v9 }
 0x215   : > { %v6032_v18 = vmax.f32 %v5912_v22, %v5920_v23  ;;  %v7353_v57 = vpack.c.bf16 %v6030_v16, %v6030_v16  ;;  %v7354_v32 = vpack.c.bf16 %v6031_v56, %v6031_v56  ;;  %v6349_v35 = vunpack.c.l.b16 %v7352_v33  ;;  %v4140_v22 = vpop.f32.mrf.mxu1 }
 0x216   : > { %v7180_v17 = vrot.slane %v4972_v37, 9  ;;  %v5922_v49 = vmax.f32 %v4971_v27, %v7178_v50  ;;  %v5923_v8 = vmax.f32 %v4970_v12, %v7179_v59  ;;  %v4937_v61 = vcombine.high %v4929_v4, %v4929_v4  ;;  %v7846_v12 = vpop.f32.mrf.mxu0 }
 0x217   : > { %v7355_v54 = vpack.c.bf16 %v6032_v18, %v6032_v18  ;;  %v6350_v24 = vunpack.c.l.b16 %v7353_v57  ;;  %v6351_v11 = vunpack.c.l.b16 %v7354_v32  ;;  %v4938_v28 = vcombine.high %v4936_v36, %v4936_v36 }
 0x218   : > { %v5924_v14 = vmax.f32 %v4972_v37, %v7180_v17  ;;  %v7169_v58 = vrot.slane %v4929_v4, 9  ;;  %v7170_v29 = vrot.slane %v4937_v61, 9  ;;  %v7171_v53 = vrot.slane %v4936_v36, 9 }
 0x219   : > { %v6352_v3 = vunpack.c.l.b16 %v7355_v54  ;;  %v6426_v19 = vrot.slane %v6350_v24, 7  ;;  %v6428_v23 = vrot.slane %v6351_v11, 6  ;;  %v7172_v20 = vrot.slane %v4938_v28, 9  ;;  %v7815_v11 = vpop.f32.mrf.mxu1 }
 0x21a   : > { %v5913_v47 = vmax.f32 %v4929_v4, %v7169_v58  ;;  %v5914_v46 = vmax.f32 %v4937_v61, %v7170_v29  ;;  %v5915_v9 = vmax.f32 %v4936_v36, %v7171_v53  ;;  %v4783_v27 = vmax.f32 %v4751_v0, 0.0 }
 0x21b   : > { %v6427_v16 = vsel %vm6406_vm9, %v6426_v19, %v6349_v35  ;;  %v6430_v56 = vrot.slane %v6352_v3, 5  ;;  %v5916_v33 = vmax.f32 %v4938_v28, %v7172_v20  ;;  %v4240_v50 = vadd.f32 %v4137_v39, %v10339_v15  ;;  %v4610_v35 = vpop.f32.mrf.mxu0 }
 0x21c   : > { %v6429_v37 = vsel %vm6409_vm10, %v6428_v23, %v6427_v16  ;;  %v6033_v59 = vmax.f32 %v5913_v47, %v5921_v63  ;;  %v6034_v18 = vmax.f32 %v5914_v46, %v5922_v49  ;;  %v6035_v57 = vmax.f32 %v5915_v9, %v5923_v8  ;;  %v4153_v9 = vpop.f32.mrf.mxu1 }
 0x21d   : > { %v6036_v32 = vmax.f32 %v5916_v33, %v5924_v14  ;;  %v6431_v17 = vsel %vm6412_vm11, %v6430_v56, %v6429_v37  ;;  %v5007_v4 = vcombine.high %v4783_v27, %v4783_v27  ;;  %v5014_v36 = vrot.slane %v4783_v27, %v10423_v21  ;;  %v7849_v46 = vpop.f32.mrf.mxu0 }
 0x21e   : > { %v7356_v0 = vpack.c.bf16 %v6033_v59, %v6033_v59  ;;  %v7357_v61 = vpack.c.bf16 %v6034_v18, %v6034_v18  ;;  %v7358_v54 = vpack.c.bf16 %v6035_v57, %v6035_v57  ;;  %v4710_v24 = vadd.f32 %v4607_v40, %v4240_v50 }
 0x21f   : > { %v7359_v28 = vpack.c.bf16 %v6036_v32, %v6036_v32  ;;  %v5021_v15 = vrot.slane %v5007_v4, %v10423_v21  ;;  %v5022_v39 = vcombine.high %v5014_v36, %v5014_v36  ;;  %v7189_v58 = vrot.slane %v5014_v36, 9 }
 0x220   : > { %v6353_v63 = vunpack.c.l.b16 %v7356_v0  ;;  %v6354_v49 = vunpack.c.l.b16 %v7357_v61  ;;  %v6355_v8 = vunpack.c.l.b16 %v7358_v54  ;;  %v4749_v14 = vadd.f32 %v10420_v10, %v4710_v24 }
 0x221   : > { %v6356_v29 = vunpack.c.l.b16 %v7359_v28  ;;  %v5023_v53 = vcombine.high %v5021_v15, %v5021_v15  ;;  %v7190_v3 = vrot.slane %v5022_v39, 9  ;;  %v7191_v19 = vrot.slane %v5021_v15, 9 }
 0x222   : > { %v6432_v23 = vrot.slane %v6353_v63, 4  ;;  %v6434_v20 = vrot.slane %v6354_v49, 3  ;;  %v6436_v47 = vrot.slane %v6355_v8, 2  ;;  %v5933_v40 = vmax.f32 %v5014_v36, %v7189_v58 }
 0x223   : > { %v6438_v27 = vrot.slane %v6356_v29, 1  ;;  %v7192_v16 = vrot.slane %v5023_v53, 9  ;;  %v5934_v56 = vmax.f32 %v5022_v39, %v7190_v3  ;;  %v5935_v33 = vmax.f32 %v5021_v15, %v7191_v19 }
 0x224   : > { %v6433_v50 = vsel %vm6415_vm12, %v6432_v23, %v6431_v17  ;;  %v4781_v37 = vmax.f32 %v4749_v14, 0.0  ;;  %v4243_v59 = vadd.f32 %v7812_v62, %v10342_v13  ;;  %v4241_v18 = vadd.f32 %v4140_v22, %v10345_v44  ;;  %v4623_v17 = vpop.f32.mrf.mxu0 }
 0x225   : > { %v6435_v57 = vsel %vm6418_vm13, %v6434_v20, %v6433_v50  ;;  %v5936_v32 = vmax.f32 %v5023_v53, %v7192_v16  ;;  %v4246_v4 = vadd.f32 %v7815_v11, %v10348_v48  ;;  %v4244_v36 = vadd.f32 %v4153_v9, %v10351_v2 }
 0x226   : > { %v6437_v0 = vsel %vm6421_vm14, %v6436_v47, %v6435_v57  ;;  %v4973_v61 = vcombine.high %v4781_v37, %v4781_v37  ;;  %v4980_v54 = vrot.slane %v4781_v37, %v10423_v21  ;;  %v4713_v24 = vadd.f32 %v7846_v12, %v4243_v59 }
 0x227   : > { %v6439_v28 = vsel %vm6424_vm15, %v6438_v27, %v6437_v0  ;;  %v4711_v13 = vadd.f32 %v4610_v35, %v4241_v18  ;;  %v4716_v62 = vadd.f32 %v7849_v46, %v4246_v4  ;;  %v4714_v44 = vadd.f32 %v4623_v17, %v4244_v36 }
 0x228   : > { %v6525_v22 = vpack.c.b16 %v6439_v28, %v6439_v28  ;;  %v4987_v15 = vrot.slane %v4973_v61, %v10423_v21  ;;  %v4988_v39 = vcombine.high %v4980_v54, %v4980_v54  ;;  %v7181_v48 = vrot.slane %v4980_v54, 9 }
 0x229   : > { %v4752_v2 = vadd.f32 %v10420_v10, %v4713_v24  ;;  %v4750_v11 = vadd.f32 %v10420_v10, %v4711_v13  ;;  %v4755_v58 = vadd.f32 %v10420_v10, %v4716_v62  ;;  %v4753_v63 = vadd.f32 %v10420_v10, %v4714_v44 }
 0x22a   : > { %6542 = vst.msk [vmem:[%s10460_s15 + $0x4] sm:$0xf] %vm6540_vm0, %v6525_v22  ;;  %v4989_v12 = vcombine.high %v4987_v15, %v4987_v15  ;;  %v7182_v49 = vrot.slane %v4988_v39, 9  ;;  %v7183_v35 = vrot.slane %v4987_v15, 9  ;;  %v5925_v8 = vmax.f32 %v4980_v54, %v7181_v48 }
 0x22b   : > { %v4784_v14 = vmax.f32 %v4752_v2, 0.0  ;;  %v4782_v29 = vmax.f32 %v4750_v11, 0.0  ;;  %v4787_v53 = vmax.f32 %v4755_v58, 0.0  ;;  %v10494_v3 = vmax.f32 %v4753_v63, 0.0 }
 0x22c   : > { %v7184_v19 = vrot.slane %v4989_v12, 9  ;;  %v5926_v23 = vmax.f32 %v4988_v39, %v7182_v49  ;;  %v5927_v20 = vmax.f32 %v4987_v15, %v7183_v35  ;;  %v6037_v47 = vmax.f32 %v5925_v8, %v5933_v40 }
 0x22d   : > { %v5024_v46 = vcombine.high %v4784_v14, %v4784_v14  ;;  %v5031_v9 = vrot.slane %v4784_v14, %v10423_v21  ;;  %v4990_v27 = vcombine.high %v4782_v29, %v4782_v29  ;;  %v4997_v16 = vrot.slane %v4782_v29, %v10423_v21 }
 0x22e   : > { %v5928_v50 = vmax.f32 %v4989_v12, %v7184_v19  ;;  %v6038_v37 = vmax.f32 %v5926_v23, %v5934_v56  ;;  %v6039_v59 = vmax.f32 %v5927_v20, %v5935_v33  ;;  %v7360_v18 = vpack.c.bf16 %v6037_v47, %v6037_v47 }
 0x22f   : > { %v5038_v57 = vrot.slane %v5024_v46, %v10423_v21  ;;  %v5039_v4 = vcombine.high %v5031_v9, %v5031_v9  ;;  %v7193_v36 = vrot.slane %v5031_v9, 9  ;;  %v5004_v0 = vrot.slane %v4990_v27, %v10423_v21  ;;  %v7816_v27 = vpop.f32.mrf.mxu1 }
 0x230   : > { %v6040_v61 = vmax.f32 %v5928_v50, %v5936_v32  ;;  %v7361_v54 = vpack.c.bf16 %v6038_v37, %v6038_v37  ;;  %v7362_v24 = vpack.c.bf16 %v6039_v59, %v6039_v59  ;;  %v6357_v40 = vunpack.c.l.b16 %v7360_v18 }
 0x231   : > { %v5040_v17 = vcombine.high %v5038_v57, %v5038_v57  ;;  %v7194_v28 = vrot.slane %v5039_v4, 9  ;;  %v7195_v13 = vrot.slane %v5038_v57, 9  ;;  %v5937_v62 = vmax.f32 %v5031_v9, %v7193_v36 }
 0x232   : > { %v7363_v44 = vpack.c.bf16 %v6040_v61, %v6040_v61  ;;  %v6358_v22 = vunpack.c.l.b16 %v7361_v54  ;;  %v6359_v15 = vunpack.c.l.b16 %v7362_v24  ;;  %v5005_v56 = vcombine.high %v4997_v16, %v4997_v16 }
 0x233   : > { %v7196_v33 = vrot.slane %v5040_v17, 9  ;;  %v5938_v39 = vmax.f32 %v5039_v4, %v7194_v28  ;;  %v5939_v48 = vmax.f32 %v5038_v57, %v7195_v13  ;;  %v5006_v2 = vcombine.high %v5004_v0, %v5004_v0 }
 0x234   : > { %v6360_v11 = vunpack.c.l.b16 %v7363_v44  ;;  %v6440_v58 = vrot.slane %v6358_v22, 7  ;;  %v6442_v63 = vrot.slane %v6359_v15, 6  ;;  %v7185_v12 = vrot.slane %v4997_v16, 9 }
 0x235   : > { %v5940_v32 = vmax.f32 %v5040_v17, %v7196_v33  ;;  %v7186_v49 = vrot.slane %v5005_v56, 9  ;;  %v7187_v35 = vrot.slane %v5004_v0, 9  ;;  %v7188_v8 = vrot.slane %v5006_v2, 9 }
 0x236   : > { %v6441_v14 = vsel %vm6406_vm9, %v6440_v58, %v6357_v40  ;;  %v6444_v29 = vrot.slane %v6360_v11, 5  ;;  %v5929_v19 = vmax.f32 %v4997_v16, %v7185_v12  ;;  %v5075_v23 = vcombine.high %v4787_v53, %v4787_v53  ;;  %v7850_v12 = vpop.f32.mrf.mxu0 }
 0x237   : > { %v6443_v20 = vsel %vm6409_vm10, %v6442_v63, %v6441_v14  ;;  %v5930_v47 = vmax.f32 %v5005_v56, %v7186_v49  ;;  %v5931_v46 = vmax.f32 %v5004_v0, %v7187_v35  ;;  %v5932_v9 = vmax.f32 %v5006_v2, %v7188_v8 }
 0x238   : > { %v6041_v50 = vmax.f32 %v5929_v19, %v5937_v62  ;;  %v6445_v37 = vsel %vm6412_vm11, %v6444_v29, %v6443_v20  ;;  %v5082_v59 = vrot.slane %v4787_v53, %v10423_v21  ;;  %v5089_v18 = vrot.slane %v5075_v23, %v10423_v21  ;;  %v4156_v62 = vpop.f32.mrf.mxu1 }
 0x239   : > { %v6042_v57 = vmax.f32 %v5930_v47, %v5938_v39  ;;  %v6043_v4 = vmax.f32 %v5931_v46, %v5939_v48  ;;  %v6044_v36 = vmax.f32 %v5932_v9, %v5940_v32  ;;  %v5041_v16 = vcombine.high %v10494_v3, %v10494_v3 }
 0x23a   : > { %v7364_v61 = vpack.c.bf16 %v6041_v50, %v6041_v50  ;;  %v5090_v54 = vcombine.high %v5082_v59, %v5082_v59  ;;  %v5091_v24 = vcombine.high %v5089_v18, %v5089_v18  ;;  %v7205_v40 = vrot.slane %v5082_v59, 9  ;;  %v7819_v14 = vpop.f32.mrf.mxu1 }
 0x23b   : > { %v7365_v0 = vpack.c.bf16 %v6042_v57, %v6042_v57  ;;  %v7366_v17 = vpack.c.bf16 %v6043_v4, %v6043_v4  ;;  %v7367_v28 = vpack.c.bf16 %v6044_v36, %v6044_v36  ;;  %v7207_v13 = vrot.slane %v5089_v18, 9  ;;  %v4626_v4 = vpop.f32.mrf.mxu0 }
 0x23c   : > { %v6361_v44 = vunpack.c.l.b16 %v7364_v61  ;;  %v7206_v22 = vrot.slane %v5090_v54, 9  ;;  %v7208_v53 = vrot.slane %v5091_v24, 9  ;;  %v5949_v15 = vmax.f32 %v5082_v59, %v7205_v40 }
 0x23d   : > { %v6362_v56 = vunpack.c.l.b16 %v7365_v0  ;;  %v6363_v33 = vunpack.c.l.b16 %v7366_v17  ;;  %v6364_v39 = vunpack.c.l.b16 %v7367_v28  ;;  %v5951_v48 = vmax.f32 %v5089_v18, %v7207_v13 }
 0x23e   : > { %v6446_v2 = vrot.slane %v6361_v44, 4  ;;  %v5950_v11 = vmax.f32 %v5090_v54, %v7206_v22  ;;  %v5952_v58 = vmax.f32 %v5091_v24, %v7208_v53  ;;  %v5048_v63 = vrot.slane %v10494_v3, %v10423_v21  ;;  %v4169_v54 = vpop.f32.mrf.mxu1  ;;  %v7853_v22 = vpop.f32.mrf.mxu0 }
 0x23f   : > { %v6448_v32 = vrot.slane %v6362_v56, 3  ;;  %v6450_v49 = vrot.slane %v6363_v33, 2  ;;  %v6452_v35 = vrot.slane %v6364_v39, 1  ;;  %v5055_v8 = vrot.slane %v5041_v16, %v10423_v21 }
 0x240   : > { %v6447_v29 = vsel %vm6415_vm12, %v6446_v2, %v6445_v37  ;;  %v5056_v19 = vcombine.high %v5048_v63, %v5048_v63  ;;  %v7197_v23 = vrot.slane %v5048_v63, 9  ;;  %v4247_v20 = vadd.f32 %v7816_v27, %v10354_v25 }
 0x241   : > { %v6449_v47 = vsel %vm6418_vm13, %v6448_v32, %v6447_v29  ;;  %v5057_v46 = vcombine.high %v5055_v8, %v5055_v8  ;;  %v7199_v9 = vrot.slane %v5055_v8, 9  ;;  %v4245_v50 = vadd.f32 %v4156_v62, %v10357_v38 }
 0x242   : > { %v6451_v3 = vsel %vm6421_vm14, %v6450_v49, %v6449_v47  ;;  %v7198_v59 = vrot.slane %v5056_v19, 9  ;;  %v5941_v18 = vmax.f32 %v5048_v63, %v7197_v23  ;;  %v4717_v57 = vadd.f32 %v7850_v12, %v4247_v20  ;;  %v7820_v20 = vpop.f32.mrf.mxu1 }
 0x243   : > { %v6453_v36 = vsel %vm6424_vm15, %v6452_v35, %v6451_v3  ;;  %v7200_v37 = vrot.slane %v5057_v46, 9  ;;  %v5943_v16 = vmax.f32 %v5055_v8, %v7199_v9  ;;  %v4715_v61 = vadd.f32 %v4626_v4, %v4245_v50 }
 0x244   : > { %v6526_v25 = vpack.c.b16 %v6453_v36, %v6453_v36  ;;  %v5942_v27 = vmax.f32 %v5056_v19, %v7198_v59  ;;  %v6045_v24 = vmax.f32 %v5941_v18, %v5949_v15  ;;  %v4756_v40 = vadd.f32 %v10420_v10, %v4717_v57 }
 0x245   : > { %v5944_v0 = vmax.f32 %v5057_v46, %v7200_v37  ;;  %v6047_v38 = vmax.f32 %v5943_v16, %v5951_v48  ;;  %v4754_v17 = vadd.f32 %v10420_v10, %v4715_v61  ;;  %v4250_v28 = vadd.f32 %v7819_v14, %v10360_v1 }
 0x246   : > { %6543 = vst.msk [vmem:[%s10460_s15 + $0x8] sm:$0xf] %vm6540_vm0, %v6526_v25  ;;  %v6046_v13 = vmax.f32 %v5942_v27, %v5950_v11  ;;  %v7368_v62 = vpack.c.bf16 %v6045_v24, %v6045_v24  ;;  %v4788_v44 = vmax.f32 %v4756_v40, 0.0  ;;  %v4248_v53 = vadd.f32 %v4169_v54, %v10363_v41  ;;  %v4639_v24 = vpop.f32.mrf.mxu0  ;;  %v4172_v40 = vpop.f32.mrf.mxu1 }
 0x247   : > { %v6048_v56 = vmax.f32 %v5944_v0, %v5952_v58  ;;  %v7370_v33 = vpack.c.bf16 %v6047_v38, %v6047_v38  ;;  %v4786_v39 = vmax.f32 %v4754_v17, 0.0  ;;  %v4720_v15 = vadd.f32 %v7853_v22, %v4250_v28 }
 0x248   : > { %v7369_v2 = vpack.c.bf16 %v6046_v13, %v6046_v13  ;;  %v6365_v63 = vunpack.c.l.b16 %v7368_v62  ;;  %v5092_v12 = vcombine.high %v4788_v44, %v4788_v44  ;;  %v5099_v48 = vrot.slane %v4788_v44, %v10423_v21 }
 0x249   : > { %v7371_v32 = vpack.c.bf16 %v6048_v56, %v6048_v56  ;;  %v6367_v49 = vunpack.c.l.b16 %v7370_v33  ;;  %v5058_v1 = vcombine.high %v4786_v39, %v4786_v39  ;;  %v5065_v35 = vrot.slane %v4786_v39, %v10423_v21 }
 0x24a   : > { %v6366_v11 = vunpack.c.l.b16 %v7369_v2  ;;  %v5106_v8 = vrot.slane %v5092_v12, %v10423_v21  ;;  %v5107_v14 = vcombine.high %v5099_v48, %v5099_v48  ;;  %v7209_v29 = vrot.slane %v5099_v48, 9 }
 0x24b   : > { %v6368_v41 = vunpack.c.l.b16 %v7371_v32  ;;  %v6456_v58 = vrot.slane %v6367_v49, 6  ;;  %v5072_v19 = vrot.slane %v5058_v1, %v10423_v21  ;;  %v5073_v23 = vcombine.high %v5065_v35, %v5065_v35  ;;  %v7854_v49 = vpop.f32.mrf.mxu0 }
 0x24c   : > { %v6454_v47 = vrot.slane %v6366_v11, 7  ;;  %v5108_v46 = vcombine.high %v5106_v8, %v5106_v8  ;;  %v7210_v9 = vrot.slane %v5107_v14, 9  ;;  %v7211_v50 = vrot.slane %v5106_v8, 9 }
 0x24d   : > { %v6458_v3 = vrot.slane %v6368_v41, 5  ;;  %v5953_v59 = vmax.f32 %v5099_v48, %v7209_v29  ;;  %v5074_v18 = vcombine.high %v5072_v19, %v5072_v19  ;;  %v7201_v57 = vrot.slane %v5065_v35, 9 }
 0x24e   : > { %v6455_v4 = vsel %vm6406_vm9, %v6454_v47, %v6365_v63  ;;  %v7212_v36 = vrot.slane %v5108_v46, 9  ;;  %v5954_v37 = vmax.f32 %v5107_v14, %v7210_v9  ;;  %v5955_v16 = vmax.f32 %v5106_v8, %v7211_v50 }
 0x24f   : > { %v6457_v61 = vsel %vm6409_vm10, %v6456_v58, %v6455_v4  ;;  %v7202_v54 = vrot.slane %v5073_v23, 9  ;;  %v7203_v25 = vrot.slane %v5072_v19, 9  ;;  %v7204_v27 = vrot.slane %v5074_v18, 9 }
 0x250   : > { %v5956_v0 = vmax.f32 %v5108_v46, %v7212_v36  ;;  %v5945_v38 = vmax.f32 %v5065_v35, %v7201_v57  ;;  %v6459_v17 = vsel %vm6412_vm11, %v6458_v3, %v6457_v61  ;;  %v4759_v28 = vadd.f32 %v10420_v10, %v4720_v15  ;;  %v7823_v36 = vpop.f32.mrf.mxu1 }
 0x251   : > { %v5946_v13 = vmax.f32 %v5073_v23, %v7202_v54  ;;  %v5947_v62 = vmax.f32 %v5072_v19, %v7203_v25  ;;  %v5948_v44 = vmax.f32 %v5074_v18, %v7204_v27  ;;  %v4718_v22 = vadd.f32 %v4639_v24, %v4248_v53  ;;  %v4642_v25 = vpop.f32.mrf.mxu0 }
 0x252   : > { %v6049_v56 = vmax.f32 %v5945_v38, %v5953_v59  ;;  %v4791_v33 = vmax.f32 %v4759_v28, 0.0  ;;  %v4251_v39 = vadd.f32 %v7820_v20, %v10366_v30  ;;  %v4249_v2 = vadd.f32 %v4172_v40, %v10369_v31 }
 0x253   : > { %v6050_v63 = vmax.f32 %v5946_v13, %v5954_v37  ;;  %v6051_v12 = vmax.f32 %v5947_v62, %v5955_v16  ;;  %v6052_v48 = vmax.f32 %v5948_v44, %v5956_v0  ;;  %v4757_v32 = vadd.f32 %v10420_v10, %v4718_v22 }
 0x254   : > { %v7372_v1 = vpack.c.bf16 %v6049_v56, %v6049_v56  ;;  %v5143_v35 = vcombine.high %v4791_v33, %v4791_v33  ;;  %v5150_v15 = vrot.slane %v4791_v33, %v10423_v21  ;;  %v4721_v11 = vadd.f32 %v7854_v49, %v4251_v39 }
 0x255   : > { %v7373_v8 = vpack.c.bf16 %v6050_v63, %v6050_v63  ;;  %v7374_v14 = vpack.c.bf16 %v6051_v12, %v6051_v12  ;;  %v7375_v53 = vpack.c.bf16 %v6052_v48, %v6052_v48  ;;  %v4789_v29 = vmax.f32 %v4757_v32, 0.0  ;;  %v10546_v12 = vld [vmem:[%s10643_s2] ss:$0 sm:$0xff]  ;;  %v7857_v48 = vpop.f32.mrf.mxu0 }
 0x256   : > { %v6369_v41 = vunpack.c.l.b16 %v7372_v1  ;;  %v5157_v30 = vrot.slane %v5143_v35, %v10423_v21  ;;  %v5158_v58 = vcombine.high %v5150_v15, %v5150_v15  ;;  %v7221_v31 = vrot.slane %v5150_v15, 9 }
 0x257   : > { %v6370_v19 = vunpack.c.l.b16 %v7373_v8  ;;  %v6371_v23 = vunpack.c.l.b16 %v7374_v14  ;;  %v6372_v20 = vunpack.c.l.b16 %v7375_v53  ;;  %v5109_v47 = vcombine.high %v4789_v29, %v4789_v29 }
 0x258   : > { %v6460_v46 = vrot.slane %v6369_v41, 4  ;;  %v5159_v9 = vcombine.high %v5157_v30, %v5157_v30  ;;  %v7222_v50 = vrot.slane %v5158_v58, 9  ;;  %v7223_v3 = vrot.slane %v5157_v30, 9 }
 0x259   : > { %v6462_v59 = vrot.slane %v6370_v19, 3  ;;  %v6464_v18 = vrot.slane %v6371_v23, 2  ;;  %v6466_v57 = vrot.slane %v6372_v20, 1  ;;  %v5965_v4 = vmax.f32 %v5150_v15, %v7221_v31 }
 0x25a   : > { %v6461_v37 = vsel %vm6415_vm12, %v6460_v46, %v6459_v17  ;;  %v7224_v16 = vrot.slane %v5159_v9, 9  ;;  %v5966_v61 = vmax.f32 %v5158_v58, %v7222_v50  ;;  %v5967_v54 = vmax.f32 %v5157_v30, %v7223_v3 }
 0x25b   : > { %v6463_v27 = vsel %vm6418_vm13, %v6462_v59, %v6461_v37  ;;  %v5116_v24 = vrot.slane %v4789_v29, %v10423_v21  ;;  %v5123_v40 = vrot.slane %v5109_v47, %v10423_v21  ;;  %v4760_v0 = vadd.f32 %v10420_v10, %v4721_v11  ;;  %v4185_v59 = vpop.f32.mrf.mxu1 }
 0x25c   : > { %v6465_v38 = vsel %vm6421_vm14, %v6464_v18, %v6463_v27  ;;  %v5968_v28 = vmax.f32 %v5159_v9, %v7224_v16  ;;  %v4719_v13 = vadd.f32 %v4642_v25, %v4249_v2  ;;  %v4254_v62 = vadd.f32 %v7823_v36, %v10372_v45 }
 0x25d   : > { %v6467_v17 = vsel %vm6424_vm15, %v6466_v57, %v6465_v38  ;;  %v5124_v44 = vcombine.high %v5116_v24, %v5116_v24  ;;  %v5125_v22 = vcombine.high %v5123_v40, %v5123_v40  ;;  %v7213_v56 = vrot.slane %v5116_v24, 9 }
 0x25e   : > { %v6527_v33 = vpack.c.b16 %v6467_v17, %v6467_v17  ;;  %v7215_v39 = vrot.slane %v5123_v40, 9  ;;  %v4792_v63 = vmax.f32 %v4760_v0, 0.0  ;;  %v4758_v10 = vadd.f32 %v10546_v12, %v4719_v13 }
 0x25f   : > { %v7214_v2 = vrot.slane %v5124_v44, 9  ;;  %v7216_v32 = vrot.slane %v5125_v22, 9  ;;  %v5957_v49 = vmax.f32 %v5116_v24, %v7213_v56  ;;  %v4724_v45 = vadd.f32 %v7857_v48, %v4254_v62  ;;  %v7824_v62 = vpop.f32.mrf.mxu1 }
 0x260   : > { %6544 = vst.msk [vmem:[%s10460_s15 + $0xc] sm:$0xf] %vm6540_vm0, %v6527_v33  ;;  %v5959_v1 = vmax.f32 %v5123_v40, %v7215_v39  ;;  %v5160_v35 = vcombine.high %v4792_v63, %v4792_v63  ;;  %v5167_v15 = vrot.slane %v4792_v63, %v10423_v21  ;;  %v4790_v11 = vmax.f32 %v4758_v10, 0.0  ;;  %v4655_v33 = vpop.f32.mrf.mxu0 }
 0x261   : > { %v5958_v8 = vmax.f32 %v5124_v44, %v7214_v2  ;;  %v5960_v14 = vmax.f32 %v5125_v22, %v7216_v32  ;;  %v6053_v53 = vmax.f32 %v5957_v49, %v5965_v4  ;;  %v4763_v29 = vadd.f32 %v10546_v12, %v4724_v45 }
 0x262   : > { %v6055_v41 = vmax.f32 %v5959_v1, %v5967_v54  ;;  %v5174_v30 = vrot.slane %v5160_v35, %v10423_v21  ;;  %v5175_v58 = vcombine.high %v5167_v15, %v5167_v15  ;;  %v7225_v31 = vrot.slane %v5167_v15, 9 }
 0x263   : > { %v6054_v19 = vmax.f32 %v5958_v8, %v5966_v61  ;;  %v6056_v23 = vmax.f32 %v5960_v14, %v5968_v28  ;;  %v7376_v20 = vpack.c.bf16 %v6053_v53, %v6053_v53  ;;  %v5126_v47 = vcombine.high %v4790_v11, %v4790_v11 }
 0x264   : > { %v7378_v46 = vpack.c.bf16 %v6055_v41, %v6055_v41  ;;  %v5176_v9 = vcombine.high %v5174_v30, %v5174_v30  ;;  %v7226_v50 = vrot.slane %v5175_v58, 9  ;;  %v7227_v3 = vrot.slane %v5174_v30, 9  ;;  %v7858_v41 = vpop.f32.mrf.mxu0 }
 0x265   : > { %v7377_v18 = vpack.c.bf16 %v6054_v19, %v6054_v19  ;;  %v7379_v57 = vpack.c.bf16 %v6056_v23, %v6056_v23  ;;  %v6373_v36 = vunpack.c.l.b16 %v7376_v20  ;;  %v5969_v4 = vmax.f32 %v5167_v15, %v7225_v31 }
 0x266   : > { %v6375_v37 = vunpack.c.l.b16 %v7378_v46  ;;  %v7228_v16 = vrot.slane %v5176_v9, 9  ;;  %v5970_v54 = vmax.f32 %v5175_v58, %v7226_v50  ;;  %v5971_v25 = vmax.f32 %v5174_v30, %v7227_v3 }
 0x267   : > { %v6374_v27 = vunpack.c.l.b16 %v7377_v18  ;;  %v6376_v24 = vunpack.c.l.b16 %v7379_v57  ;;  %v5133_v61 = vrot.slane %v4790_v11, %v10423_v21  ;;  %v5140_v40 = vrot.slane %v5126_v47, %v10423_v21  ;;  %v4188_v11 = vpop.f32.mrf.mxu1 }
 0x268   : > { %v6470_v0 = vrot.slane %v6375_v37, 6  ;;  %v5972_v38 = vmax.f32 %v5176_v9, %v7228_v16  ;;  %v4795_v28 = vmax.f32 %v4763_v29, 0.0  ;;  %v4252_v13 = vadd.f32 %v4185_v59, %v10375_v60 }
 0x269   : > { %v6468_v17 = vrot.slane %v6374_v27, 7  ;;  %v6472_v44 = vrot.slane %v6376_v24, 5  ;;  %v5141_v22 = vcombine.high %v5133_v61, %v5133_v61  ;;  %v5142_v56 = vcombine.high %v5140_v40, %v5140_v40  ;;  %v7827_v18 = vpop.f32.mrf.mxu1  ;;  %v4658_v27 = vpop.f32.mrf.mxu0 }
 0x26a   : > { %v7217_v39 = vrot.slane %v5133_v61, 9  ;;  %v7219_v63 = vrot.slane %v5140_v40, 9  ;;  %v5211_v10 = vcombine.high %v4795_v28, %v4795_v28  ;;  %v5218_v48 = vrot.slane %v4795_v28, %v10423_v21 }
 0x26b   : > { %v6469_v2 = vsel %vm6406_vm9, %v6468_v17, %v6373_v36  ;;  %v7218_v32 = vrot.slane %v5141_v22, 9  ;;  %v7220_v49 = vrot.slane %v5142_v56, 9  ;;  %v4722_v45 = vadd.f32 %v4655_v33, %v4252_v13 }
 0x26c   : > { %v6471_v1 = vsel %vm6409_vm10, %v6470_v0, %v6469_v2  ;;  %v5961_v35 = vmax.f32 %v5133_v61, %v7217_v39  ;;  %v5963_v60 = vmax.f32 %v5140_v40, %v7219_v63  ;;  %v5225_v15 = vrot.slane %v5211_v10, %v10423_v21  ;;  %v7861_v10 = vpop.f32.mrf.mxu0 }
 0x26d   : > { %v5962_v8 = vmax.f32 %v5141_v22, %v7218_v32  ;;  %v5964_v14 = vmax.f32 %v5142_v56, %v7220_v49  ;;  %v6473_v53 = vsel %vm6412_vm11, %v6472_v44, %v6471_v1  ;;  %v5226_v29 = vcombine.high %v5218_v48, %v5218_v48  ;;  %v4201_v22 = vpop.f32.mrf.mxu1 }
 0x26e   : > { %v6057_v30 = vmax.f32 %v5961_v35, %v5969_v4  ;;  %v6059_v58 = vmax.f32 %v5963_v60, %v5971_v25  ;;  %v5227_v31 = vcombine.high %v5225_v15, %v5225_v15  ;;  %v7237_v19 = vrot.slane %v5218_v48, 9 }
 0x26f   : > { %v6058_v23 = vmax.f32 %v5962_v8, %v5970_v54  ;;  %v6060_v20 = vmax.f32 %v5964_v14, %v5972_v38  ;;  %v7238_v47 = vrot.slane %v5226_v29, 9  ;;  %v7239_v46 = vrot.slane %v5225_v15, 9 }
 0x270   : > { %v7380_v9 = vpack.c.bf16 %v6057_v30, %v6057_v30  ;;  %v7382_v50 = vpack.c.bf16 %v6059_v58, %v6059_v58  ;;  %v7240_v3 = vrot.slane %v5227_v31, 9  ;;  %v5981_v59 = vmax.f32 %v5218_v48, %v7237_v19 }
 0x271   : > { %v7381_v57 = vpack.c.bf16 %v6058_v23, %v6058_v23  ;;  %v7383_v36 = vpack.c.bf16 %v6060_v20, %v6060_v20  ;;  %v5982_v37 = vmax.f32 %v5226_v29, %v7238_v47  ;;  %v5983_v16 = vmax.f32 %v5225_v15, %v7239_v46 }
 0x272   : > { %v6377_v24 = vunpack.c.l.b16 %v7380_v9  ;;  %v6379_v61 = vunpack.c.l.b16 %v7382_v50  ;;  %v5984_v4 = vmax.f32 %v5227_v31, %v7240_v3  ;;  %v4761_v25 = vadd.f32 %v10546_v12, %v4722_v45 }
 0x273   : > { %v6378_v40 = vunpack.c.l.b16 %v7381_v57  ;;  %v6380_v54 = vunpack.c.l.b16 %v7383_v36  ;;  %v4255_v0 = vadd.f32 %v7824_v62, %v10378_v26  ;;  %v4253_v38 = vadd.f32 %v4188_v11, %v10381_v51 }
 0x274   : > { %v6474_v28 = vrot.slane %v6377_v24, 4  ;;  %v6478_v13 = vrot.slane %v6379_v61, 2  ;;  %v4793_v17 = vmax.f32 %v4761_v25, 0.0  ;;  %v4258_v44 = vadd.f32 %v7827_v18, %v10384_v55 }
 0x275   : > { %v6476_v56 = vrot.slane %v6378_v40, 3  ;;  %v6480_v33 = vrot.slane %v6380_v54, 1  ;;  %v4725_v39 = vadd.f32 %v7858_v41, %v4255_v0  ;;  %v4723_v63 = vadd.f32 %v4658_v27, %v4253_v38 }
 0x276   : > { %v6475_v48 = vsel %vm6415_vm12, %v6474_v28, %v6473_v53  ;;  %v5177_v2 = vcombine.high %v4793_v17, %v4793_v17  ;;  %v5184_v32 = vrot.slane %v4793_v17, %v10423_v21  ;;  %v4728_v49 = vadd.f32 %v7861_v10, %v4258_v44 }
 0x277   : > { %v6477_v26 = vsel %vm6418_vm13, %v6476_v56, %v6475_v48  ;;  %v4764_v51 = vadd.f32 %v10546_v12, %v4725_v39  ;;  %v4762_v62 = vadd.f32 %v10546_v12, %v4723_v63  ;;  %v4256_v55 = vadd.f32 %v4201_v22, %v10387_v7 }
 0x278   : > { %v6479_v45 = vsel %vm6421_vm14, %v6478_v13, %v6477_v26  ;;  %v5191_v1 = vrot.slane %v5177_v2, %v10423_v21  ;;  %v5192_v35 = vcombine.high %v5184_v32, %v5184_v32  ;;  %v7229_v60 = vrot.slane %v5184_v32, 9 }
 0x279   : > { %v6481_v15 = vsel %vm6424_vm15, %v6480_v33, %v6479_v45  ;;  %v4796_v11 = vmax.f32 %v4764_v51, 0.0  ;;  %v4794_v8 = vmax.f32 %v4762_v62, 0.0  ;;  %v4767_v14 = vadd.f32 %v10546_v12, %v4728_v49 }
 0x27a   : > { %v6528_v53 = vpack.c.b16 %v6481_v15, %v6481_v15  ;;  %v5193_v29 = vcombine.high %v5191_v1, %v5191_v1  ;;  %v7230_v41 = vrot.slane %v5192_v35, 9  ;;  %v7231_v30 = vrot.slane %v5191_v1, 9 }
 0x27b   : > { %v5973_v58 = vmax.f32 %v5184_v32, %v7229_v60  ;;  %v5228_v31 = vcombine.high %v4796_v11, %v4796_v11  ;;  %v5235_v7 = vrot.slane %v4796_v11, %v10423_v21  ;;  %v5194_v19 = vcombine.high %v4794_v8, %v4794_v8 }
 0x27c   : > { %6545 = vst.msk [vmem:[%s10460_s15 + $0x10] sm:$0xf] %vm6540_vm0, %v6528_v53  ;;  %v7232_v23 = vrot.slane %v5193_v29, 9  ;;  %v5974_v20 = vmax.f32 %v5192_v35, %v7230_v41  ;;  %v5975_v47 = vmax.f32 %v5191_v1, %v7231_v30  ;;  %v5201_v46 = vrot.slane %v4794_v8, %v10423_v21  ;;  %v4671_v1 = vpop.f32.mrf.mxu0  ;;  %v7828_v8 = vpop.f32.mrf.mxu1 }
 0x27d   : > { %v6061_v9 = vmax.f32 %v5973_v58, %v5981_v59  ;;  %v5242_v50 = vrot.slane %v5228_v31, %v10423_v21  ;;  %v5243_v3 = vcombine.high %v5235_v7, %v5235_v7  ;;  %v7241_v18 = vrot.slane %v5235_v7, 9 }
 0x27e   : > { %v5976_v57 = vmax.f32 %v5193_v29, %v7232_v23  ;;  %v6062_v36 = vmax.f32 %v5974_v20, %v5982_v37  ;;  %v6063_v27 = vmax.f32 %v5975_v47, %v5983_v16  ;;  %v5208_v24 = vrot.slane %v5194_v19, %v10423_v21 }
 0x27f   : > { %v7384_v61 = vpack.c.bf16 %v6061_v9, %v6061_v9  ;;  %v5244_v25 = vcombine.high %v5242_v50, %v5242_v50  ;;  %v7242_v40 = vrot.slane %v5243_v3, 9  ;;  %v7243_v54 = vrot.slane %v5242_v50, 9 }
 0x280   : > { %v6064_v0 = vmax.f32 %v5976_v57, %v5984_v4  ;;  %v7385_v38 = vpack.c.bf16 %v6062_v36, %v6062_v36  ;;  %v7386_v28 = vpack.c.bf16 %v6063_v27, %v6063_v27  ;;  %v5985_v13 = vmax.f32 %v5235_v7, %v7241_v18  ;;  %v4204_v18 = vpop.f32.mrf.mxu1 }
 0x281   : > { %v6381_v17 = vunpack.c.l.b16 %v7384_v61  ;;  %v7244_v44 = vrot.slane %v5244_v25, 9  ;;  %v5986_v59 = vmax.f32 %v5243_v3, %v7242_v40  ;;  %v5987_v22 = vmax.f32 %v5242_v50, %v7243_v54  ;;  %v7862_v3 = vpop.f32.mrf.mxu0 }
 0x282   : > { %v7387_v56 = vpack.c.bf16 %v6064_v0, %v6064_v0  ;;  %v6382_v33 = vunpack.c.l.b16 %v7385_v38  ;;  %v6383_v39 = vunpack.c.l.b16 %v7386_v28  ;;  %v5209_v63 = vcombine.high %v5201_v46, %v5201_v46 }
 0x283   : > { %v5988_v37 = vmax.f32 %v5244_v25, %v7244_v44  ;;  %v5210_v16 = vcombine.high %v5208_v24, %v5208_v24  ;;  %v7233_v10 = vrot.slane %v5201_v46, 9  ;;  %v7235_v48 = vrot.slane %v5208_v24, 9 }
 0x284   : > { %v6384_v2 = vunpack.c.l.b16 %v7387_v56  ;;  %v6482_v32 = vrot.slane %v6382_v33, 7  ;;  %v6484_v49 = vrot.slane %v6383_v39, 6  ;;  %v7234_v26 = vrot.slane %v5209_v63, 9  ;;  %v4674_v56 = vpop.f32.mrf.mxu0  ;;  %v7831_v33 = vpop.f32.mrf.mxu1 }
 0x285   : > { %v7236_v4 = vrot.slane %v5210_v16, 9  ;;  %v5977_v51 = vmax.f32 %v5201_v46, %v7233_v10  ;;  %v5979_v62 = vmax.f32 %v5208_v24, %v7235_v48  ;;  %v4799_v45 = vmax.f32 %v4767_v14, 0.0 }
 0x286   : > { %v6483_v35 = vsel %vm6406_vm9, %v6482_v32, %v6381_v17  ;;  %v6486_v60 = vrot.slane %v6384_v2, 5  ;;  %v5978_v15 = vmax.f32 %v5209_v63, %v7234_v26  ;;  %v4726_v11 = vadd.f32 %v4671_v1, %v4256_v55 }
 0x287   : > { %v6485_v53 = vsel %vm6409_vm10, %v6484_v49, %v6483_v35  ;;  %v5980_v29 = vmax.f32 %v5210_v16, %v7236_v4  ;;  %v6065_v41 = vmax.f32 %v5977_v51, %v5985_v13  ;;  %v6067_v30 = vmax.f32 %v5979_v62, %v5987_v22 }
 0x288   : > { %v6066_v58 = vmax.f32 %v5978_v15, %v5986_v59  ;;  %v6487_v31 = vsel %vm6412_vm11, %v6486_v60, %v6485_v53  ;;  %v5279_v7 = vcombine.high %v4799_v45, %v4799_v45  ;;  %v5286_v19 = vrot.slane %v4799_v45, %v10423_v21  ;;  %v7865_v60 = vpop.f32.mrf.mxu0  ;;  %v4217_v15 = vpop.f32.mrf.mxu1 }
 0x289   : > { %v6068_v23 = vmax.f32 %v5980_v29, %v5988_v37  ;;  %v7388_v14 = vpack.c.bf16 %v6065_v41, %v6065_v41  ;;  %v7390_v20 = vpack.c.bf16 %v6067_v30, %v6067_v30  ;;  %v4765_v47 = vadd.f32 %v10546_v12, %v4726_v11 }
 0x28a   : > { %v7389_v46 = vpack.c.bf16 %v6066_v58, %v6066_v58  ;;  %v5293_v55 = vrot.slane %v5279_v7, %v10423_v21  ;;  %v5294_v9 = vcombine.high %v5286_v19, %v5286_v19  ;;  %v7253_v50 = vrot.slane %v5286_v19, 9 }
 0x28b   : > { %v7391_v57 = vpack.c.bf16 %v6068_v23, %v6068_v23  ;;  %v6385_v36 = vunpack.c.l.b16 %v7388_v14  ;;  %v6387_v27 = vunpack.c.l.b16 %v7390_v20  ;;  %v4797_v24 = vmax.f32 %v4765_v47, 0.0  ;;  %v4687_v47 = vpop.f32.mrf.mxu0 }
 0x28c   : > { %v6386_v61 = vunpack.c.l.b16 %v7389_v46  ;;  %v5295_v25 = vcombine.high %v5293_v55, %v5293_v55  ;;  %v7254_v40 = vrot.slane %v5294_v9, 9  ;;  %v7255_v54 = vrot.slane %v5293_v55, 9 }
 0x28d   : > { %v6388_v0 = vunpack.c.l.b16 %v7391_v57  ;;  %v6488_v38 = vrot.slane %v6385_v36, 4  ;;  %v6492_v28 = vrot.slane %v6387_v27, 2  ;;  %v5997_v13 = vmax.f32 %v5286_v19, %v7253_v50 }
 0x28e   : > { %v6490_v17 = vrot.slane %v6386_v61, 3  ;;  %v7256_v44 = vrot.slane %v5295_v25, 9  ;;  %v5998_v59 = vmax.f32 %v5294_v9, %v7254_v40  ;;  %v5999_v22 = vmax.f32 %v5293_v55, %v7255_v54 }
 0x28f   : > { %v6489_v39 = vsel %vm6415_vm12, %v6488_v38, %v6487_v31  ;;  %v6494_v63 = vrot.slane %v6388_v0, 1  ;;  %v5245_v37 = vcombine.high %v4797_v24, %v4797_v24  ;;  %v5252_v16 = vrot.slane %v4797_v24, %v10423_v21 }
 0x290   : > { %v6491_v10 = vsel %vm6418_vm13, %v6490_v17, %v6489_v39  ;;  %v6000_v48 = vmax.f32 %v5295_v25, %v7256_v44  ;;  %v4259_v2 = vadd.f32 %v7828_v8, %v10390_v42  ;;  %v4257_v32 = vadd.f32 %v4204_v18, %v10393_v34 }
 0x291   : > { %v6493_v49 = vsel %vm6421_vm14, %v6492_v28, %v6491_v10  ;;  %v5259_v26 = vrot.slane %v5245_v37, %v10423_v21  ;;  %v5260_v4 = vcombine.high %v5252_v16, %v5252_v16  ;;  %v7245_v51 = vrot.slane %v5252_v16, 9 }
 0x292   : > { %v6495_v62 = vsel %vm6424_vm15, %v6494_v63, %v6493_v49  ;;  %v4729_v45 = vadd.f32 %v7862_v3, %v4259_v2  ;;  %v4727_v1 = vadd.f32 %v4674_v56, %v4257_v32  ;;  %v4262_v35 = vadd.f32 %v7831_v33, %v10398_v6 }
 0x293   : > { %v6529_v11 = vpack.c.b16 %v6495_v62, %v6495_v62  ;;  %v5261_v53 = vcombine.high %v5259_v26, %v5259_v26  ;;  %v7246_v42 = vrot.slane %v5260_v4, 9  ;;  %v7247_v8 = vrot.slane %v5259_v26, 9 }
 0x294   : > { %v5989_v34 = vmax.f32 %v5252_v16, %v7245_v51  ;;  %v4768_v29 = vadd.f32 %v10546_v12, %v4729_v45  ;;  %v4766_v41 = vadd.f32 %v10546_v12, %v4727_v1  ;;  %v4732_v30 = vadd.f32 %v7865_v60, %v4262_v35  ;;  %v7832_v51 = vpop.f32.mrf.mxu1 }
 0x295   : > { %6546 = vst.msk [vmem:[%s10460_s15 + $0x14] sm:$0xf] %vm6540_vm0, %v6529_v11  ;;  %v7248_v58 = vrot.slane %v5261_v53, 9  ;;  %v5990_v31 = vmax.f32 %v5260_v4, %v7246_v42  ;;  %v5991_v7 = vmax.f32 %v5259_v26, %v7247_v8  ;;  %v4260_v19 = vadd.f32 %v4217_v15, %v10403_v52 }
 0x296   : > { %v6069_v6 = vmax.f32 %v5989_v34, %v5997_v13  ;;  %v4800_v23 = vmax.f32 %v4768_v29, 0.0  ;;  %v4798_v14 = vmax.f32 %v4766_v41, 0.0  ;;  %v4771_v20 = vadd.f32 %v10546_v12, %v4732_v30 }
 0x297   : > { %v5992_v46 = vmax.f32 %v5261_v53, %v7248_v58  ;;  %v6070_v55 = vmax.f32 %v5990_v31, %v5998_v59  ;;  %v6071_v9 = vmax.f32 %v5991_v7, %v5999_v22  ;;  %v4730_v50 = vadd.f32 %v4687_v47, %v4260_v19 }
 0x298   : > { %v7392_v3 = vpack.c.bf16 %v6069_v6, %v6069_v6  ;;  %v5296_v18 = vcombine.high %v4800_v23, %v4800_v23  ;;  %v5303_v57 = vrot.slane %v4800_v23, %v10423_v21  ;;  %v5262_v36 = vcombine.high %v4798_v14, %v4798_v14 }
 0x299   : > { %v6072_v27 = vmax.f32 %v5992_v46, %v6000_v48  ;;  %v7393_v24 = vpack.c.bf16 %v6070_v55, %v6070_v55  ;;  %v7394_v61 = vpack.c.bf16 %v6071_v9, %v6071_v9  ;;  %v5269_v52 = vrot.slane %v4798_v14, %v10423_v21 }
 0x29a   : > { %v6389_v25 = vunpack.c.l.b16 %v7392_v3  ;;  %v5310_v40 = vrot.slane %v5296_v18, %v10423_v21  ;;  %v5311_v54 = vcombine.high %v5303_v57, %v5303_v57  ;;  %v7257_v0 = vrot.slane %v5303_v57, 9 }
 0x29b   : > { %v7395_v38 = vpack.c.bf16 %v6072_v27, %v6072_v27  ;;  %v6390_v28 = vunpack.c.l.b16 %v7393_v24  ;;  %v6391_v13 = vunpack.c.l.b16 %v7394_v61  ;;  %v5276_v17 = vrot.slane %v5262_v36, %v10423_v21 }
 0x29c   : > { %v5312_v44 = vcombine.high %v5310_v40, %v5310_v40  ;;  %v7258_v59 = vrot.slane %v5311_v54, 9  ;;  %v7259_v22 = vrot.slane %v5310_v40, 9  ;;  %v6001_v56 = vmax.f32 %v5303_v57, %v7257_v0  ;;  %v4220_v0 = vpop.f32.mrf.mxu1 }
 0x29d   : > { %v6392_v33 = vunpack.c.l.b16 %v7395_v38  ;;  %v6496_v39 = vrot.slane %v6390_v28, 7  ;;  %v6498_v63 = vrot.slane %v6391_v13, 6  ;;  %v5277_v37 = vcombine.high %v5269_v52, %v5269_v52 }
 0x29e   : > { %v7260_v16 = vrot.slane %v5312_v44, 9  ;;  %v6002_v10 = vmax.f32 %v5311_v54, %v7258_v59  ;;  %v6003_v48 = vmax.f32 %v5310_v40, %v7259_v22  ;;  %v5278_v2 = vcombine.high %v5276_v17, %v5276_v17 }
 0x29f   : > { %v6497_v32 = vsel %vm6406_vm9, %v6496_v39, %v6389_v25  ;;  %v6500_v49 = vrot.slane %v6392_v33, 5  ;;  %v7249_v26 = vrot.slane %v5269_v52, 9  ;;  %v7250_v4 = vrot.slane %v5277_v37, 9 }
 0x2a0   : > { %v6499_v62 = vsel %vm6409_vm10, %v6498_v63, %v6497_v32  ;;  %v6004_v45 = vmax.f32 %v5312_v44, %v7260_v16  ;;  %v7251_v1 = vrot.slane %v5276_v17, 9  ;;  %v7252_v35 = vrot.slane %v5278_v2, 9 }
 0x2a1   : > { %v5993_v60 = vmax.f32 %v5269_v52, %v7249_v26  ;;  %v5994_v15 = vmax.f32 %v5277_v37, %v7250_v4  ;;  %v6501_v11 = vsel %vm6412_vm11, %v6500_v49, %v6499_v62  ;;  %v4803_v53 = vmax.f32 %v4771_v20, 0.0  ;;  %v7866_v20 = vpop.f32.mrf.mxu0 }
 0x2a2   : > { %v5995_v42 = vmax.f32 %v5276_v17, %v7251_v1  ;;  %v5996_v8 = vmax.f32 %v5278_v2, %v7252_v35  ;;  %v4769_v34 = vadd.f32 %v10546_v12, %v4730_v50  ;;  %v4263_v29 = vadd.f32 %v7832_v51, %v10409_v43 }
 0x2a3   : > { %v6073_v41 = vmax.f32 %v5993_v60, %v6001_v56  ;;  %v6074_v30 = vmax.f32 %v5994_v15, %v6002_v10  ;;  %v5347_v58 = vcombine.high %v4803_v53, %v4803_v53  ;;  %v5354_v31 = vrot.slane %v4803_v53, %v10423_v21  ;;  %v4690_v32 = vpop.f32.mrf.mxu0 }
 0x2a4   : > { %v6075_v7 = vmax.f32 %v5995_v42, %v6003_v48  ;;  %v6076_v19 = vmax.f32 %v5996_v8, %v6004_v45  ;;  %v4801_v6 = vmax.f32 %v4769_v34, 0.0  ;;  %v4733_v50 = vadd.f32 %v7866_v20, %v4263_v29 }
 0x2a5   : > { %v7396_v23 = vpack.c.bf16 %v6073_v41, %v6073_v41  ;;  %v7397_v14 = vpack.c.bf16 %v6074_v30, %v6074_v30  ;;  %v5361_v47 = vrot.slane %v5347_v58, %v10423_v21  ;;  %v5362_v46 = vcombine.high %v5354_v31, %v5354_v31 }
 0x2a6   : > { %v7398_v55 = vpack.c.bf16 %v6075_v7, %v6075_v7  ;;  %v7399_v9 = vpack.c.bf16 %v6076_v19, %v6076_v19  ;;  %v7269_v3 = vrot.slane %v5354_v31, 9  ;;  %v5313_v36 = vcombine.high %v4801_v6, %v4801_v6 }
 0x2a7   : > { %v6393_v18 = vunpack.c.l.b16 %v7396_v23  ;;  %v6394_v43 = vunpack.c.l.b16 %v7397_v14  ;;  %v5363_v57 = vcombine.high %v5361_v47, %v5361_v47  ;;  %v7271_v61 = vrot.slane %v5361_v47, 9 }
 0x2a8   : > { %v6395_v27 = vunpack.c.l.b16 %v7398_v55  ;;  %v6396_v24 = vunpack.c.l.b16 %v7399_v9  ;;  %v7270_v40 = vrot.slane %v5362_v46, 9  ;;  %v6013_v54 = vmax.f32 %v5354_v31, %v7269_v3 }
 0x2a9   : > { %v6502_v52 = vrot.slane %v6393_v18, 4  ;;  %v6504_v25 = vrot.slane %v6394_v43, 3  ;;  %v7272_v13 = vrot.slane %v5363_v57, 9  ;;  %v5320_v17 = vrot.slane %v4801_v6, %v10423_v21 }
 0x2aa   : > { %v6506_v38 = vrot.slane %v6395_v27, 2  ;;  %v6508_v28 = vrot.slane %v6396_v24, 1  ;;  %v6015_v59 = vmax.f32 %v5361_v47, %v7271_v61  ;;  %v5327_v22 = vrot.slane %v5313_v36, %v10423_v21 }
 0x2ab   : > { %v6503_v44 = vsel %vm6415_vm12, %v6502_v52, %v6501_v11  ;;  %v4772_v56 = vadd.f32 %v10546_v12, %v4733_v50  ;;  %v5328_v39 = vcombine.high %v5320_v17, %v5320_v17  ;;  %v7261_v63 = vrot.slane %v5320_v17, 9 }
 0x2ac   : > { %v6505_v33 = vsel %vm6418_vm13, %v6504_v25, %v6503_v44  ;;  %v4261_v37 = vadd.f32 %v4220_v0, %v10415_v5  ;;  %v5329_v10 = vcombine.high %v5327_v22, %v5327_v22  ;;  %v7263_v48 = vrot.slane %v5327_v22, 9 }
 0x2ad   : > { %v6507_v16 = vsel %vm6421_vm14, %v6506_v38, %v6505_v33  ;;  %v4804_v2 = vmax.f32 %v4772_v56, 0.0  ;;  %v7262_v26 = vrot.slane %v5328_v39, 9  ;;  %v6005_v4 = vmax.f32 %v5320_v17, %v7261_v63 }
 0x2ae   : > { %v6509_v49 = vsel %vm6424_vm15, %v6508_v28, %v6507_v16  ;;  %v4731_v51 = vadd.f32 %v4690_v32, %v4261_v37  ;;  %v7264_v45 = vrot.slane %v5329_v10, 9  ;;  %v6007_v1 = vmax.f32 %v5327_v22, %v7263_v48 }
 0x2af   : > { %v6530_v62 = vpack.c.b16 %v6509_v49, %v6509_v49  ;;  %v5364_v35 = vcombine.high %v4804_v2, %v4804_v2  ;;  %v6014_v60 = vmax.f32 %v5362_v46, %v7270_v40  ;;  %v6006_v15 = vmax.f32 %v5328_v39, %v7262_v26 }
 0x2b0   : > { %v6077_v11 = vmax.f32 %v6005_v4, %v6013_v54  ;;  %v6016_v5 = vmax.f32 %v5363_v57, %v7272_v13  ;;  %v6008_v53 = vmax.f32 %v5329_v10, %v7264_v45  ;;  %v6079_v42 = vmax.f32 %v6007_v1, %v6015_v59 }
 0x2b1   : > { %6547 = vst.msk [vmem:[%s10460_s15 + $0x18] sm:$0xf] %vm6540_vm0, %v6530_v62  ;;  %v5371_v8 = vrot.slane %v4804_v2, %v10423_v21  ;;  %v6078_v34 = vmax.f32 %v6006_v15, %v6014_v60  ;;  %v4770_v29 = vadd.f32 %v10546_v12, %v4731_v51  ;;  %v5378_v58 = vrot.slane %v5364_v35, %v10423_v21 }
 0x2b2   : > { %v6080_v41 = vmax.f32 %v6008_v53, %v6016_v5  ;;  %v7402_v30 = vpack.c.bf16 %v6079_v42, %v6079_v42  ;;  %v7400_v31 = vpack.c.bf16 %v6077_v11, %v6077_v11 }
 0x2b3   : > { %v7401_v7 = vpack.c.bf16 %v6078_v34, %v6078_v34  ;;  %v5379_v23 = vcombine.high %v5371_v8, %v5371_v8  ;;  %v4802_v47 = vmax.f32 %v4770_v29, 0.0  ;;  %v5380_v55 = vcombine.high %v5378_v58, %v5378_v58 }
 0x2b4   : > { %v7403_v19 = vpack.c.bf16 %v6080_v41, %v6080_v41  ;;  %v6399_v6 = vunpack.c.l.b16 %v7402_v30  ;;  %v7273_v9 = vrot.slane %v5371_v8, 9  ;;  %v6397_v3 = vunpack.c.l.b16 %v7400_v31 }
 0x2b5   : > { %v6398_v14 = vunpack.c.l.b16 %v7401_v7  ;;  %v5330_v18 = vcombine.high %v4802_v47, %v4802_v47  ;;  %v5337_v12 = vrot.slane %v4802_v47, %v10423_v21  ;;  %v7274_v57 = vrot.slane %v5379_v23, 9 }
 0x2b6   : > { %v6400_v46 = vunpack.c.l.b16 %v7403_v19  ;;  %v6512_v20 = vrot.slane %v6399_v6, 6  ;;  %v7275_v36 = vrot.slane %v5378_v58, 9  ;;  %v7276_v40 = vrot.slane %v5380_v55, 9 }
 0x2b7   : > { %v6510_v50 = vrot.slane %v6398_v14, 7  ;;  %v5344_v24 = vrot.slane %v5330_v18, %v10423_v21  ;;  %v5345_v61 = vcombine.high %v5337_v12, %v5337_v12  ;;  %v7265_v52 = vrot.slane %v5337_v12, 9 }
 0x2b8   : > { %v6514_v43 = vrot.slane %v6400_v46, 5  ;;  %v6017_v54 = vmax.f32 %v5371_v8, %v7273_v9  ;;  %v6018_v17 = vmax.f32 %v5379_v23, %v7274_v57  ;;  %v6019_v44 = vmax.f32 %v5378_v58, %v7275_v36 }
 0x2b9   : > { %v6511_v27 = vsel %vm6406_vm9, %v6510_v50, %v6397_v3  ;;  %v5346_v0 = vcombine.high %v5344_v24, %v5344_v24  ;;  %v7266_v38 = vrot.slane %v5345_v61, 9  ;;  %v7267_v28 = vrot.slane %v5344_v24, 9 }
 0x2ba   : > { %v6513_v25 = vsel %vm6409_vm10, %v6512_v20, %v6511_v27  ;;  %v6009_v13 = vmax.f32 %v5337_v12, %v7265_v52  ;;  %v6020_v63 = vmax.f32 %v5380_v55, %v7276_v40 }
 0x2bb   : > { %v6515_v59 = vsel %vm6412_vm11, %v6514_v43, %v6513_v25  ;;  %v7268_v22 = vrot.slane %v5346_v0, 9  ;;  %v6010_v56 = vmax.f32 %v5345_v61, %v7266_v38  ;;  %v6011_v33 = vmax.f32 %v5344_v24, %v7267_v28 }
 0x2bc   : > { %v6081_v39 = vmax.f32 %v6009_v13, %v6017_v54 }
 0x2bd   : > { %v6012_v21 = vmax.f32 %v5346_v0, %v7268_v22  ;;  %v6082_v37 = vmax.f32 %v6010_v56, %v6018_v17  ;;  %v6083_v16 = vmax.f32 %v6011_v33, %v6019_v44 }
 0x2be   : > { %v7404_v10 = vpack.c.bf16 %v6081_v39, %v6081_v39 }
 0x2bf   : > { %v6084_v48 = vmax.f32 %v6012_v21, %v6020_v63  ;;  %v7405_v2 = vpack.c.bf16 %v6082_v37, %v6082_v37  ;;  %v7406_v32 = vpack.c.bf16 %v6083_v16, %v6083_v16 }
 0x2c0   : > { %v6401_v49 = vunpack.c.l.b16 %v7404_v10 }
 0x2c1   : > { %v7407_v26 = vpack.c.bf16 %v6084_v48, %v6084_v48  ;;  %v6402_v4 = vunpack.c.l.b16 %v7405_v2  ;;  %v6403_v51 = vunpack.c.l.b16 %v7406_v32 }
 0x2c2   : > { %v6516_v62 = vrot.slane %v6401_v49, 4 }
 0x2c3   : > { %v6404_v45 = vunpack.c.l.b16 %v7407_v26  ;;  %v6518_v35 = vrot.slane %v6402_v4, 3  ;;  %v6520_v60 = vrot.slane %v6403_v51, 2 }
 0x2c4   : > { %v6517_v1 = vsel %vm6415_vm12, %v6516_v62, %v6515_v59 }
 0x2c5   : > { %v6519_v15 = vsel %vm6418_vm13, %v6518_v35, %v6517_v1  ;;  %v6522_v11 = vrot.slane %v6404_v45, 1 }
 0x2c6   : > { %v6521_v5 = vsel %vm6421_vm14, %v6520_v60, %v6519_v15 }
 0x2c7   : > { %v6523_v53 = vsel %vm6424_vm15, %v6522_v11, %v6521_v5 }
 0x2c8   : > { %v6531_v42 = vpack.c.b16 %v6523_v53, %v6523_v53 }
 0x2ca   : > { %6548 = vst.msk [vmem:[%s10460_s15 + $0x1c] sm:$0xf] %vm6540_vm0, %v6531_v42 }
 0x2cb PF: > { %s13_s12 = sadd.s32 1, %s7940_s12  }
 0x2cc   : > { %p10_p4 = scmp.ge.s32.totalorder %s13_s12, 4  }
 0x2ce   :  { %12 = sbr.rel (!%p10_p4) target bundleno = 1 (0x1), region = 72 }

</bundles_post_ra>
